<compile_context>
chip_gen: v6e
topology: v6e:2x2x1
jax: 0.10.0
libtpu: 0.0.40
codegen_flags: <defaults>
</compile_context>

<pallas_src>
import functools

import jax
import jax.numpy as jnp
from jax import lax
from jax.experimental import pallas as pl
from jax.experimental.pallas import tpu as pltpu


def _round_up(x, m):
    return (x + m - 1) // m * m


# ---------------------------------------------------------------------------
# Fused conv layer kernel: (patches @ W) + bias [+ BatchNorm(train)] + LeakyReLU
# ---------------------------------------------------------------------------
def _fused_matmul_kernel(*refs, has_bn, act, eps, neg_slope):
    if has_bn:
        a_ref, w_ref, b_ref, g_ref, bt_ref, o_ref = refs
    else:
        a_ref, w_ref, b_ref, o_ref = refs
    # MXU contraction: bf16 operands, f32 accumulation.
    y = jnp.dot(a_ref[...], w_ref[...], preferred_element_type=jnp.float32)
    y = y + b_ref[...]
    if has_bn:
        # PyTorch training-mode BatchNorm2d: biased stats over (B, H, W) = rows.
        # Two-pass (subtract-mean) form avoids E[x^2]-E[x]^2 cancellation.
        m_rows = y.shape[0]
        mean = jnp.sum(y, axis=0, keepdims=True) * (1.0 / m_rows)
        yc = y - mean
        var = jnp.sum(yc * yc, axis=0, keepdims=True) * (1.0 / m_rows)
        y = yc * lax.rsqrt(var + eps) * g_ref[...] + bt_ref[...]
    if act == "leaky_relu":
        y = jnp.where(y >= 0.0, y, y * neg_slope)
    elif act == "sigmoid":
        y = 1.0 / (1.0 + jnp.exp(-y))
    o_ref[...] = y.astype(o_ref.dtype)


def fused_conv_layer(a, w, bias, gamma=None, beta=None, *, act="leaky_relu",
                     eps=1e-5, neg_slope=0.01, out_dtype=jnp.bfloat16):
    """(M,K)@(K,N) + bias [+ BN(train)] + LeakyReLU as a single pallas_call.

    M and K stay whole (single reduction step -> no grid-step overhead, no
    accumulator scratch).  N is split into two lane-dense (>=128) tiles when it
    allows it so the 'parallel' axis has >=2 blocks (megacore).  K is
    zero-padded to a multiple of 128 so A's lane dim / W's sublane dim are
    tile-aligned.
    """
    M, K = a.shape
    Kw, N = w.shape
    assert K == Kw
    K_pad = _round_up(K, 128)
    if K_pad != K:
        a = jnp.pad(a, ((0, 0), (0, K_pad - K)))
        w = jnp.pad(w, ((0, K_pad - K), (0, 0)))

    tn = N // 2 if (N >= 256 and (N // 2) % 128 == 0) else N
    grid = (N // tn,)

    has_bn = gamma is not None
    kernel = functools.partial(_fused_matmul_kernel, has_bn=has_bn, act=act,
                               eps=eps, neg_slope=neg_slope)

    in_specs = [
        pl.BlockSpec((M, K_pad), lambda n: (0, 0)),
        pl.BlockSpec((K_pad, tn), lambda n: (0, n)),
        pl.BlockSpec((1, tn), lambda n: (0, n)),
    ]
    args = [a, w, bias.reshape(1, N).astype(jnp.float32)]
    if has_bn:
        in_specs += [pl.BlockSpec((1, tn), lambda n: (0, n)),
                     pl.BlockSpec((1, tn), lambda n: (0, n))]
        args += [gamma.reshape(1, N).astype(jnp.float32),
                 beta.reshape(1, N).astype(jnp.float32)]

    return pl.pallas_call(
        kernel,
        out_shape=jax.ShapeDtypeStruct((M, N), out_dtype),
        grid_spec=pltpu.PrefetchScalarGridSpec(
            num_scalar_prefetch=0,
            grid=grid,
            in_specs=in_specs,
            out_specs=pl.BlockSpec((M, tn), lambda n: (0, n)),
        ),
        compiler_params=pltpu.CompilerParams(
            dimension_semantics=("parallel",)),
    )(*args)


# ---------------------------------------------------------------------------
# Final Linear(8192 -> 1) + sigmoid as a VPU reduction kernel
# ---------------------------------------------------------------------------
def _linear_sigmoid_kernel(a_ref, w_ref, b_ref, o_ref):
    a = a_ref[...].astype(jnp.float32)
    w = w_ref[...].astype(jnp.float32)          # (1, K) broadcast over rows
    y = jnp.sum(a * w, axis=1, keepdims=True) + b_ref[...]
    o_ref[...] = 1.0 / (1.0 + jnp.exp(-y))


def pallas_linear_sigmoid(a, w_row, bias):
    B = a.shape[0]
    return pl.pallas_call(
        _linear_sigmoid_kernel,
        out_shape=jax.ShapeDtypeStruct((B, 1), jnp.float32),
    )(a, w_row, bias.reshape(1, 1).astype(jnp.float32))


# ---------------------------------------------------------------------------
# NHWC im2col glue (single fused gather; no HBM-resident stack/transpose)
# ---------------------------------------------------------------------------
def _im2col_nhwc(x, k, stride, pad):
    """k x k patches in NHWC.  Output feature order is (c, kh, kw) with the
    input channel slowest (channel-grouped), matching _conv_w_to_mat."""
    B = x.shape[0]
    patches = lax.conv_general_dilated_patches(
        x, filter_shape=(k, k), window_strides=(stride, stride),
        padding=((pad, pad), (pad, pad)),
        dimension_numbers=("NHWC", "HWIO", "NHWC"))
    _, Ho, Wo, KC = patches.shape
    return patches.reshape(B * Ho * Wo, KC), (Ho, Wo)


def _conv_w_to_mat(w):
    """PyTorch Conv2d weight (Cout, Cin, kh, kw) -> (Cin*kh*kw, Cout) bf16,
    feature order (c, kh, kw) to match conv_general_dilated_patches."""
    Cout, Cin, kh, kw = w.shape
    return jnp.transpose(w, (1, 2, 3, 0)).reshape(Cin * kh * kw, Cout).astype(jnp.bfloat16)


# ---------------------------------------------------------------------------
# Forward pass (matches Discriminator.forward semantics, BN in training mode)
# ---------------------------------------------------------------------------
def discriminator_forward(x, p):
    B = x.shape[0]
    h = jnp.transpose(x, (0, 2, 3, 1)).astype(jnp.bfloat16)      # NCHW -> NHWC once

    # conv1: 1->64, k3 s2 p1, bias + LeakyReLU
    a, (Ho, Wo) = _im2col_nhwc(h, 3, 2, 1)
    h = fused_conv_layer(a, _conv_w_to_mat(p["c1_w"]), p["c1_b"]
                         ).reshape(B, Ho, Wo, 64)

    # conv2: 64->128, k3 s2 p1, bias + BN1(train) + LeakyReLU
    a, (Ho, Wo) = _im2col_nhwc(h, 3, 2, 1)
    h = fused_conv_layer(a, _conv_w_to_mat(p["c2_w"]), p["c2_b"],
                         gamma=p["bn1_g"], beta=p["bn1_b"]).reshape(B, Ho, Wo, 128)

    # conv3: 128->256, k3 s2 p1, bias + BN2 + LeakyReLU
    a, (Ho, Wo) = _im2col_nhwc(h, 3, 2, 1)
    h = fused_conv_layer(a, _conv_w_to_mat(p["c3_w"]), p["c3_b"],
                         gamma=p["bn2_g"], beta=p["bn2_b"]).reshape(B, Ho, Wo, 256)

    # conv4: 256->512, k3 s1 p1, bias + BN3 + LeakyReLU
    a, (Ho, Wo) = _im2col_nhwc(h, 3, 1, 1)
    h2d = fused_conv_layer(a, _conv_w_to_mat(p["c4_w"]), p["c4_b"],
                           gamma=p["bn3_g"], beta=p["bn3_b"])    # (B*Ho*Wo, 512)

    # Linear(8192 -> 1) + sigmoid.  PyTorch flattens NCHW; our slab is NHWC, so
    # permute the tiny linear weight instead of transposing the activation.
    C = 512
    feat = h2d.reshape(B, Ho * Wo * C)                            # (h, w, c) order
    w_hwc = jnp.transpose(p["lin_w"].reshape(1, C, Ho, Wo),
                          (0, 2, 3, 1)).reshape(1, Ho * Wo * C)
    return pallas_linear_sigmoid(feat, w_hwc, p["lin_b"])         # (B, 1) f32


def init_params(key):
    ks = jax.random.split(key, 10)
    s = 0.05
    f32 = jnp.float32
    return {
        "c1_w": jax.random.normal(ks[0], (64, 1, 3, 3), f32) * s,
        "c1_b": jax.random.normal(ks[1], (64,), f32) * s,
        "c2_w": jax.random.normal(ks[2], (128, 64, 3, 3), f32) * s,
        "c2_b": jax.random.normal(ks[3], (128,), f32) * s,
        "c3_w": jax.random.normal(ks[4], (256, 128, 3, 3), f32) * s,
        "c3_b": jax.random.normal(ks[5], (256,), f32) * s,
        "c4_w": jax.random.normal(ks[6], (512, 256, 3, 3), f32) * s,
        "c4_b": jax.random.normal(ks[7], (512,), f32) * s,
        "lin_w": jax.random.normal(ks[8], (1, 8192), f32) * s,
        "lin_b": jax.random.normal(ks[9], (1,), f32) * s,
        "bn1_g": jnp.ones((128,), f32), "bn1_b": jnp.zeros((128,), f32),
        "bn2_g": jnp.ones((256,), f32), "bn2_b": jnp.zeros((256,), f32),
        "bn3_g": jnp.ones((512,), f32), "bn3_b": jnp.zeros((512,), f32),
    }


if __name__ == "__main__":
    key = jax.random.PRNGKey(0)
    pkey, xkey = jax.random.split(key)
    batch = 2
    params = init_params(pkey)
    # MNIST-sized input: 28x28 -> 14 -> 7 -> 4 -> 4, so 512*4*4 = 8192 features.
    x = jax.random.normal(xkey, (batch, 1, 28, 28), jnp.float32)

    fwd = jax.jit(discriminator_forward)
    y = jax.block_until_ready(fwd(x, params))
    assert y.shape == (batch, 1), y.shape
    assert bool(jnp.all(jnp.isfinite(y)))
    print("KERNEL_OK")
</pallas_src>

<mosaic_0001>
module attributes {stable_mosaic.version = 11 : i64} {
  func.func @_fused_matmul_kernel(%arg0: i32, %arg1: memref<392x128xbf16, #tpu.memory_space<vmem>>, %arg2: memref<128x64xbf16, #tpu.memory_space<vmem>>, %arg3: memref<1x64xf32, #tpu.memory_space<vmem>>, %arg4: memref<392x64xbf16, #tpu.memory_space<vmem>>) attributes {dimension_semantics = [#tpu.dimension_semantics<parallel>], iteration_bounds = array<i64: 1>, scalar_prefetch = 0 : i64, scratch_operands = 0 : i64, tpu.core_type = #tpu.core_type<tc>, window_params = [{pipeline_mode = #tpu.pipeline_mode<synchronous>, transform_indices = @transform_0, window_bounds = array<i64: 392, 128>}, {transform_indices = @transform_1, window_bounds = array<i64: 128, 64>}, {transform_indices = @transform_2, window_bounds = array<i64: 1, 64>}, {transform_indices = @transform_3, window_bounds = array<i64: 392, 64>}]} {
    %c0 = arith.constant 0 : index
    %c0_0 = arith.constant 0 : index
    %0 = vector.load %arg1[%c0, %c0_0] : memref<392x128xbf16, #tpu.memory_space<vmem>>, vector<392x128xbf16>
    %c0_1 = arith.constant 0 : index
    %c0_2 = arith.constant 0 : index
    %1 = vector.load %arg2[%c0_1, %c0_2] : memref<128x64xbf16, #tpu.memory_space<vmem>>, vector<128x64xbf16>
    %cst = arith.constant dense<0.000000e+00> : vector<392x64xf32>
    %2 = tpu.matmul %0, %1, %cst {dimension_numbers = #tpu.dot_dimension_numbers<[1], [0], [0], [1], [0, 0, 1, 1], [], []>} : vector<392x128xbf16>, vector<128x64xbf16>, vector<392x64xf32> -> vector<392x64xf32>
    %c0_3 = arith.constant 0 : index
    %c0_4 = arith.constant 0 : index
    %3 = vector.load %arg3[%c0_3, %c0_4] : memref<1x64xf32, #tpu.memory_space<vmem>>, vector<1x64xf32>
    %4 = vector.broadcast %3 : vector<1x64xf32> to vector<392x64xf32>
    %5 = arith.addf %2, %4 : vector<392x64xf32>
    %cst_5 = arith.constant 0.000000e+00 : f32
    %6 = vector.broadcast %cst_5 : f32 to vector<392x64xf32>
    %7 = arith.cmpf oge, %5, %6 : vector<392x64xf32>
    %cst_6 = arith.constant 0.00999999977 : f32
    %8 = vector.broadcast %cst_6 : f32 to vector<392x64xf32>
    %9 = arith.mulf %5, %8 : vector<392x64xf32>
    %10 = arith.select %7, %5, %9 : vector<392x64xi1>, vector<392x64xf32>
    %11 = arith.truncf %10 : vector<392x64xf32> to vector<392x64xbf16>
    %c0_7 = arith.constant 0 : index
    %c0_8 = arith.constant 0 : index
    %12 = vector.load %arg4[%c0_7, %c0_8] : memref<392x64xbf16, #tpu.memory_space<vmem>>, vector<392x64xbf16>
    tpu.vector_store %arg4[%c0_7, %c0_8], %11 {strides = array<i32>} : memref<392x64xbf16, #tpu.memory_space<vmem>>, vector<392x64xbf16>,
    return
  }
  func.func @transform_0(%arg0: i32) -> (i32, i32) {
    %c0_i32 = arith.constant 0 : i32
    %c0_i32_0 = arith.constant 0 : i32
    %c0_i32_1 = arith.constant 0 : i32
    return %c0_i32, %c0_i32_0 : i32, i32
  }
  func.func @transform_1(%arg0: i32) -> (i32, i32) {
    %c0_i32 = arith.constant 0 : i32
    %c0_i32_0 = arith.constant 0 : i32
    return %c0_i32, %arg0 : i32, i32
  }
  func.func @transform_2(%arg0: i32) -> (i32, i32) {
    %c0_i32 = arith.constant 0 : i32
    %c0_i32_0 = arith.constant 0 : i32
    return %c0_i32, %arg0 : i32, i32
  }
  func.func @transform_3(%arg0: i32) -> (i32, i32) {
    %c0_i32 = arith.constant 0 : i32
    %c0_i32_0 = arith.constant 0 : i32
    return %c0_i32, %arg0 : i32, i32
  }
}

module attributes {stable_mosaic.version = 11 : i64} {
  func.func @_fused_matmul_kernel(%arg0: i32, %arg1: memref<98x640xbf16, #tpu.memory_space<vmem>>, %arg2: memref<640x128xbf16, #tpu.memory_space<vmem>>, %arg3: memref<1x128xf32, #tpu.memory_space<vmem>>, %arg4: memref<1x128xf32, #tpu.memory_space<vmem>>, %arg5: memref<1x128xf32, #tpu.memory_space<vmem>>, %arg6: memref<98x128xbf16, #tpu.memory_space<vmem>>) attributes {dimension_semantics = [#tpu.dimension_semantics<parallel>], iteration_bounds = array<i64: 1>, scalar_prefetch = 0 : i64, scratch_operands = 0 : i64, tpu.core_type = #tpu.core_type<tc>, window_params = [{pipeline_mode = #tpu.pipeline_mode<synchronous>, transform_indices = @transform_0, window_bounds = array<i64: 98, 640>}, {transform_indices = @transform_1, window_bounds = array<i64: 640, 128>}, {transform_indices = @transform_2, window_bounds = array<i64: 1, 128>}, {transform_indices = @transform_3, window_bounds = array<i64: 1, 128>}, {transform_indices = @transform_4, window_bounds = array<i64: 1, 128>}, {transform_indices = @transform_5, window_bounds = array<i64: 98, 128>}]} {
    %c0 = arith.constant 0 : index
    %c0_0 = arith.constant 0 : index
    %0 = vector.load %arg1[%c0, %c0_0] : memref<98x640xbf16, #tpu.memory_space<vmem>>, vector<98x640xbf16>
    %c0_1 = arith.constant 0 : index
    %c0_2 = arith.constant 0 : index
    %1 = vector.load %arg2[%c0_1, %c0_2] : memref<640x128xbf16, #tpu.memory_space<vmem>>, vector<640x128xbf16>
    %cst = arith.constant dense<0.000000e+00> : vector<98x128xf32>
    %2 = tpu.matmul %0, %1, %cst {dimension_numbers = #tpu.dot_dimension_numbers<[1], [0], [0], [1], [0, 0, 1, 1], [], []>} : vector<98x640xbf16>, vector<640x128xbf16>, vector<98x128xf32> -> vector<98x128xf32>
    %c0_3 = arith.constant 0 : index
    %c0_4 = arith.constant 0 : index
    %3 = vector.load %arg3[%c0_3, %c0_4] : memref<1x128xf32, #tpu.memory_space<vmem>>, vector<1x128xf32>
    %4 = vector.broadcast %3 : vector<1x128xf32> to vector<98x128xf32>
    %5 = arith.addf %2, %4 : vector<98x128xf32>
    %cst_5 = arith.constant dense<0.000000e+00> : vector<128xf32>
    %6 = vector.multi_reduction <add>, %5, %cst_5 [0] : vector<98x128xf32> to vector<128xf32>
    %7 = vector.shape_cast %6 : vector<128xf32> to vector<1x128xf32>
    %cst_6 = arith.constant 0.0102040814 : f32
    %8 = vector.broadcast %cst_6 : f32 to vector<1x128xf32>
    %9 = arith.mulf %7, %8 : vector<1x128xf32>
    %10 = vector.broadcast %9 : vector<1x128xf32> to vector<98x128xf32>
    %11 = arith.subf %5, %10 : vector<98x128xf32>
    %12 = arith.mulf %11, %11 : vector<98x128xf32>
    %cst_7 = arith.constant dense<0.000000e+00> : vector<128xf32>
    %13 = vector.multi_reduction <add>, %12, %cst_7 [0] : vector<98x128xf32> to vector<128xf32>
    %14 = vector.shape_cast %13 : vector<128xf32> to vector<1x128xf32>
    %cst_8 = arith.constant 0.0102040814 : f32
    %15 = vector.broadcast %cst_8 : f32 to vector<1x128xf32>
    %16 = arith.mulf %14, %15 : vector<1x128xf32>
    %cst_9 = arith.constant 9.99999974E-6 : f32
    %17 = vector.broadcast %cst_9 : f32 to vector<1x128xf32>
    %18 = arith.addf %16, %17 : vector<1x128xf32>
    %19 = math.rsqrt %18 : vector<1x128xf32>
    %20 = vector.broadcast %19 : vector<1x128xf32> to vector<98x128xf32>
    %21 = arith.mulf %11, %20 : vector<98x128xf32>
    %c0_10 = arith.constant 0 : index
    %c0_11 = arith.constant 0 : index
    %22 = vector.load %arg4[%c0_10, %c0_11] : memref<1x128xf32, #tpu.memory_space<vmem>>, vector<1x128xf32>
    %23 = vector.broadcast %22 : vector<1x128xf32> to vector<98x128xf32>
    %24 = arith.mulf %21, %23 : vector<98x128xf32>
    %c0_12 = arith.constant 0 : index
    %c0_13 = arith.constant 0 : index
    %25 = vector.load %arg5[%c0_12, %c0_13] : memref<1x128xf32, #tpu.memory_space<vmem>>, vector<1x128xf32>
    %26 = vector.broadcast %25 : vector<1x128xf32> to vector<98x128xf32>
    %27 = arith.addf %24, %26 : vector<98x128xf32>
    %cst_14 = arith.constant 0.000000e+00 : f32
    %28 = vector.broadcast %cst_14 : f32 to vector<98x128xf32>
    %29 = arith.cmpf oge, %27, %28 : vector<98x128xf32>
    %cst_15 = arith.constant 0.00999999977 : f32
    %30 = vector.broadcast %cst_15 : f32 to vector<98x128xf32>
    %31 = arith.mulf %27, %30 : vector<98x128xf32>
    %32 = arith.select %29, %27, %31 : vector<98x128xi1>, vector<98x128xf32>
    %33 = arith.truncf %32 : vector<98x128xf32> to vector<98x128xbf16>
    %c0_16 = arith.constant 0 : index
    %c0_17 = arith.constant 0 : index
    %34 = vector.load %arg6[%c0_16, %c0_17] : memref<98x128xbf16, #tpu.memory_space<vmem>>, vector<98x128xbf16>
    tpu.vector_store %arg6[%c0_16, %c0_17], %33 {strides = array<i32>} : memref<98x128xbf16, #tpu.memory_space<vmem>>, vector<98x128xbf16>,
    return
  }
  func.func @transform_0(%arg0: i32) -> (i32, i32) {
    %c0_i32 = arith.constant 0 : i32
    %c0_i32_0 = arith.constant 0 : i32
    %c0_i32_1 = arith.constant 0 : i32
    return %c0_i32, %c0_i32_0 : i32, i32
  }
  func.func @transform_1(%arg0: i32) -> (i32, i32) {
    %c0_i32 = arith.constant 0 : i32
    %c0_i32_0 = arith.constant 0 : i32
    return %c0_i32, %arg0 : i32, i32
  }
  func.func @transform_2(%arg0: i32) -> (i32, i32) {
    %c0_i32 = arith.constant 0 : i32
    %c0_i32_0 = arith.constant 0 : i32
    return %c0_i32, %arg0 : i32, i32
  }
  func.func @transform_3(%arg0: i32) -> (i32, i32) {
    %c0_i32 = arith.constant 0 : i32
    %c0_i32_0 = arith.constant 0 : i32
    return %c0_i32, %arg0 : i32, i32
  }
  func.func @transform_4(%arg0: i32) -> (i32, i32) {
    %c0_i32 = arith.constant 0 : i32
    %c0_i32_0 = arith.constant 0 : i32
    return %c0_i32, %arg0 : i32, i32
  }
  func.func @transform_5(%arg0: i32) -> (i32, i32) {
    %c0_i32 = arith.constant 0 : i32
    %c0_i32_0 = arith.constant 0 : i32
    return %c0_i32, %arg0 : i32, i32
  }
}

module attributes {stable_mosaic.version = 11 : i64} {
  func.func @_fused_matmul_kernel(%arg0: i32, %arg1: memref<32x1152xbf16, #tpu.memory_space<vmem>>, %arg2: memref<1152x128xbf16, #tpu.memory_space<vmem>>, %arg3: memref<1x128xf32, #tpu.memory_space<vmem>>, %arg4: memref<1x128xf32, #tpu.memory_space<vmem>>, %arg5: memref<1x128xf32, #tpu.memory_space<vmem>>, %arg6: memref<32x128xbf16, #tpu.memory_space<vmem>>) attributes {dimension_semantics = [#tpu.dimension_semantics<parallel>], iteration_bounds = array<i64: 2>, scalar_prefetch = 0 : i64, scratch_operands = 0 : i64, tpu.core_type = #tpu.core_type<tc>, window_params = [{pipeline_mode = #tpu.pipeline_mode<synchronous>, transform_indices = @transform_0, window_bounds = array<i64: 32, 1152>}, {transform_indices = @transform_1, window_bounds = array<i64: 1152, 128>}, {transform_indices = @transform_2, window_bounds = array<i64: 1, 128>}, {transform_indices = @transform_3, window_bounds = array<i64: 1, 128>}, {transform_indices = @transform_4, window_bounds = array<i64: 1, 128>}, {transform_indices = @transform_5, window_bounds = array<i64: 32, 128>}]} {
    %c0 = arith.constant 0 : index
    %c0_0 = arith.constant 0 : index
    %0 = vector.load %arg1[%c0, %c0_0] : memref<32x1152xbf16, #tpu.memory_space<vmem>>, vector<32x1152xbf16>
    %c0_1 = arith.constant 0 : index
    %c0_2 = arith.constant 0 : index
    %1 = vector.load %arg2[%c0_1, %c0_2] : memref<1152x128xbf16, #tpu.memory_space<vmem>>, vector<1152x128xbf16>
    %cst = arith.constant dense<0.000000e+00> : vector<32x128xf32>
    %2 = tpu.matmul %0, %1, %cst {dimension_numbers = #tpu.dot_dimension_numbers<[1], [0], [0], [1], [0, 0, 1, 1], [], []>} : vector<32x1152xbf16>, vector<1152x128xbf16>, vector<32x128xf32> -> vector<32x128xf32>
    %c0_3 = arith.constant 0 : index
    %c0_4 = arith.constant 0 : index
    %3 = vector.load %arg3[%c0_3, %c0_4] : memref<1x128xf32, #tpu.memory_space<vmem>>, vector<1x128xf32>
    %4 = vector.broadcast %3 : vector<1x128xf32> to vector<32x128xf32>
    %5 = arith.addf %2, %4 : vector<32x128xf32>
    %cst_5 = arith.constant dense<0.000000e+00> : vector<128xf32>
    %6 = vector.multi_reduction <add>, %5, %cst_5 [0] : vector<32x128xf32> to vector<128xf32>
    %7 = vector.shape_cast %6 : vector<128xf32> to vector<1x128xf32>
    %cst_6 = arith.constant 3.125000e-02 : f32
    %8 = vector.broadcast %cst_6 : f32 to vector<1x128xf32>
    %9 = arith.mulf %7, %8 : vector<1x128xf32>
    %10 = vector.broadcast %9 : vector<1x128xf32> to vector<32x128xf32>
    %11 = arith.subf %5, %10 : vector<32x128xf32>
    %12 = arith.mulf %11, %11 : vector<32x128xf32>
    %cst_7 = arith.constant dense<0.000000e+00> : vector<128xf32>
    %13 = vector.multi_reduction <add>, %12, %cst_7 [0] : vector<32x128xf32> to vector<128xf32>
    %14 = vector.shape_cast %13 : vector<128xf32> to vector<1x128xf32>
    %cst_8 = arith.constant 3.125000e-02 : f32
    %15 = vector.broadcast %cst_8 : f32 to vector<1x128xf32>
    %16 = arith.mulf %14, %15 : vector<1x128xf32>
    %cst_9 = arith.constant 9.99999974E-6 : f32
    %17 = vector.broadcast %cst_9 : f32 to vector<1x128xf32>
    %18 = arith.addf %16, %17 : vector<1x128xf32>
    %19 = math.rsqrt %18 : vector<1x128xf32>
    %20 = vector.broadcast %19 : vector<1x128xf32> to vector<32x128xf32>
    %21 = arith.mulf %11, %20 : vector<32x128xf32>
    %c0_10 = arith.constant 0 : index
    %c0_11 = arith.constant 0 : index
    %22 = vector.load %arg4[%c0_10, %c0_11] : memref<1x128xf32, #tpu.memory_space<vmem>>, vector<1x128xf32>
    %23 = vector.broadcast %22 : vector<1x128xf32> to vector<32x128xf32>
    %24 = arith.mulf %21, %23 : vector<32x128xf32>
    %c0_12 = arith.constant 0 : index
    %c0_13 = arith.constant 0 : index
    %25 = vector.load %arg5[%c0_12, %c0_13] : memref<1x128xf32, #tpu.memory_space<vmem>>, vector<1x128xf32>
    %26 = vector.broadcast %25 : vector<1x128xf32> to vector<32x128xf32>
    %27 = arith.addf %24, %26 : vector<32x128xf32>
    %cst_14 = arith.constant 0.000000e+00 : f32
    %28 = vector.broadcast %cst_14 : f32 to vector<32x128xf32>
    %29 = arith.cmpf oge, %27, %28 : vector<32x128xf32>
    %cst_15 = arith.constant 0.00999999977 : f32
    %30 = vector.broadcast %cst_15 : f32 to vector<32x128xf32>
    %31 = arith.mulf %27, %30 : vector<32x128xf32>
    %32 = arith.select %29, %27, %31 : vector<32x128xi1>, vector<32x128xf32>
    %33 = arith.truncf %32 : vector<32x128xf32> to vector<32x128xbf16>
    %c0_16 = arith.constant 0 : index
    %c0_17 = arith.constant 0 : index
    %34 = vector.load %arg6[%c0_16, %c0_17] : memref<32x128xbf16, #tpu.memory_space<vmem>>, vector<32x128xbf16>
    tpu.vector_store %arg6[%c0_16, %c0_17], %33 {strides = array<i32>} : memref<32x128xbf16, #tpu.memory_space<vmem>>, vector<32x128xbf16>,
    return
  }
  func.func @transform_0(%arg0: i32) -> (i32, i32) {
    %c0_i32 = arith.constant 0 : i32
    %c0_i32_0 = arith.constant 0 : i32
    %c0_i32_1 = arith.constant 0 : i32
    return %c0_i32, %c0_i32_0 : i32, i32
  }
  func.func @transform_1(%arg0: i32) -> (i32, i32) {
    %c0_i32 = arith.constant 0 : i32
    %c0_i32_0 = arith.constant 0 : i32
    return %c0_i32, %arg0 : i32, i32
  }
  func.func @transform_2(%arg0: i32) -> (i32, i32) {
    %c0_i32 = arith.constant 0 : i32
    %c0_i32_0 = arith.constant 0 : i32
    return %c0_i32, %arg0 : i32, i32
  }
  func.func @transform_3(%arg0: i32) -> (i32, i32) {
    %c0_i32 = arith.constant 0 : i32
    %c0_i32_0 = arith.constant 0 : i32
    return %c0_i32, %arg0 : i32, i32
  }
  func.func @transform_4(%arg0: i32) -> (i32, i32) {
    %c0_i32 = arith.constant 0 : i32
    %c0_i32_0 = arith.constant 0 : i32
    return %c0_i32, %arg0 : i32, i32
  }
  func.func @transform_5(%arg0: i32) -> (i32, i32) {
    %c0_i32 = arith.constant 0 : i32
    %c0_i32_0 = arith.constant 0 : i32
    return %c0_i32, %arg0 : i32, i32
  }
}

module attributes {stable_mosaic.version = 11 : i64} {
  func.func @_fused_matmul_kernel(%arg0: i32, %arg1: memref<32x2304xbf16, #tpu.memory_space<vmem>>, %arg2: memref<2304x256xbf16, #tpu.memory_space<vmem>>, %arg3: memref<1x256xf32, #tpu.memory_space<vmem>>, %arg4: memref<1x256xf32, #tpu.memory_space<vmem>>, %arg5: memref<1x256xf32, #tpu.memory_space<vmem>>, %arg6: memref<32x256xbf16, #tpu.memory_space<vmem>>) attributes {dimension_semantics = [#tpu.dimension_semantics<parallel>], iteration_bounds = array<i64: 2>, scalar_prefetch = 0 : i64, scratch_operands = 0 : i64, tpu.core_type = #tpu.core_type<tc>, window_params = [{pipeline_mode = #tpu.pipeline_mode<synchronous>, transform_indices = @transform_0, window_bounds = array<i64: 32, 2304>}, {transform_indices = @transform_1, window_bounds = array<i64: 2304, 256>}, {transform_indices = @transform_2, window_bounds = array<i64: 1, 256>}, {transform_indices = @transform_3, window_bounds = array<i64: 1, 256>}, {transform_indices = @transform_4, window_bounds = array<i64: 1, 256>}, {transform_indices = @transform_5, window_bounds = array<i64: 32, 256>}]} {
    %c0 = arith.constant 0 : index
    %c0_0 = arith.constant 0 : index
    %0 = vector.load %arg1[%c0, %c0_0] : memref<32x2304xbf16, #tpu.memory_space<vmem>>, vector<32x2304xbf16>
    %c0_1 = arith.constant 0 : index
    %c0_2 = arith.constant 0 : index
    %1 = vector.load %arg2[%c0_1, %c0_2] : memref<2304x256xbf16, #tpu.memory_space<vmem>>, vector<2304x256xbf16>
    %cst = arith.constant dense<0.000000e+00> : vector<32x256xf32>
    %2 = tpu.matmul %0, %1, %cst {dimension_numbers = #tpu.dot_dimension_numbers<[1], [0], [0], [1], [0, 0, 1, 1], [], []>} : vector<32x2304xbf16>, vector<2304x256xbf16>, vector<32x256xf32> -> vector<32x256xf32>
    %c0_3 = arith.constant 0 : index
    %c0_4 = arith.constant 0 : index
    %3 = vector.load %arg3[%c0_3, %c0_4] : memref<1x256xf32, #tpu.memory_space<vmem>>, vector<1x256xf32>
    %4 = vector.broadcast %3 : vector<1x256xf32> to vector<32x256xf32>
    %5 = arith.addf %2, %4 : vector<32x256xf32>
    %cst_5 = arith.constant dense<0.000000e+00> : vector<256xf32>
    %6 = vector.multi_reduction <add>, %5, %cst_5 [0] : vector<32x256xf32> to vector<256xf32>
    %7 = vector.shape_cast %6 : vector<256xf32> to vector<1x256xf32>
    %cst_6 = arith.constant 3.125000e-02 : f32
    %8 = vector.broadcast %cst_6 : f32 to vector<1x256xf32>
    %9 = arith.mulf %7, %8 : vector<1x256xf32>
    %10 = vector.broadcast %9 : vector<1x256xf32> to vector<32x256xf32>
    %11 = arith.subf %5, %10 : vector<32x256xf32>
    %12 = arith.mulf %11, %11 : vector<32x256xf32>
    %cst_7 = arith.constant dense<0.000000e+00> : vector<256xf32>
    %13 = vector.multi_reduction <add>, %12, %cst_7 [0] : vector<32x256xf32> to vector<256xf32>
    %14 = vector.shape_cast %13 : vector<256xf32> to vector<1x256xf32>
    %cst_8 = arith.constant 3.125000e-02 : f32
    %15 = vector.broadcast %cst_8 : f32 to vector<1x256xf32>
    %16 = arith.mulf %14, %15 : vector<1x256xf32>
    %cst_9 = arith.constant 9.99999974E-6 : f32
    %17 = vector.broadcast %cst_9 : f32 to vector<1x256xf32>
    %18 = arith.addf %16, %17 : vector<1x256xf32>
    %19 = math.rsqrt %18 : vector<1x256xf32>
    %20 = vector.broadcast %19 : vector<1x256xf32> to vector<32x256xf32>
    %21 = arith.mulf %11, %20 : vector<32x256xf32>
    %c0_10 = arith.constant 0 : index
    %c0_11 = arith.constant 0 : index
    %22 = vector.load %arg4[%c0_10, %c0_11] : memref<1x256xf32, #tpu.memory_space<vmem>>, vector<1x256xf32>
    %23 = vector.broadcast %22 : vector<1x256xf32> to vector<32x256xf32>
    %24 = arith.mulf %21, %23 : vector<32x256xf32>
    %c0_12 = arith.constant 0 : index
    %c0_13 = arith.constant 0 : index
    %25 = vector.load %arg5[%c0_12, %c0_13] : memref<1x256xf32, #tpu.memory_space<vmem>>, vector<1x256xf32>
    %26 = vector.broadcast %25 : vector<1x256xf32> to vector<32x256xf32>
    %27 = arith.addf %24, %26 : vector<32x256xf32>
    %cst_14 = arith.constant 0.000000e+00 : f32
    %28 = vector.broadcast %cst_14 : f32 to vector<32x256xf32>
    %29 = arith.cmpf oge, %27, %28 : vector<32x256xf32>
    %cst_15 = arith.constant 0.00999999977 : f32
    %30 = vector.broadcast %cst_15 : f32 to vector<32x256xf32>
    %31 = arith.mulf %27, %30 : vector<32x256xf32>
    %32 = arith.select %29, %27, %31 : vector<32x256xi1>, vector<32x256xf32>
    %33 = arith.truncf %32 : vector<32x256xf32> to vector<32x256xbf16>
    %c0_16 = arith.constant 0 : index
    %c0_17 = arith.constant 0 : index
    %34 = vector.load %arg6[%c0_16, %c0_17] : memref<32x256xbf16, #tpu.memory_space<vmem>>, vector<32x256xbf16>
    tpu.vector_store %arg6[%c0_16, %c0_17], %33 {strides = array<i32>} : memref<32x256xbf16, #tpu.memory_space<vmem>>, vector<32x256xbf16>,
    return
  }
  func.func @transform_0(%arg0: i32) -> (i32, i32) {
    %c0_i32 = arith.constant 0 : i32
    %c0_i32_0 = arith.constant 0 : i32
    %c0_i32_1 = arith.constant 0 : i32
    return %c0_i32, %c0_i32_0 : i32, i32
  }
  func.func @transform_1(%arg0: i32) -> (i32, i32) {
    %c0_i32 = arith.constant 0 : i32
    %c0_i32_0 = arith.constant 0 : i32
    return %c0_i32, %arg0 : i32, i32
  }
  func.func @transform_2(%arg0: i32) -> (i32, i32) {
    %c0_i32 = arith.constant 0 : i32
    %c0_i32_0 = arith.constant 0 : i32
    return %c0_i32, %arg0 : i32, i32
  }
  func.func @transform_3(%arg0: i32) -> (i32, i32) {
    %c0_i32 = arith.constant 0 : i32
    %c0_i32_0 = arith.constant 0 : i32
    return %c0_i32, %arg0 : i32, i32
  }
  func.func @transform_4(%arg0: i32) -> (i32, i32) {
    %c0_i32 = arith.constant 0 : i32
    %c0_i32_0 = arith.constant 0 : i32
    return %c0_i32, %arg0 : i32, i32
  }
  func.func @transform_5(%arg0: i32) -> (i32, i32) {
    %c0_i32 = arith.constant 0 : i32
    %c0_i32_0 = arith.constant 0 : i32
    return %c0_i32, %arg0 : i32, i32
  }
}

module attributes {stable_mosaic.version = 11 : i64} {
  func.func @_linear_sigmoid_kernel(%arg0: memref<2x8192xbf16, #tpu.memory_space<vmem>>, %arg1: memref<1x8192xf32, #tpu.memory_space<vmem>>, %arg2: memref<1x1xf32, #tpu.memory_space<vmem>>, %arg3: memref<2x1xf32, #tpu.memory_space<vmem>>) attributes {dimension_semantics = [], scalar_prefetch = 0 : i64, scratch_operands = 0 : i64, tpu.core_type = #tpu.core_type<tc>} {
    %c0 = arith.constant 0 : index
    %c0_0 = arith.constant 0 : index
    %0 = vector.load %arg0[%c0, %c0_0] : memref<2x8192xbf16, #tpu.memory_space<vmem>>, vector<2x8192xbf16>
    %1 = arith.extf %0 : vector<2x8192xbf16> to vector<2x8192xf32>
    %c0_1 = arith.constant 0 : index
    %c0_2 = arith.constant 0 : index
    %2 = vector.load %arg1[%c0_1, %c0_2] : memref<1x8192xf32, #tpu.memory_space<vmem>>, vector<1x8192xf32>
    %3 = vector.broadcast %2 : vector<1x8192xf32> to vector<2x8192xf32>
    %4 = arith.mulf %1, %3 : vector<2x8192xf32>
    %cst = arith.constant dense<0.000000e+00> : vector<2xf32>
    %5 = vector.multi_reduction <add>, %4, %cst [1] : vector<2x8192xf32> to vector<2xf32>
    %6 = vector.shape_cast %5 : vector<2xf32> to vector<2x1xf32>
    %c0_3 = arith.constant 0 : index
    %c0_4 = arith.constant 0 : index
    %7 = vector.load %arg2[%c0_3, %c0_4] : memref<1x1xf32, #tpu.memory_space<vmem>>, vector<1x1xf32>
    %8 = vector.broadcast %7 : vector<1x1xf32> to vector<2x1xf32>
    %9 = arith.addf %6, %8 : vector<2x1xf32>
    %cst_5 = arith.constant 0.000000e+00 : f32
    %10 = vector.broadcast %cst_5 : f32 to vector<2x1xf32>
    %11 = arith.subf %10, %9 : vector<2x1xf32>
    %12 = math.exp %11 : vector<2x1xf32>
    %cst_6 = arith.constant 1.000000e+00 : f32
    %13 = vector.broadcast %cst_6 : f32 to vector<2x1xf32>
    %14 = arith.addf %13, %12 : vector<2x1xf32>
    %cst_7 = arith.constant 1.000000e+00 : f32
    %15 = vector.broadcast %cst_7 : f32 to vector<2x1xf32>
    %16 = arith.divf %15, %14 : vector<2x1xf32>
    %c0_8 = arith.constant 0 : index
    %c0_9 = arith.constant 0 : index
    %17 = vector.load %arg3[%c0_8, %c0_9] : memref<2x1xf32, #tpu.memory_space<vmem>>, vector<2x1xf32>
    tpu.vector_store %arg3[%c0_8, %c0_9], %16 {strides = array<i32>} : memref<2x1xf32, #tpu.memory_space<vmem>>, vector<2x1xf32>,
    return
  }
}

</mosaic_0001>

<bundles_post_ra>
// kernel: discriminator_forward.5
= control target key start
LH: loop header
LB: loop body
LE: loop exit
PB: predicated region body
PF: predicated region fallthrough
CT: control target
= control target key end

     0   :  { %8 = vsyncpa [#allocation3], 0  ;;  %s1281_s12 = smov [#allocation2]   ;;  %s1719_s0 = inlined_call_operand.vmem [shape: bf16[392,128], index: 0, kind: input, shape index: {}]   ;;  %s1720_s1 = inlined_call_operand.vmem [shape: bf16[128,64], index: 1, kind: input, shape index: {}]   ;;  %s1721_s2 = inlined_call_operand.hbm [shape: f32[1,64], index: 2, kind: input, shape index: {}]   ;;  %s1722_s3 = inlined_call_operand.vmem [shape: bf16[392,64], index: 3, kind: output, shape index: {}]  }
   0x1   :  { %s19_s13 = sshll.u32 %s1281_s12, 4  ;;  %s20_s13 = int_to_ptr.vmem [resolvable:$true] %s19_s13 }
   0x2   :  { %s1267_s14 = scalar_lea.vmem %s20_s13, 16  ;;  %s1271_s15 = scalar_lea.vmem %s20_s13, 32 }
   0x3   :  { %p1268_p0 = scmp.ne.s32.totalorder %s20_s13, %s1267_s14  ;;  %p1272_p1 = scmp.lt.s32.totalorder %s20_s13, %s20_s13 }
   0x4   :  { %p1273_p2 = scmp.lt.s32.totalorder %s1271_s15, %s1267_s14 }
   0x6   :  { %p1274_p3 = por %p1273_p2, %p1272_p1 }
   0x8   :  { %p1275_p4 = pnand %p1274_p3, %p1268_p0 }
   0xa   :  { %1278 = shalt.err (!%p1275_p4)
}
   0xb   :  { %22 = dma.hbm_to_vmem [thread:$0]  %s1721_s2, 16, %s20_s13, [#allocation3]  }
   0xc   :  { %1279 = dma.done.wait [#allocation3], 16  }
   0xd   :  { %1280 = vsyncadd [#allocation3], 4294967280  ;;  %v1282_v0 = vmov 0.0   ;;  %vm1283_vm0 = vmmov 0   ;;  %v1226_v1 = vld [vmem:[%s1720_s1 + $0x38] sm:$0xff]   ;;  %v1227_v2 = vld [vmem:[%s1720_s1 + $0x30] sm:$0xff]  }
   0xe   :  { %1091 = vmatprep.subr.bf16.mxu0 %v1282_v0  ;;  %1207 = vmatprep.subr.bf16.mxu1 %v1282_v0  ;;  %v1228_v3 = vld [vmem:[%s1720_s1 + $0x28] sm:$0xff]   ;;  %v1229_v4 = vld [vmem:[%s1720_s1 + $0x20] sm:$0xff]   ;;  %v1230_v5 = vld [vmem:[%s1720_s1 + $0x18] sm:$0xff]   ;;  %vm871_vm3 = vcmask 519168  }
   0xf   :  { %1107 = vmatprep.mubr.msk.bf16.mxu0 %vm1283_vm0, %v1282_v0  ;;  %1159 = vmatprep.mubr.msk.bf16.mxu1 %vm1283_vm0, %v1282_v0  ;;  %v1231_v6 = vld [vmem:[%s1720_s1 + $0x10] sm:$0xff]   ;;  %v1232_v7 = vld [vmem:[%s1720_s1 + $0x8] sm:$0xff]   ;;  %v1233_v8 = vld [vmem:[%s1720_s1] sm:$0xff]  }
  0x10   :  { %1092 = vmatpush3.bf16.msra.mxu0 %v1226_v1  ;;  %1215 = vmatpush3.bf16.msra.mxu1 %v1226_v1  ;;  %v1234_v9 = vld [vmem:[%s1719_s0] sm:$0xff]   ;;  %v1235_v10 = vld [vmem:[%s1719_s0 + $0x68] sm:$0xff]   ;;  %v1237_v12 = vld [vmem:[%s1719_s0 + $0x70] sm:$0xff]  }
  0x11   :  { %1093 = vmatprep.subr.bf16.mxu0 %v1282_v0  ;;  %1208 = vmatprep.subr.bf16.mxu1 %v1282_v0  ;;  %v1236_v11 = vld [vmem:[%s1719_s0 + $0x8] sm:$0xff]   ;;  %v1238_v13 = vld [vmem:[%s1719_s0 + $0x10] sm:$0xff]   ;;  %v1239_v14 = vld [vmem:[%s1719_s0 + $0x78] sm:$0xff]  }
  0x12   :  { %v1240_v15 = vld [vmem:[%s1719_s0 + $0x18] sm:$0xff]   ;;  %v1241_v16 = vld [vmem:[%s1719_s0 + $0x80] sm:$0xff]   ;;  %v1243_v18 = vld [vmem:[%s1719_s0 + $0x88] sm:$0xff]  }
  0x13   :  { %v1242_v17 = vld [vmem:[%s1719_s0 + $0x20] sm:$0xff]   ;;  %v1244_v19 = vld [vmem:[%s1719_s0 + $0x28] sm:$0xff]   ;;  %v1245_v20 = vld [vmem:[%s1719_s0 + $0x90] sm:$0xff]  }
  0x14   :  { %1094 = vmatpush3.bf16.msra.mxu0 %v1227_v2  ;;  %1216 = vmatpush3.bf16.msra.mxu1 %v1227_v2  ;;  %v1246_v21 = vld [vmem:[%s1719_s0 + $0x30] sm:$0xff]   ;;  %v1247_v22 = vld [vmem:[%s1719_s0 + $0x98] sm:$0xff]   ;;  %v1249_v24 = vld [vmem:[%s1719_s0 + $0xa0] sm:$0xff]  }
  0x15   :  { %1095 = vmatprep.subr.bf16.mxu0 %v1282_v0  ;;  %1209 = vmatprep.subr.bf16.mxu1 %v1282_v0  ;;  %v1248_v23 = vld [vmem:[%s1719_s0 + $0x38] sm:$0xff]   ;;  %v1250_v25 = vld [vmem:[%s1719_s0 + $0x40] sm:$0xff]   ;;  %v1251_v26 = vld [vmem:[%s1719_s0 + $0xa8] sm:$0xff]  }
  0x16   :  { %v1252_v27 = vld [vmem:[%s1719_s0 + $0x48] sm:$0xff]   ;;  %v1253_v28 = vld [vmem:[%s1719_s0 + $0xb0] sm:$0xff]   ;;  %v1255_v30 = vld [vmem:[%s1719_s0 + $0xb8] sm:$0xff]  }
  0x17   :  { %v1254_v29 = vld [vmem:[%s1719_s0 + $0x50] sm:$0xff]   ;;  %v1256_v31 = vld [vmem:[%s1719_s0 + $0x58] sm:$0xff]   ;;  %v1257_v32 = vld [vmem:[%s1719_s0 + $0xc0] ss:$0 sps:$4 sm:$0xff]  }
  0x18   :  { %1096 = vmatpush3.bf16.msra.mxu0 %v1228_v3  ;;  %1217 = vmatpush3.bf16.msra.mxu1 %v1228_v3  ;;  %v1258_v33 = vld [vmem:[%s1719_s0 + $0x60] sm:$0xff]  }
  0x19   :  { %1097 = vmatprep.subr.bf16.mxu0 %v1282_v0  ;;  %1210 = vmatprep.subr.bf16.mxu1 %v1282_v0  ;;  %v1472_v34 = vld [vmem:[#allocation2] ss:$0 sm:$0xff] }
  0x1c   :  { %1098 = vmatpush3.bf16.msra.mxu0 %v1229_v4  ;;  %1218 = vmatpush3.bf16.msra.mxu1 %v1229_v4 }
  0x1d   :  { %1099 = vmatprep.subr.bf16.mxu0 %v1282_v0  ;;  %1211 = vmatprep.subr.bf16.mxu1 %v1282_v0 }
  0x20   :  { %1100 = vmatpush3.bf16.msra.mxu0 %v1230_v5  ;;  %1219 = vmatpush3.bf16.msra.mxu1 %v1230_v5 }
  0x21   :  { %1101 = vmatprep.subr.bf16.mxu0 %v1282_v0  ;;  %1212 = vmatprep.subr.bf16.mxu1 %v1282_v0 }
  0x24   :  { %1102 = vmatpush3.bf16.msra.mxu0 %v1231_v6  ;;  %1220 = vmatpush3.bf16.msra.mxu1 %v1231_v6 }
  0x25   :  { %1103 = vmatprep.subr.bf16.mxu0 %v1282_v0  ;;  %1213 = vmatprep.subr.bf16.mxu1 %v1282_v0 }
  0x28   :  { %1104 = vmatpush3.bf16.msra.mxu0 %v1232_v7  ;;  %1221 = vmatpush3.bf16.msra.mxu1 %v1232_v7 }
  0x29   :  { %1105 = vmatprep.subr.bf16.mxu0 %v1282_v0  ;;  %1214 = vmatprep.subr.bf16.mxu1 %v1282_v0 }
  0x2c   :  { %1106 = vmatpush3.bf16.msra.mxu0 %v1233_v8  ;;  %1222 = vmatpush3.bf16.msra.mxu1 %v1233_v8 }
  0x2f   :  { %1108 = vmatmul.mubr.bf16.vlgmr.msra.gmra.mxu0 %v1234_v9  ;;  %1160 = vmatmul.mubr.bf16.vlgmr.msra.gmra.mxu1 %v1235_v10 }
  0x30   :  { %1111 = vmatprep.mubr.msk.bf16.mxu0 %vm1283_vm0, %v1282_v0  ;;  %1163 = vmatprep.mubr.msk.bf16.mxu1 %vm1283_vm0, %v1282_v0 }
  0x37   :  { %1112 = vmatmul.mubr.bf16.gmra.mxu0 %v1236_v11  ;;  %1164 = vmatmul.mubr.bf16.gmra.mxu1 %v1237_v12 }
  0x38   :  { %1115 = vmatprep.mubr.msk.bf16.mxu0 %vm1283_vm0, %v1282_v0  ;;  %1167 = vmatprep.mubr.msk.bf16.mxu1 %vm1283_vm0, %v1282_v0 }
  0x3f   :  { %1116 = vmatmul.mubr.bf16.gmra.mxu0 %v1238_v13  ;;  %1168 = vmatmul.mubr.bf16.gmra.mxu1 %v1239_v14 }
  0x40   :  { %1119 = vmatprep.mubr.msk.bf16.mxu0 %vm1283_vm0, %v1282_v0  ;;  %1171 = vmatprep.mubr.msk.bf16.mxu1 %vm1283_vm0, %v1282_v0 }
  0x47   :  { %1120 = vmatmul.mubr.bf16.gmra.mxu0 %v1240_v15  ;;  %1172 = vmatmul.mubr.bf16.gmra.mxu1 %v1241_v16 }
  0x48   :  { %1123 = vmatprep.mubr.msk.bf16.mxu0 %vm1283_vm0, %v1282_v0  ;;  %1175 = vmatprep.mubr.msk.bf16.mxu1 %vm1283_vm0, %v1282_v0 }
  0x4f   :  { %1124 = vmatmul.mubr.bf16.gmra.mxu0 %v1242_v17  ;;  %1176 = vmatmul.mubr.bf16.gmra.mxu1 %v1243_v18 }
  0x50   :  { %1127 = vmatprep.mubr.msk.bf16.mxu0 %vm1283_vm0, %v1282_v0  ;;  %1179 = vmatprep.mubr.msk.bf16.mxu1 %vm1283_vm0, %v1282_v0 }
  0x57   :  { %1128 = vmatmul.mubr.bf16.gmra.mxu0 %v1244_v19  ;;  %1180 = vmatmul.mubr.bf16.gmra.mxu1 %v1245_v20 }
  0x58   :  { %1131 = vmatprep.mubr.msk.bf16.mxu0 %vm1283_vm0, %v1282_v0  ;;  %1183 = vmatprep.mubr.msk.bf16.mxu1 %vm1283_vm0, %v1282_v0 }
  0x5f   :  { %1132 = vmatmul.mubr.bf16.gmra.mxu0 %v1246_v21  ;;  %1184 = vmatmul.mubr.bf16.gmra.mxu1 %v1247_v22 }
  0x60   :  { %1135 = vmatprep.mubr.msk.bf16.mxu0 %vm1283_vm0, %v1282_v0  ;;  %1187 = vmatprep.mubr.msk.bf16.mxu1 %vm1283_vm0, %v1282_v0 }
  0x67   :  { %1136 = vmatmul.mubr.bf16.gmra.mxu0 %v1248_v23  ;;  %1188 = vmatmul.mubr.bf16.gmra.mxu1 %v1249_v24 }
  0x68   :  { %1139 = vmatprep.mubr.msk.bf16.mxu0 %vm1283_vm0, %v1282_v0  ;;  %1191 = vmatprep.mubr.msk.bf16.mxu1 %vm1283_vm0, %v1282_v0 }
  0x6f   :  { %1140 = vmatmul.mubr.bf16.gmra.mxu0 %v1250_v25  ;;  %1192 = vmatmul.mubr.bf16.gmra.mxu1 %v1251_v26 }
  0x70   :  { %1143 = vmatprep.mubr.msk.bf16.mxu0 %vm1283_vm0, %v1282_v0  ;;  %1195 = vmatprep.mubr.msk.bf16.mxu1 %vm1283_vm0, %v1282_v0 }
  0x77   :  { %1144 = vmatmul.mubr.bf16.gmra.mxu0 %v1252_v27  ;;  %1196 = vmatmul.mubr.bf16.gmra.mxu1 %v1253_v28 }
  0x78   :  { %1147 = vmatprep.mubr.msk.bf16.mxu0 %vm1283_vm0, %v1282_v0  ;;  %1199 = vmatprep.mubr.msk.bf16.mxu1 %vm1283_vm0, %v1282_v0 }
  0x7f   :  { %1148 = vmatmul.mubr.bf16.gmra.mxu0 %v1254_v29  ;;  %1200 = vmatmul.mubr.bf16.gmra.mxu1 %v1255_v30 }
  0x80   :  { %1151 = vmatprep.mubr.msk.bf16.mxu0 %vm1283_vm0, %v1282_v0  ;;  %1203 = vmatprep.mubr.msk.bf16.mxu1 %vm1283_vm0, %v1282_v0 }
  0x87   :  { %1152 = vmatmul.mubr.bf16.gmra.mxu0 %v1256_v31  ;;  %1204 = vmatmul.mubr.bf16.gmra.mxu1 %v1257_v32 }
  0x88   :  { %1155 = vmatprep.mubr.msk.bf16.mxu0 %vm1283_vm0, %v1282_v0 }
  0x8f   :  { %1156 = vmatmul.mubr.bf16.gmra.mxu0 %v1258_v33 }
  0xef   :  { %v329_v35 = vpop.f32.mrf.mxu0  ;;  %v433_v36 = vpop.f32.mrf.mxu1 }
  0xf0   :  { %v330_v37 = vadd.f32 %v1472_v34, %v329_v35  ;;  %v434_v38 = vadd.f32 %v1472_v34, %v433_v36 }
  0xf1   :  { %v1109_v39 = vpop.f32.mrf.mxu0  ;;  %v1161_v40 = vpop.f32.mrf.mxu1 }
  0xf2   :  { %vm527_vm1 = vcmp.ge.f32.partialorder %v330_v37, 0.0  ;;  %v576_v41 = vmul.f32 0.01, %v330_v37  ;;  %vm553_vm2 = vcmp.ge.f32.partialorder %v434_v38, 0.0  ;;  %v602_v42 = vmul.f32 0.01, %v434_v38 }
  0xf3   :  { %v332_v43 = vpop.f32.mrf.mxu0  ;;  %v436_v44 = vpop.f32.mrf.mxu1 }
  0xf4   :  { %v625_v45 = vsel %vm527_vm1, %v330_v37, %v576_v41  ;;  %v333_v46 = vadd.f32 %v1472_v34, %v332_v43  ;;  %v651_v47 = vsel %vm553_vm2, %v434_v38, %v602_v42  ;;  %v437_v48 = vadd.f32 %v1472_v34, %v436_v44 }
  0xf5   :  { %v1009_v49 = vpack.c.bf16 %v625_v45, %v625_v45  ;;  %v1110_v50 = vpop.f32.mrf.mxu0  ;;  %v1035_v51 = vpack.c.bf16 %v651_v47, %v651_v47  ;;  %v1162_v52 = vpop.f32.mrf.mxu1 }
  0xf6   :  { %vm528_vm4 = vcmp.ge.f32.partialorder %v333_v46, 0.0  ;;  %v577_v53 = vmul.f32 0.01, %v333_v46  ;;  %vm554_vm5 = vcmp.ge.f32.partialorder %v437_v48, 0.0  ;;  %v603_v54 = vmul.f32 0.01, %v437_v48 }
  0xf7   :  { %872 = vst.msk [vmem:[%s1722_s3] sm:$0xf] %vm871_vm3, %v1009_v49  ;;  %898 = vst.msk [vmem:[%s1722_s3 + $0x68] sm:$0xf] %vm871_vm3, %v1035_v51  ;;  %v337_v55 = vpop.f32.mrf.mxu0  ;;  %v441_v56 = vpop.f32.mrf.mxu1 }
  0xf8   :  { %v626_v57 = vsel %vm528_vm4, %v333_v46, %v577_v53  ;;  %v338_v58 = vadd.f32 %v1472_v34, %v337_v55  ;;  %v652_v59 = vsel %vm554_vm5, %v437_v48, %v603_v54  ;;  %v442_v60 = vadd.f32 %v1472_v34, %v441_v56 }
  0xf9   :  { %v1010_v61 = vpack.c.bf16 %v626_v57, %v626_v57  ;;  %v1113_v62 = vpop.f32.mrf.mxu0  ;;  %v1036_v63 = vpack.c.bf16 %v652_v59, %v652_v59  ;;  %v1165_v0 = vpop.f32.mrf.mxu1 }
  0xfa   :  { %vm529_vm6 = vcmp.ge.f32.partialorder %v338_v58, 0.0  ;;  %v578_v1 = vmul.f32 0.01, %v338_v58  ;;  %vm555_vm7 = vcmp.ge.f32.partialorder %v442_v60, 0.0  ;;  %v604_v2 = vmul.f32 0.01, %v442_v60 }
  0xfb   :  { %873 = vst.msk [vmem:[%s1722_s3 + $0x4] sm:$0xf] %vm871_vm3, %v1010_v61  ;;  %899 = vst.msk [vmem:[%s1722_s3 + $0x6c] sm:$0xf] %vm871_vm3, %v1036_v63  ;;  %v340_v3 = vpop.f32.mrf.mxu0  ;;  %v444_v4 = vpop.f32.mrf.mxu1 }
  0xfc   :  { %v627_v5 = vsel %vm529_vm6, %v338_v58, %v578_v1  ;;  %v341_v6 = vadd.f32 %v1472_v34, %v340_v3  ;;  %v653_v7 = vsel %vm555_vm7, %v442_v60, %v604_v2  ;;  %v445_v8 = vadd.f32 %v1472_v34, %v444_v4 }
  0xfd   :  { %v1011_v9 = vpack.c.bf16 %v627_v5, %v627_v5  ;;  %v1114_v10 = vpop.f32.mrf.mxu0  ;;  %v1037_v11 = vpack.c.bf16 %v653_v7, %v653_v7  ;;  %v1166_v12 = vpop.f32.mrf.mxu1 }
  0xfe   :  { %vm530_vm8 = vcmp.ge.f32.partialorder %v341_v6, 0.0  ;;  %v579_v13 = vmul.f32 0.01, %v341_v6  ;;  %vm556_vm9 = vcmp.ge.f32.partialorder %v445_v8, 0.0  ;;  %v605_v14 = vmul.f32 0.01, %v445_v8 }
  0xff   :  { %874 = vst.msk [vmem:[%s1722_s3 + $0x8] sm:$0xf] %vm871_vm3, %v1011_v9  ;;  %900 = vst.msk [vmem:[%s1722_s3 + $0x70] sm:$0xf] %vm871_vm3, %v1037_v11  ;;  %v345_v15 = vpop.f32.mrf.mxu0  ;;  %v449_v16 = vpop.f32.mrf.mxu1 }
 0x100   :  { %v628_v17 = vsel %vm530_vm8, %v341_v6, %v579_v13  ;;  %v346_v18 = vadd.f32 %v1472_v34, %v345_v15  ;;  %v654_v19 = vsel %vm556_vm9, %v445_v8, %v605_v14  ;;  %v450_v20 = vadd.f32 %v1472_v34, %v449_v16 }
 0x101   :  { %v1012_v21 = vpack.c.bf16 %v628_v17, %v628_v17  ;;  %v1117_v22 = vpop.f32.mrf.mxu0  ;;  %v1038_v23 = vpack.c.bf16 %v654_v19, %v654_v19  ;;  %v1169_v24 = vpop.f32.mrf.mxu1 }
 0x102   :  { %vm531_vm10 = vcmp.ge.f32.partialorder %v346_v18, 0.0  ;;  %v580_v25 = vmul.f32 0.01, %v346_v18  ;;  %vm557_vm11 = vcmp.ge.f32.partialorder %v450_v20, 0.0  ;;  %v606_v26 = vmul.f32 0.01, %v450_v20 }
 0x103   :  { %875 = vst.msk [vmem:[%s1722_s3 + $0xc] sm:$0xf] %vm871_vm3, %v1012_v21  ;;  %901 = vst.msk [vmem:[%s1722_s3 + $0x74] sm:$0xf] %vm871_vm3, %v1038_v23  ;;  %v348_v27 = vpop.f32.mrf.mxu0  ;;  %v452_v28 = vpop.f32.mrf.mxu1 }
 0x104   :  { %v629_v29 = vsel %vm531_vm10, %v346_v18, %v580_v25  ;;  %v349_v30 = vadd.f32 %v1472_v34, %v348_v27  ;;  %v655_v31 = vsel %vm557_vm11, %v450_v20, %v606_v26  ;;  %v453_v32 = vadd.f32 %v1472_v34, %v452_v28 }
 0x105   :  { %v1013_v33 = vpack.c.bf16 %v629_v29, %v629_v29  ;;  %v1118_v35 = vpop.f32.mrf.mxu0  ;;  %v1039_v36 = vpack.c.bf16 %v655_v31, %v655_v31  ;;  %v1170_v37 = vpop.f32.mrf.mxu1 }
 0x106   :  { %vm532_vm12 = vcmp.ge.f32.partialorder %v349_v30, 0.0  ;;  %v581_v38 = vmul.f32 0.01, %v349_v30  ;;  %vm558_vm13 = vcmp.ge.f32.partialorder %v453_v32, 0.0  ;;  %v607_v39 = vmul.f32 0.01, %v453_v32 }
 0x107   :  { %876 = vst.msk [vmem:[%s1722_s3 + $0x10] sm:$0xf] %vm871_vm3, %v1013_v33  ;;  %902 = vst.msk [vmem:[%s1722_s3 + $0x78] sm:$0xf] %vm871_vm3, %v1039_v36  ;;  %v353_v40 = vpop.f32.mrf.mxu0  ;;  %v457_v41 = vpop.f32.mrf.mxu1 }
 0x108   :  { %v630_v42 = vsel %vm532_vm12, %v349_v30, %v581_v38  ;;  %v354_v43 = vadd.f32 %v1472_v34, %v353_v40  ;;  %v656_v44 = vsel %vm558_vm13, %v453_v32, %v607_v39  ;;  %v458_v45 = vadd.f32 %v1472_v34, %v457_v41 }
 0x109   :  { %v1014_v46 = vpack.c.bf16 %v630_v42, %v630_v42  ;;  %v1121_v47 = vpop.f32.mrf.mxu0  ;;  %v1040_v48 = vpack.c.bf16 %v656_v44, %v656_v44  ;;  %v1173_v49 = vpop.f32.mrf.mxu1 }
 0x10a   :  { %vm533_vm14 = vcmp.ge.f32.partialorder %v354_v43, 0.0  ;;  %v582_v50 = vmul.f32 0.01, %v354_v43  ;;  %vm559_vm15 = vcmp.ge.f32.partialorder %v458_v45, 0.0  ;;  %v608_v51 = vmul.f32 0.01, %v458_v45 }
 0x10b   :  { %877 = vst.msk [vmem:[%s1722_s3 + $0x14] sm:$0xf] %vm871_vm3, %v1014_v46  ;;  %903 = vst.msk [vmem:[%s1722_s3 + $0x7c] sm:$0xf] %vm871_vm3, %v1040_v48  ;;  %v356_v52 = vpop.f32.mrf.mxu0  ;;  %v460_v53 = vpop.f32.mrf.mxu1 }
 0x10c   :  { %v631_v54 = vsel %vm533_vm14, %v354_v43, %v582_v50  ;;  %v357_v55 = vadd.f32 %v1472_v34, %v356_v52  ;;  %v657_v56 = vsel %vm559_vm15, %v458_v45, %v608_v51  ;;  %v461_v57 = vadd.f32 %v1472_v34, %v460_v53 }
 0x10d   :  { %v1015_v58 = vpack.c.bf16 %v631_v54, %v631_v54  ;;  %v1122_v59 = vpop.f32.mrf.mxu0  ;;  %v1041_v60 = vpack.c.bf16 %v657_v56, %v657_v56  ;;  %v1174_v61 = vpop.f32.mrf.mxu1 }
 0x10e   :  { %vm534_vm0 = vcmp.ge.f32.partialorder %v357_v55, 0.0  ;;  %v583_v62 = vmul.f32 0.01, %v357_v55  ;;  %vm560_vm1 = vcmp.ge.f32.partialorder %v461_v57, 0.0  ;;  %v609_v63 = vmul.f32 0.01, %v461_v57 }
 0x10f   :  { %878 = vst.msk [vmem:[%s1722_s3 + $0x18] sm:$0xf] %vm871_vm3, %v1015_v58  ;;  %904 = vst.msk [vmem:[%s1722_s3 + $0x80] sm:$0xf] %vm871_vm3, %v1041_v60  ;;  %v361_v0 = vpop.f32.mrf.mxu0  ;;  %v465_v1 = vpop.f32.mrf.mxu1 }
 0x110   :  { %v632_v2 = vsel %vm534_vm0, %v357_v55, %v583_v62  ;;  %v362_v3 = vadd.f32 %v1472_v34, %v361_v0  ;;  %v658_v4 = vsel %vm560_vm1, %v461_v57, %v609_v63  ;;  %v466_v5 = vadd.f32 %v1472_v34, %v465_v1 }
 0x111   :  { %v1016_v6 = vpack.c.bf16 %v632_v2, %v632_v2  ;;  %v1125_v7 = vpop.f32.mrf.mxu0  ;;  %v1042_v8 = vpack.c.bf16 %v658_v4, %v658_v4  ;;  %v1177_v9 = vpop.f32.mrf.mxu1 }
 0x112   :  { %vm535_vm2 = vcmp.ge.f32.partialorder %v362_v3, 0.0  ;;  %v584_v10 = vmul.f32 0.01, %v362_v3  ;;  %vm561_vm4 = vcmp.ge.f32.partialorder %v466_v5, 0.0  ;;  %v610_v11 = vmul.f32 0.01, %v466_v5 }
 0x113   :  { %879 = vst.msk [vmem:[%s1722_s3 + $0x1c] sm:$0xf] %vm871_vm3, %v1016_v6  ;;  %905 = vst.msk [vmem:[%s1722_s3 + $0x84] sm:$0xf] %vm871_vm3, %v1042_v8  ;;  %v364_v12 = vpop.f32.mrf.mxu0  ;;  %v468_v13 = vpop.f32.mrf.mxu1 }
 0x114   :  { %v633_v14 = vsel %vm535_vm2, %v362_v3, %v584_v10  ;;  %v365_v15 = vadd.f32 %v1472_v34, %v364_v12  ;;  %v659_v16 = vsel %vm561_vm4, %v466_v5, %v610_v11  ;;  %v469_v17 = vadd.f32 %v1472_v34, %v468_v13 }
 0x115   :  { %v1017_v18 = vpack.c.bf16 %v633_v14, %v633_v14  ;;  %v1126_v19 = vpop.f32.mrf.mxu0  ;;  %v1043_v20 = vpack.c.bf16 %v659_v16, %v659_v16  ;;  %v1178_v21 = vpop.f32.mrf.mxu1 }
 0x116   :  { %vm536_vm5 = vcmp.ge.f32.partialorder %v365_v15, 0.0  ;;  %v585_v22 = vmul.f32 0.01, %v365_v15  ;;  %vm562_vm6 = vcmp.ge.f32.partialorder %v469_v17, 0.0  ;;  %v611_v23 = vmul.f32 0.01, %v469_v17 }
 0x117   :  { %880 = vst.msk [vmem:[%s1722_s3 + $0x20] sm:$0xf] %vm871_vm3, %v1017_v18  ;;  %906 = vst.msk [vmem:[%s1722_s3 + $0x88] sm:$0xf] %vm871_vm3, %v1043_v20  ;;  %v369_v24 = vpop.f32.mrf.mxu0  ;;  %v473_v25 = vpop.f32.mrf.mxu1 }
 0x118   :  { %v634_v26 = vsel %vm536_vm5, %v365_v15, %v585_v22  ;;  %v370_v27 = vadd.f32 %v1472_v34, %v369_v24  ;;  %v660_v28 = vsel %vm562_vm6, %v469_v17, %v611_v23  ;;  %v474_v29 = vadd.f32 %v1472_v34, %v473_v25 }
 0x119   :  { %v1018_v30 = vpack.c.bf16 %v634_v26, %v634_v26  ;;  %v1129_v31 = vpop.f32.mrf.mxu0  ;;  %v1044_v32 = vpack.c.bf16 %v660_v28, %v660_v28  ;;  %v1181_v33 = vpop.f32.mrf.mxu1 }
 0x11a   :  { %vm537_vm7 = vcmp.ge.f32.partialorder %v370_v27, 0.0  ;;  %v586_v35 = vmul.f32 0.01, %v370_v27  ;;  %vm563_vm8 = vcmp.ge.f32.partialorder %v474_v29, 0.0  ;;  %v612_v36 = vmul.f32 0.01, %v474_v29 }
 0x11b   :  { %881 = vst.msk [vmem:[%s1722_s3 + $0x24] sm:$0xf] %vm871_vm3, %v1018_v30  ;;  %907 = vst.msk [vmem:[%s1722_s3 + $0x8c] sm:$0xf] %vm871_vm3, %v1044_v32  ;;  %v372_v37 = vpop.f32.mrf.mxu0  ;;  %v476_v38 = vpop.f32.mrf.mxu1 }
 0x11c   :  { %v635_v39 = vsel %vm537_vm7, %v370_v27, %v586_v35  ;;  %v373_v40 = vadd.f32 %v1472_v34, %v372_v37  ;;  %v661_v41 = vsel %vm563_vm8, %v474_v29, %v612_v36  ;;  %v477_v42 = vadd.f32 %v1472_v34, %v476_v38 }
 0x11d   :  { %v1019_v43 = vpack.c.bf16 %v635_v39, %v635_v39  ;;  %v1130_v44 = vpop.f32.mrf.mxu0  ;;  %v1045_v45 = vpack.c.bf16 %v661_v41, %v661_v41  ;;  %v1182_v46 = vpop.f32.mrf.mxu1 }
 0x11e   :  { %vm538_vm9 = vcmp.ge.f32.partialorder %v373_v40, 0.0  ;;  %v587_v47 = vmul.f32 0.01, %v373_v40  ;;  %vm564_vm10 = vcmp.ge.f32.partialorder %v477_v42, 0.0  ;;  %v613_v48 = vmul.f32 0.01, %v477_v42 }
 0x11f   :  { %882 = vst.msk [vmem:[%s1722_s3 + $0x28] sm:$0xf] %vm871_vm3, %v1019_v43  ;;  %908 = vst.msk [vmem:[%s1722_s3 + $0x90] sm:$0xf] %vm871_vm3, %v1045_v45  ;;  %v377_v49 = vpop.f32.mrf.mxu0  ;;  %v481_v50 = vpop.f32.mrf.mxu1 }
 0x120   :  { %v636_v51 = vsel %vm538_vm9, %v373_v40, %v587_v47  ;;  %v378_v52 = vadd.f32 %v1472_v34, %v377_v49  ;;  %v662_v53 = vsel %vm564_vm10, %v477_v42, %v613_v48  ;;  %v482_v54 = vadd.f32 %v1472_v34, %v481_v50 }
 0x121   :  { %v1020_v55 = vpack.c.bf16 %v636_v51, %v636_v51  ;;  %v1133_v56 = vpop.f32.mrf.mxu0  ;;  %v1046_v57 = vpack.c.bf16 %v662_v53, %v662_v53  ;;  %v1185_v58 = vpop.f32.mrf.mxu1 }
 0x122   :  { %vm539_vm11 = vcmp.ge.f32.partialorder %v378_v52, 0.0  ;;  %v588_v59 = vmul.f32 0.01, %v378_v52  ;;  %vm565_vm12 = vcmp.ge.f32.partialorder %v482_v54, 0.0  ;;  %v614_v60 = vmul.f32 0.01, %v482_v54 }
 0x123   :  { %883 = vst.msk [vmem:[%s1722_s3 + $0x2c] sm:$0xf] %vm871_vm3, %v1020_v55  ;;  %909 = vst.msk [vmem:[%s1722_s3 + $0x94] sm:$0xf] %vm871_vm3, %v1046_v57  ;;  %v380_v61 = vpop.f32.mrf.mxu0  ;;  %v484_v62 = vpop.f32.mrf.mxu1 }
 0x124   :  { %v637_v63 = vsel %vm539_vm11, %v378_v52, %v588_v59  ;;  %v381_v0 = vadd.f32 %v1472_v34, %v380_v61  ;;  %v663_v1 = vsel %vm565_vm12, %v482_v54, %v614_v60  ;;  %v485_v2 = vadd.f32 %v1472_v34, %v484_v62 }
 0x125   :  { %v1021_v3 = vpack.c.bf16 %v637_v63, %v637_v63  ;;  %v1134_v4 = vpop.f32.mrf.mxu0  ;;  %v1047_v5 = vpack.c.bf16 %v663_v1, %v663_v1  ;;  %v1186_v6 = vpop.f32.mrf.mxu1 }
 0x126   :  { %vm540_vm13 = vcmp.ge.f32.partialorder %v381_v0, 0.0  ;;  %v589_v7 = vmul.f32 0.01, %v381_v0  ;;  %vm566_vm14 = vcmp.ge.f32.partialorder %v485_v2, 0.0  ;;  %v615_v8 = vmul.f32 0.01, %v485_v2 }
 0x127   :  { %884 = vst.msk [vmem:[%s1722_s3 + $0x30] sm:$0xf] %vm871_vm3, %v1021_v3  ;;  %910 = vst.msk [vmem:[%s1722_s3 + $0x98] sm:$0xf] %vm871_vm3, %v1047_v5  ;;  %v385_v9 = vpop.f32.mrf.mxu0  ;;  %v489_v10 = vpop.f32.mrf.mxu1 }
 0x128   :  { %v638_v11 = vsel %vm540_vm13, %v381_v0, %v589_v7  ;;  %v386_v12 = vadd.f32 %v1472_v34, %v385_v9  ;;  %v664_v13 = vsel %vm566_vm14, %v485_v2, %v615_v8  ;;  %v490_v14 = vadd.f32 %v1472_v34, %v489_v10 }
 0x129   :  { %v1022_v15 = vpack.c.bf16 %v638_v11, %v638_v11  ;;  %v1137_v16 = vpop.f32.mrf.mxu0  ;;  %v1048_v17 = vpack.c.bf16 %v664_v13, %v664_v13  ;;  %v1189_v18 = vpop.f32.mrf.mxu1 }
 0x12a   :  { %vm541_vm15 = vcmp.ge.f32.partialorder %v386_v12, 0.0  ;;  %v590_v19 = vmul.f32 0.01, %v386_v12  ;;  %vm567_vm0 = vcmp.ge.f32.partialorder %v490_v14, 0.0  ;;  %v616_v20 = vmul.f32 0.01, %v490_v14 }
 0x12b   :  { %885 = vst.msk [vmem:[%s1722_s3 + $0x34] sm:$0xf] %vm871_vm3, %v1022_v15  ;;  %911 = vst.msk [vmem:[%s1722_s3 + $0x9c] sm:$0xf] %vm871_vm3, %v1048_v17  ;;  %v388_v21 = vpop.f32.mrf.mxu0  ;;  %v492_v22 = vpop.f32.mrf.mxu1 }
 0x12c   :  { %v639_v23 = vsel %vm541_vm15, %v386_v12, %v590_v19  ;;  %v389_v24 = vadd.f32 %v1472_v34, %v388_v21  ;;  %v665_v25 = vsel %vm567_vm0, %v490_v14, %v616_v20  ;;  %v493_v26 = vadd.f32 %v1472_v34, %v492_v22 }
 0x12d   :  { %v1023_v27 = vpack.c.bf16 %v639_v23, %v639_v23  ;;  %v1138_v28 = vpop.f32.mrf.mxu0  ;;  %v1049_v29 = vpack.c.bf16 %v665_v25, %v665_v25  ;;  %v1190_v30 = vpop.f32.mrf.mxu1 }
 0x12e   :  { %vm542_vm1 = vcmp.ge.f32.partialorder %v389_v24, 0.0  ;;  %v591_v31 = vmul.f32 0.01, %v389_v24  ;;  %vm568_vm2 = vcmp.ge.f32.partialorder %v493_v26, 0.0  ;;  %v617_v32 = vmul.f32 0.01, %v493_v26 }
 0x12f   :  { %886 = vst.msk [vmem:[%s1722_s3 + $0x38] sm:$0xf] %vm871_vm3, %v1023_v27  ;;  %912 = vst.msk [vmem:[%s1722_s3 + $0xa0] sm:$0xf] %vm871_vm3, %v1049_v29  ;;  %v393_v33 = vpop.f32.mrf.mxu0  ;;  %v497_v35 = vpop.f32.mrf.mxu1 }
 0x130   :  { %v640_v36 = vsel %vm542_vm1, %v389_v24, %v591_v31  ;;  %v394_v37 = vadd.f32 %v1472_v34, %v393_v33  ;;  %v666_v38 = vsel %vm568_vm2, %v493_v26, %v617_v32  ;;  %v498_v39 = vadd.f32 %v1472_v34, %v497_v35 }
 0x131   :  { %v1024_v40 = vpack.c.bf16 %v640_v36, %v640_v36  ;;  %v1141_v41 = vpop.f32.mrf.mxu0  ;;  %v1050_v42 = vpack.c.bf16 %v666_v38, %v666_v38  ;;  %v1193_v43 = vpop.f32.mrf.mxu1 }
 0x132   :  { %vm543_vm4 = vcmp.ge.f32.partialorder %v394_v37, 0.0  ;;  %v592_v44 = vmul.f32 0.01, %v394_v37  ;;  %vm569_vm5 = vcmp.ge.f32.partialorder %v498_v39, 0.0  ;;  %v618_v45 = vmul.f32 0.01, %v498_v39 }
 0x133   :  { %887 = vst.msk [vmem:[%s1722_s3 + $0x3c] sm:$0xf] %vm871_vm3, %v1024_v40  ;;  %913 = vst.msk [vmem:[%s1722_s3 + $0xa4] sm:$0xf] %vm871_vm3, %v1050_v42  ;;  %v396_v46 = vpop.f32.mrf.mxu0  ;;  %v500_v47 = vpop.f32.mrf.mxu1 }
 0x134   :  { %v641_v48 = vsel %vm543_vm4, %v394_v37, %v592_v44  ;;  %v397_v49 = vadd.f32 %v1472_v34, %v396_v46  ;;  %v667_v50 = vsel %vm569_vm5, %v498_v39, %v618_v45  ;;  %v501_v51 = vadd.f32 %v1472_v34, %v500_v47 }
 0x135   :  { %v1025_v52 = vpack.c.bf16 %v641_v48, %v641_v48  ;;  %v1142_v53 = vpop.f32.mrf.mxu0  ;;  %v1051_v54 = vpack.c.bf16 %v667_v50, %v667_v50  ;;  %v1194_v55 = vpop.f32.mrf.mxu1 }
 0x136   :  { %vm544_vm6 = vcmp.ge.f32.partialorder %v397_v49, 0.0  ;;  %v593_v56 = vmul.f32 0.01, %v397_v49  ;;  %vm570_vm7 = vcmp.ge.f32.partialorder %v501_v51, 0.0  ;;  %v619_v57 = vmul.f32 0.01, %v501_v51 }
 0x137   :  { %888 = vst.msk [vmem:[%s1722_s3 + $0x40] sm:$0xf] %vm871_vm3, %v1025_v52  ;;  %914 = vst.msk [vmem:[%s1722_s3 + $0xa8] sm:$0xf] %vm871_vm3, %v1051_v54  ;;  %v401_v58 = vpop.f32.mrf.mxu0  ;;  %v505_v59 = vpop.f32.mrf.mxu1 }
 0x138   :  { %v642_v60 = vsel %vm544_vm6, %v397_v49, %v593_v56  ;;  %v402_v61 = vadd.f32 %v1472_v34, %v401_v58  ;;  %v668_v62 = vsel %vm570_vm7, %v501_v51, %v619_v57  ;;  %v506_v63 = vadd.f32 %v1472_v34, %v505_v59 }
 0x139   :  { %v1026_v0 = vpack.c.bf16 %v642_v60, %v642_v60  ;;  %v1145_v1 = vpop.f32.mrf.mxu0  ;;  %v1052_v2 = vpack.c.bf16 %v668_v62, %v668_v62  ;;  %v1197_v3 = vpop.f32.mrf.mxu1 }
 0x13a   :  { %vm545_vm8 = vcmp.ge.f32.partialorder %v402_v61, 0.0  ;;  %v594_v4 = vmul.f32 0.01, %v402_v61  ;;  %vm571_vm9 = vcmp.ge.f32.partialorder %v506_v63, 0.0  ;;  %v620_v5 = vmul.f32 0.01, %v506_v63 }
 0x13b   :  { %889 = vst.msk [vmem:[%s1722_s3 + $0x44] sm:$0xf] %vm871_vm3, %v1026_v0  ;;  %915 = vst.msk [vmem:[%s1722_s3 + $0xac] sm:$0xf] %vm871_vm3, %v1052_v2  ;;  %v404_v6 = vpop.f32.mrf.mxu0  ;;  %v508_v7 = vpop.f32.mrf.mxu1 }
 0x13c   :  { %v643_v8 = vsel %vm545_vm8, %v402_v61, %v594_v4  ;;  %v405_v9 = vadd.f32 %v1472_v34, %v404_v6  ;;  %v669_v10 = vsel %vm571_vm9, %v506_v63, %v620_v5  ;;  %v509_v11 = vadd.f32 %v1472_v34, %v508_v7 }
 0x13d   :  { %v1027_v12 = vpack.c.bf16 %v643_v8, %v643_v8  ;;  %v1146_v13 = vpop.f32.mrf.mxu0  ;;  %v1053_v14 = vpack.c.bf16 %v669_v10, %v669_v10  ;;  %v1198_v15 = vpop.f32.mrf.mxu1 }
 0x13e   :  { %vm546_vm10 = vcmp.ge.f32.partialorder %v405_v9, 0.0  ;;  %v595_v16 = vmul.f32 0.01, %v405_v9  ;;  %vm572_vm11 = vcmp.ge.f32.partialorder %v509_v11, 0.0  ;;  %v621_v17 = vmul.f32 0.01, %v509_v11 }
 0x13f   :  { %890 = vst.msk [vmem:[%s1722_s3 + $0x48] sm:$0xf] %vm871_vm3, %v1027_v12  ;;  %916 = vst.msk [vmem:[%s1722_s3 + $0xb0] sm:$0xf] %vm871_vm3, %v1053_v14  ;;  %v409_v18 = vpop.f32.mrf.mxu0  ;;  %v513_v19 = vpop.f32.mrf.mxu1 }
 0x140   :  { %v644_v20 = vsel %vm546_vm10, %v405_v9, %v595_v16  ;;  %v410_v21 = vadd.f32 %v1472_v34, %v409_v18  ;;  %v670_v22 = vsel %vm572_vm11, %v509_v11, %v621_v17  ;;  %v514_v23 = vadd.f32 %v1472_v34, %v513_v19 }
 0x141   :  { %v1028_v24 = vpack.c.bf16 %v644_v20, %v644_v20  ;;  %v1149_v25 = vpop.f32.mrf.mxu0  ;;  %v1054_v26 = vpack.c.bf16 %v670_v22, %v670_v22  ;;  %v1201_v27 = vpop.f32.mrf.mxu1 }
 0x142   :  { %vm547_vm12 = vcmp.ge.f32.partialorder %v410_v21, 0.0  ;;  %v596_v28 = vmul.f32 0.01, %v410_v21  ;;  %vm573_vm13 = vcmp.ge.f32.partialorder %v514_v23, 0.0  ;;  %v622_v29 = vmul.f32 0.01, %v514_v23 }
 0x143   :  { %891 = vst.msk [vmem:[%s1722_s3 + $0x4c] sm:$0xf] %vm871_vm3, %v1028_v24  ;;  %917 = vst.msk [vmem:[%s1722_s3 + $0xb4] sm:$0xf] %vm871_vm3, %v1054_v26  ;;  %v412_v30 = vpop.f32.mrf.mxu0  ;;  %v516_v31 = vpop.f32.mrf.mxu1 }
 0x144   :  { %v645_v32 = vsel %vm547_vm12, %v410_v21, %v596_v28  ;;  %v413_v33 = vadd.f32 %v1472_v34, %v412_v30  ;;  %v671_v35 = vsel %vm573_vm13, %v514_v23, %v622_v29  ;;  %v517_v36 = vadd.f32 %v1472_v34, %v516_v31 }
 0x145   :  { %v1029_v37 = vpack.c.bf16 %v645_v32, %v645_v32  ;;  %v1150_v38 = vpop.f32.mrf.mxu0  ;;  %v1055_v39 = vpack.c.bf16 %v671_v35, %v671_v35  ;;  %v1202_v40 = vpop.f32.mrf.mxu1 }
 0x146   :  { %vm548_vm14 = vcmp.ge.f32.partialorder %v413_v33, 0.0  ;;  %v597_v41 = vmul.f32 0.01, %v413_v33  ;;  %vm574_vm15 = vcmp.ge.f32.partialorder %v517_v36, 0.0  ;;  %v623_v42 = vmul.f32 0.01, %v517_v36 }
 0x147   :  { %892 = vst.msk [vmem:[%s1722_s3 + $0x50] sm:$0xf] %vm871_vm3, %v1029_v37  ;;  %918 = vst.msk [vmem:[%s1722_s3 + $0xb8] sm:$0xf] %vm871_vm3, %v1055_v39  ;;  %v417_v43 = vpop.f32.mrf.mxu0  ;;  %v521_v44 = vpop.f32.mrf.mxu1 }
 0x148   :  { %v646_v45 = vsel %vm548_vm14, %v413_v33, %v597_v41  ;;  %v418_v46 = vadd.f32 %v1472_v34, %v417_v43  ;;  %v672_v47 = vsel %vm574_vm15, %v517_v36, %v623_v42  ;;  %v522_v48 = vadd.f32 %v1472_v34, %v521_v44 }
 0x149   :  { %v1030_v49 = vpack.c.bf16 %v646_v45, %v646_v45  ;;  %v1153_v50 = vpop.f32.mrf.mxu0  ;;  %v1056_v51 = vpack.c.bf16 %v672_v47, %v672_v47  ;;  %v1205_v52 = vpop.f32.mrf.mxu1 }
 0x14a   :  { %vm549_vm0 = vcmp.ge.f32.partialorder %v418_v46, 0.0  ;;  %v598_v53 = vmul.f32 0.01, %v418_v46  ;;  %vm575_vm1 = vcmp.ge.f32.partialorder %v522_v48, 0.0  ;;  %v624_v54 = vmul.f32 0.01, %v522_v48 }
 0x14b   :  { %893 = vst.msk [vmem:[%s1722_s3 + $0x54] sm:$0xf] %vm871_vm3, %v1030_v49  ;;  %919 = vst.msk [vmem:[%s1722_s3 + $0xbc] sm:$0xf] %vm871_vm3, %v1056_v51  ;;  %v420_v55 = vpop.f32.mrf.mxu0  ;;  %v524_v56 = vpop.f32.mrf.mxu1 }
 0x14c   :  { %v647_v57 = vsel %vm549_vm0, %v418_v46, %v598_v53  ;;  %v421_v58 = vadd.f32 %v1472_v34, %v420_v55  ;;  %v673_v59 = vsel %vm575_vm1, %v522_v48, %v624_v54 }
 0x14d   :  { %v1031_v60 = vpack.c.bf16 %v647_v57, %v647_v57  ;;  %v1154_v61 = vpop.f32.mrf.mxu0  ;;  %v1057_v62 = vpack.c.bf16 %v673_v59, %v673_v59  ;;  %v1206_v63 = vpop.f32.mrf.mxu1 }
 0x14e   :  { %vm550_vm2 = vcmp.ge.f32.partialorder %v421_v58, 0.0  ;;  %v599_v0 = vmul.f32 0.01, %v421_v58 }
 0x14f   :  { %894 = vst.msk [vmem:[%s1722_s3 + $0x58] sm:$0xf] %vm871_vm3, %v1031_v60  ;;  %920 = vst.msk [vmem:[%s1722_s3 + $0xc0] sm:$0xf] %vm871_vm3, %v1057_v62  ;;  %v425_v1 = vpop.f32.mrf.mxu0 }
 0x150   :  { %v648_v2 = vsel %vm550_vm2, %v421_v58, %v599_v0  ;;  %v426_v3 = vadd.f32 %v1472_v34, %v425_v1 }
 0x151   :  { %v1032_v4 = vpack.c.bf16 %v648_v2, %v648_v2  ;;  %v1157_v5 = vpop.f32.mrf.mxu0 }
 0x152   :  { %vm551_vm4 = vcmp.ge.f32.partialorder %v426_v3, 0.0  ;;  %v600_v6 = vmul.f32 0.01, %v426_v3 }
 0x153   :  { %895 = vst.msk [vmem:[%s1722_s3 + $0x5c] sm:$0xf] %vm871_vm3, %v1032_v4  ;;  %v428_v7 = vpop.f32.mrf.mxu0 }
 0x154   :  { %v649_v8 = vsel %vm551_vm4, %v426_v3, %v600_v6  ;;  %v429_v9 = vadd.f32 %v1472_v34, %v428_v7 }
 0x155   :  { %v1033_v10 = vpack.c.bf16 %v649_v8, %v649_v8  ;;  %v1158_v11 = vpop.f32.mrf.mxu0 }
 0x156   :  { %vm552_vm5 = vcmp.ge.f32.partialorder %v429_v9, 0.0  ;;  %v601_v12 = vmul.f32 0.01, %v429_v9 }
 0x157   :  { %896 = vst.msk [vmem:[%s1722_s3 + $0x60] sm:$0xf] %vm871_vm3, %v1033_v10 }
 0x158   :  { %v650_v13 = vsel %vm552_vm5, %v429_v9, %v601_v12 }
 0x159   :  { %v1034_v14 = vpack.c.bf16 %v650_v13, %v650_v13 }
 0x15b   :  { %897 = vst.msk [vmem:[%s1722_s3 + $0x64] sm:$0xf] %vm871_vm3, %v1034_v14 }
 0x15c   :  { %925 = vsyncpa [#allocation3], 1 }

// kernel: discriminator_forward.6
= control target key start
LH: loop header
LB: loop body
LE: loop exit
PB: predicated region body
PF: predicated region fallthrough
CT: control target
= control target key end

     0   :  { %v1477_v24 = vmov 0.0   ;;  %vm1478_vm0 = vmmov 0   ;;  %vm836_vm1 = vcmask 1041408   ;;  %s1857_s1 = inlined_call_operand.vmem [shape: bf16[640,128], index: 1, kind: input, shape index: {}]   ;;  %s1858_s0 = inlined_call_operand.vmem [shape: bf16[98,640], index: 0, kind: input, shape index: {}]   ;;  %s1859_s2 = inlined_call_operand.vmem [shape: f32[1,128], index: 2, kind: input, shape index: {}]   ;;  %s1860_s3 = inlined_call_operand.vmem [shape: f32[1,128], index: 3, kind: input, shape index: {}]   ;;  %s1861_s4 = inlined_call_operand.vmem [shape: f32[1,128], index: 4, kind: input, shape index: {}]   ;;  %s1862_s5 = inlined_call_operand.vmem [shape: bf16[98,128], index: 5, kind: output, shape index: {}]  }
   0x1   :  { %v1388_v0 = vld [vmem:[%s1857_s1 + $0x78] sm:$0xff]   ;;  %v1390_v2 = vld [vmem:[%s1857_s1 + $0x70] sm:$0xff]   ;;  %v1392_v4 = vld [vmem:[%s1857_s1 + $0x68] sm:$0xff]  }
   0x2   :  { %v1389_v1 = vld [vmem:[%s1857_s1 + $0x38] sm:$0xff]   ;;  %1195 = vmatprep.subr.bf16.mxu0 %v1388_v0  ;;  %1370 = vmatprep.subr.bf16.mxu1 %v1388_v0  ;;  %v1391_v3 = vld [vmem:[%s1857_s1 + $0x30] sm:$0xff]   ;;  %v1393_v5 = vld [vmem:[%s1857_s1 + $0x28] sm:$0xff]  }
   0x3   :  { %1196 = vmatpush3.bf16.msra.mxu0 %v1389_v1  ;;  %1378 = vmatpush3.bf16.msra.mxu1 %v1389_v1  ;;  %v1394_v6 = vld [vmem:[%s1857_s1 + $0x60] sm:$0xff]   ;;  %v1396_v8 = vld [vmem:[%s1857_s1 + $0x58] sm:$0xff]   ;;  %v1398_v10 = vld [vmem:[%s1857_s1 + $0x50] sm:$0xff]  }
   0x4   :  { %1197 = vmatprep.subr.bf16.mxu0 %v1390_v2  ;;  %1371 = vmatprep.subr.bf16.mxu1 %v1390_v2  ;;  %v1395_v7 = vld [vmem:[%s1857_s1 + $0x20] sm:$0xff]   ;;  %v1397_v9 = vld [vmem:[%s1857_s1 + $0x18] sm:$0xff]   ;;  %v1399_v13 = vld [vmem:[%s1857_s1 + $0x10] sm:$0xff]  }
   0x5   :  { %v1406_v11 = vld [vmem:[%s1858_s0 + $0x4] ss:$20 sps:$4 sm:$0xff]   ;;  %v1400_v14 = vld [vmem:[%s1857_s1 + $0x48] sm:$0xff]   ;;  %v1404_v18 = vld [vmem:[%s1858_s0] ss:$20 sps:$4 sm:$0xff]  }
   0x6   :  { %v1409_v12 = vld [vmem:[%s1858_s0 + $0xa4] ss:$20 sps:$4 sm:$0xff]   ;;  %593 = vmatprep.mubr.bf16.mxu0 %v1406_v11  ;;  %v1401_v15 = vld [vmem:[%s1857_s1 + $0x8] sm:$0xff]   ;;  %v1407_v19 = vld [vmem:[%s1858_s0 + $0xa0] ss:$20 sps:$4 sm:$0xff]  }
   0x7   :  { %1198 = vmatpush3.bf16.msra.mxu0 %v1391_v3  ;;  %1379 = vmatpush3.bf16.msra.mxu1 %v1391_v3  ;;  %v1402_v16 = vld [vmem:[%s1857_s1 + $0x40] sm:$0xff]   ;;  %v1410_v20 = vld [vmem:[%s1857_s1 + $0xf8] sm:$0xff]   ;;  %v1413_v23 = vld [vmem:[%s1857_s1 + $0xf0] sm:$0xff]  }
   0x8   :  { %1199 = vmatprep.subr.bf16.mxu0 %v1392_v4  ;;  %1372 = vmatprep.subr.bf16.mxu1 %v1392_v4  ;;  %v1403_v17 = vld [vmem:[%s1857_s1] sm:$0xff]   ;;  %v1411_v21 = vld [vmem:[%s1857_s1 + $0xb8] sm:$0xff]   ;;  %v1414_v27 = vld [vmem:[%s1857_s1 + $0xb0] sm:$0xff]  }
   0x9   :  { %625 = vmatprep.mubr.bf16.mxu1 %v1409_v12  ;;  %v1412_v22 = vld [vmem:[%s1857_s1 + $0x138] sm:$0xff]   ;;  %v1416_v25 = vld [vmem:[%s1858_s0 + $0x2c] ss:$20 sps:$4 sm:$0xff]   ;;  %v1415_v28 = vld [vmem:[%s1857_s1 + $0x130] sm:$0xff]  }
   0xa   :  { %v1420_v26 = vld [vmem:[%s1858_s0 + $0xcc] ss:$20 sps:$4 sm:$0xff]   ;;  %v1418_v29 = vld [vmem:[%s1858_s0 + $0x28] ss:$20 sps:$4 sm:$0xff]   ;;  %v57_v33 = vld [vmem:[%s1858_s0 + $0xf0] sm:$0x11] }
   0xb   :  { %1200 = vmatpush3.bf16.msra.mxu0 %v1393_v5  ;;  %1380 = vmatpush3.bf16.msra.mxu1 %v1393_v5  ;;  %v1419_v30 = vld [vmem:[%s1857_s1 + $0xe8] sm:$0xff]   ;;  %v1425_v35 = vld [vmem:[%s1857_s1 + $0xe0] sm:$0xff]   ;;  %v1088_v37 = vcombine.high %v57_v33, %v57_v33  ;;  %v1431_v40 = vld [vmem:[%s1857_s1 + $0xd8] sm:$0xff]   ;;  %v1087_v43 = vcombine.low %v57_v33, %v57_v33 }
   0xc   :  { %1201 = vmatprep.subr.bf16.mxu0 %v1394_v6  ;;  %1373 = vmatprep.subr.bf16.mxu1 %v1394_v6  ;;  %v1422_v31 = vld [vmem:[%s1857_s1 + $0xa8] sm:$0xff]   ;;  %v1426_v38 = vld [vmem:[%s1857_s1 + $0xa0] sm:$0xff]   ;;  %v1433_v42 = vld [vmem:[%s1857_s1 + $0x98] sm:$0xff]  }
   0xd   :  { %v1424_v32 = vld [vmem:[%s1858_s0 + $0xc8] ss:$20 sps:$4 sm:$0xff]   ;;  %v1427_v39 = vld [vmem:[%s1857_s1 + $0x120] sm:$0xff]   ;;  %v1436_v45 = vld [vmem:[%s1857_s1 + $0xd0] sm:$0xff]  }
   0xe   :  { %v1423_v34 = vld [vmem:[%s1857_s1 + $0x128] sm:$0xff]   ;;  %v1430_v41 = vld [vmem:[%s1858_s0 + $0x50] ss:$20 sps:$4 sm:$0xff]   ;;  %v1434_v44 = vld [vmem:[%s1857_s1 + $0x118] sm:$0xff]  }
   0xf   :  { %1202 = vmatpush3.bf16.msra.mxu0 %v1395_v7  ;;  %1381 = vmatpush3.bf16.msra.mxu1 %v1395_v7  ;;  %v1428_v36 = vld [vmem:[%s1858_s0 + $0x54] ss:$20 sps:$4 sm:$0xff]   ;;  %v1439_v46 = vld [vmem:[%s1858_s0 + $0x7c] ss:$20 sps:$4 sm:$0xff]   ;;  %v1450_v47 = vld [vmem:[%s1858_s0 + $0xc] ss:$20 sps:$4 sm:$0xff]  }
  0x10   :  { %1203 = vmatprep.subr.bf16.mxu0 %v1396_v8  ;;  %1374 = vmatprep.subr.bf16.mxu1 %v1396_v8  ;;  %v1437_v48 = vld [vmem:[%s1857_s1 + $0x90] sm:$0xff]   ;;  %v1442_v50 = vld [vmem:[%s1857_s1 + $0xc8] sm:$0xff]   ;;  %v1445_v54 = vld [vmem:[%s1857_s1 + $0xc0] sm:$0xff]  }
  0x11   :  { %v1438_v49 = vld [vmem:[%s1857_s1 + $0x110] sm:$0xff]   ;;  %v1441_v51 = vld [vmem:[%s1858_s0 + $0x78] ss:$20 sps:$4 sm:$0xff]   ;;  %v1446_v55 = vld [vmem:[%s1857_s1 + $0x80] sm:$0xff]  }
  0x12   :  { %v1443_v52 = vld [vmem:[%s1857_s1 + $0x88] sm:$0xff]   ;;  %v1447_v56 = vld [vmem:[%s1857_s1 + $0x100] sm:$0xff]   ;;  %v1456_v62 = vld [vmem:[%s1858_s0 + $0x5c] ss:$20 sps:$4 sm:$0xff]  }
  0x13   :  { %1204 = vmatpush3.bf16.msra.mxu0 %v1397_v9  ;;  %1382 = vmatpush3.bf16.msra.mxu1 %v1397_v9  ;;  %v1444_v53 = vld [vmem:[%s1857_s1 + $0x108] sm:$0xff]   ;;  %v1451_v58 = vld [vmem:[%s1858_s0 + $0x10] ss:$20 sps:$4 sm:$0xff]   ;;  %v1459_v0 = vld [vmem:[%s1858_s0 + $0x60] ss:$20 sps:$4 sm:$0xff]  }
  0x14   :  { %1205 = vmatprep.subr.bf16.mxu0 %v1398_v10  ;;  %1375 = vmatprep.subr.bf16.mxu1 %v1398_v10  ;;  %v1448_v57 = vld [vmem:[%s1858_s0 + $0x8] ss:$20 sps:$4 sm:$0xff]   ;;  %v1454_v60 = vld [vmem:[%s1858_s0 + $0x30] ss:$20 sps:$4 sm:$0xff]   ;;  %v1455_v61 = vld [vmem:[%s1858_s0 + $0x38] ss:$20 sps:$4 sm:$0xff]  }
  0x15   :  { %v1452_v59 = vld [vmem:[%s1858_s0 + $0x34] ss:$20 sps:$4 sm:$0xff]   ;;  %v1458_v63 = vld [vmem:[%s1858_s0 + $0x58] ss:$20 sps:$4 sm:$0xff]   ;;  %v1467_v6 = vld [vmem:[%s1858_s0 + $0xb0] ss:$20 sps:$4 sm:$0xff]  }
  0x16   :  { %v1460_v1 = vld [vmem:[%s1858_s0 + $0x84] ss:$20 sps:$4 sm:$0xff]   ;;  %v1462_v2 = vld [vmem:[%s1858_s0 + $0x80] ss:$20 sps:$4 sm:$0xff]   ;;  %v1463_v3 = vld [vmem:[%s1858_s0 + $0x88] ss:$20 sps:$4 sm:$0xff]  }
  0x17   :  { %1206 = vmatpush3.bf16.msra.mxu0 %v1399_v13  ;;  %1383 = vmatpush3.bf16.msra.mxu1 %v1399_v13  ;;  %v1464_v4 = vld [vmem:[%s1858_s0 + $0xac] ss:$20 sps:$4 sm:$0xff]   ;;  %v1466_v5 = vld [vmem:[%s1858_s0 + $0xa8] ss:$20 sps:$4 sm:$0xff]   ;;  %v1470_v9 = vld [vmem:[%s1858_s0 + $0xd0] ss:$20 sps:$4 sm:$0xff]  }
  0x18   :  { %1207 = vmatprep.subr.bf16.mxu0 %v1400_v14  ;;  %1376 = vmatprep.subr.bf16.mxu1 %v1400_v14  ;;  %v1468_v7 = vld [vmem:[%s1858_s0 + $0xd4] ss:$20 sps:$4 sm:$0xff]   ;;  %v58_v8 = vld [vmem:[%s1858_s0 + $0xf8] sm:$0x11] }
  0x19   :  { %v1471_v10 = vld [vmem:[%s1858_s0 + $0xd8] ss:$20 sps:$4 sm:$0xff]   ;;  %v1090_v11 = vcombine.high %v58_v8, %v58_v8  ;;  %v1089_v12 = vcombine.low %v58_v8, %v58_v8  ;;  %v1474_v13 = vld [vmem:[%s1858_s0 + $0x100] ss:$0 sps:$4 sm:$0x11]  }
  0x1b   :  { %1208 = vmatpush3.bf16.msra.mxu0 %v1401_v15  ;;  %1384 = vmatpush3.bf16.msra.mxu1 %v1401_v15 }
  0x1c   :  { %1209 = vmatprep.subr.bf16.mxu0 %v1402_v16  ;;  %1377 = vmatprep.subr.bf16.mxu1 %v1402_v16 }
  0x1f   :  { %1210 = vmatpush3.bf16.msra.mxu0 %v1403_v17  ;;  %1385 = vmatpush3.bf16.msra.mxu1 %v1403_v17 }
  0x20   :  { %1253 = vmatprep.subr.bf16.mxu1 %v1410_v20  ;;  %1326 = vmatprep.subr.bf16.mxu0 %v1477_v24 }
  0x22   :  { %594 = vmatmul.mubr.bf16.vlgmr.msra.gmra.mxu0 %v1404_v18  ;;  %626 = vmatmul.mubr.bf16.vlgmr.msra.gmra.mxu1 %v1407_v19 }
  0x23   :  { %1254 = vmatpush3.bf16.msra.mxu1 %v1411_v21  ;;  %1327 = vmatpush3.bf16.msra.mxu0 %v1412_v22 }
  0x24   :  { %1255 = vmatprep.subr.bf16.mxu1 %v1413_v23  ;;  %1328 = vmatprep.subr.bf16.mxu0 %v1477_v24 }
  0x25   :  { %601 = vmatprep.mubr.bf16.mxu0 %v1416_v25  ;;  %633 = vmatprep.mubr.bf16.mxu1 %v1420_v26 }
  0x27   :  { %1256 = vmatpush3.bf16.msra.mxu1 %v1414_v27  ;;  %1329 = vmatpush3.bf16.msra.mxu0 %v1415_v28 }
  0x28   :  { %1257 = vmatprep.subr.bf16.mxu1 %v1419_v30  ;;  %1330 = vmatprep.subr.bf16.mxu0 %v1477_v24 }
  0x2a   :  { %602 = vmatmul.mubr.bf16.gmra.mxu0 %v1418_v29  ;;  %634 = vmatmul.mubr.bf16.gmra.mxu1 %v1424_v32 }
  0x2b   :  { %1258 = vmatpush3.bf16.msra.mxu1 %v1422_v31  ;;  %1331 = vmatpush3.bf16.msra.mxu0 %v1423_v34 }
  0x2c   :  { %1259 = vmatprep.subr.bf16.mxu1 %v1425_v35  ;;  %1332 = vmatprep.subr.bf16.mxu0 %v1477_v24 }
  0x2d   :  { %609 = vmatprep.mubr.bf16.mxu0 %v1428_v36  ;;  %641 = vmatprep.mubr.bf16.mxu1 %v1088_v37 }
  0x2f   :  { %1260 = vmatpush3.bf16.msra.mxu1 %v1426_v38  ;;  %1333 = vmatpush3.bf16.msra.mxu0 %v1427_v39 }
  0x30   :  { %1261 = vmatprep.subr.bf16.mxu1 %v1431_v40  ;;  %1334 = vmatprep.subr.bf16.mxu0 %v1477_v24 }
  0x32   :  { %610 = vmatmul.mubr.bf16.gmra.mxu0 %v1430_v41  ;;  %642 = vmatmul.mubr.bf16.gmra.mxu1 %v1087_v43 }
  0x33   :  { %1262 = vmatpush3.bf16.msra.mxu1 %v1433_v42  ;;  %1335 = vmatpush3.bf16.msra.mxu0 %v1434_v44 }
  0x34   :  { %1263 = vmatprep.subr.bf16.mxu1 %v1436_v45  ;;  %1336 = vmatprep.subr.bf16.mxu0 %v1477_v24 }
  0x35   :  { %617 = vmatprep.mubr.bf16.mxu0 %v1439_v46  ;;  %681 = vmatprep.mubr.bf16.mxu1 %v1450_v47 }
  0x37   :  { %1264 = vmatpush3.bf16.msra.mxu1 %v1437_v48  ;;  %1337 = vmatpush3.bf16.msra.mxu0 %v1438_v49 }
  0x38   :  { %1265 = vmatprep.subr.bf16.mxu1 %v1442_v50  ;;  %1338 = vmatprep.subr.bf16.mxu0 %v1477_v24 }
  0x3a   :  { %618 = vmatmul.mubr.bf16.gmra.mxu0 %v1441_v51 }
  0x3b   :  { %1266 = vmatpush3.bf16.msra.mxu1 %v1443_v52  ;;  %1339 = vmatpush3.bf16.msra.mxu0 %v1444_v53 }
  0x3c   :  { %1267 = vmatprep.subr.bf16.mxu1 %v1445_v54  ;;  %1340 = vmatprep.subr.bf16.mxu0 %v1477_v24 }
  0x3d   :  { %1342 = vmatprep.mubr.msk.bf16.mxu0 %vm1478_vm0, %v1477_v24 }
  0x3f   :  { %1268 = vmatpush3.bf16.msra.mxu1 %v1446_v55  ;;  %1341 = vmatpush3.bf16.msra.mxu0 %v1447_v56  ;;  %v1763_v55 = vld [vmem:[%s1859_s2] ss:$0 sm:$0xff] }
  0x42   :  { %682 = vmatmul.mubr.bf16.vlgmr.msra.gmra.mxu1 %v1448_v57  ;;  %1343 = vmatmul.mubr.bf16.vlgmr.msra.gmra.mxu0 %v1451_v58 }
  0x43   :  { %689 = vmatprep.mubr.bf16.mxu1 %v1452_v59  ;;  %1346 = vmatprep.mubr.msk.bf16.mxu0 %vm1478_vm0, %v1477_v24 }
  0x4a   :  { %690 = vmatmul.mubr.bf16.gmra.mxu1 %v1454_v60  ;;  %1347 = vmatmul.mubr.bf16.gmra.mxu0 %v1455_v61 }
  0x4b   :  { %697 = vmatprep.mubr.bf16.mxu1 %v1456_v62  ;;  %1350 = vmatprep.mubr.msk.bf16.mxu0 %vm1478_vm0, %v1477_v24 }
  0x52   :  { %698 = vmatmul.mubr.bf16.gmra.mxu1 %v1458_v63  ;;  %1351 = vmatmul.mubr.bf16.gmra.mxu0 %v1459_v0 }
  0x53   :  { %705 = vmatprep.mubr.bf16.mxu1 %v1460_v1  ;;  %1354 = vmatprep.mubr.msk.bf16.mxu0 %vm1478_vm0, %v1477_v24 }
  0x5a   :  { %706 = vmatmul.mubr.bf16.gmra.mxu1 %v1462_v2  ;;  %1355 = vmatmul.mubr.bf16.gmra.mxu0 %v1463_v3 }
  0x5b   :  { %713 = vmatprep.mubr.bf16.mxu1 %v1464_v4  ;;  %1358 = vmatprep.mubr.msk.bf16.mxu0 %vm1478_vm0, %v1477_v24 }
  0x62   :  { %714 = vmatmul.mubr.bf16.gmra.mxu1 %v1466_v5  ;;  %1359 = vmatmul.mubr.bf16.gmra.mxu0 %v1467_v6 }
  0x63   :  { %721 = vmatprep.mubr.bf16.mxu1 %v1468_v7  ;;  %1362 = vmatprep.mubr.msk.bf16.mxu0 %vm1478_vm0, %v1477_v24 }
  0x6a   :  { %722 = vmatmul.mubr.bf16.gmra.mxu1 %v1470_v9  ;;  %1363 = vmatmul.mubr.bf16.gmra.mxu0 %v1471_v10 }
  0x6b   :  { %729 = vmatprep.mubr.bf16.mxu1 %v1090_v11  ;;  %1366 = vmatprep.mubr.msk.bf16.mxu0 %vm1478_vm0, %v1477_v24 }
  0x72   :  { %730 = vmatmul.mubr.bf16.gmra.mxu1 %v1089_v12  ;;  %1367 = vmatmul.mubr.bf16.gmra.mxu0 %v1474_v13 }
  0xe2   :  { %v1211_v14 = vpop.f32.mrf.mxu0  ;;  %v1235_v15 = vpop.f32.mrf.mxu1 }
  0xe4   :  { %v1212_v16 = vpop.f32.mrf.mxu0  ;;  %v1236_v17 = vpop.f32.mrf.mxu1 }
  0xe5   :  { %v1213_v18 = vadd.f32 %v1212_v16, %v1211_v14  ;;  %v1750_v19 = vadd.f32 %v1236_v17, %v1235_v15 }
  0xe6   :  { %v1214_v20 = vpop.f32.mrf.mxu0  ;;  %v1238_v21 = vpop.f32.mrf.mxu1 }
  0xe7   :  { %v596_v58 = vadd.f32 %v1213_v18, %v1763_v55 }
  0xe8   :  { %v1215_v22 = vpop.f32.mrf.mxu0  ;;  %v1239_v23 = vpop.f32.mrf.mxu1 }
  0xe9   :  { %v1216_v25 = vadd.f32 %v1215_v22, %v1214_v20  ;;  %v1752_v24 = vadd.f32 %v1239_v23, %v1238_v21 }
  0xea   :  { %v1217_v26 = vpop.f32.mrf.mxu0  ;;  %v1241_v27 = vpop.f32.mrf.mxu1 }
  0xeb   :  { %v599_v61 = vadd.f32 %v1216_v25, %v1763_v55 }
  0xec   :  { %v1218_v28 = vpop.f32.mrf.mxu0  ;;  %v1242_v29 = vpop.f32.mrf.mxu1 }
  0xed   :  { %v1219_v30 = vadd.f32 %v1218_v28, %v1217_v26  ;;  %v1754_v31 = vadd.f32 %v1242_v29, %v1241_v27 }
  0xee   :  { %v1220_v32 = vpop.f32.mrf.mxu0  ;;  %v1244_v33 = vpop.f32.mrf.mxu1 }
  0xef   :  { %v604_v3 = vadd.f32 %v1219_v30, %v1763_v55 }
  0xf0   :  { %v1221_v34 = vpop.f32.mrf.mxu0  ;;  %v1245_v35 = vpop.f32.mrf.mxu1 }
  0xf1   :  { %v1756_v36 = vadd.f32 %v1245_v35, %v1244_v33  ;;  %v1222_v6 = vadd.f32 %v1221_v34, %v1220_v32 }
  0xf2   :  { %v1223_v37 = vpop.f32.mrf.mxu0  ;;  %v1247_v38 = vpop.f32.mrf.mxu1 }
  0xf3   :  { %v607_v16 = vadd.f32 %v1222_v6, %v1763_v55 }
  0xf4   :  { %v1224_v39 = vpop.f32.mrf.mxu0  ;;  %v1248_v40 = vpop.f32.mrf.mxu1 }
  0xf5   :  { %v1758_v41 = vadd.f32 %v1248_v40, %v1247_v38  ;;  %v1225_v27 = vadd.f32 %v1224_v39, %v1223_v37 }
  0xf6   :  { %v1226_v42 = vpop.f32.mrf.mxu0  ;;  %v1250_v43 = vpop.f32.mrf.mxu1 }
  0xf7   :  { %v612_v40 = vadd.f32 %v1225_v27, %v1763_v55 }
  0xf8   :  { %v1227_v44 = vpop.f32.mrf.mxu0  ;;  %v1251_v45 = vpop.f32.mrf.mxu1 }
  0xf9   :  { %v1228_v32 = vadd.f32 %v1227_v44, %v1226_v42 }
  0xfa   :  { %v1229_v46 = vpop.f32.mrf.mxu0 }
  0xfc   :  { %v1230_v47 = vpop.f32.mrf.mxu0 }
  0xfd   :  { %v1231_v43 = vadd.f32 %v1230_v47, %v1229_v46 }
  0xfe   :  { %v1232_v48 = vpop.f32.mrf.mxu0 }
 0x100   :  { %v1233_v49 = vpop.f32.mrf.mxu0 }
 0x102   :  { %v1269_v50 = vpop.f32.mrf.mxu1  ;;  %v771_v51 = vpop.f32.mrf.mxu0 }
 0x104   :  { %v1270_v52 = vpop.f32.mrf.mxu1  ;;  %v1344_v53 = vpop.f32.mrf.mxu0 }
 0x105   :  { %v1271_v54 = vadd.f32 %v1270_v52, %v1269_v50  ;;  %v615_v52 = vadd.f32 %v1228_v32, %v1763_v55 }
 0x106   :  { %v1272_v56 = vpop.f32.mrf.mxu1  ;;  %v774_v57 = vpop.f32.mrf.mxu0 }
 0x107   :  { %v684_v62 = vadd.f32 %v1271_v54, %v596_v58  ;;  %v620_v54 = vadd.f32 %v1231_v43, %v1763_v55 }
 0x108   :  { %v1273_v59 = vpop.f32.mrf.mxu1  ;;  %v1345_v60 = vpop.f32.mrf.mxu0 }
 0x109   :  { %v1274_v63 = vadd.f32 %v1273_v59, %v1272_v56  ;;  %v1768_v7 = vadd.f32 %v771_v51, %v684_v62  ;;  %v1234_v56 = vadd.f32 %v1233_v49, %v1232_v48 }
 0x10a   :  { %v1275_v0 = vpop.f32.mrf.mxu1  ;;  %v779_v1 = vpop.f32.mrf.mxu0 }
 0x10b   :  { %v687_v2 = vadd.f32 %v1274_v63, %v599_v61  ;;  %v623_v47 = vadd.f32 %v1234_v56, %v1763_v55 }
 0x10c   :  { %v1276_v4 = vpop.f32.mrf.mxu1  ;;  %v1348_v5 = vpop.f32.mrf.mxu0 }
 0x10d   :  { %v1770_v8 = vadd.f32 %v774_v57, %v687_v2  ;;  %v1277_v9 = vadd.f32 %v1276_v4, %v1275_v0  ;;  %v628_v5 = vadd.f32 %v1750_v19, %v1763_v55 }
 0x10e   :  { %v1278_v10 = vpop.f32.mrf.mxu1  ;;  %v782_v11 = vpop.f32.mrf.mxu0 }
 0x10f   :  { %v825_v12 = vadd.f32 %v1770_v8, %v1768_v7  ;;  %v692_v13 = vadd.f32 %v1277_v9, %v604_v3 }
 0x110   :  { %v1279_v14 = vpop.f32.mrf.mxu1  ;;  %v1349_v15 = vpop.f32.mrf.mxu0 }
 0x111   :  { %v1775_v17 = vadd.f32 %v779_v1, %v692_v13  ;;  %v1280_v18 = vadd.f32 %v1279_v14, %v1278_v10 }
 0x112   :  { %v1281_v20 = vpop.f32.mrf.mxu1  ;;  %v787_v21 = vpop.f32.mrf.mxu0 }
 0x113   :  { %v826_v22 = vadd.f32 %v825_v12, %v1775_v17  ;;  %v695_v23 = vadd.f32 %v1280_v18, %v607_v16  ;;  %v631_v18 = vadd.f32 %v1752_v24, %v1763_v55 }
 0x114   :  { %v1282_v25 = vpop.f32.mrf.mxu1  ;;  %v1352_v26 = vpop.f32.mrf.mxu0 }
 0x115   :  { %v1778_v28 = vadd.f32 %v782_v11, %v695_v23  ;;  %v1283_v34 = vadd.f32 %v1282_v25, %v1281_v20 }
 0x116   :  { %v1284_v29 = vpop.f32.mrf.mxu1  ;;  %v790_v30 = vpop.f32.mrf.mxu0 }
 0x117   :  { %v827_v33 = vadd.f32 %v826_v22, %v1778_v28  ;;  %v700_v53 = vadd.f32 %v1283_v34, %v612_v40 }
 0x118   :  { %v1285_v35 = vpop.f32.mrf.mxu1  ;;  %v1353_v38 = vpop.f32.mrf.mxu0 }
 0x119   :  { %v1286_v45 = vadd.f32 %v1285_v35, %v1284_v29  ;;  %v1784_v59 = vadd.f32 %v787_v21, %v700_v53 }
 0x11a   :  { %v1287_v50 = vpop.f32.mrf.mxu1  ;;  %v795_v51 = vpop.f32.mrf.mxu0 }
 0x11b   :  { %v703_v42 = vadd.f32 %v1286_v45, %v615_v52  ;;  %v828_v2 = vadd.f32 %v827_v33, %v1784_v59  ;;  %v639_v45 = vadd.f32 %v1756_v36, %v1763_v55 }
 0x11c   :  { %v1288_v37 = vpop.f32.mrf.mxu1  ;;  %v1356_v39 = vpop.f32.mrf.mxu0 }
 0x11d   :  { %v1289_v44 = vadd.f32 %v1288_v37, %v1287_v50  ;;  %v1787_v62 = vadd.f32 %v790_v30, %v703_v42  ;;  %v636_v30 = vadd.f32 %v1754_v31, %v1763_v55  ;;  %v644_v31 = vadd.f32 %v1758_v41, %v1763_v55 }
 0x11e   :  { %v1290_v57 = vpop.f32.mrf.mxu1  ;;  %v798_v58 = vpop.f32.mrf.mxu0 }
 0x11f   :  { %v708_v60 = vadd.f32 %v1289_v44, %v620_v54  ;;  %v829_v6 = vadd.f32 %v828_v2, %v1787_v62 }
 0x120   :  { %v1291_v61 = vpop.f32.mrf.mxu1  ;;  %v1357_v46 = vpop.f32.mrf.mxu0 }
 0x121   :  { %v1292_v63 = vadd.f32 %v1291_v61, %v1290_v57  ;;  %v1790_v3 = vadd.f32 %v795_v51, %v708_v60 }
 0x122   :  { %v1293_v0 = vpop.f32.mrf.mxu1  ;;  %v803_v1 = vpop.f32.mrf.mxu0 }
 0x123   :  { %v711_v48 = vadd.f32 %v1292_v63, %v623_v47  ;;  %v830_v13 = vadd.f32 %v829_v6, %v1790_v3 }
 0x124   :  { %v1294_v49 = vpop.f32.mrf.mxu1  ;;  %v1360_v4 = vpop.f32.mrf.mxu0 }
 0x125   :  { %v1795_v9 = vadd.f32 %v798_v58, %v711_v48  ;;  %v1295_v10 = vadd.f32 %v1294_v49, %v1293_v0 }
 0x126   :  { %v1296_v11 = vpop.f32.mrf.mxu1  ;;  %v806_v12 = vpop.f32.mrf.mxu0 }
 0x127   :  { %v716_v14 = vadd.f32 %v1295_v10, %v628_v5  ;;  %v831_v20 = vadd.f32 %v830_v13, %v1795_v9 }
 0x128   :  { %v1297_v15 = vpop.f32.mrf.mxu1  ;;  %v1361_v16 = vpop.f32.mrf.mxu0 }
 0x129   :  { %v804_v21 = vadd.f32 %v803_v1, %v716_v14  ;;  %v1298_v22 = vadd.f32 %v1297_v15, %v1296_v11 }
 0x12a   :  { %v1299_v19 = vpop.f32.mrf.mxu1  ;;  %v811_v23 = vpop.f32.mrf.mxu0 }
 0x12b   :  { %v832_v25 = vadd.f32 %v831_v20, %v804_v21  ;;  %v719_v26 = vadd.f32 %v1298_v22, %v631_v18 }
 0x12c   :  { %v1300_v27 = vpop.f32.mrf.mxu1  ;;  %v1364_v29 = vpop.f32.mrf.mxu0 }
 0x12d   :  { %v807_v32 = vadd.f32 %v806_v12, %v719_v26  ;;  %v1301_v33 = vadd.f32 %v1300_v27, %v1299_v19 }
 0x12e   :  { %v1302_v34 = vpop.f32.mrf.mxu1  ;;  %v814_v35 = vpop.f32.mrf.mxu0 }
 0x12f   :  { %v833_v38 = vadd.f32 %v832_v25, %v807_v32  ;;  %v724_v40 = vadd.f32 %v1301_v33, %v636_v30 }
 0x130   :  { %v1303_v24 = vpop.f32.mrf.mxu1  ;;  %v1365_v43 = vpop.f32.mrf.mxu0 }
 0x131   :  { %v812_v50 = vadd.f32 %v811_v23, %v724_v40  ;;  %v1304_v51 = vadd.f32 %v1303_v24, %v1302_v34 }
 0x132   :  { %v1305_v52 = vpop.f32.mrf.mxu1  ;;  %v819_v53 = vpop.f32.mrf.mxu0 }
 0x133   :  { %v834_v37 = vadd.f32 %v833_v38, %v812_v50  ;;  %v727_v39 = vadd.f32 %v1304_v51, %v639_v45 }
 0x134   :  { %v1306_v54 = vpop.f32.mrf.mxu1  ;;  %v1368_v56 = vpop.f32.mrf.mxu0 }
 0x135   :  { %v815_v42 = vadd.f32 %v814_v35, %v727_v39  ;;  %v1307_v44 = vadd.f32 %v1306_v54, %v1305_v52 }
 0x136   :  { %v1308_v57 = vpop.f32.mrf.mxu1  ;;  %v822_v58 = vpop.f32.mrf.mxu0 }
 0x137   :  { %v835_v60 = vadd.f32 %v834_v37, %v815_v42  ;;  %v732_v61 = vadd.f32 %v1307_v44, %v644_v31 }
 0x138   :  { %v1309_v46 = vpop.f32.mrf.mxu1  ;;  %v1369_v36 = vpop.f32.mrf.mxu0 }
 0x139   :  { %v820_v47 = vadd.f32 %v819_v53, %v732_v61  ;;  %v1132_v46 = vld [vmem:[%s1860_s3] ss:$0 sm:$0xff] }
 0x13b   :  { %v837_v63 = vsel %vm836_vm1, %v820_v47, 0.0 }
 0x13c   :  { %v838_v0 = vadd.f32 %v837_v63, %v835_v60 }
 0x13e   :  { %v839_v1 = vrot.slane %v838_v0, 4 }
 0x140   :  { %v840_v2 = vadd.f32 %v839_v1, %v838_v0 }
 0x142   :  { %v841_v48 = vrot.slane %v840_v2, 2 }
 0x144   :  { %v842_v49 = vadd.f32 %v841_v48, %v840_v2 }
 0x146   :  { %v843_v4 = vrot.slane %v842_v49, 1 }
 0x148   :  { %v844_v5 = vadd.f32 %v843_v4, %v842_v49 }
 0x14a   :  { %v845_v41 = vmul.f32 0.010204081, %v844_v5 }
 0x14c   :  { %v846_v55 = vsub.f32 %v1768_v7, %v845_v41  ;;  %v847_v6 = vsub.f32 %v1770_v8, %v845_v41  ;;  %v848_v10 = vsub.f32 %v1775_v17, %v845_v41  ;;  %v849_v11 = vsub.f32 %v1778_v28, %v845_v41 }
 0x14d   :  { %v854_v12 = vsub.f32 %v804_v21, %v845_v41  ;;  %v855_v13 = vsub.f32 %v807_v32, %v845_v41  ;;  %v856_v14 = vsub.f32 %v812_v50, %v845_v41  ;;  %v857_v15 = vsub.f32 %v815_v42, %v845_v41 }
 0x14e   :  { %v858_v16 = vsub.f32 %v820_v47, %v845_v41  ;;  %v859_v18 = vmul.f32 %v846_v55, %v846_v55  ;;  %v860_v20 = vmul.f32 %v847_v6, %v847_v6  ;;  %v850_v22 = vsub.f32 %v1784_v59, %v845_v41 }
 0x14f   :  { %v861_v19 = vmul.f32 %v848_v10, %v848_v10  ;;  %v851_v25 = vsub.f32 %v1787_v62, %v845_v41  ;;  %v862_v7 = vmul.f32 %v849_v11, %v849_v11  ;;  %v852_v8 = vsub.f32 %v1790_v3, %v845_v41 }
 0x150   :  { %v872_v23 = vadd.f32 %v860_v20, %v859_v18  ;;  %v863_v17 = vmul.f32 %v850_v22, %v850_v22  ;;  %v853_v28 = vsub.f32 %v1795_v9, %v845_v41  ;;  %v867_v35 = vmul.f32 %v854_v12, %v854_v12 }
 0x151   :  { %v864_v21 = vmul.f32 %v851_v25, %v851_v25  ;;  %v865_v30 = vmul.f32 %v852_v8, %v852_v8  ;;  %v868_v38 = vmul.f32 %v855_v13, %v855_v13  ;;  %v869_v24 = vmul.f32 %v856_v14, %v856_v14 }
 0x152   :  { %v873_v26 = vadd.f32 %v872_v23, %v861_v19  ;;  %v866_v33 = vmul.f32 %v853_v28, %v853_v28  ;;  %v871_v43 = vmul.f32 %v858_v16, %v858_v16  ;;  %v870_v45 = vmul.f32 %v857_v15, %v857_v15 }
 0x154   :  { %v874_v27 = vadd.f32 %v873_v26, %v862_v7  ;;  %v883_v51 = vsel %vm836_vm1, %v871_v43, 0.0 }
 0x156   :  { %v875_v29 = vadd.f32 %v874_v27, %v863_v17 }
 0x158   :  { %v876_v32 = vadd.f32 %v875_v29, %v864_v21 }
 0x15a   :  { %v877_v34 = vadd.f32 %v876_v32, %v865_v30 }
 0x15c   :  { %v878_v59 = vadd.f32 %v877_v34, %v866_v33 }
 0x15e   :  { %v879_v40 = vadd.f32 %v878_v59, %v867_v35 }
 0x160   :  { %v880_v62 = vadd.f32 %v879_v40, %v868_v38 }
 0x162   :  { %v881_v50 = vadd.f32 %v880_v62, %v869_v24 }
 0x164   :  { %v882_v3 = vadd.f32 %v881_v50, %v870_v45 }
 0x166   :  { %v884_v52 = vadd.f32 %v883_v51, %v882_v3 }
 0x168   :  { %v885_v9 = vrot.slane %v884_v52, 4 }
 0x16a   :  { %v886_v53 = vadd.f32 %v885_v9, %v884_v52 }
 0x16c   :  { %v887_v37 = vrot.slane %v886_v53, 2 }
 0x16e   :  { %v888_v39 = vadd.f32 %v887_v37, %v886_v53 }
 0x170   :  { %v889_v54 = vrot.slane %v888_v39, 1 }
 0x172   :  { %v890_v56 = vadd.f32 %v889_v54, %v888_v39 }
 0x174   :  { %v891_v31 = vmul.f32 0.010204081, %v890_v56 }
 0x176   :  { %v892_v42 = vadd.f32 1e-05, %v891_v31 }
 0x178   :  { %1475 = vrsqrt.f32 %v892_v42 }
 0x185   :  { %v1476_v44 = vpop.eup %1475 }
 0x186   :  { %v894_v57 = vmul.f32 %v1476_v44, %v846_v55  ;;  %v895_v58 = vmul.f32 %v1476_v44, %v847_v6  ;;  %v896_v60 = vmul.f32 %v1476_v44, %v848_v10  ;;  %v897_v61 = vmul.f32 %v1476_v44, %v849_v11  ;;  %v1133_v55 = vld [vmem:[%s1861_s4] ss:$0 sm:$0xff] }
 0x187   :  { %v898_v36 = vmul.f32 %v1476_v44, %v850_v22  ;;  %v899_v47 = vmul.f32 %v1476_v44, %v851_v25  ;;  %v900_v63 = vmul.f32 %v1476_v44, %v852_v8  ;;  %v901_v0 = vmul.f32 %v1476_v44, %v853_v28 }
 0x188   :  { %v902_v1 = vmul.f32 %v1476_v44, %v854_v12  ;;  %v903_v2 = vmul.f32 %v1476_v44, %v855_v13  ;;  %v904_v48 = vmul.f32 %v1476_v44, %v856_v14  ;;  %v905_v49 = vmul.f32 %v1476_v44, %v857_v15 }
 0x189   :  { %v906_v4 = vmul.f32 %v1476_v44, %v858_v16  ;;  %v914_v5 = vmul.f32 %v1132_v46, %v894_v57  ;;  %v915_v41 = vmul.f32 %v1132_v46, %v895_v58  ;;  %v916_v18 = vmul.f32 %v1132_v46, %v896_v60 }
 0x18a   :  { %v917_v6 = vmul.f32 %v1132_v46, %v897_v61  ;;  %v918_v10 = vmul.f32 %v1132_v46, %v898_v36  ;;  %v919_v11 = vmul.f32 %v1132_v46, %v899_v47  ;;  %v920_v20 = vmul.f32 %v1132_v46, %v900_v63 }
 0x18b   :  { %v921_v22 = vmul.f32 %v1132_v46, %v901_v0  ;;  %v922_v19 = vmul.f32 %v1132_v46, %v902_v1  ;;  %v923_v23 = vmul.f32 %v1132_v46, %v903_v2  ;;  %v924_v25 = vmul.f32 %v1132_v46, %v904_v48 }
 0x18c   :  { %v925_v12 = vmul.f32 %v1132_v46, %v905_v49  ;;  %v926_v13 = vmul.f32 %v1132_v46, %v906_v4  ;;  %v934_v14 = vadd.f32 %v1133_v55, %v914_v5  ;;  %v935_v15 = vadd.f32 %v1133_v55, %v915_v41 }
 0x18d   :  { %v936_v16 = vadd.f32 %v1133_v55, %v916_v18  ;;  %v937_v7 = vadd.f32 %v1133_v55, %v917_v6  ;;  %v938_v26 = vadd.f32 %v1133_v55, %v918_v10  ;;  %v939_v8 = vadd.f32 %v1133_v55, %v919_v11 }
 0x18e   :  { %v940_v17 = vadd.f32 %v1133_v55, %v920_v20  ;;  %v941_v27 = vadd.f32 %v1133_v55, %v921_v22  ;;  %v942_v28 = vadd.f32 %v1133_v55, %v922_v19  ;;  %v943_v21 = vadd.f32 %v1133_v55, %v923_v23 }
 0x18f   :  { %v944_v29 = vadd.f32 %v1133_v55, %v924_v25  ;;  %v945_v30 = vadd.f32 %v1133_v55, %v925_v12  ;;  %v946_v32 = vadd.f32 %v1133_v55, %v926_v13  ;;  %vm947_vm2 = vcmp.ge.f32.partialorder %v934_v14, 0.0 }
 0x190   :  { %vm948_vm3 = vcmp.ge.f32.partialorder %v935_v15, 0.0  ;;  %vm949_vm4 = vcmp.ge.f32.partialorder %v936_v16, 0.0  ;;  %vm950_vm5 = vcmp.ge.f32.partialorder %v937_v7, 0.0  ;;  %vm951_vm6 = vcmp.ge.f32.partialorder %v938_v26, 0.0 }
 0x191   :  { %vm952_vm7 = vcmp.ge.f32.partialorder %v939_v8, 0.0  ;;  %vm953_vm8 = vcmp.ge.f32.partialorder %v940_v17, 0.0  ;;  %vm954_vm9 = vcmp.ge.f32.partialorder %v941_v27, 0.0  ;;  %vm955_vm10 = vcmp.ge.f32.partialorder %v942_v28, 0.0 }
 0x192   :  { %vm956_vm11 = vcmp.ge.f32.partialorder %v943_v21, 0.0  ;;  %vm957_vm12 = vcmp.ge.f32.partialorder %v944_v29, 0.0  ;;  %vm958_vm13 = vcmp.ge.f32.partialorder %v945_v30, 0.0  ;;  %vm959_vm14 = vcmp.ge.f32.partialorder %v946_v32, 0.0 }
 0x193   :  { %v960_v33 = vmul.f32 0.01, %v934_v14  ;;  %v961_v34 = vmul.f32 0.01, %v935_v15  ;;  %v962_v35 = vmul.f32 0.01, %v936_v16 }
 0x194   :  { %v963_v59 = vmul.f32 0.01, %v937_v7  ;;  %v964_v38 = vmul.f32 0.01, %v938_v26  ;;  %v965_v40 = vmul.f32 0.01, %v939_v8 }
 0x195   :  { %v966_v24 = vmul.f32 0.01, %v940_v17  ;;  %v967_v62 = vmul.f32 0.01, %v941_v27  ;;  %v968_v43 = vmul.f32 0.01, %v942_v28  ;;  %v973_v45 = vsel %vm947_vm2, %v934_v14, %v960_v33 }
 0x196   :  { %v969_v50 = vmul.f32 0.01, %v943_v21  ;;  %v970_v3 = vmul.f32 0.01, %v944_v29  ;;  %v971_v51 = vmul.f32 0.01, %v945_v30  ;;  %v974_v52 = vsel %vm948_vm3, %v935_v15, %v961_v34 }
 0x197   :  { %v972_v9 = vmul.f32 0.01, %v946_v32  ;;  %v975_v53 = vsel %vm949_vm4, %v936_v16, %v962_v35  ;;  %v976_v37 = vsel %vm950_vm5, %v937_v7, %v963_v59  ;;  %v977_v39 = vsel %vm951_vm6, %v938_v26, %v964_v38 }
 0x198   :  { %v978_v54 = vsel %vm952_vm7, %v939_v8, %v965_v40  ;;  %v979_v56 = vsel %vm953_vm8, %v940_v17, %v966_v24  ;;  %v980_v31 = vsel %vm954_vm9, %v941_v27, %v967_v62  ;;  %v981_v42 = vsel %vm955_vm10, %v942_v28, %v968_v43 }
 0x199   :  { %v982_v44 = vsel %vm956_vm11, %v943_v21, %v969_v50  ;;  %v983_v57 = vsel %vm957_vm12, %v944_v29, %v970_v3  ;;  %v984_v58 = vsel %vm958_vm13, %v945_v30, %v971_v51  ;;  %v985_v60 = vsel %vm959_vm14, %v946_v32, %v972_v9 }
 0x19a   :  { %v1159_v61 = vpack.c.bf16 %v985_v60, %v985_v60  ;;  %v1163_v46 = vpack.c.bf16 %v974_v52, %v973_v45  ;;  %v1168_v36 = vpack.c.bf16 %v976_v37, %v975_v53  ;;  %v1173_v47 = vpack.c.bf16 %v978_v54, %v977_v39 }
 0x19b   :  { %v1178_v63 = vpack.c.bf16 %v980_v31, %v979_v56  ;;  %v1183_v0 = vpack.c.bf16 %v982_v44, %v981_v42  ;;  %v1188_v1 = vpack.c.bf16 %v984_v58, %v983_v57 }
 0x19c   :  { %1164 = vst [vmem:[%s1862_s5] sm:$0xff] %v1163_v46   ;;  %1190 = vst [vmem:[%s1862_s5 + $0x8] sm:$0xff] %v1168_v36  }
 0x19d   :  { %1191 = vst [vmem:[%s1862_s5 + $0x10] sm:$0xff] %v1173_v47   ;;  %1051 = vst [vmem:[%s1862_s5 + $0x30] sm:$0x1] %v1159_v61 }
 0x19e   :  { %1192 = vst [vmem:[%s1862_s5 + $0x18] sm:$0xff] %v1178_v63   ;;  %1193 = vst [vmem:[%s1862_s5 + $0x20] sm:$0xff] %v1183_v0  }
 0x19f   :  { %1194 = vst [vmem:[%s1862_s5 + $0x28] sm:$0xff] %v1188_v1  }

// kernel: discriminator_forward.7
= control target key start
LH: loop header
LB: loop body
LE: loop exit
PB: predicated region body
PF: predicated region fallthrough
CT: control target
= control target key end

     0   :  { %s2495_s18 = smov 0   ;;  %s2497_s19 = smov 0   ;;  %s2995_s0 = inlined_call_operand.vmem [shape: bf16[32,1152], index: 0, kind: input, shape index: {}]   ;;  %s2996_s1 = inlined_call_operand.vmem [shape: bf16[1152,256], index: 1, kind: input, shape index: {}]   ;;  %s2997_s2 = inlined_call_operand.vmem [shape: f32[1,256], index: 2, kind: input, shape index: {}]   ;;  %s2998_s3 = inlined_call_operand.vmem [shape: f32[1,256], index: 3, kind: input, shape index: {}]   ;;  %s2999_s4 = inlined_call_operand.vmem [shape: f32[1,256], index: 4, kind: input, shape index: {}]   ;;  %s3000_s5 = inlined_call_operand.vmem [shape: bf16[32,256], index: 5, kind: output, shape index: {}]  }
   0x1   :  { %s2499_s20 = smov 0  }
   0x2 LB: > { %s2511_s21 = sadd.s32 4294967295, %s2463_s20   ;;  %s2514_s22 = sadd.s32 1, %s2463_s20   ;;  %s2463_s20 = sphi %s2499_s20, %s3004_s20   ;;  %s2459_s19 = sphi %s2497_s19, %s3003_s19   ;;  %s2455_s18 = sphi %s2495_s18, %s3002_s18  }
   0x3   : > { %s40_s23 = ssub.s32 %s2463_s20, %s2514_s22  ;;  %s43_s24 = sadd.s32 1, %s2459_s19 }
   0x4   : > { %p41_p0 = scmp.eq.s32.totalorder %s40_s23, 0  ;;  %p50_p1 = scmp.ne.s32.totalorder %s2459_s19, %s2455_s18 }
   0x5   : > { %p51_p2 = scmp.eq.s32.totalorder %s2463_s20, 0  ;;  %p158_p3 = scmp.eq.s32.totalorder %s2511_s21, 1 }
   0x6   : > { %s2524_s25 = scalar_select %p41_p0, %s2459_s19, %s43_s24  }
   0x7   : > { %p52_p4 = por %p51_p2, %p50_p1  ;;  %p2526_p5 = por %p158_p3, %p50_p1 }
   0x8   : > { %p2053_p6 = scmp.ge.s32.totalorder %s2463_s20, 2 }
   0xa   : > { %183 = sbr.rel (%p2053_p6) target bundleno = 115 (0x73), region = 20 }
   0xf   : > { %186 = sbr.rel (!%p52_p4) target bundleno = 115 (0x73), region = 24  ;;  %s188_s27 = sand.u32 (%p52_p4), 1, %s2459_s19  }
  0x10   : > { %s2054_s28 = sshll.u32 (%p52_p4), %s2463_s20, 2  ;;  %s2315_s29 = smul.u32 (%p52_p4), 576, %s188_s27 }
  0x11   : > { %s2536_s7 = scalar_lea.vmem (%p52_p4), %s2996_s1, %s2054_s28 }
  0x12   : > { %v209_v0 = vld [vmem:[%s2536_s7] sm:$0xf] (%p52_p4)  ;;  %v211_v1 = vld [vmem:[%s2536_s7 + $0x8] sm:$0xf] (%p52_p4)  ;;  %v213_v2 = vld [vmem:[%s2536_s7 + $0x10] sm:$0xf] (%p52_p4) }
  0x13   : > { %v215_v3 = vld [vmem:[%s2536_s7 + $0x18] sm:$0xf] (%p52_p4)  ;;  %v217_v4 = vld [vmem:[%s2536_s7 + $0x20] sm:$0xf] (%p52_p4)  ;;  %s2543_s8 = scalar_lea.vmem (%p52_p4), [#allocation2], %s2315_s29 }
  0x14   : > { %210 = vst [vmem:[%s2543_s8] sm:$0xf] %v209_v0  ;;  %212 = vst [vmem:[%s2543_s8 + $0x4] sm:$0xf] %v211_v1  ;;  %v219_v5 = vld [vmem:[%s2536_s7 + $0x28] sm:$0xf] }
  0x15   : > { %214 = vst [vmem:[%s2543_s8 + $0x8] sm:$0xf] %v213_v2  ;;  %216 = vst [vmem:[%s2543_s8 + $0xc] sm:$0xf] %v215_v3  ;;  %v221_v6 = vld [vmem:[%s2536_s7 + $0x30] sm:$0xf] }
  0x16   : > { %218 = vst [vmem:[%s2543_s8 + $0x10] sm:$0xf] %v217_v4  ;;  %v223_v7 = vld [vmem:[%s2536_s7 + $0x38] sm:$0xf]  ;;  %220 = vst [vmem:[%s2543_s8 + $0x14] sm:$0xf] %v219_v5 }
  0x17   : > { %222 = vst [vmem:[%s2543_s8 + $0x18] sm:$0xf] %v221_v6  ;;  %224 = vst [vmem:[%s2543_s8 + $0x1c] sm:$0xf] %v223_v7  ;;  %v225_v8 = vld [vmem:[%s2536_s7 + $0x40] sm:$0xf] }
  0x18   : > { %v227_v9 = vld [vmem:[%s2536_s7 + $0x48] sm:$0xf]  ;;  %v229_v10 = vld [vmem:[%s2536_s7 + $0x50] sm:$0xf]  ;;  %226 = vst [vmem:[%s2543_s8 + $0x20] sm:$0xf] %v225_v8 }
  0x19   : > { %228 = vst [vmem:[%s2543_s8 + $0x24] sm:$0xf] %v227_v9  ;;  %230 = vst [vmem:[%s2543_s8 + $0x28] sm:$0xf] %v229_v10  ;;  %v231_v11 = vld [vmem:[%s2536_s7 + $0x58] sm:$0xf] }
  0x1a   : > { %v233_v12 = vld [vmem:[%s2536_s7 + $0x60] sm:$0xf]  ;;  %v235_v13 = vld [vmem:[%s2536_s7 + $0x68] sm:$0xf]  ;;  %232 = vst [vmem:[%s2543_s8 + $0x2c] sm:$0xf] %v231_v11 }
  0x1b   : > { %234 = vst [vmem:[%s2543_s8 + $0x30] sm:$0xf] %v233_v12  ;;  %236 = vst [vmem:[%s2543_s8 + $0x34] sm:$0xf] %v235_v13  ;;  %v237_v14 = vld [vmem:[%s2536_s7 + $0x70] sm:$0xf] }
  0x1c   : > { %v239_v15 = vld [vmem:[%s2536_s7 + $0x78] sm:$0xf]  ;;  %v241_v16 = vld [vmem:[%s2536_s7 + $0x80] sm:$0xf]  ;;  %238 = vst [vmem:[%s2543_s8 + $0x38] sm:$0xf] %v237_v14 }
  0x1d   : > { %240 = vst [vmem:[%s2543_s8 + $0x3c] sm:$0xf] %v239_v15  ;;  %242 = vst [vmem:[%s2543_s8 + $0x40] sm:$0xf] %v241_v16  ;;  %v243_v17 = vld [vmem:[%s2536_s7 + $0x88] sm:$0xf] }
  0x1e   : > { %v245_v18 = vld [vmem:[%s2536_s7 + $0x90] sm:$0xf]  ;;  %v247_v19 = vld [vmem:[%s2536_s7 + $0x98] sm:$0xf]  ;;  %244 = vst [vmem:[%s2543_s8 + $0x44] sm:$0xf] %v243_v17 }
  0x1f   : > { %246 = vst [vmem:[%s2543_s8 + $0x48] sm:$0xf] %v245_v18  ;;  %248 = vst [vmem:[%s2543_s8 + $0x4c] sm:$0xf] %v247_v19  ;;  %v249_v20 = vld [vmem:[%s2536_s7 + $0xa0] sm:$0xf] }
  0x20   : > { %v251_v21 = vld [vmem:[%s2536_s7 + $0xa8] sm:$0xf]  ;;  %v253_v22 = vld [vmem:[%s2536_s7 + $0xb0] sm:$0xf]  ;;  %250 = vst [vmem:[%s2543_s8 + $0x50] sm:$0xf] %v249_v20 }
  0x21   : > { %252 = vst [vmem:[%s2543_s8 + $0x54] sm:$0xf] %v251_v21  ;;  %254 = vst [vmem:[%s2543_s8 + $0x58] sm:$0xf] %v253_v22  ;;  %v255_v23 = vld [vmem:[%s2536_s7 + $0xb8] sm:$0xf] }
  0x22   : > { %v257_v24 = vld [vmem:[%s2536_s7 + $0xc0] sm:$0xf]  ;;  %v259_v25 = vld [vmem:[%s2536_s7 + $0xc8] sm:$0xf]  ;;  %256 = vst [vmem:[%s2543_s8 + $0x5c] sm:$0xf] %v255_v23 }
  0x23   : > { %258 = vst [vmem:[%s2543_s8 + $0x60] sm:$0xf] %v257_v24  ;;  %260 = vst [vmem:[%s2543_s8 + $0x64] sm:$0xf] %v259_v25  ;;  %v261_v26 = vld [vmem:[%s2536_s7 + $0xd0] sm:$0xf] }
  0x24   : > { %v263_v27 = vld [vmem:[%s2536_s7 + $0xd8] sm:$0xf]  ;;  %v265_v28 = vld [vmem:[%s2536_s7 + $0xe0] sm:$0xf]  ;;  %262 = vst [vmem:[%s2543_s8 + $0x68] sm:$0xf] %v261_v26 }
  0x25   : > { %264 = vst [vmem:[%s2543_s8 + $0x6c] sm:$0xf] %v263_v27  ;;  %266 = vst [vmem:[%s2543_s8 + $0x70] sm:$0xf] %v265_v28  ;;  %v267_v29 = vld [vmem:[%s2536_s7 + $0xe8] sm:$0xf] }
  0x26   : > { %v269_v30 = vld [vmem:[%s2536_s7 + $0xf0] sm:$0xf]  ;;  %v271_v31 = vld [vmem:[%s2536_s7 + $0xf8] sm:$0xf]  ;;  %268 = vst [vmem:[%s2543_s8 + $0x74] sm:$0xf] %v267_v29 }
  0x27   : > { %270 = vst [vmem:[%s2543_s8 + $0x78] sm:$0xf] %v269_v30  ;;  %272 = vst [vmem:[%s2543_s8 + $0x7c] sm:$0xf] %v271_v31  ;;  %v273_v32 = vld [vmem:[%s2536_s7 + $0x100] sm:$0xf] }
  0x28   : > { %v275_v33 = vld [vmem:[%s2536_s7 + $0x108] sm:$0xf]  ;;  %v277_v34 = vld [vmem:[%s2536_s7 + $0x110] sm:$0xf]  ;;  %274 = vst [vmem:[%s2543_s8 + $0x80] sm:$0xf] %v273_v32 }
  0x29   : > { %276 = vst [vmem:[%s2543_s8 + $0x84] sm:$0xf] %v275_v33  ;;  %278 = vst [vmem:[%s2543_s8 + $0x88] sm:$0xf] %v277_v34  ;;  %v279_v35 = vld [vmem:[%s2536_s7 + $0x118] sm:$0xf] }
  0x2a   : > { %v281_v36 = vld [vmem:[%s2536_s7 + $0x120] sm:$0xf]  ;;  %v283_v37 = vld [vmem:[%s2536_s7 + $0x128] sm:$0xf]  ;;  %280 = vst [vmem:[%s2543_s8 + $0x8c] sm:$0xf] %v279_v35 }
  0x2b   : > { %282 = vst [vmem:[%s2543_s8 + $0x90] sm:$0xf] %v281_v36  ;;  %284 = vst [vmem:[%s2543_s8 + $0x94] sm:$0xf] %v283_v37  ;;  %v285_v38 = vld [vmem:[%s2536_s7 + $0x130] sm:$0xf] }
  0x2c   : > { %v287_v39 = vld [vmem:[%s2536_s7 + $0x138] sm:$0xf]  ;;  %v289_v40 = vld [vmem:[%s2536_s7 + $0x140] sm:$0xf]  ;;  %286 = vst [vmem:[%s2543_s8 + $0x98] sm:$0xf] %v285_v38 }
  0x2d   : > { %288 = vst [vmem:[%s2543_s8 + $0x9c] sm:$0xf] %v287_v39  ;;  %290 = vst [vmem:[%s2543_s8 + $0xa0] sm:$0xf] %v289_v40  ;;  %v291_v41 = vld [vmem:[%s2536_s7 + $0x148] sm:$0xf] }
  0x2e   : > { %v293_v42 = vld [vmem:[%s2536_s7 + $0x150] sm:$0xf]  ;;  %v295_v43 = vld [vmem:[%s2536_s7 + $0x158] sm:$0xf]  ;;  %292 = vst [vmem:[%s2543_s8 + $0xa4] sm:$0xf] %v291_v41 }
  0x2f   : > { %294 = vst [vmem:[%s2543_s8 + $0xa8] sm:$0xf] %v293_v42  ;;  %296 = vst [vmem:[%s2543_s8 + $0xac] sm:$0xf] %v295_v43  ;;  %v297_v44 = vld [vmem:[%s2536_s7 + $0x160] sm:$0xf] }
  0x30   : > { %v299_v45 = vld [vmem:[%s2536_s7 + $0x168] sm:$0xf]  ;;  %v301_v46 = vld [vmem:[%s2536_s7 + $0x170] sm:$0xf]  ;;  %298 = vst [vmem:[%s2543_s8 + $0xb0] sm:$0xf] %v297_v44 }
  0x31   : > { %300 = vst [vmem:[%s2543_s8 + $0xb4] sm:$0xf] %v299_v45  ;;  %302 = vst [vmem:[%s2543_s8 + $0xb8] sm:$0xf] %v301_v46  ;;  %v303_v47 = vld [vmem:[%s2536_s7 + $0x178] sm:$0xf] }
  0x32   : > { %v305_v48 = vld [vmem:[%s2536_s7 + $0x180] sm:$0xf]  ;;  %v307_v49 = vld [vmem:[%s2536_s7 + $0x188] sm:$0xf]  ;;  %304 = vst [vmem:[%s2543_s8 + $0xbc] sm:$0xf] %v303_v47 }
  0x33   : > { %306 = vst [vmem:[%s2543_s8 + $0xc0] sm:$0xf] %v305_v48  ;;  %308 = vst [vmem:[%s2543_s8 + $0xc4] sm:$0xf] %v307_v49  ;;  %v309_v50 = vld [vmem:[%s2536_s7 + $0x190] sm:$0xf] }
  0x34   : > { %v311_v51 = vld [vmem:[%s2536_s7 + $0x198] sm:$0xf]  ;;  %v313_v52 = vld [vmem:[%s2536_s7 + $0x1a0] sm:$0xf]  ;;  %310 = vst [vmem:[%s2543_s8 + $0xc8] sm:$0xf] %v309_v50 }
  0x35   : > { %312 = vst [vmem:[%s2543_s8 + $0xcc] sm:$0xf] %v311_v51  ;;  %314 = vst [vmem:[%s2543_s8 + $0xd0] sm:$0xf] %v313_v52  ;;  %v315_v53 = vld [vmem:[%s2536_s7 + $0x1a8] sm:$0xf] }
  0x36   : > { %v317_v54 = vld [vmem:[%s2536_s7 + $0x1b0] sm:$0xf]  ;;  %v319_v55 = vld [vmem:[%s2536_s7 + $0x1b8] sm:$0xf]  ;;  %316 = vst [vmem:[%s2543_s8 + $0xd4] sm:$0xf] %v315_v53 }
  0x37   : > { %318 = vst [vmem:[%s2543_s8 + $0xd8] sm:$0xf] %v317_v54  ;;  %320 = vst [vmem:[%s2543_s8 + $0xdc] sm:$0xf] %v319_v55  ;;  %v321_v56 = vld [vmem:[%s2536_s7 + $0x1c0] sm:$0xf] }
  0x38   : > { %v323_v57 = vld [vmem:[%s2536_s7 + $0x1c8] sm:$0xf]  ;;  %v325_v58 = vld [vmem:[%s2536_s7 + $0x1d0] sm:$0xf]  ;;  %322 = vst [vmem:[%s2543_s8 + $0xe0] sm:$0xf] %v321_v56 }
  0x39   : > { %324 = vst [vmem:[%s2543_s8 + $0xe4] sm:$0xf] %v323_v57  ;;  %326 = vst [vmem:[%s2543_s8 + $0xe8] sm:$0xf] %v325_v58  ;;  %v327_v59 = vld [vmem:[%s2536_s7 + $0x1d8] sm:$0xf] }
  0x3a   : > { %v329_v60 = vld [vmem:[%s2536_s7 + $0x1e0] sm:$0xf]  ;;  %v331_v61 = vld [vmem:[%s2536_s7 + $0x1e8] sm:$0xf]  ;;  %328 = vst [vmem:[%s2543_s8 + $0xec] sm:$0xf] %v327_v59 }
  0x3b   : > { %330 = vst [vmem:[%s2543_s8 + $0xf0] sm:$0xf] %v329_v60  ;;  %332 = vst [vmem:[%s2543_s8 + $0xf4] sm:$0xf] %v331_v61  ;;  %v333_v62 = vld [vmem:[%s2536_s7 + $0x1f0] sm:$0xf] }
  0x3c   : > { %v335_v63 = vld [vmem:[%s2536_s7 + $0x1f8] sm:$0xf]  ;;  %v337_v0 = vld [vmem:[%s2536_s7 + $0x200] sm:$0xf]  ;;  %334 = vst [vmem:[%s2543_s8 + $0xf8] sm:$0xf] %v333_v62 }
  0x3d   : > { %336 = vst [vmem:[%s2543_s8 + $0xfc] sm:$0xf] %v335_v63  ;;  %338 = vst [vmem:[%s2543_s8 + $0x100] sm:$0xf] %v337_v0  ;;  %v339_v1 = vld [vmem:[%s2536_s7 + $0x208] sm:$0xf] }
  0x3e   : > { %v341_v2 = vld [vmem:[%s2536_s7 + $0x210] sm:$0xf]  ;;  %v343_v3 = vld [vmem:[%s2536_s7 + $0x218] sm:$0xf]  ;;  %340 = vst [vmem:[%s2543_s8 + $0x104] sm:$0xf] %v339_v1 }
  0x3f   : > { %342 = vst [vmem:[%s2543_s8 + $0x108] sm:$0xf] %v341_v2  ;;  %344 = vst [vmem:[%s2543_s8 + $0x10c] sm:$0xf] %v343_v3  ;;  %v345_v4 = vld [vmem:[%s2536_s7 + $0x220] sm:$0xf] }
  0x40   : > { %v347_v5 = vld [vmem:[%s2536_s7 + $0x228] sm:$0xf]  ;;  %v349_v6 = vld [vmem:[%s2536_s7 + $0x230] sm:$0xf]  ;;  %346 = vst [vmem:[%s2543_s8 + $0x110] sm:$0xf] %v345_v4 }
  0x41   : > { %348 = vst [vmem:[%s2543_s8 + $0x114] sm:$0xf] %v347_v5  ;;  %350 = vst [vmem:[%s2543_s8 + $0x118] sm:$0xf] %v349_v6  ;;  %v351_v7 = vld [vmem:[%s2536_s7 + $0x238] sm:$0xf] }
  0x42   : > { %v353_v8 = vld [vmem:[%s2536_s7 + $0x240] sm:$0xf]  ;;  %v355_v9 = vld [vmem:[%s2536_s7 + $0x248] sm:$0xf]  ;;  %352 = vst [vmem:[%s2543_s8 + $0x11c] sm:$0xf] %v351_v7 }
  0x43   : > { %354 = vst [vmem:[%s2543_s8 + $0x120] sm:$0xf] %v353_v8  ;;  %356 = vst [vmem:[%s2543_s8 + $0x124] sm:$0xf] %v355_v9  ;;  %v357_v10 = vld [vmem:[%s2536_s7 + $0x250] sm:$0xf] }
  0x44   : > { %v359_v11 = vld [vmem:[%s2536_s7 + $0x258] sm:$0xf]  ;;  %v361_v12 = vld [vmem:[%s2536_s7 + $0x260] sm:$0xf]  ;;  %358 = vst [vmem:[%s2543_s8 + $0x128] sm:$0xf] %v357_v10 }
  0x45   : > { %360 = vst [vmem:[%s2543_s8 + $0x12c] sm:$0xf] %v359_v11  ;;  %362 = vst [vmem:[%s2543_s8 + $0x130] sm:$0xf] %v361_v12  ;;  %v363_v13 = vld [vmem:[%s2536_s7 + $0x268] sm:$0xf] }
  0x46   : > { %v365_v14 = vld [vmem:[%s2536_s7 + $0x270] sm:$0xf]  ;;  %v367_v15 = vld [vmem:[%s2536_s7 + $0x278] sm:$0xf]  ;;  %364 = vst [vmem:[%s2543_s8 + $0x134] sm:$0xf] %v363_v13 }
  0x47   : > { %366 = vst [vmem:[%s2543_s8 + $0x138] sm:$0xf] %v365_v14  ;;  %368 = vst [vmem:[%s2543_s8 + $0x13c] sm:$0xf] %v367_v15  ;;  %v369_v16 = vld [vmem:[%s2536_s7 + $0x280] sm:$0xf] }
  0x48   : > { %v371_v17 = vld [vmem:[%s2536_s7 + $0x288] sm:$0xf]  ;;  %v373_v18 = vld [vmem:[%s2536_s7 + $0x290] sm:$0xf]  ;;  %370 = vst [vmem:[%s2543_s8 + $0x140] sm:$0xf] %v369_v16 }
  0x49   : > { %372 = vst [vmem:[%s2543_s8 + $0x144] sm:$0xf] %v371_v17  ;;  %374 = vst [vmem:[%s2543_s8 + $0x148] sm:$0xf] %v373_v18  ;;  %v375_v19 = vld [vmem:[%s2536_s7 + $0x298] sm:$0xf] }
  0x4a   : > { %v377_v20 = vld [vmem:[%s2536_s7 + $0x2a0] sm:$0xf]  ;;  %v379_v21 = vld [vmem:[%s2536_s7 + $0x2a8] sm:$0xf]  ;;  %376 = vst [vmem:[%s2543_s8 + $0x14c] sm:$0xf] %v375_v19 }
  0x4b   : > { %378 = vst [vmem:[%s2543_s8 + $0x150] sm:$0xf] %v377_v20  ;;  %380 = vst [vmem:[%s2543_s8 + $0x154] sm:$0xf] %v379_v21  ;;  %v381_v22 = vld [vmem:[%s2536_s7 + $0x2b0] sm:$0xf] }
  0x4c   : > { %v383_v23 = vld [vmem:[%s2536_s7 + $0x2b8] sm:$0xf]  ;;  %v385_v24 = vld [vmem:[%s2536_s7 + $0x2c0] sm:$0xf]  ;;  %382 = vst [vmem:[%s2543_s8 + $0x158] sm:$0xf] %v381_v22 }
  0x4d   : > { %384 = vst [vmem:[%s2543_s8 + $0x15c] sm:$0xf] %v383_v23  ;;  %386 = vst [vmem:[%s2543_s8 + $0x160] sm:$0xf] %v385_v24  ;;  %v387_v25 = vld [vmem:[%s2536_s7 + $0x2c8] sm:$0xf] }
  0x4e   : > { %v389_v26 = vld [vmem:[%s2536_s7 + $0x2d0] sm:$0xf]  ;;  %v391_v27 = vld [vmem:[%s2536_s7 + $0x2d8] sm:$0xf]  ;;  %388 = vst [vmem:[%s2543_s8 + $0x164] sm:$0xf] %v387_v25 }
  0x4f   : > { %390 = vst [vmem:[%s2543_s8 + $0x168] sm:$0xf] %v389_v26  ;;  %392 = vst [vmem:[%s2543_s8 + $0x16c] sm:$0xf] %v391_v27  ;;  %v393_v28 = vld [vmem:[%s2536_s7 + $0x2e0] sm:$0xf] }
  0x50   : > { %v395_v29 = vld [vmem:[%s2536_s7 + $0x2e8] sm:$0xf]  ;;  %v397_v30 = vld [vmem:[%s2536_s7 + $0x2f0] sm:$0xf]  ;;  %394 = vst [vmem:[%s2543_s8 + $0x170] sm:$0xf] %v393_v28 }
  0x51   : > { %396 = vst [vmem:[%s2543_s8 + $0x174] sm:$0xf] %v395_v29  ;;  %398 = vst [vmem:[%s2543_s8 + $0x178] sm:$0xf] %v397_v30  ;;  %v399_v31 = vld [vmem:[%s2536_s7 + $0x2f8] sm:$0xf] }
  0x52   : > { %v401_v32 = vld [vmem:[%s2536_s7 + $0x300] sm:$0xf]  ;;  %v403_v33 = vld [vmem:[%s2536_s7 + $0x308] sm:$0xf]  ;;  %400 = vst [vmem:[%s2543_s8 + $0x17c] sm:$0xf] %v399_v31 }
  0x53   : > { %402 = vst [vmem:[%s2543_s8 + $0x180] sm:$0xf] %v401_v32  ;;  %404 = vst [vmem:[%s2543_s8 + $0x184] sm:$0xf] %v403_v33  ;;  %v405_v34 = vld [vmem:[%s2536_s7 + $0x310] sm:$0xf] }
  0x54   : > { %v407_v35 = vld [vmem:[%s2536_s7 + $0x318] sm:$0xf]  ;;  %v409_v36 = vld [vmem:[%s2536_s7 + $0x320] sm:$0xf]  ;;  %406 = vst [vmem:[%s2543_s8 + $0x188] sm:$0xf] %v405_v34 }
  0x55   : > { %408 = vst [vmem:[%s2543_s8 + $0x18c] sm:$0xf] %v407_v35  ;;  %410 = vst [vmem:[%s2543_s8 + $0x190] sm:$0xf] %v409_v36  ;;  %v411_v37 = vld [vmem:[%s2536_s7 + $0x328] sm:$0xf] }
  0x56   : > { %v413_v38 = vld [vmem:[%s2536_s7 + $0x330] sm:$0xf]  ;;  %v415_v39 = vld [vmem:[%s2536_s7 + $0x338] sm:$0xf]  ;;  %412 = vst [vmem:[%s2543_s8 + $0x194] sm:$0xf] %v411_v37 }
  0x57   : > { %414 = vst [vmem:[%s2543_s8 + $0x198] sm:$0xf] %v413_v38  ;;  %416 = vst [vmem:[%s2543_s8 + $0x19c] sm:$0xf] %v415_v39  ;;  %v417_v40 = vld [vmem:[%s2536_s7 + $0x340] sm:$0xf] }
  0x58   : > { %v419_v41 = vld [vmem:[%s2536_s7 + $0x348] sm:$0xf]  ;;  %v421_v42 = vld [vmem:[%s2536_s7 + $0x350] sm:$0xf]  ;;  %418 = vst [vmem:[%s2543_s8 + $0x1a0] sm:$0xf] %v417_v40 }
  0x59   : > { %420 = vst [vmem:[%s2543_s8 + $0x1a4] sm:$0xf] %v419_v41  ;;  %422 = vst [vmem:[%s2543_s8 + $0x1a8] sm:$0xf] %v421_v42  ;;  %v423_v43 = vld [vmem:[%s2536_s7 + $0x358] sm:$0xf] }
  0x5a   : > { %v425_v44 = vld [vmem:[%s2536_s7 + $0x360] sm:$0xf]  ;;  %v427_v45 = vld [vmem:[%s2536_s7 + $0x368] sm:$0xf]  ;;  %424 = vst [vmem:[%s2543_s8 + $0x1ac] sm:$0xf] %v423_v43 }
  0x5b   : > { %426 = vst [vmem:[%s2543_s8 + $0x1b0] sm:$0xf] %v425_v44  ;;  %428 = vst [vmem:[%s2543_s8 + $0x1b4] sm:$0xf] %v427_v45  ;;  %v429_v46 = vld [vmem:[%s2536_s7 + $0x370] sm:$0xf] }
  0x5c   : > { %v431_v47 = vld [vmem:[%s2536_s7 + $0x378] sm:$0xf]  ;;  %v433_v48 = vld [vmem:[%s2536_s7 + $0x380] sm:$0xf]  ;;  %430 = vst [vmem:[%s2543_s8 + $0x1b8] sm:$0xf] %v429_v46 }
  0x5d   : > { %432 = vst [vmem:[%s2543_s8 + $0x1bc] sm:$0xf] %v431_v47  ;;  %434 = vst [vmem:[%s2543_s8 + $0x1c0] sm:$0xf] %v433_v48  ;;  %v435_v49 = vld [vmem:[%s2536_s7 + $0x388] sm:$0xf] }
  0x5e   : > { %v437_v50 = vld [vmem:[%s2536_s7 + $0x390] sm:$0xf]  ;;  %v439_v51 = vld [vmem:[%s2536_s7 + $0x398] sm:$0xf]  ;;  %436 = vst [vmem:[%s2543_s8 + $0x1c4] sm:$0xf] %v435_v49 }
  0x5f   : > { %438 = vst [vmem:[%s2543_s8 + $0x1c8] sm:$0xf] %v437_v50  ;;  %440 = vst [vmem:[%s2543_s8 + $0x1cc] sm:$0xf] %v439_v51  ;;  %v441_v52 = vld [vmem:[%s2536_s7 + $0x3a0] sm:$0xf] }
  0x60   : > { %v443_v53 = vld [vmem:[%s2536_s7 + $0x3a8] sm:$0xf]  ;;  %v445_v54 = vld [vmem:[%s2536_s7 + $0x3b0] sm:$0xf]  ;;  %442 = vst [vmem:[%s2543_s8 + $0x1d0] sm:$0xf] %v441_v52 }
  0x61   : > { %444 = vst [vmem:[%s2543_s8 + $0x1d4] sm:$0xf] %v443_v53  ;;  %446 = vst [vmem:[%s2543_s8 + $0x1d8] sm:$0xf] %v445_v54  ;;  %v447_v55 = vld [vmem:[%s2536_s7 + $0x3b8] sm:$0xf] }
  0x62   : > { %v449_v56 = vld [vmem:[%s2536_s7 + $0x3c0] sm:$0xf]  ;;  %v451_v57 = vld [vmem:[%s2536_s7 + $0x3c8] sm:$0xf]  ;;  %448 = vst [vmem:[%s2543_s8 + $0x1dc] sm:$0xf] %v447_v55 }
  0x63   : > { %450 = vst [vmem:[%s2543_s8 + $0x1e0] sm:$0xf] %v449_v56  ;;  %452 = vst [vmem:[%s2543_s8 + $0x1e4] sm:$0xf] %v451_v57  ;;  %v453_v58 = vld [vmem:[%s2536_s7 + $0x3d0] sm:$0xf] }
  0x64   : > { %v455_v59 = vld [vmem:[%s2536_s7 + $0x3d8] sm:$0xf]  ;;  %v457_v60 = vld [vmem:[%s2536_s7 + $0x3e0] sm:$0xf]  ;;  %454 = vst [vmem:[%s2543_s8 + $0x1e8] sm:$0xf] %v453_v58 }
  0x65   : > { %456 = vst [vmem:[%s2543_s8 + $0x1ec] sm:$0xf] %v455_v59  ;;  %458 = vst [vmem:[%s2543_s8 + $0x1f0] sm:$0xf] %v457_v60  ;;  %v459_v61 = vld [vmem:[%s2536_s7 + $0x3e8] sm:$0xf] }
  0x66   : > { %v461_v62 = vld [vmem:[%s2536_s7 + $0x3f0] sm:$0xf]  ;;  %v463_v63 = vld [vmem:[%s2536_s7 + $0x3f8] sm:$0xf]  ;;  %460 = vst [vmem:[%s2543_s8 + $0x1f4] sm:$0xf] %v459_v61 }
  0x67   : > { %462 = vst [vmem:[%s2543_s8 + $0x1f8] sm:$0xf] %v461_v62  ;;  %464 = vst [vmem:[%s2543_s8 + $0x1fc] sm:$0xf] %v463_v63  ;;  %v465_v0 = vld [vmem:[%s2536_s7 + $0x400] sm:$0xf] }
  0x68   : > { %v467_v1 = vld [vmem:[%s2536_s7 + $0x408] sm:$0xf]  ;;  %v469_v2 = vld [vmem:[%s2536_s7 + $0x410] sm:$0xf]  ;;  %466 = vst [vmem:[%s2543_s8 + $0x200] sm:$0xf] %v465_v0 }
  0x69   : > { %468 = vst [vmem:[%s2543_s8 + $0x204] sm:$0xf] %v467_v1  ;;  %470 = vst [vmem:[%s2543_s8 + $0x208] sm:$0xf] %v469_v2  ;;  %v471_v3 = vld [vmem:[%s2536_s7 + $0x418] sm:$0xf] }
  0x6a   : > { %v473_v4 = vld [vmem:[%s2536_s7 + $0x420] sm:$0xf]  ;;  %v475_v5 = vld [vmem:[%s2536_s7 + $0x428] sm:$0xf]  ;;  %472 = vst [vmem:[%s2543_s8 + $0x20c] sm:$0xf] %v471_v3 }
  0x6b   : > { %474 = vst [vmem:[%s2543_s8 + $0x210] sm:$0xf] %v473_v4  ;;  %476 = vst [vmem:[%s2543_s8 + $0x214] sm:$0xf] %v475_v5  ;;  %v477_v6 = vld [vmem:[%s2536_s7 + $0x430] sm:$0xf] }
  0x6c   : > { %v479_v7 = vld [vmem:[%s2536_s7 + $0x438] sm:$0xf]  ;;  %v481_v8 = vld [vmem:[%s2536_s7 + $0x440] sm:$0xf]  ;;  %478 = vst [vmem:[%s2543_s8 + $0x218] sm:$0xf] %v477_v6 }
  0x6d   : > { %480 = vst [vmem:[%s2543_s8 + $0x21c] sm:$0xf] %v479_v7  ;;  %482 = vst [vmem:[%s2543_s8 + $0x220] sm:$0xf] %v481_v8  ;;  %v483_v9 = vld [vmem:[%s2536_s7 + $0x448] sm:$0xf] }
  0x6e   : > { %v485_v10 = vld [vmem:[%s2536_s7 + $0x450] sm:$0xf]  ;;  %v487_v11 = vld [vmem:[%s2536_s7 + $0x458] sm:$0xf]  ;;  %484 = vst [vmem:[%s2543_s8 + $0x224] sm:$0xf] %v483_v9 }
  0x6f   : > { %486 = vst [vmem:[%s2543_s8 + $0x228] sm:$0xf] %v485_v10  ;;  %488 = vst [vmem:[%s2543_s8 + $0x22c] sm:$0xf] %v487_v11  ;;  %v489_v12 = vld [vmem:[%s2536_s7 + $0x460] sm:$0xf] }
  0x70   : > { %v491_v13 = vld [vmem:[%s2536_s7 + $0x468] sm:$0xf]  ;;  %v493_v14 = vld [vmem:[%s2536_s7 + $0x470] sm:$0xf]  ;;  %490 = vst [vmem:[%s2543_s8 + $0x230] sm:$0xf] %v489_v12 }
  0x71   : > { %492 = vst [vmem:[%s2543_s8 + $0x234] sm:$0xf] %v491_v13  ;;  %494 = vst [vmem:[%s2543_s8 + $0x238] sm:$0xf] %v493_v14  ;;  %v495_v15 = vld [vmem:[%s2536_s7 + $0x478] sm:$0xf] }
  0x72   : > { %496 = vst [vmem:[%s2543_s8 + $0x23c] sm:$0xf] %v495_v15 }
  0x73 PF: > { %p2055_p7 = scmp.ge.s32.totalorder %s2463_s20, 1  ;;  %p825_p8 = scmp.lt.s32.totalorder %s2463_s20, 3 }
  0x75   : > { %p826_p9 = pnand %p2055_p7, %p825_p8 }
  0x76   : > { %s832_s9 = sand.u32 (!%p826_p9), 1, %s2455_s18   ;;  %p867_p10 = scmp.lt.s32.totalorder (!%p826_p9), %s2511_s21, 1 }
  0x77   : > { %829 = sbr.rel (%p826_p9) target bundleno = 506 (0x1fa), region = 77  ;;  %s2056_s29 = sshll.u32 (!%p826_p9), %s832_s9, 4 }
  0x78   : > { %s2316_s10 = smul.u32 (!%p826_p9), 576, %s832_s9  ;;  %s866_s30 = scalar_lea.vmem (!%p826_p9), [#allocation3], %s2056_s29 }
  0x7a   : > { %s2839_s15 = scalar_lea.vmem (!%p826_p9), [#allocation2], %s2316_s10 }
  0x7c   : > { %v2374_v16 = vld [vmem:[%s2995_s0 + $0x4] ss:$36 sps:$4 sm:$0xff]   ;;  %v2379_v17 = vld [vmem:[%s2995_s0 + $0xc] ss:$36 sps:$4 sm:$0xff]   ;;  %v2341_v18 = vld [vmem:[%s2839_s15 + $0x78] sm:$0xff]   ;;  %s2155_s18 = sshll.u32 (%p2526_p5), %s2511_s21, 2 }
  0x7d   : > { %1604 = vmatprep.mubr.bf16.mxu0 %v2374_v16  ;;  %1653 = vmatprep.mubr.bf16.mxu1 %v2379_v17  ;;  %v2342_v19 = vld [vmem:[%s2839_s15 + $0x38] sm:$0xff]   ;;  %v2345_v22 = vld [vmem:[%s2839_s15 + $0x70] sm:$0xff]   ;;  %v2349_v26 = vld [vmem:[%s2839_s15 + $0x68] sm:$0xff]   ;;  %s1913_s7 = scalar_lea.vmem (%p2526_p5), %s3000_s5, %s2155_s18 }
  0x7e   : > { %2173 = vmatprep.subr.bf16.mxu0 %v2341_v18  ;;  %v2343_v20 = vld [vmem:[%s2839_s15 + $0xf8] sm:$0xff]   ;;  %v2346_v23 = vld [vmem:[%s2839_s15 + $0x30] sm:$0xff]   ;;  %v2350_v27 = vld [vmem:[%s2839_s15 + $0x28] sm:$0xff]  }
  0x7f   : > { %2174 = vmatpush3.bf16.msra.mxu0 %v2342_v19  ;;  %v2344_v21 = vld [vmem:[%s2839_s15 + $0xb8] sm:$0xff]   ;;  %2201 = vmatprep.subr.bf16.mxu1 %v2343_v20  ;;  %v2347_v24 = vld [vmem:[%s2839_s15 + $0xf0] sm:$0xff]   ;;  %v2351_v28 = vld [vmem:[%s2839_s15 + $0xe8] sm:$0xff]  }
  0x80   : > { %2202 = vmatpush3.bf16.msra.mxu1 %v2344_v21  ;;  %2175 = vmatprep.subr.bf16.mxu0 %v2345_v22  ;;  %v2348_v25 = vld [vmem:[%s2839_s15 + $0xb0] sm:$0xff]   ;;  %v2352_v29 = vld [vmem:[%s2839_s15 + $0xa8] sm:$0xff]   ;;  %v2353_v30 = vld [vmem:[%s2839_s15 + $0x60] sm:$0xff]  }
  0x81   : > { %2203 = vmatprep.subr.bf16.mxu1 %v2347_v24  ;;  %v2354_v31 = vld [vmem:[%s2839_s15 + $0x20] sm:$0xff]   ;;  %v2357_v34 = vld [vmem:[%s2839_s15 + $0x58] sm:$0xff]   ;;  %v2361_v38 = vld [vmem:[%s2839_s15 + $0x50] sm:$0xff]  }
  0x82   : > { %v2355_v32 = vld [vmem:[%s2839_s15 + $0xe0] sm:$0xff]   ;;  %v2358_v35 = vld [vmem:[%s2839_s15 + $0x18] sm:$0xff]   ;;  %v2362_v39 = vld [vmem:[%s2839_s15 + $0x10] sm:$0xff]  }
  0x83   : > { %2176 = vmatpush3.bf16.msra.mxu0 %v2346_v23  ;;  %v2356_v33 = vld [vmem:[%s2839_s15 + $0xa0] sm:$0xff]   ;;  %v2359_v36 = vld [vmem:[%s2839_s15 + $0xd8] sm:$0xff]   ;;  %v2363_v40 = vld [vmem:[%s2839_s15 + $0xd0] sm:$0xff]  }
  0x84   : > { %2204 = vmatpush3.bf16.msra.mxu1 %v2348_v25  ;;  %2177 = vmatprep.subr.bf16.mxu0 %v2349_v26  ;;  %v2360_v37 = vld [vmem:[%s2839_s15 + $0x98] sm:$0xff]   ;;  %v2364_v41 = vld [vmem:[%s2839_s15 + $0x90] sm:$0xff]   ;;  %v2365_v42 = vld [vmem:[%s2839_s15 + $0x48] sm:$0xff]  }
  0x85   : > { %2205 = vmatprep.subr.bf16.mxu1 %v2351_v28  ;;  %v2366_v43 = vld [vmem:[%s2839_s15 + $0x8] sm:$0xff]   ;;  %v2369_v46 = vld [vmem:[%s2839_s15 + $0x40] sm:$0xff]   ;;  %v2376_v53 = vld [vmem:[%s2839_s15 + $0x178] sm:$0xff]  }
  0x86   : > { %v2367_v44 = vld [vmem:[%s2839_s15 + $0xc8] sm:$0xff]   ;;  %v2372_v47 = vld [vmem:[%s2995_s0] ss:$36 sps:$4 sm:$0xff]   ;;  %v2380_v54 = vld [vmem:[%s2839_s15 + $0x138] sm:$0xff]  }
  0x87   : > { %2178 = vmatpush3.bf16.msra.mxu0 %v2350_v27  ;;  %v2368_v45 = vld [vmem:[%s2839_s15 + $0x88] sm:$0xff]   ;;  %v2370_v48 = vld [vmem:[%s2839_s15] sm:$0xff]   ;;  %v2381_v55 = vld [vmem:[%s2839_s15 + $0x1f8] sm:$0xff]  }
  0x88   : > { %2206 = vmatpush3.bf16.msra.mxu1 %v2352_v29  ;;  %2179 = vmatprep.subr.bf16.mxu0 %v2353_v30  ;;  %v2397_v49 = vld [vmem:[%s2995_s0 + $0x4c] ss:$36 sps:$4 sm:$0xff]   ;;  %v2371_v50 = vld [vmem:[%s2839_s15 + $0xc0] sm:$0xff]   ;;  %v2382_v56 = vld [vmem:[%s2839_s15 + $0x1b8] sm:$0xff]  }
  0x89   : > { %2207 = vmatprep.subr.bf16.mxu1 %v2355_v32  ;;  %v2377_v51 = vld [vmem:[%s2995_s0 + $0x8] ss:$36 sps:$4 sm:$0xff]   ;;  %v2375_v52 = vld [vmem:[%s2839_s15 + $0x80] sm:$0xff]   ;;  %v2383_v57 = vld [vmem:[%s2839_s15 + $0x170] sm:$0xff]  }
  0x8a   : > { %v2400_v58 = vld [vmem:[%s2995_s0 + $0x48] ss:$36 sps:$4 sm:$0xff]   ;;  %v2384_v59 = vld [vmem:[%s2839_s15 + $0x130] sm:$0xff]   ;;  %v2391_v2 = vld [vmem:[%s2839_s15 + $0x160] sm:$0xff]  }
  0x8b   : > { %2180 = vmatpush3.bf16.msra.mxu0 %v2354_v31  ;;  %v2385_v60 = vld [vmem:[%s2839_s15 + $0x1f0] sm:$0xff]   ;;  %v2387_v62 = vld [vmem:[%s2839_s15 + $0x168] sm:$0xff]   ;;  %v2392_v3 = vld [vmem:[%s2839_s15 + $0x120] sm:$0xff]  }
  0x8c   : > { %2208 = vmatpush3.bf16.msra.mxu1 %v2356_v33  ;;  %2181 = vmatprep.subr.bf16.mxu0 %v2357_v34  ;;  %v2386_v61 = vld [vmem:[%s2839_s15 + $0x1b0] sm:$0xff]   ;;  %v2388_v63 = vld [vmem:[%s2839_s15 + $0x128] sm:$0xff]   ;;  %v2393_v4 = vld [vmem:[%s2839_s15 + $0x1e0] sm:$0xff]  }
  0x8d   : > { %2209 = vmatprep.subr.bf16.mxu1 %v2359_v36  ;;  %v2389_v0 = vld [vmem:[%s2839_s15 + $0x1e8] sm:$0xff]   ;;  %v2394_v5 = vld [vmem:[%s2839_s15 + $0x1a0] sm:$0xff]   ;;  %v2395_v6 = vld [vmem:[%s2839_s15 + $0x158] sm:$0xff]  }
  0x8e   : > { %v2390_v1 = vld [vmem:[%s2839_s15 + $0x1a8] sm:$0xff]   ;;  %v2396_v7 = vld [vmem:[%s2839_s15 + $0x118] sm:$0xff]   ;;  %v2404_v11 = vld [vmem:[%s2839_s15 + $0x150] sm:$0xff]  }
  0x8f   : > { %2182 = vmatpush3.bf16.msra.mxu0 %v2358_v35  ;;  %v2399_v8 = vld [vmem:[%s2839_s15 + $0x1d8] sm:$0xff]   ;;  %v2405_v12 = vld [vmem:[%s2995_s0 + $0x50] ss:$36 sps:$4 sm:$0xff]   ;;  %v2409_v16 = vld [vmem:[%s2839_s15 + $0x148] sm:$0xff]  }
  0x90   : > { %2210 = vmatpush3.bf16.msra.mxu1 %v2360_v37  ;;  %2183 = vmatprep.subr.bf16.mxu0 %v2361_v38  ;;  %v2401_v9 = vld [vmem:[%s2839_s15 + $0x198] sm:$0xff]   ;;  %v2406_v13 = vld [vmem:[%s2839_s15 + $0x110] sm:$0xff]   ;;  %v2410_v17 = vld [vmem:[%s2839_s15 + $0x108] sm:$0xff]  }
  0x91   : > { %2211 = vmatprep.subr.bf16.mxu1 %v2363_v40  ;;  %v2402_v10 = vld [vmem:[%s2995_s0 + $0x54] ss:$36 sps:$4 sm:$0xff]   ;;  %v2411_v18 = vld [vmem:[%s2839_s15 + $0x1c8] sm:$0xff]   ;;  %v2413_v20 = vld [vmem:[%s2839_s15 + $0x140] sm:$0xff]  }
  0x92   : > { %v2407_v14 = vld [vmem:[%s2839_s15 + $0x1d0] sm:$0xff]   ;;  %v2412_v19 = vld [vmem:[%s2839_s15 + $0x188] sm:$0xff]   ;;  %v2414_v21 = vld [vmem:[%s2839_s15 + $0x100] sm:$0xff]  }
  0x93   : > { %2184 = vmatpush3.bf16.msra.mxu0 %v2362_v39  ;;  %v2408_v15 = vld [vmem:[%s2839_s15 + $0x190] sm:$0xff]   ;;  %v2415_v22 = vld [vmem:[%s2839_s15 + $0x1c0] sm:$0xff]   ;;  %v2420_v26 = vld [vmem:[%s2839_s15 + $0x238] sm:$0xff]  }
  0x94   : > { %2212 = vmatpush3.bf16.msra.mxu1 %v2364_v41  ;;  %2185 = vmatprep.subr.bf16.mxu0 %v2365_v42  ;;  %v2416_v23 = vld [vmem:[%s2995_s0 + $0x10] ss:$36 sps:$4 sm:$0xff]   ;;  %v2419_v25 = vld [vmem:[%s2839_s15 + $0x180] sm:$0xff]   ;;  %v2421_v27 = vld [vmem:[%s2995_s0 + $0x18] ss:$36 sps:$4 sm:$0xff]  }
  0x95   : > { %2213 = vmatprep.subr.bf16.mxu1 %v2367_v44  ;;  %v2418_v24 = vld [vmem:[%s2995_s0 + $0x14] ss:$36 sps:$4 sm:$0xff]   ;;  %v2423_v28 = vld [vmem:[%s2995_s0 + $0x1c] ss:$36 sps:$4 sm:$0xff]   ;;  %v2428_v32 = vld [vmem:[%s2839_s15 + $0x228] sm:$0xff]  }
  0x96   : > { %v2424_v29 = vld [vmem:[%s2839_s15 + $0x230] sm:$0xff]   ;;  %v2425_v30 = vld [vmem:[%s2995_s0 + $0x5c] ss:$36 sps:$4 sm:$0xff]   ;;  %v2429_v33 = vld [vmem:[%s2995_s0 + $0x64] ss:$36 sps:$4 sm:$0xff]  }
  0x97   : > { %2186 = vmatpush3.bf16.msra.mxu0 %v2366_v43  ;;  %v2427_v31 = vld [vmem:[%s2995_s0 + $0x58] ss:$36 sps:$4 sm:$0xff]   ;;  %v2431_v34 = vld [vmem:[%s2995_s0 + $0x60] ss:$36 sps:$4 sm:$0xff]   ;;  %v2434_v38 = vld [vmem:[%s2839_s15 + $0x210] sm:$0xff]  }
  0x98   : > { %2214 = vmatpush3.bf16.msra.mxu1 %v2368_v45  ;;  %2187 = vmatprep.subr.bf16.mxu0 %v2369_v46  ;;  %v2432_v35 = vld [vmem:[%s2839_s15 + $0x220] sm:$0xff]   ;;  %v2433_v36 = vld [vmem:[%s2839_s15 + $0x218] sm:$0xff]   ;;  %v2435_v39 = vld [vmem:[%s2839_s15 + $0x208] sm:$0xff]  }
  0x99   : > { %2215 = vmatprep.subr.bf16.mxu1 %v2371_v50  ;;  %v2437_v37 = vld [vmem:[%s2995_s0 + $0x20] ss:$36 sps:$4 sm:$0xff]   ;;  %v2438_v41 = vld [vmem:[%s2995_s0 + $0x68] ss:$36 sps:$4 sm:$0xff]  }
  0x9a   : > { %v2436_v40 = vld [vmem:[%s2839_s15 + $0x200] sm:$0xff]   ;;  %s2963_s15 = scalar_select %p867_p10, %s2511_s21, 1 }
  0x9b   : > { %2188 = vmatpush3.bf16.msra.mxu0 %v2370_v48 }
  0x9c   : > { %2216 = vmatpush3.bf16.msra.mxu1 %v2375_v52  ;;  %2229 = vmatprep.subr.bf16.mxu0 %v2376_v53  ;;  %s869_s16 = scalar_lea.vmem %s2997_s2, %s2963_s15  ;;  %s872_s23 = scalar_lea.vmem %s2998_s3, %s2963_s15 }
  0x9d   : > { %2257 = vmatprep.subr.bf16.mxu1 %v2381_v55  ;;  %s875_s28 = scalar_lea.vmem %s2999_s4, %s2963_s15 }
  0x9e   : > { %1605 = vmatmul.mubr.bf16.vlgmr.msra.gmra.mxu0 %v2372_v47 }
  0x9f   : > { %2230 = vmatpush3.bf16.msra.mxu0 %v2380_v54  ;;  %1612 = vmatprep.mubr.bf16.mxu0 %v2397_v49 }
  0xa0   : > { %1654 = vmatmul.mubr.bf16.vlgmr.msra.gmra.mxu1 %v2377_v51  ;;  %2231 = vmatprep.subr.bf16.mxu0 %v2383_v57 }
  0xa1   : > { %2258 = vmatpush3.bf16.msra.mxu1 %v2382_v56  ;;  %1661 = vmatprep.mubr.bf16.mxu1 %v2402_v10 }
  0xa2   : > { %2259 = vmatprep.subr.bf16.mxu1 %v2385_v60 }
  0xa3   : > { %2232 = vmatpush3.bf16.msra.mxu0 %v2384_v59 }
  0xa4   : > { %2233 = vmatprep.subr.bf16.mxu0 %v2387_v62 }
  0xa5   : > { %2260 = vmatpush3.bf16.msra.mxu1 %v2386_v61 }
  0xa6   : > { %1613 = vmatmul.mubr.bf16.gmra.mxu0 %v2400_v58  ;;  %2261 = vmatprep.subr.bf16.mxu1 %v2389_v0 }
  0xa7   : > { %2234 = vmatpush3.bf16.msra.mxu0 %v2388_v63  ;;  %1702 = vmatprep.mubr.bf16.mxu0 %v2418_v24 }
  0xa8   : > { %2235 = vmatprep.subr.bf16.mxu0 %v2391_v2  ;;  %1662 = vmatmul.mubr.bf16.gmra.mxu1 %v2405_v12 }
  0xa9   : > { %2262 = vmatpush3.bf16.msra.mxu1 %v2390_v1  ;;  %1751 = vmatprep.mubr.bf16.mxu1 %v2423_v28 }
  0xaa   : > { %2263 = vmatprep.subr.bf16.mxu1 %v2393_v4 }
  0xab   : > { %2236 = vmatpush3.bf16.msra.mxu0 %v2392_v3 }
  0xac   : > { %2237 = vmatprep.subr.bf16.mxu0 %v2395_v6  ;;  %v2057_v6 = vld [vmem:[%s869_s16] ss:$0 sm:$0xff] }
  0xad   : > { %2264 = vmatpush3.bf16.msra.mxu1 %v2394_v5 }
  0xae   : > { %2265 = vmatprep.subr.bf16.mxu1 %v2399_v8 }
  0xaf   : > { %2238 = vmatpush3.bf16.msra.mxu0 %v2396_v7 }
  0xb0   : > { %2239 = vmatprep.subr.bf16.mxu0 %v2404_v11 }
  0xb1   : > { %2266 = vmatpush3.bf16.msra.mxu1 %v2401_v9 }
  0xb2   : > { %2267 = vmatprep.subr.bf16.mxu1 %v2407_v14 }
  0xb3   : > { %2240 = vmatpush3.bf16.msra.mxu0 %v2406_v13 }
  0xb4   : > { %2241 = vmatprep.subr.bf16.mxu0 %v2409_v16 }
  0xb5   : > { %2268 = vmatpush3.bf16.msra.mxu1 %v2408_v15 }
  0xb6   : > { %2269 = vmatprep.subr.bf16.mxu1 %v2411_v18 }
  0xb7   : > { %2242 = vmatpush3.bf16.msra.mxu0 %v2410_v17 }
  0xb8   : > { %2243 = vmatprep.subr.bf16.mxu0 %v2413_v20 }
  0xb9   : > { %2270 = vmatpush3.bf16.msra.mxu1 %v2412_v19 }
  0xba   : > { %2271 = vmatprep.subr.bf16.mxu1 %v2415_v22 }
  0xbb   : > { %2244 = vmatpush3.bf16.msra.mxu0 %v2414_v21 }
  0xbc   : > { %2295 = vmatprep.subr.bf16.mxu0 %v2420_v26 }
  0xbd   : > { %2272 = vmatpush3.bf16.msra.mxu1 %v2419_v25 }
  0xbe   : > { %1703 = vmatmul.mubr.bf16.vlgmr.msra.gmra.mxu0 %v2416_v23 }
  0xbf   : > { %2296 = vmatpush3.bf16.msra.mxu0 %v2420_v26  ;;  %1710 = vmatprep.mubr.bf16.mxu0 %v2425_v30 }
  0xc0   : > { %1752 = vmatmul.mubr.bf16.vlgmr.msra.gmra.mxu1 %v2421_v27  ;;  %2297 = vmatprep.subr.bf16.mxu0 %v2424_v29 }
  0xc1   : > { %1759 = vmatprep.mubr.bf16.mxu1 %v2429_v33 }
  0xc3   : > { %2298 = vmatpush3.bf16.msra.mxu0 %v2424_v29 }
  0xc4   : > { %2299 = vmatprep.subr.bf16.mxu0 %v2428_v32 }
  0xc6   : > { %1711 = vmatmul.mubr.bf16.gmra.mxu0 %v2427_v31 }
  0xc7   : > { %2300 = vmatpush3.bf16.msra.mxu0 %v2428_v32  ;;  %2311 = vmatprep.mubr.bf16.mxu0 %v2437_v37 }
  0xc8   : > { %1760 = vmatmul.mubr.bf16.gmra.mxu1 %v2431_v34  ;;  %2301 = vmatprep.subr.bf16.mxu0 %v2432_v35 }
  0xcb   : > { %2302 = vmatpush3.bf16.msra.mxu0 %v2432_v35 }
  0xcc   : > { %2303 = vmatprep.subr.bf16.mxu0 %v2433_v36 }
  0xcf   : > { %2304 = vmatpush3.bf16.msra.mxu0 %v2433_v36 }
  0xd0   : > { %2305 = vmatprep.subr.bf16.mxu0 %v2434_v38 }
  0xd3   : > { %2306 = vmatpush3.bf16.msra.mxu0 %v2434_v38 }
  0xd4   : > { %2307 = vmatprep.subr.bf16.mxu0 %v2435_v39 }
  0xd7   : > { %2308 = vmatpush3.bf16.msra.mxu0 %v2435_v39 }
  0xd8   : > { %2309 = vmatprep.subr.bf16.mxu0 %v2436_v40 }
  0xdb   : > { %2310 = vmatpush3.bf16.msra.mxu0 %v2436_v40 }
  0xde   : > { %2312 = vmatmul.mubr.bf16.vlgmr.msra.gmra.mxu0 %v2438_v41 }
 0x15e   : > { %v2189_v42 = vpop.f32.mrf.mxu0 }
 0x160   : > { %v2190_v43 = vpop.f32.mrf.mxu0  ;;  %v2217_v44 = vpop.f32.mrf.mxu1 }
 0x161   : > { %v2191_v3 = vadd.f32 %v2190_v43, %v2189_v42 }
 0x162   : > { %v2192_v45 = vpop.f32.mrf.mxu0  ;;  %v2218_v46 = vpop.f32.mrf.mxu1 }
 0x163   : > { %v1607_v9 = vadd.f32 %v2191_v3, %v2057_v6  ;;  %v2219_v10 = vadd.f32 %v2218_v46, %v2217_v44 }
 0x164   : > { %v2193_v47 = vpop.f32.mrf.mxu0  ;;  %v2220_v48 = vpop.f32.mrf.mxu1 }
 0x165   : > { %v2194_v7 = vadd.f32 %v2193_v47, %v2192_v45  ;;  %v1656_v20 = vadd.f32 %v2219_v10, %v1607_v9 }
 0x166   : > { %v2195_v49 = vpop.f32.mrf.mxu0  ;;  %v2221_v50 = vpop.f32.mrf.mxu1 }
 0x167   : > { %v1610_v13 = vadd.f32 %v2194_v7, %v2057_v6  ;;  %v2222_v14 = vadd.f32 %v2221_v50, %v2220_v48 }
 0x168   : > { %v2196_v51 = vpop.f32.mrf.mxu0  ;;  %v2223_v52 = vpop.f32.mrf.mxu1 }
 0x169   : > { %v2197_v8 = vadd.f32 %v2196_v51, %v2195_v49  ;;  %v1659_v23 = vadd.f32 %v2222_v14, %v1610_v13 }
 0x16a   : > { %v2198_v53 = vpop.f32.mrf.mxu0  ;;  %v2224_v54 = vpop.f32.mrf.mxu1 }
 0x16b   : > { %v1615_v16 = vadd.f32 %v2197_v8, %v2057_v6  ;;  %v2225_v17 = vadd.f32 %v2224_v54, %v2223_v52 }
 0x16c   : > { %v2199_v55 = vpop.f32.mrf.mxu0  ;;  %v2226_v56 = vpop.f32.mrf.mxu1 }
 0x16d   : > { %v2200_v15 = vadd.f32 %v2199_v55, %v2198_v53  ;;  %v1664_v27 = vadd.f32 %v2225_v17, %v1615_v16  ;;  %v2148_v17 = vld [vmem:[%s872_s23] ss:$0 sm:$0xff] }
 0x16e   : > { %v2227_v58 = vpop.f32.mrf.mxu1 }
 0x16f   : > { %v1618_v24 = vadd.f32 %v2200_v15, %v2057_v6  ;;  %v2228_v25 = vadd.f32 %v2227_v58, %v2226_v56 }
 0x171   : > { %v1667_v36 = vadd.f32 %v2228_v25, %v1618_v24 }
 0x17e   : > { %v2245_v57 = vpop.f32.mrf.mxu0 }
 0x180   : > { %v2246_v59 = vpop.f32.mrf.mxu0  ;;  %v2273_v60 = vpop.f32.mrf.mxu1 }
 0x181   : > { %v2247_v18 = vadd.f32 %v2246_v59, %v2245_v57 }
 0x182   : > { %v2248_v61 = vpop.f32.mrf.mxu0  ;;  %v2274_v62 = vpop.f32.mrf.mxu1 }
 0x183   : > { %v1705_v28 = vadd.f32 %v2247_v18, %v1656_v20  ;;  %v2275_v30 = vadd.f32 %v2274_v62, %v2273_v60 }
 0x184   : > { %v2249_v63 = vpop.f32.mrf.mxu0  ;;  %v2276_v0 = vpop.f32.mrf.mxu1 }
 0x185   : > { %v2250_v19 = vadd.f32 %v2249_v63, %v2248_v61  ;;  %v1754_v42 = vadd.f32 %v2275_v30, %v1705_v28 }
 0x186   : > { %v2251_v1 = vpop.f32.mrf.mxu0  ;;  %v2277_v2 = vpop.f32.mrf.mxu1 }
 0x187   : > { %v1708_v31 = vadd.f32 %v2250_v19, %v1659_v23  ;;  %v2278_v32 = vadd.f32 %v2277_v2, %v2276_v0 }
 0x188   : > { %v2252_v4 = vpop.f32.mrf.mxu0  ;;  %v2279_v5 = vpop.f32.mrf.mxu1 }
 0x189   : > { %v2253_v26 = vadd.f32 %v2252_v4, %v2251_v1  ;;  %v1757_v43 = vadd.f32 %v2278_v32, %v1708_v31 }
 0x18a   : > { %v2254_v11 = vpop.f32.mrf.mxu0  ;;  %v2280_v12 = vpop.f32.mrf.mxu1 }
 0x18b   : > { %v1713_v37 = vadd.f32 %v2253_v26, %v1664_v27  ;;  %v2281_v38 = vadd.f32 %v2280_v12, %v2279_v5 }
 0x18c   : > { %v2255_v21 = vpop.f32.mrf.mxu0  ;;  %v2282_v22 = vpop.f32.mrf.mxu1 }
 0x18d   : > { %v2256_v33 = vadd.f32 %v2255_v21, %v2254_v11  ;;  %v1762_v45 = vadd.f32 %v2281_v38, %v1713_v37 }
 0x18e   : > { %v2283_v34 = vpop.f32.mrf.mxu1 }
 0x18f   : > { %v1716_v40 = vadd.f32 %v2256_v33, %v1667_v36  ;;  %v2284_v41 = vadd.f32 %v2283_v34, %v2282_v22  ;;  %v2149_v22 = vld [vmem:[%s875_s28] ss:$0 sm:$0xff] }
 0x191   : > { %v1765_v49 = vadd.f32 %v2284_v41, %v1716_v40 }
 0x19e   : > { %v2313_v29 = vpop.f32.mrf.mxu0 }
 0x19f   : > { %v1811_v48 = vadd.f32 %v2313_v29, %v1762_v45 }
 0x1a0   : > { %v1802_v35 = vpop.f32.mrf.mxu0 }
 0x1a1   : > { %v1803_v46 = vadd.f32 %v1802_v35, %v1754_v42 }
 0x1a2   : > { %v2314_v39 = vpop.f32.mrf.mxu0 }
 0x1a3   : > { %v1814_v51 = vadd.f32 %v2314_v39, %v1765_v49 }
 0x1a4   : > { %v1805_v44 = vpop.f32.mrf.mxu0 }
 0x1a5   : > { %v1806_v47 = vadd.f32 %v1805_v44, %v1757_v43 }
 0x1a7   : > { %v1817_v50 = vadd.f32 %v1806_v47, %v1803_v46 }
 0x1a9   : > { %v1818_v52 = vadd.f32 %v1817_v50, %v1811_v48 }
 0x1ab   : > { %v1819_v53 = vadd.f32 %v1818_v52, %v1814_v51 }
 0x1ad   : > { %v1820_v54 = vrot.slane %v1819_v53, 4 }
 0x1af   : > { %v1821_v55 = vadd.f32 %v1820_v54, %v1819_v53 }
 0x1b1   : > { %v1822_v56 = vrot.slane %v1821_v55, 2 }
 0x1b3   : > { %v1823_v57 = vadd.f32 %v1822_v56, %v1821_v55 }
 0x1b5   : > { %v1824_v58 = vrot.slane %v1823_v57, 1 }
 0x1b7   : > { %v1825_v59 = vadd.f32 %v1824_v58, %v1823_v57 }
 0x1b9   : > { %v1826_v60 = vmul.f32 0.03125, %v1825_v59 }
 0x1bb   : > { %v1827_v61 = vsub.f32 %v1803_v46, %v1826_v60  ;;  %v1828_v62 = vsub.f32 %v1806_v47, %v1826_v60  ;;  %v1829_v63 = vsub.f32 %v1811_v48, %v1826_v60  ;;  %v1830_v0 = vsub.f32 %v1814_v51, %v1826_v60 }
 0x1bd   : > { %v1831_v1 = vmul.f32 %v1827_v61, %v1827_v61  ;;  %v1832_v2 = vmul.f32 %v1828_v62, %v1828_v62  ;;  %v1833_v3 = vmul.f32 %v1829_v63, %v1829_v63  ;;  %v1834_v5 = vmul.f32 %v1830_v0, %v1830_v0 }
 0x1bf   : > { %v1835_v4 = vadd.f32 %v1832_v2, %v1831_v1 }
 0x1c1   : > { %v1836_v6 = vadd.f32 %v1835_v4, %v1833_v3 }
 0x1c3   : > { %v1837_v7 = vadd.f32 %v1836_v6, %v1834_v5 }
 0x1c5   : > { %v1838_v8 = vrot.slane %v1837_v7, 4 }
 0x1c7   : > { %v1839_v9 = vadd.f32 %v1838_v8, %v1837_v7 }
 0x1c9   : > { %v1840_v10 = vrot.slane %v1839_v9, 2 }
 0x1cb   : > { %v1841_v11 = vadd.f32 %v1840_v10, %v1839_v9 }
 0x1cd   : > { %v1842_v12 = vrot.slane %v1841_v11, 1 }
 0x1cf   : > { %v1843_v13 = vadd.f32 %v1842_v12, %v1841_v11 }
 0x1d1   : > { %v1844_v14 = vmul.f32 0.03125, %v1843_v13 }
 0x1d3   : > { %v1845_v15 = vadd.f32 1e-05, %v1844_v14 }
 0x1d5   : > { %2439 = vrsqrt.f32 %v1845_v15 }
 0x1e2   : > { %v2440_v16 = vpop.eup %2439 }
 0x1e3   : > { %v1847_v18 = vmul.f32 %v2440_v16, %v1827_v61  ;;  %v1848_v19 = vmul.f32 %v2440_v16, %v1828_v62  ;;  %v1849_v20 = vmul.f32 %v2440_v16, %v1829_v63  ;;  %v1850_v21 = vmul.f32 %v2440_v16, %v1830_v0 }
 0x1e5   : > { %v1858_v23 = vmul.f32 %v2148_v17, %v1847_v18  ;;  %v1859_v24 = vmul.f32 %v2148_v17, %v1848_v19  ;;  %v1860_v25 = vmul.f32 %v2148_v17, %v1849_v20  ;;  %v1861_v26 = vmul.f32 %v2148_v17, %v1850_v21 }
 0x1e7   : > { %v1869_v27 = vadd.f32 %v2149_v22, %v1858_v23  ;;  %v1870_v28 = vadd.f32 %v2149_v22, %v1859_v24  ;;  %v1871_v29 = vadd.f32 %v2149_v22, %v1860_v25  ;;  %v1872_v30 = vadd.f32 %v2149_v22, %v1861_v26 }
 0x1e9   : > { %vm1873_vm0 = vcmp.ge.f32.partialorder %v1869_v27, 0.0  ;;  %vm1874_vm1 = vcmp.ge.f32.partialorder %v1870_v28, 0.0  ;;  %vm1875_vm2 = vcmp.ge.f32.partialorder %v1871_v29, 0.0  ;;  %vm1876_vm3 = vcmp.ge.f32.partialorder %v1872_v30, 0.0 }
 0x1ea   : > { %v1877_v31 = vmul.f32 0.01, %v1869_v27  ;;  %v1878_v32 = vmul.f32 0.01, %v1870_v28  ;;  %v1879_v33 = vmul.f32 0.01, %v1871_v29 }
 0x1eb   : > { %v1880_v34 = vmul.f32 0.01, %v1872_v30 }
 0x1ec   : > { %v1881_v35 = vsel %vm1873_vm0, %v1869_v27, %v1877_v31  ;;  %v1882_v36 = vsel %vm1874_vm1, %v1870_v28, %v1878_v32  ;;  %v1883_v37 = vsel %vm1875_vm2, %v1871_v29, %v1879_v33  ;;  %1911 = sbr.rel (!%p2526_p5) target bundleno = 506 (0x1fa), region = 85 }
 0x1ed   : > { %v1884_v38 = vsel %vm1876_vm3, %v1872_v30, %v1880_v34  ;;  %v2165_v39 = vpack.c.bf16 %v1882_v36, %v1881_v35 }
 0x1ee   : > { %v2170_v40 = vpack.c.bf16 %v1884_v38, %v1883_v37 }
 0x1ef   : > { %2166 = vst [vmem:[%s866_s30] sm:$0xff] %v2165_v39  }
 0x1f0   : > { %2172 = vst [vmem:[%s866_s30 + $0x8] sm:$0xff] %v2170_v40  }
 0x1f6   : > { %v1930_v41 = vld [vmem:[%s866_s30] sm:$0xf]  ;;  %v1932_v42 = vld [vmem:[%s866_s30 + $0x4] sm:$0xf] }
 0x1f7   : > { %v1934_v43 = vld [vmem:[%s866_s30 + $0x8] sm:$0xf]  ;;  %v1936_v44 = vld [vmem:[%s866_s30 + $0xc] sm:$0xf]  ;;  %1931 = vst [vmem:[%s1913_s7] sm:$0xf] %v1930_v41 }
 0x1f8   : > { %1933 = vst [vmem:[%s1913_s7 + $0x8] sm:$0xf] %v1932_v42  ;;  %1935 = vst [vmem:[%s1913_s7 + $0x10] sm:$0xf] %v1934_v43 }
 0x1f9   : > { %1937 = vst [vmem:[%s1913_s7 + $0x18] sm:$0xf] %v1936_v44 }
 0x1fa PF: > { %p12_p11 = scmp.ge.s32.totalorder %s2514_s22, 4   ;;  %s3002_s18 = smov %s2459_s19 }
 0x1fb   : > { %s3003_s19 = smov %s2524_s25  ;;  %s3004_s20 = smov %s2514_s22 }
 0x1fc   :  { %14 = sbr.rel (!%p12_p11) target bundleno = 2 (0x2), region = 166 }

// kernel: discriminator_forward.8
= control target key start
LH: loop header
LB: loop body
LE: loop exit
PB: predicated region body
PF: predicated region fallthrough
CT: control target
= control target key end

     0   :  { %s5145_s18 = smov 0   ;;  %s5147_s19 = smov 0   ;;  %s6369_s0 = inlined_call_operand.vmem [shape: bf16[32,2304], index: 0, kind: input, shape index: {}]   ;;  %s6370_s1 = inlined_call_operand.vmem [shape: bf16[2304,512], index: 1, kind: input, shape index: {}]   ;;  %s6371_s2 = inlined_call_operand.vmem [shape: f32[1,512], index: 2, kind: input, shape index: {}]   ;;  %s6372_s3 = inlined_call_operand.vmem [shape: f32[1,512], index: 3, kind: input, shape index: {}]   ;;  %s6373_s4 = inlined_call_operand.vmem [shape: f32[1,512], index: 4, kind: input, shape index: {}]   ;;  %s6374_s5 = inlined_call_operand.vmem [shape: bf16[32,512], index: 5, kind: output, shape index: {}]  }
   0x1   :  { %s5149_s20 = smov 0  }
   0x2 LB: > { %s5161_s21 = sadd.s32 4294967295, %s5113_s20   ;;  %s5164_s22 = sadd.s32 1, %s5113_s20   ;;  %s5113_s20 = sphi %s5149_s20, %s6396_s20   ;;  %s5109_s19 = sphi %s5147_s19, %s6395_s19   ;;  %s5105_s18 = sphi %s5145_s18, %s6394_s18  }
   0x3   : > { %s40_s23 = ssub.s32 %s5113_s20, %s5164_s22  ;;  %s43_s24 = sadd.s32 1, %s5109_s19 }
   0x4   : > { %p41_p0 = scmp.eq.s32.totalorder %s40_s23, 0  ;;  %p50_p1 = scmp.ne.s32.totalorder %s5109_s19, %s5105_s18 }
   0x5   : > { %p51_p2 = scmp.eq.s32.totalorder %s5113_s20, 0  ;;  %p158_p3 = scmp.eq.s32.totalorder %s5161_s21, 1 }
   0x6   : > { %s5174_s25 = scalar_select %p41_p0, %s5109_s19, %s43_s24  }
   0x7   : > { %p52_p4 = por %p51_p2, %p50_p1  ;;  %p5176_p5 = por %p158_p3, %p50_p1 }
   0x8   : > { %p4196_p6 = scmp.ge.s32.totalorder %s5113_s20, 2 }
   0xa   : > { %183 = sbr.rel (%p4196_p6) target bundleno = 163 (0xa3), region = 20 }
   0xf   : > { %186 = sbr.rel (!%p52_p4) target bundleno = 163 (0xa3), region = 24  ;;  %s188_s27 = sand.u32 (%p52_p4), 1, %s5109_s19  }
  0x10   : > { %s4537_s28 = sshll.u32 (%p52_p4), %s5113_s20, 3  ;;  %s4575_s29 = smul.u32 (%p52_p4), 2304, %s188_s27 }
  0x11   : > { %s5186_s7 = scalar_lea.vmem (%p52_p4), %s6370_s1, %s4537_s28 }
  0x12   : > { %v796_v0 = vld [vmem:[%s5186_s7] sm:$0xff] (%p52_p4)  ;;  %v798_v1 = vld [vmem:[%s5186_s7 + $0x10] sm:$0xff] (%p52_p4)  ;;  %s5194_s8 = scalar_lea.vmem (%p52_p4), [#allocation2], %s4575_s29 }
  0x13   : > { %v800_v2 = vld [vmem:[%s5186_s7 + $0x20] sm:$0xff] (%p52_p4)  ;;  %v802_v3 = vld [vmem:[%s5186_s7 + $0x30] sm:$0xff] (%p52_p4)  ;;  %797 = vst [vmem:[%s5194_s8] sm:$0xff] (%p52_p4), %v796_v0  ;;  %799 = vst [vmem:[%s5194_s8 + $0x8] sm:$0xff] (%p52_p4), %v798_v1 }
  0x14   : > { %v804_v4 = vld [vmem:[%s5186_s7 + $0x40] sm:$0xff]  ;;  %v806_v5 = vld [vmem:[%s5186_s7 + $0x50] sm:$0xff]  ;;  %801 = vst [vmem:[%s5194_s8 + $0x10] sm:$0xff] %v800_v2  ;;  %803 = vst [vmem:[%s5194_s8 + $0x18] sm:$0xff] %v802_v3 }
  0x15   : > { %805 = vst [vmem:[%s5194_s8 + $0x20] sm:$0xff] %v804_v4  ;;  %807 = vst [vmem:[%s5194_s8 + $0x28] sm:$0xff] %v806_v5  ;;  %v808_v6 = vld [vmem:[%s5186_s7 + $0x60] sm:$0xff]  ;;  %v810_v7 = vld [vmem:[%s5186_s7 + $0x70] sm:$0xff] }
  0x16   : > { %v812_v8 = vld [vmem:[%s5186_s7 + $0x80] sm:$0xff]  ;;  %809 = vst [vmem:[%s5194_s8 + $0x30] sm:$0xff] %v808_v6  ;;  %811 = vst [vmem:[%s5194_s8 + $0x38] sm:$0xff] %v810_v7  ;;  %v814_v9 = vld [vmem:[%s5186_s7 + $0x90] sm:$0xff] }
  0x17   : > { %813 = vst [vmem:[%s5194_s8 + $0x40] sm:$0xff] %v812_v8  ;;  %v816_v10 = vld [vmem:[%s5186_s7 + $0xa0] sm:$0xff]  ;;  %v818_v11 = vld [vmem:[%s5186_s7 + $0xb0] sm:$0xff]  ;;  %815 = vst [vmem:[%s5194_s8 + $0x48] sm:$0xff] %v814_v9 }
  0x18   : > { %817 = vst [vmem:[%s5194_s8 + $0x50] sm:$0xff] %v816_v10  ;;  %819 = vst [vmem:[%s5194_s8 + $0x58] sm:$0xff] %v818_v11  ;;  %v820_v12 = vld [vmem:[%s5186_s7 + $0xc0] sm:$0xff]  ;;  %v822_v13 = vld [vmem:[%s5186_s7 + $0xd0] sm:$0xff] }
  0x19   : > { %v824_v14 = vld [vmem:[%s5186_s7 + $0xe0] sm:$0xff]  ;;  %821 = vst [vmem:[%s5194_s8 + $0x60] sm:$0xff] %v820_v12  ;;  %823 = vst [vmem:[%s5194_s8 + $0x68] sm:$0xff] %v822_v13  ;;  %v826_v15 = vld [vmem:[%s5186_s7 + $0xf0] sm:$0xff] }
  0x1a   : > { %825 = vst [vmem:[%s5194_s8 + $0x70] sm:$0xff] %v824_v14  ;;  %v828_v16 = vld [vmem:[%s5186_s7 + $0x100] sm:$0xff]  ;;  %v830_v17 = vld [vmem:[%s5186_s7 + $0x110] sm:$0xff]  ;;  %827 = vst [vmem:[%s5194_s8 + $0x78] sm:$0xff] %v826_v15 }
  0x1b   : > { %829 = vst [vmem:[%s5194_s8 + $0x80] sm:$0xff] %v828_v16  ;;  %831 = vst [vmem:[%s5194_s8 + $0x88] sm:$0xff] %v830_v17  ;;  %v832_v18 = vld [vmem:[%s5186_s7 + $0x120] sm:$0xff]  ;;  %v834_v19 = vld [vmem:[%s5186_s7 + $0x130] sm:$0xff] }
  0x1c   : > { %v836_v20 = vld [vmem:[%s5186_s7 + $0x140] sm:$0xff]  ;;  %833 = vst [vmem:[%s5194_s8 + $0x90] sm:$0xff] %v832_v18  ;;  %835 = vst [vmem:[%s5194_s8 + $0x98] sm:$0xff] %v834_v19  ;;  %v838_v21 = vld [vmem:[%s5186_s7 + $0x150] sm:$0xff] }
  0x1d   : > { %837 = vst [vmem:[%s5194_s8 + $0xa0] sm:$0xff] %v836_v20  ;;  %v840_v22 = vld [vmem:[%s5186_s7 + $0x160] sm:$0xff]  ;;  %v842_v23 = vld [vmem:[%s5186_s7 + $0x170] sm:$0xff]  ;;  %839 = vst [vmem:[%s5194_s8 + $0xa8] sm:$0xff] %v838_v21 }
  0x1e   : > { %841 = vst [vmem:[%s5194_s8 + $0xb0] sm:$0xff] %v840_v22  ;;  %843 = vst [vmem:[%s5194_s8 + $0xb8] sm:$0xff] %v842_v23  ;;  %v844_v24 = vld [vmem:[%s5186_s7 + $0x180] sm:$0xff]  ;;  %v846_v25 = vld [vmem:[%s5186_s7 + $0x190] sm:$0xff] }
  0x1f   : > { %v848_v26 = vld [vmem:[%s5186_s7 + $0x1a0] sm:$0xff]  ;;  %845 = vst [vmem:[%s5194_s8 + $0xc0] sm:$0xff] %v844_v24  ;;  %847 = vst [vmem:[%s5194_s8 + $0xc8] sm:$0xff] %v846_v25  ;;  %v850_v27 = vld [vmem:[%s5186_s7 + $0x1b0] sm:$0xff] }
  0x20   : > { %849 = vst [vmem:[%s5194_s8 + $0xd0] sm:$0xff] %v848_v26  ;;  %v852_v28 = vld [vmem:[%s5186_s7 + $0x1c0] sm:$0xff]  ;;  %v854_v29 = vld [vmem:[%s5186_s7 + $0x1d0] sm:$0xff]  ;;  %851 = vst [vmem:[%s5194_s8 + $0xd8] sm:$0xff] %v850_v27 }
  0x21   : > { %853 = vst [vmem:[%s5194_s8 + $0xe0] sm:$0xff] %v852_v28  ;;  %855 = vst [vmem:[%s5194_s8 + $0xe8] sm:$0xff] %v854_v29  ;;  %v856_v30 = vld [vmem:[%s5186_s7 + $0x1e0] sm:$0xff]  ;;  %v858_v31 = vld [vmem:[%s5186_s7 + $0x1f0] sm:$0xff] }
  0x22   : > { %v860_v32 = vld [vmem:[%s5186_s7 + $0x200] sm:$0xff]  ;;  %857 = vst [vmem:[%s5194_s8 + $0xf0] sm:$0xff] %v856_v30  ;;  %859 = vst [vmem:[%s5194_s8 + $0xf8] sm:$0xff] %v858_v31  ;;  %v862_v33 = vld [vmem:[%s5186_s7 + $0x210] sm:$0xff] }
  0x23   : > { %861 = vst [vmem:[%s5194_s8 + $0x100] sm:$0xff] %v860_v32  ;;  %v864_v34 = vld [vmem:[%s5186_s7 + $0x220] sm:$0xff]  ;;  %v866_v35 = vld [vmem:[%s5186_s7 + $0x230] sm:$0xff]  ;;  %863 = vst [vmem:[%s5194_s8 + $0x108] sm:$0xff] %v862_v33 }
  0x24   : > { %865 = vst [vmem:[%s5194_s8 + $0x110] sm:$0xff] %v864_v34  ;;  %867 = vst [vmem:[%s5194_s8 + $0x118] sm:$0xff] %v866_v35  ;;  %v868_v36 = vld [vmem:[%s5186_s7 + $0x240] sm:$0xff]  ;;  %v870_v37 = vld [vmem:[%s5186_s7 + $0x250] sm:$0xff] }
  0x25   : > { %v872_v38 = vld [vmem:[%s5186_s7 + $0x260] sm:$0xff]  ;;  %869 = vst [vmem:[%s5194_s8 + $0x120] sm:$0xff] %v868_v36  ;;  %871 = vst [vmem:[%s5194_s8 + $0x128] sm:$0xff] %v870_v37  ;;  %v874_v39 = vld [vmem:[%s5186_s7 + $0x270] sm:$0xff] }
  0x26   : > { %873 = vst [vmem:[%s5194_s8 + $0x130] sm:$0xff] %v872_v38  ;;  %v876_v40 = vld [vmem:[%s5186_s7 + $0x280] sm:$0xff]  ;;  %v878_v41 = vld [vmem:[%s5186_s7 + $0x290] sm:$0xff]  ;;  %875 = vst [vmem:[%s5194_s8 + $0x138] sm:$0xff] %v874_v39 }
  0x27   : > { %877 = vst [vmem:[%s5194_s8 + $0x140] sm:$0xff] %v876_v40  ;;  %879 = vst [vmem:[%s5194_s8 + $0x148] sm:$0xff] %v878_v41  ;;  %v880_v42 = vld [vmem:[%s5186_s7 + $0x2a0] sm:$0xff]  ;;  %v882_v43 = vld [vmem:[%s5186_s7 + $0x2b0] sm:$0xff] }
  0x28   : > { %v884_v44 = vld [vmem:[%s5186_s7 + $0x2c0] sm:$0xff]  ;;  %881 = vst [vmem:[%s5194_s8 + $0x150] sm:$0xff] %v880_v42  ;;  %883 = vst [vmem:[%s5194_s8 + $0x158] sm:$0xff] %v882_v43  ;;  %v886_v45 = vld [vmem:[%s5186_s7 + $0x2d0] sm:$0xff] }
  0x29   : > { %885 = vst [vmem:[%s5194_s8 + $0x160] sm:$0xff] %v884_v44  ;;  %v888_v46 = vld [vmem:[%s5186_s7 + $0x2e0] sm:$0xff]  ;;  %v890_v47 = vld [vmem:[%s5186_s7 + $0x2f0] sm:$0xff]  ;;  %887 = vst [vmem:[%s5194_s8 + $0x168] sm:$0xff] %v886_v45 }
  0x2a   : > { %889 = vst [vmem:[%s5194_s8 + $0x170] sm:$0xff] %v888_v46  ;;  %891 = vst [vmem:[%s5194_s8 + $0x178] sm:$0xff] %v890_v47  ;;  %v892_v48 = vld [vmem:[%s5186_s7 + $0x300] sm:$0xff]  ;;  %v894_v49 = vld [vmem:[%s5186_s7 + $0x310] sm:$0xff] }
  0x2b   : > { %v896_v50 = vld [vmem:[%s5186_s7 + $0x320] sm:$0xff]  ;;  %893 = vst [vmem:[%s5194_s8 + $0x180] sm:$0xff] %v892_v48  ;;  %895 = vst [vmem:[%s5194_s8 + $0x188] sm:$0xff] %v894_v49  ;;  %v898_v51 = vld [vmem:[%s5186_s7 + $0x330] sm:$0xff] }
  0x2c   : > { %897 = vst [vmem:[%s5194_s8 + $0x190] sm:$0xff] %v896_v50  ;;  %v900_v52 = vld [vmem:[%s5186_s7 + $0x340] sm:$0xff]  ;;  %v902_v53 = vld [vmem:[%s5186_s7 + $0x350] sm:$0xff]  ;;  %899 = vst [vmem:[%s5194_s8 + $0x198] sm:$0xff] %v898_v51 }
  0x2d   : > { %901 = vst [vmem:[%s5194_s8 + $0x1a0] sm:$0xff] %v900_v52  ;;  %903 = vst [vmem:[%s5194_s8 + $0x1a8] sm:$0xff] %v902_v53  ;;  %v904_v54 = vld [vmem:[%s5186_s7 + $0x360] sm:$0xff]  ;;  %v906_v55 = vld [vmem:[%s5186_s7 + $0x370] sm:$0xff] }
  0x2e   : > { %v908_v56 = vld [vmem:[%s5186_s7 + $0x380] sm:$0xff]  ;;  %905 = vst [vmem:[%s5194_s8 + $0x1b0] sm:$0xff] %v904_v54  ;;  %907 = vst [vmem:[%s5194_s8 + $0x1b8] sm:$0xff] %v906_v55  ;;  %v910_v57 = vld [vmem:[%s5186_s7 + $0x390] sm:$0xff] }
  0x2f   : > { %909 = vst [vmem:[%s5194_s8 + $0x1c0] sm:$0xff] %v908_v56  ;;  %v912_v58 = vld [vmem:[%s5186_s7 + $0x3a0] sm:$0xff]  ;;  %v914_v59 = vld [vmem:[%s5186_s7 + $0x3b0] sm:$0xff]  ;;  %911 = vst [vmem:[%s5194_s8 + $0x1c8] sm:$0xff] %v910_v57 }
  0x30   : > { %913 = vst [vmem:[%s5194_s8 + $0x1d0] sm:$0xff] %v912_v58  ;;  %915 = vst [vmem:[%s5194_s8 + $0x1d8] sm:$0xff] %v914_v59  ;;  %v916_v60 = vld [vmem:[%s5186_s7 + $0x3c0] sm:$0xff]  ;;  %v918_v61 = vld [vmem:[%s5186_s7 + $0x3d0] sm:$0xff] }
  0x31   : > { %v920_v62 = vld [vmem:[%s5186_s7 + $0x3e0] sm:$0xff]  ;;  %917 = vst [vmem:[%s5194_s8 + $0x1e0] sm:$0xff] %v916_v60  ;;  %919 = vst [vmem:[%s5194_s8 + $0x1e8] sm:$0xff] %v918_v61  ;;  %v922_v63 = vld [vmem:[%s5186_s7 + $0x3f0] sm:$0xff] }
  0x32   : > { %921 = vst [vmem:[%s5194_s8 + $0x1f0] sm:$0xff] %v920_v62  ;;  %v924_v0 = vld [vmem:[%s5186_s7 + $0x400] sm:$0xff]  ;;  %v926_v1 = vld [vmem:[%s5186_s7 + $0x410] sm:$0xff]  ;;  %923 = vst [vmem:[%s5194_s8 + $0x1f8] sm:$0xff] %v922_v63 }
  0x33   : > { %925 = vst [vmem:[%s5194_s8 + $0x200] sm:$0xff] %v924_v0  ;;  %927 = vst [vmem:[%s5194_s8 + $0x208] sm:$0xff] %v926_v1  ;;  %v928_v2 = vld [vmem:[%s5186_s7 + $0x420] sm:$0xff]  ;;  %v930_v3 = vld [vmem:[%s5186_s7 + $0x430] sm:$0xff] }
  0x34   : > { %v932_v4 = vld [vmem:[%s5186_s7 + $0x440] sm:$0xff]  ;;  %929 = vst [vmem:[%s5194_s8 + $0x210] sm:$0xff] %v928_v2  ;;  %931 = vst [vmem:[%s5194_s8 + $0x218] sm:$0xff] %v930_v3  ;;  %v934_v5 = vld [vmem:[%s5186_s7 + $0x450] sm:$0xff] }
  0x35   : > { %933 = vst [vmem:[%s5194_s8 + $0x220] sm:$0xff] %v932_v4  ;;  %v936_v6 = vld [vmem:[%s5186_s7 + $0x460] sm:$0xff]  ;;  %v938_v7 = vld [vmem:[%s5186_s7 + $0x470] sm:$0xff]  ;;  %935 = vst [vmem:[%s5194_s8 + $0x228] sm:$0xff] %v934_v5 }
  0x36   : > { %937 = vst [vmem:[%s5194_s8 + $0x230] sm:$0xff] %v936_v6  ;;  %939 = vst [vmem:[%s5194_s8 + $0x238] sm:$0xff] %v938_v7  ;;  %v940_v8 = vld [vmem:[%s5186_s7 + $0x480] sm:$0xff]  ;;  %v942_v9 = vld [vmem:[%s5186_s7 + $0x490] sm:$0xff] }
  0x37   : > { %v944_v10 = vld [vmem:[%s5186_s7 + $0x4a0] sm:$0xff]  ;;  %941 = vst [vmem:[%s5194_s8 + $0x240] sm:$0xff] %v940_v8  ;;  %943 = vst [vmem:[%s5194_s8 + $0x248] sm:$0xff] %v942_v9  ;;  %v946_v11 = vld [vmem:[%s5186_s7 + $0x4b0] sm:$0xff] }
  0x38   : > { %945 = vst [vmem:[%s5194_s8 + $0x250] sm:$0xff] %v944_v10  ;;  %v948_v12 = vld [vmem:[%s5186_s7 + $0x4c0] sm:$0xff]  ;;  %v950_v13 = vld [vmem:[%s5186_s7 + $0x4d0] sm:$0xff]  ;;  %947 = vst [vmem:[%s5194_s8 + $0x258] sm:$0xff] %v946_v11 }
  0x39   : > { %949 = vst [vmem:[%s5194_s8 + $0x260] sm:$0xff] %v948_v12  ;;  %951 = vst [vmem:[%s5194_s8 + $0x268] sm:$0xff] %v950_v13  ;;  %v952_v14 = vld [vmem:[%s5186_s7 + $0x4e0] sm:$0xff]  ;;  %v954_v15 = vld [vmem:[%s5186_s7 + $0x4f0] sm:$0xff] }
  0x3a   : > { %v956_v16 = vld [vmem:[%s5186_s7 + $0x500] sm:$0xff]  ;;  %953 = vst [vmem:[%s5194_s8 + $0x270] sm:$0xff] %v952_v14  ;;  %955 = vst [vmem:[%s5194_s8 + $0x278] sm:$0xff] %v954_v15  ;;  %v958_v17 = vld [vmem:[%s5186_s7 + $0x510] sm:$0xff] }
  0x3b   : > { %957 = vst [vmem:[%s5194_s8 + $0x280] sm:$0xff] %v956_v16  ;;  %v960_v18 = vld [vmem:[%s5186_s7 + $0x520] sm:$0xff]  ;;  %v962_v19 = vld [vmem:[%s5186_s7 + $0x530] sm:$0xff]  ;;  %959 = vst [vmem:[%s5194_s8 + $0x288] sm:$0xff] %v958_v17 }
  0x3c   : > { %961 = vst [vmem:[%s5194_s8 + $0x290] sm:$0xff] %v960_v18  ;;  %963 = vst [vmem:[%s5194_s8 + $0x298] sm:$0xff] %v962_v19  ;;  %v964_v20 = vld [vmem:[%s5186_s7 + $0x540] sm:$0xff]  ;;  %v966_v21 = vld [vmem:[%s5186_s7 + $0x550] sm:$0xff] }
  0x3d   : > { %v968_v22 = vld [vmem:[%s5186_s7 + $0x560] sm:$0xff]  ;;  %965 = vst [vmem:[%s5194_s8 + $0x2a0] sm:$0xff] %v964_v20  ;;  %967 = vst [vmem:[%s5194_s8 + $0x2a8] sm:$0xff] %v966_v21  ;;  %v970_v23 = vld [vmem:[%s5186_s7 + $0x570] sm:$0xff] }
  0x3e   : > { %969 = vst [vmem:[%s5194_s8 + $0x2b0] sm:$0xff] %v968_v22  ;;  %v972_v24 = vld [vmem:[%s5186_s7 + $0x580] sm:$0xff]  ;;  %v974_v25 = vld [vmem:[%s5186_s7 + $0x590] sm:$0xff]  ;;  %971 = vst [vmem:[%s5194_s8 + $0x2b8] sm:$0xff] %v970_v23 }
  0x3f   : > { %973 = vst [vmem:[%s5194_s8 + $0x2c0] sm:$0xff] %v972_v24  ;;  %975 = vst [vmem:[%s5194_s8 + $0x2c8] sm:$0xff] %v974_v25  ;;  %v976_v26 = vld [vmem:[%s5186_s7 + $0x5a0] sm:$0xff]  ;;  %v978_v27 = vld [vmem:[%s5186_s7 + $0x5b0] sm:$0xff] }
  0x40   : > { %v980_v28 = vld [vmem:[%s5186_s7 + $0x5c0] sm:$0xff]  ;;  %977 = vst [vmem:[%s5194_s8 + $0x2d0] sm:$0xff] %v976_v26  ;;  %979 = vst [vmem:[%s5194_s8 + $0x2d8] sm:$0xff] %v978_v27  ;;  %v982_v29 = vld [vmem:[%s5186_s7 + $0x5d0] sm:$0xff] }
  0x41   : > { %981 = vst [vmem:[%s5194_s8 + $0x2e0] sm:$0xff] %v980_v28  ;;  %v984_v30 = vld [vmem:[%s5186_s7 + $0x5e0] sm:$0xff]  ;;  %v986_v31 = vld [vmem:[%s5186_s7 + $0x5f0] sm:$0xff]  ;;  %983 = vst [vmem:[%s5194_s8 + $0x2e8] sm:$0xff] %v982_v29 }
  0x42   : > { %985 = vst [vmem:[%s5194_s8 + $0x2f0] sm:$0xff] %v984_v30  ;;  %987 = vst [vmem:[%s5194_s8 + $0x2f8] sm:$0xff] %v986_v31  ;;  %v988_v32 = vld [vmem:[%s5186_s7 + $0x600] sm:$0xff]  ;;  %v990_v33 = vld [vmem:[%s5186_s7 + $0x610] sm:$0xff] }
  0x43   : > { %v992_v34 = vld [vmem:[%s5186_s7 + $0x620] sm:$0xff]  ;;  %989 = vst [vmem:[%s5194_s8 + $0x300] sm:$0xff] %v988_v32  ;;  %991 = vst [vmem:[%s5194_s8 + $0x308] sm:$0xff] %v990_v33  ;;  %v994_v35 = vld [vmem:[%s5186_s7 + $0x630] sm:$0xff] }
  0x44   : > { %993 = vst [vmem:[%s5194_s8 + $0x310] sm:$0xff] %v992_v34  ;;  %v996_v36 = vld [vmem:[%s5186_s7 + $0x640] sm:$0xff]  ;;  %v998_v37 = vld [vmem:[%s5186_s7 + $0x650] sm:$0xff]  ;;  %995 = vst [vmem:[%s5194_s8 + $0x318] sm:$0xff] %v994_v35 }
  0x45   : > { %997 = vst [vmem:[%s5194_s8 + $0x320] sm:$0xff] %v996_v36  ;;  %999 = vst [vmem:[%s5194_s8 + $0x328] sm:$0xff] %v998_v37  ;;  %v1000_v38 = vld [vmem:[%s5186_s7 + $0x660] sm:$0xff]  ;;  %v1002_v39 = vld [vmem:[%s5186_s7 + $0x670] sm:$0xff] }
  0x46   : > { %v1004_v40 = vld [vmem:[%s5186_s7 + $0x680] sm:$0xff]  ;;  %1001 = vst [vmem:[%s5194_s8 + $0x330] sm:$0xff] %v1000_v38  ;;  %1003 = vst [vmem:[%s5194_s8 + $0x338] sm:$0xff] %v1002_v39  ;;  %v1006_v41 = vld [vmem:[%s5186_s7 + $0x690] sm:$0xff] }
  0x47   : > { %1005 = vst [vmem:[%s5194_s8 + $0x340] sm:$0xff] %v1004_v40  ;;  %v1008_v42 = vld [vmem:[%s5186_s7 + $0x6a0] sm:$0xff]  ;;  %v1010_v43 = vld [vmem:[%s5186_s7 + $0x6b0] sm:$0xff]  ;;  %1007 = vst [vmem:[%s5194_s8 + $0x348] sm:$0xff] %v1006_v41 }
  0x48   : > { %1009 = vst [vmem:[%s5194_s8 + $0x350] sm:$0xff] %v1008_v42  ;;  %1011 = vst [vmem:[%s5194_s8 + $0x358] sm:$0xff] %v1010_v43  ;;  %v1012_v44 = vld [vmem:[%s5186_s7 + $0x6c0] sm:$0xff]  ;;  %v1014_v45 = vld [vmem:[%s5186_s7 + $0x6d0] sm:$0xff] }
  0x49   : > { %v1016_v46 = vld [vmem:[%s5186_s7 + $0x6e0] sm:$0xff]  ;;  %1013 = vst [vmem:[%s5194_s8 + $0x360] sm:$0xff] %v1012_v44  ;;  %1015 = vst [vmem:[%s5194_s8 + $0x368] sm:$0xff] %v1014_v45  ;;  %v1018_v47 = vld [vmem:[%s5186_s7 + $0x6f0] sm:$0xff] }
  0x4a   : > { %1017 = vst [vmem:[%s5194_s8 + $0x370] sm:$0xff] %v1016_v46  ;;  %v1020_v48 = vld [vmem:[%s5186_s7 + $0x700] sm:$0xff]  ;;  %v1022_v49 = vld [vmem:[%s5186_s7 + $0x710] sm:$0xff]  ;;  %1019 = vst [vmem:[%s5194_s8 + $0x378] sm:$0xff] %v1018_v47 }
  0x4b   : > { %1021 = vst [vmem:[%s5194_s8 + $0x380] sm:$0xff] %v1020_v48  ;;  %1023 = vst [vmem:[%s5194_s8 + $0x388] sm:$0xff] %v1022_v49  ;;  %v1024_v50 = vld [vmem:[%s5186_s7 + $0x720] sm:$0xff]  ;;  %v1026_v51 = vld [vmem:[%s5186_s7 + $0x730] sm:$0xff] }
  0x4c   : > { %v1028_v52 = vld [vmem:[%s5186_s7 + $0x740] sm:$0xff]  ;;  %1025 = vst [vmem:[%s5194_s8 + $0x390] sm:$0xff] %v1024_v50  ;;  %1027 = vst [vmem:[%s5194_s8 + $0x398] sm:$0xff] %v1026_v51  ;;  %v1030_v53 = vld [vmem:[%s5186_s7 + $0x750] sm:$0xff] }
  0x4d   : > { %1029 = vst [vmem:[%s5194_s8 + $0x3a0] sm:$0xff] %v1028_v52  ;;  %v1032_v54 = vld [vmem:[%s5186_s7 + $0x760] sm:$0xff]  ;;  %v1034_v55 = vld [vmem:[%s5186_s7 + $0x770] sm:$0xff]  ;;  %1031 = vst [vmem:[%s5194_s8 + $0x3a8] sm:$0xff] %v1030_v53 }
  0x4e   : > { %1033 = vst [vmem:[%s5194_s8 + $0x3b0] sm:$0xff] %v1032_v54  ;;  %1035 = vst [vmem:[%s5194_s8 + $0x3b8] sm:$0xff] %v1034_v55  ;;  %v1036_v56 = vld [vmem:[%s5186_s7 + $0x780] sm:$0xff]  ;;  %v1038_v57 = vld [vmem:[%s5186_s7 + $0x790] sm:$0xff] }
  0x4f   : > { %v1040_v58 = vld [vmem:[%s5186_s7 + $0x7a0] sm:$0xff]  ;;  %1037 = vst [vmem:[%s5194_s8 + $0x3c0] sm:$0xff] %v1036_v56  ;;  %1039 = vst [vmem:[%s5194_s8 + $0x3c8] sm:$0xff] %v1038_v57  ;;  %v1042_v59 = vld [vmem:[%s5186_s7 + $0x7b0] sm:$0xff] }
  0x50   : > { %1041 = vst [vmem:[%s5194_s8 + $0x3d0] sm:$0xff] %v1040_v58  ;;  %v1044_v60 = vld [vmem:[%s5186_s7 + $0x7c0] sm:$0xff]  ;;  %v1046_v61 = vld [vmem:[%s5186_s7 + $0x7d0] sm:$0xff]  ;;  %1043 = vst [vmem:[%s5194_s8 + $0x3d8] sm:$0xff] %v1042_v59 }
  0x51   : > { %1045 = vst [vmem:[%s5194_s8 + $0x3e0] sm:$0xff] %v1044_v60  ;;  %1047 = vst [vmem:[%s5194_s8 + $0x3e8] sm:$0xff] %v1046_v61  ;;  %v1048_v62 = vld [vmem:[%s5186_s7 + $0x7e0] sm:$0xff]  ;;  %v1050_v63 = vld [vmem:[%s5186_s7 + $0x7f0] sm:$0xff] }
  0x52   : > { %v1052_v0 = vld [vmem:[%s5186_s7 + $0x800] sm:$0xff]  ;;  %1049 = vst [vmem:[%s5194_s8 + $0x3f0] sm:$0xff] %v1048_v62  ;;  %1051 = vst [vmem:[%s5194_s8 + $0x3f8] sm:$0xff] %v1050_v63  ;;  %v1054_v1 = vld [vmem:[%s5186_s7 + $0x810] sm:$0xff] }
  0x53   : > { %1053 = vst [vmem:[%s5194_s8 + $0x400] sm:$0xff] %v1052_v0  ;;  %v1056_v2 = vld [vmem:[%s5186_s7 + $0x820] sm:$0xff]  ;;  %v1058_v3 = vld [vmem:[%s5186_s7 + $0x830] sm:$0xff]  ;;  %1055 = vst [vmem:[%s5194_s8 + $0x408] sm:$0xff] %v1054_v1 }
  0x54   : > { %1057 = vst [vmem:[%s5194_s8 + $0x410] sm:$0xff] %v1056_v2  ;;  %1059 = vst [vmem:[%s5194_s8 + $0x418] sm:$0xff] %v1058_v3  ;;  %v1060_v4 = vld [vmem:[%s5186_s7 + $0x840] sm:$0xff]  ;;  %v1062_v5 = vld [vmem:[%s5186_s7 + $0x850] sm:$0xff] }
  0x55   : > { %v1064_v6 = vld [vmem:[%s5186_s7 + $0x860] sm:$0xff]  ;;  %1061 = vst [vmem:[%s5194_s8 + $0x420] sm:$0xff] %v1060_v4  ;;  %1063 = vst [vmem:[%s5194_s8 + $0x428] sm:$0xff] %v1062_v5  ;;  %v1066_v7 = vld [vmem:[%s5186_s7 + $0x870] sm:$0xff] }
  0x56   : > { %1065 = vst [vmem:[%s5194_s8 + $0x430] sm:$0xff] %v1064_v6  ;;  %v1068_v8 = vld [vmem:[%s5186_s7 + $0x880] sm:$0xff]  ;;  %v1070_v9 = vld [vmem:[%s5186_s7 + $0x890] sm:$0xff]  ;;  %1067 = vst [vmem:[%s5194_s8 + $0x438] sm:$0xff] %v1066_v7 }
  0x57   : > { %1069 = vst [vmem:[%s5194_s8 + $0x440] sm:$0xff] %v1068_v8  ;;  %1071 = vst [vmem:[%s5194_s8 + $0x448] sm:$0xff] %v1070_v9  ;;  %v1072_v10 = vld [vmem:[%s5186_s7 + $0x8a0] sm:$0xff]  ;;  %v1074_v11 = vld [vmem:[%s5186_s7 + $0x8b0] sm:$0xff] }
  0x58   : > { %v1076_v12 = vld [vmem:[%s5186_s7 + $0x8c0] sm:$0xff]  ;;  %1073 = vst [vmem:[%s5194_s8 + $0x450] sm:$0xff] %v1072_v10  ;;  %1075 = vst [vmem:[%s5194_s8 + $0x458] sm:$0xff] %v1074_v11  ;;  %v1078_v13 = vld [vmem:[%s5186_s7 + $0x8d0] sm:$0xff] }
  0x59   : > { %1077 = vst [vmem:[%s5194_s8 + $0x460] sm:$0xff] %v1076_v12  ;;  %v1080_v14 = vld [vmem:[%s5186_s7 + $0x8e0] sm:$0xff]  ;;  %v1082_v15 = vld [vmem:[%s5186_s7 + $0x8f0] sm:$0xff]  ;;  %1079 = vst [vmem:[%s5194_s8 + $0x468] sm:$0xff] %v1078_v13 }
  0x5a   : > { %1081 = vst [vmem:[%s5194_s8 + $0x470] sm:$0xff] %v1080_v14  ;;  %1083 = vst [vmem:[%s5194_s8 + $0x478] sm:$0xff] %v1082_v15  ;;  %v1084_v16 = vld [vmem:[%s5186_s7 + $0x900] sm:$0xff]  ;;  %v1086_v17 = vld [vmem:[%s5186_s7 + $0x910] sm:$0xff] }
  0x5b   : > { %v1088_v18 = vld [vmem:[%s5186_s7 + $0x920] sm:$0xff]  ;;  %1085 = vst [vmem:[%s5194_s8 + $0x480] sm:$0xff] %v1084_v16  ;;  %1087 = vst [vmem:[%s5194_s8 + $0x488] sm:$0xff] %v1086_v17  ;;  %v1090_v19 = vld [vmem:[%s5186_s7 + $0x930] sm:$0xff] }
  0x5c   : > { %1089 = vst [vmem:[%s5194_s8 + $0x490] sm:$0xff] %v1088_v18  ;;  %v1092_v20 = vld [vmem:[%s5186_s7 + $0x940] sm:$0xff]  ;;  %v1094_v21 = vld [vmem:[%s5186_s7 + $0x950] sm:$0xff]  ;;  %1091 = vst [vmem:[%s5194_s8 + $0x498] sm:$0xff] %v1090_v19 }
  0x5d   : > { %1093 = vst [vmem:[%s5194_s8 + $0x4a0] sm:$0xff] %v1092_v20  ;;  %1095 = vst [vmem:[%s5194_s8 + $0x4a8] sm:$0xff] %v1094_v21  ;;  %v1096_v22 = vld [vmem:[%s5186_s7 + $0x960] sm:$0xff]  ;;  %v1098_v23 = vld [vmem:[%s5186_s7 + $0x970] sm:$0xff] }
  0x5e   : > { %v1100_v24 = vld [vmem:[%s5186_s7 + $0x980] sm:$0xff]  ;;  %1097 = vst [vmem:[%s5194_s8 + $0x4b0] sm:$0xff] %v1096_v22  ;;  %1099 = vst [vmem:[%s5194_s8 + $0x4b8] sm:$0xff] %v1098_v23  ;;  %v1102_v25 = vld [vmem:[%s5186_s7 + $0x990] sm:$0xff] }
  0x5f   : > { %1101 = vst [vmem:[%s5194_s8 + $0x4c0] sm:$0xff] %v1100_v24  ;;  %v1104_v26 = vld [vmem:[%s5186_s7 + $0x9a0] sm:$0xff]  ;;  %v1106_v27 = vld [vmem:[%s5186_s7 + $0x9b0] sm:$0xff]  ;;  %1103 = vst [vmem:[%s5194_s8 + $0x4c8] sm:$0xff] %v1102_v25 }
  0x60   : > { %1105 = vst [vmem:[%s5194_s8 + $0x4d0] sm:$0xff] %v1104_v26  ;;  %1107 = vst [vmem:[%s5194_s8 + $0x4d8] sm:$0xff] %v1106_v27  ;;  %v1108_v28 = vld [vmem:[%s5186_s7 + $0x9c0] sm:$0xff]  ;;  %v1110_v29 = vld [vmem:[%s5186_s7 + $0x9d0] sm:$0xff] }
  0x61   : > { %v1112_v30 = vld [vmem:[%s5186_s7 + $0x9e0] sm:$0xff]  ;;  %1109 = vst [vmem:[%s5194_s8 + $0x4e0] sm:$0xff] %v1108_v28  ;;  %1111 = vst [vmem:[%s5194_s8 + $0x4e8] sm:$0xff] %v1110_v29  ;;  %v1114_v31 = vld [vmem:[%s5186_s7 + $0x9f0] sm:$0xff] }
  0x62   : > { %1113 = vst [vmem:[%s5194_s8 + $0x4f0] sm:$0xff] %v1112_v30  ;;  %v1116_v32 = vld [vmem:[%s5186_s7 + $0xa00] sm:$0xff]  ;;  %v1118_v33 = vld [vmem:[%s5186_s7 + $0xa10] sm:$0xff]  ;;  %1115 = vst [vmem:[%s5194_s8 + $0x4f8] sm:$0xff] %v1114_v31 }
  0x63   : > { %1117 = vst [vmem:[%s5194_s8 + $0x500] sm:$0xff] %v1116_v32  ;;  %1119 = vst [vmem:[%s5194_s8 + $0x508] sm:$0xff] %v1118_v33  ;;  %v1120_v34 = vld [vmem:[%s5186_s7 + $0xa20] sm:$0xff]  ;;  %v1122_v35 = vld [vmem:[%s5186_s7 + $0xa30] sm:$0xff] }
  0x64   : > { %v1124_v36 = vld [vmem:[%s5186_s7 + $0xa40] sm:$0xff]  ;;  %1121 = vst [vmem:[%s5194_s8 + $0x510] sm:$0xff] %v1120_v34  ;;  %1123 = vst [vmem:[%s5194_s8 + $0x518] sm:$0xff] %v1122_v35  ;;  %v1126_v37 = vld [vmem:[%s5186_s7 + $0xa50] sm:$0xff] }
  0x65   : > { %1125 = vst [vmem:[%s5194_s8 + $0x520] sm:$0xff] %v1124_v36  ;;  %v1128_v38 = vld [vmem:[%s5186_s7 + $0xa60] sm:$0xff]  ;;  %v1130_v39 = vld [vmem:[%s5186_s7 + $0xa70] sm:$0xff]  ;;  %1127 = vst [vmem:[%s5194_s8 + $0x528] sm:$0xff] %v1126_v37 }
  0x66   : > { %1129 = vst [vmem:[%s5194_s8 + $0x530] sm:$0xff] %v1128_v38  ;;  %1131 = vst [vmem:[%s5194_s8 + $0x538] sm:$0xff] %v1130_v39  ;;  %v1132_v40 = vld [vmem:[%s5186_s7 + $0xa80] sm:$0xff]  ;;  %v1134_v41 = vld [vmem:[%s5186_s7 + $0xa90] sm:$0xff] }
  0x67   : > { %v1136_v42 = vld [vmem:[%s5186_s7 + $0xaa0] sm:$0xff]  ;;  %1133 = vst [vmem:[%s5194_s8 + $0x540] sm:$0xff] %v1132_v40  ;;  %1135 = vst [vmem:[%s5194_s8 + $0x548] sm:$0xff] %v1134_v41  ;;  %v1138_v43 = vld [vmem:[%s5186_s7 + $0xab0] sm:$0xff] }
  0x68   : > { %1137 = vst [vmem:[%s5194_s8 + $0x550] sm:$0xff] %v1136_v42  ;;  %v1140_v44 = vld [vmem:[%s5186_s7 + $0xac0] sm:$0xff]  ;;  %v1142_v45 = vld [vmem:[%s5186_s7 + $0xad0] sm:$0xff]  ;;  %1139 = vst [vmem:[%s5194_s8 + $0x558] sm:$0xff] %v1138_v43 }
  0x69   : > { %1141 = vst [vmem:[%s5194_s8 + $0x560] sm:$0xff] %v1140_v44  ;;  %1143 = vst [vmem:[%s5194_s8 + $0x568] sm:$0xff] %v1142_v45  ;;  %v1144_v46 = vld [vmem:[%s5186_s7 + $0xae0] sm:$0xff]  ;;  %v1146_v47 = vld [vmem:[%s5186_s7 + $0xaf0] sm:$0xff] }
  0x6a   : > { %v1148_v48 = vld [vmem:[%s5186_s7 + $0xb00] sm:$0xff]  ;;  %1145 = vst [vmem:[%s5194_s8 + $0x570] sm:$0xff] %v1144_v46  ;;  %1147 = vst [vmem:[%s5194_s8 + $0x578] sm:$0xff] %v1146_v47  ;;  %v1150_v49 = vld [vmem:[%s5186_s7 + $0xb10] sm:$0xff] }
  0x6b   : > { %1149 = vst [vmem:[%s5194_s8 + $0x580] sm:$0xff] %v1148_v48  ;;  %v1152_v50 = vld [vmem:[%s5186_s7 + $0xb20] sm:$0xff]  ;;  %v1154_v51 = vld [vmem:[%s5186_s7 + $0xb30] sm:$0xff]  ;;  %1151 = vst [vmem:[%s5194_s8 + $0x588] sm:$0xff] %v1150_v49 }
  0x6c   : > { %1153 = vst [vmem:[%s5194_s8 + $0x590] sm:$0xff] %v1152_v50  ;;  %1155 = vst [vmem:[%s5194_s8 + $0x598] sm:$0xff] %v1154_v51  ;;  %v1156_v52 = vld [vmem:[%s5186_s7 + $0xb40] sm:$0xff]  ;;  %v1158_v53 = vld [vmem:[%s5186_s7 + $0xb50] sm:$0xff] }
  0x6d   : > { %v1160_v54 = vld [vmem:[%s5186_s7 + $0xb60] sm:$0xff]  ;;  %1157 = vst [vmem:[%s5194_s8 + $0x5a0] sm:$0xff] %v1156_v52  ;;  %1159 = vst [vmem:[%s5194_s8 + $0x5a8] sm:$0xff] %v1158_v53  ;;  %v1162_v55 = vld [vmem:[%s5186_s7 + $0xb70] sm:$0xff] }
  0x6e   : > { %1161 = vst [vmem:[%s5194_s8 + $0x5b0] sm:$0xff] %v1160_v54  ;;  %v1164_v56 = vld [vmem:[%s5186_s7 + $0xb80] sm:$0xff]  ;;  %v1166_v57 = vld [vmem:[%s5186_s7 + $0xb90] sm:$0xff]  ;;  %1163 = vst [vmem:[%s5194_s8 + $0x5b8] sm:$0xff] %v1162_v55 }
  0x6f   : > { %1165 = vst [vmem:[%s5194_s8 + $0x5c0] sm:$0xff] %v1164_v56  ;;  %1167 = vst [vmem:[%s5194_s8 + $0x5c8] sm:$0xff] %v1166_v57  ;;  %v1168_v58 = vld [vmem:[%s5186_s7 + $0xba0] sm:$0xff]  ;;  %v1170_v59 = vld [vmem:[%s5186_s7 + $0xbb0] sm:$0xff] }
  0x70   : > { %v1172_v60 = vld [vmem:[%s5186_s7 + $0xbc0] sm:$0xff]  ;;  %1169 = vst [vmem:[%s5194_s8 + $0x5d0] sm:$0xff] %v1168_v58  ;;  %1171 = vst [vmem:[%s5194_s8 + $0x5d8] sm:$0xff] %v1170_v59  ;;  %v1174_v61 = vld [vmem:[%s5186_s7 + $0xbd0] sm:$0xff] }
  0x71   : > { %1173 = vst [vmem:[%s5194_s8 + $0x5e0] sm:$0xff] %v1172_v60  ;;  %v1176_v62 = vld [vmem:[%s5186_s7 + $0xbe0] sm:$0xff]  ;;  %v1178_v63 = vld [vmem:[%s5186_s7 + $0xbf0] sm:$0xff]  ;;  %1175 = vst [vmem:[%s5194_s8 + $0x5e8] sm:$0xff] %v1174_v61 }
  0x72   : > { %1177 = vst [vmem:[%s5194_s8 + $0x5f0] sm:$0xff] %v1176_v62  ;;  %1179 = vst [vmem:[%s5194_s8 + $0x5f8] sm:$0xff] %v1178_v63  ;;  %v1180_v0 = vld [vmem:[%s5186_s7 + $0xc00] sm:$0xff]  ;;  %v1182_v1 = vld [vmem:[%s5186_s7 + $0xc10] sm:$0xff] }
  0x73   : > { %v1184_v2 = vld [vmem:[%s5186_s7 + $0xc20] sm:$0xff]  ;;  %1181 = vst [vmem:[%s5194_s8 + $0x600] sm:$0xff] %v1180_v0  ;;  %1183 = vst [vmem:[%s5194_s8 + $0x608] sm:$0xff] %v1182_v1  ;;  %v1186_v3 = vld [vmem:[%s5186_s7 + $0xc30] sm:$0xff] }
  0x74   : > { %1185 = vst [vmem:[%s5194_s8 + $0x610] sm:$0xff] %v1184_v2  ;;  %v1188_v4 = vld [vmem:[%s5186_s7 + $0xc40] sm:$0xff]  ;;  %v1190_v5 = vld [vmem:[%s5186_s7 + $0xc50] sm:$0xff]  ;;  %1187 = vst [vmem:[%s5194_s8 + $0x618] sm:$0xff] %v1186_v3 }
  0x75   : > { %1189 = vst [vmem:[%s5194_s8 + $0x620] sm:$0xff] %v1188_v4  ;;  %1191 = vst [vmem:[%s5194_s8 + $0x628] sm:$0xff] %v1190_v5  ;;  %v1192_v6 = vld [vmem:[%s5186_s7 + $0xc60] sm:$0xff]  ;;  %v1194_v7 = vld [vmem:[%s5186_s7 + $0xc70] sm:$0xff] }
  0x76   : > { %v1196_v8 = vld [vmem:[%s5186_s7 + $0xc80] sm:$0xff]  ;;  %1193 = vst [vmem:[%s5194_s8 + $0x630] sm:$0xff] %v1192_v6  ;;  %1195 = vst [vmem:[%s5194_s8 + $0x638] sm:$0xff] %v1194_v7  ;;  %v1198_v9 = vld [vmem:[%s5186_s7 + $0xc90] sm:$0xff] }
  0x77   : > { %1197 = vst [vmem:[%s5194_s8 + $0x640] sm:$0xff] %v1196_v8  ;;  %v1200_v10 = vld [vmem:[%s5186_s7 + $0xca0] sm:$0xff]  ;;  %v1202_v11 = vld [vmem:[%s5186_s7 + $0xcb0] sm:$0xff]  ;;  %1199 = vst [vmem:[%s5194_s8 + $0x648] sm:$0xff] %v1198_v9 }
  0x78   : > { %1201 = vst [vmem:[%s5194_s8 + $0x650] sm:$0xff] %v1200_v10  ;;  %1203 = vst [vmem:[%s5194_s8 + $0x658] sm:$0xff] %v1202_v11  ;;  %v1204_v12 = vld [vmem:[%s5186_s7 + $0xcc0] sm:$0xff]  ;;  %v1206_v13 = vld [vmem:[%s5186_s7 + $0xcd0] sm:$0xff] }
  0x79   : > { %v1208_v14 = vld [vmem:[%s5186_s7 + $0xce0] sm:$0xff]  ;;  %1205 = vst [vmem:[%s5194_s8 + $0x660] sm:$0xff] %v1204_v12  ;;  %1207 = vst [vmem:[%s5194_s8 + $0x668] sm:$0xff] %v1206_v13  ;;  %v1210_v15 = vld [vmem:[%s5186_s7 + $0xcf0] sm:$0xff] }
  0x7a   : > { %1209 = vst [vmem:[%s5194_s8 + $0x670] sm:$0xff] %v1208_v14  ;;  %v1212_v16 = vld [vmem:[%s5186_s7 + $0xd00] sm:$0xff]  ;;  %v1214_v17 = vld [vmem:[%s5186_s7 + $0xd10] sm:$0xff]  ;;  %1211 = vst [vmem:[%s5194_s8 + $0x678] sm:$0xff] %v1210_v15 }
  0x7b   : > { %1213 = vst [vmem:[%s5194_s8 + $0x680] sm:$0xff] %v1212_v16  ;;  %1215 = vst [vmem:[%s5194_s8 + $0x688] sm:$0xff] %v1214_v17  ;;  %v1216_v18 = vld [vmem:[%s5186_s7 + $0xd20] sm:$0xff]  ;;  %v1218_v19 = vld [vmem:[%s5186_s7 + $0xd30] sm:$0xff] }
  0x7c   : > { %v1220_v20 = vld [vmem:[%s5186_s7 + $0xd40] sm:$0xff]  ;;  %1217 = vst [vmem:[%s5194_s8 + $0x690] sm:$0xff] %v1216_v18  ;;  %1219 = vst [vmem:[%s5194_s8 + $0x698] sm:$0xff] %v1218_v19  ;;  %v1222_v21 = vld [vmem:[%s5186_s7 + $0xd50] sm:$0xff] }
  0x7d   : > { %1221 = vst [vmem:[%s5194_s8 + $0x6a0] sm:$0xff] %v1220_v20  ;;  %v1224_v22 = vld [vmem:[%s5186_s7 + $0xd60] sm:$0xff]  ;;  %v1226_v23 = vld [vmem:[%s5186_s7 + $0xd70] sm:$0xff]  ;;  %1223 = vst [vmem:[%s5194_s8 + $0x6a8] sm:$0xff] %v1222_v21 }
  0x7e   : > { %1225 = vst [vmem:[%s5194_s8 + $0x6b0] sm:$0xff] %v1224_v22  ;;  %1227 = vst [vmem:[%s5194_s8 + $0x6b8] sm:$0xff] %v1226_v23  ;;  %v1228_v24 = vld [vmem:[%s5186_s7 + $0xd80] sm:$0xff]  ;;  %v1230_v25 = vld [vmem:[%s5186_s7 + $0xd90] sm:$0xff] }
  0x7f   : > { %v1232_v26 = vld [vmem:[%s5186_s7 + $0xda0] sm:$0xff]  ;;  %1229 = vst [vmem:[%s5194_s8 + $0x6c0] sm:$0xff] %v1228_v24  ;;  %1231 = vst [vmem:[%s5194_s8 + $0x6c8] sm:$0xff] %v1230_v25  ;;  %v1234_v27 = vld [vmem:[%s5186_s7 + $0xdb0] sm:$0xff] }
  0x80   : > { %1233 = vst [vmem:[%s5194_s8 + $0x6d0] sm:$0xff] %v1232_v26  ;;  %v1236_v28 = vld [vmem:[%s5186_s7 + $0xdc0] sm:$0xff]  ;;  %v1238_v29 = vld [vmem:[%s5186_s7 + $0xdd0] sm:$0xff]  ;;  %1235 = vst [vmem:[%s5194_s8 + $0x6d8] sm:$0xff] %v1234_v27 }
  0x81   : > { %1237 = vst [vmem:[%s5194_s8 + $0x6e0] sm:$0xff] %v1236_v28  ;;  %1239 = vst [vmem:[%s5194_s8 + $0x6e8] sm:$0xff] %v1238_v29  ;;  %v1240_v30 = vld [vmem:[%s5186_s7 + $0xde0] sm:$0xff]  ;;  %v1242_v31 = vld [vmem:[%s5186_s7 + $0xdf0] sm:$0xff] }
  0x82   : > { %v1244_v32 = vld [vmem:[%s5186_s7 + $0xe00] sm:$0xff]  ;;  %1241 = vst [vmem:[%s5194_s8 + $0x6f0] sm:$0xff] %v1240_v30  ;;  %1243 = vst [vmem:[%s5194_s8 + $0x6f8] sm:$0xff] %v1242_v31  ;;  %v1246_v33 = vld [vmem:[%s5186_s7 + $0xe10] sm:$0xff] }
  0x83   : > { %1245 = vst [vmem:[%s5194_s8 + $0x700] sm:$0xff] %v1244_v32  ;;  %v1248_v34 = vld [vmem:[%s5186_s7 + $0xe20] sm:$0xff]  ;;  %v1250_v35 = vld [vmem:[%s5186_s7 + $0xe30] sm:$0xff]  ;;  %1247 = vst [vmem:[%s5194_s8 + $0x708] sm:$0xff] %v1246_v33 }
  0x84   : > { %1249 = vst [vmem:[%s5194_s8 + $0x710] sm:$0xff] %v1248_v34  ;;  %1251 = vst [vmem:[%s5194_s8 + $0x718] sm:$0xff] %v1250_v35  ;;  %v1252_v36 = vld [vmem:[%s5186_s7 + $0xe40] sm:$0xff]  ;;  %v1254_v37 = vld [vmem:[%s5186_s7 + $0xe50] sm:$0xff] }
  0x85   : > { %v1256_v38 = vld [vmem:[%s5186_s7 + $0xe60] sm:$0xff]  ;;  %1253 = vst [vmem:[%s5194_s8 + $0x720] sm:$0xff] %v1252_v36  ;;  %1255 = vst [vmem:[%s5194_s8 + $0x728] sm:$0xff] %v1254_v37  ;;  %v1258_v39 = vld [vmem:[%s5186_s7 + $0xe70] sm:$0xff] }
  0x86   : > { %1257 = vst [vmem:[%s5194_s8 + $0x730] sm:$0xff] %v1256_v38  ;;  %v1260_v40 = vld [vmem:[%s5186_s7 + $0xe80] sm:$0xff]  ;;  %v1262_v41 = vld [vmem:[%s5186_s7 + $0xe90] sm:$0xff]  ;;  %1259 = vst [vmem:[%s5194_s8 + $0x738] sm:$0xff] %v1258_v39 }
  0x87   : > { %1261 = vst [vmem:[%s5194_s8 + $0x740] sm:$0xff] %v1260_v40  ;;  %1263 = vst [vmem:[%s5194_s8 + $0x748] sm:$0xff] %v1262_v41  ;;  %v1264_v42 = vld [vmem:[%s5186_s7 + $0xea0] sm:$0xff]  ;;  %v1266_v43 = vld [vmem:[%s5186_s7 + $0xeb0] sm:$0xff] }
  0x88   : > { %v1268_v44 = vld [vmem:[%s5186_s7 + $0xec0] sm:$0xff]  ;;  %1265 = vst [vmem:[%s5194_s8 + $0x750] sm:$0xff] %v1264_v42  ;;  %1267 = vst [vmem:[%s5194_s8 + $0x758] sm:$0xff] %v1266_v43  ;;  %v1270_v45 = vld [vmem:[%s5186_s7 + $0xed0] sm:$0xff] }
  0x89   : > { %1269 = vst [vmem:[%s5194_s8 + $0x760] sm:$0xff] %v1268_v44  ;;  %v1272_v46 = vld [vmem:[%s5186_s7 + $0xee0] sm:$0xff]  ;;  %v1274_v47 = vld [vmem:[%s5186_s7 + $0xef0] sm:$0xff]  ;;  %1271 = vst [vmem:[%s5194_s8 + $0x768] sm:$0xff] %v1270_v45 }
  0x8a   : > { %1273 = vst [vmem:[%s5194_s8 + $0x770] sm:$0xff] %v1272_v46  ;;  %1275 = vst [vmem:[%s5194_s8 + $0x778] sm:$0xff] %v1274_v47  ;;  %v1276_v48 = vld [vmem:[%s5186_s7 + $0xf00] sm:$0xff]  ;;  %v1278_v49 = vld [vmem:[%s5186_s7 + $0xf10] sm:$0xff] }
  0x8b   : > { %v1280_v50 = vld [vmem:[%s5186_s7 + $0xf20] sm:$0xff]  ;;  %1277 = vst [vmem:[%s5194_s8 + $0x780] sm:$0xff] %v1276_v48  ;;  %1279 = vst [vmem:[%s5194_s8 + $0x788] sm:$0xff] %v1278_v49  ;;  %v1282_v51 = vld [vmem:[%s5186_s7 + $0xf30] sm:$0xff] }
  0x8c   : > { %1281 = vst [vmem:[%s5194_s8 + $0x790] sm:$0xff] %v1280_v50  ;;  %v1284_v52 = vld [vmem:[%s5186_s7 + $0xf40] sm:$0xff]  ;;  %v1286_v53 = vld [vmem:[%s5186_s7 + $0xf50] sm:$0xff]  ;;  %1283 = vst [vmem:[%s5194_s8 + $0x798] sm:$0xff] %v1282_v51 }
  0x8d   : > { %1285 = vst [vmem:[%s5194_s8 + $0x7a0] sm:$0xff] %v1284_v52  ;;  %1287 = vst [vmem:[%s5194_s8 + $0x7a8] sm:$0xff] %v1286_v53  ;;  %v1288_v54 = vld [vmem:[%s5186_s7 + $0xf60] sm:$0xff]  ;;  %v1290_v55 = vld [vmem:[%s5186_s7 + $0xf70] sm:$0xff] }
  0x8e   : > { %v1292_v56 = vld [vmem:[%s5186_s7 + $0xf80] sm:$0xff]  ;;  %1289 = vst [vmem:[%s5194_s8 + $0x7b0] sm:$0xff] %v1288_v54  ;;  %1291 = vst [vmem:[%s5194_s8 + $0x7b8] sm:$0xff] %v1290_v55  ;;  %v1294_v57 = vld [vmem:[%s5186_s7 + $0xf90] sm:$0xff] }
  0x8f   : > { %1293 = vst [vmem:[%s5194_s8 + $0x7c0] sm:$0xff] %v1292_v56  ;;  %v1296_v58 = vld [vmem:[%s5186_s7 + $0xfa0] sm:$0xff]  ;;  %v1298_v59 = vld [vmem:[%s5186_s7 + $0xfb0] sm:$0xff]  ;;  %1295 = vst [vmem:[%s5194_s8 + $0x7c8] sm:$0xff] %v1294_v57 }
  0x90   : > { %1297 = vst [vmem:[%s5194_s8 + $0x7d0] sm:$0xff] %v1296_v58  ;;  %1299 = vst [vmem:[%s5194_s8 + $0x7d8] sm:$0xff] %v1298_v59  ;;  %v1300_v60 = vld [vmem:[%s5186_s7 + $0xfc0] sm:$0xff]  ;;  %v1302_v61 = vld [vmem:[%s5186_s7 + $0xfd0] sm:$0xff] }
  0x91   : > { %v1304_v62 = vld [vmem:[%s5186_s7 + $0xfe0] sm:$0xff]  ;;  %1301 = vst [vmem:[%s5194_s8 + $0x7e0] sm:$0xff] %v1300_v60  ;;  %1303 = vst [vmem:[%s5194_s8 + $0x7e8] sm:$0xff] %v1302_v61  ;;  %v1306_v63 = vld [vmem:[%s5186_s7 + $0xff0] sm:$0xff] }
  0x92   : > { %1305 = vst [vmem:[%s5194_s8 + $0x7f0] sm:$0xff] %v1304_v62  ;;  %v1308_v0 = vld [vmem:[%s5186_s7 + $0x1000] sm:$0xff]  ;;  %v1310_v1 = vld [vmem:[%s5186_s7 + $0x1010] sm:$0xff]  ;;  %1307 = vst [vmem:[%s5194_s8 + $0x7f8] sm:$0xff] %v1306_v63 }
  0x93   : > { %1309 = vst [vmem:[%s5194_s8 + $0x800] sm:$0xff] %v1308_v0  ;;  %1311 = vst [vmem:[%s5194_s8 + $0x808] sm:$0xff] %v1310_v1  ;;  %v1312_v2 = vld [vmem:[%s5186_s7 + $0x1020] sm:$0xff]  ;;  %v1314_v3 = vld [vmem:[%s5186_s7 + $0x1030] sm:$0xff] }
  0x94   : > { %v1316_v4 = vld [vmem:[%s5186_s7 + $0x1040] sm:$0xff]  ;;  %1313 = vst [vmem:[%s5194_s8 + $0x810] sm:$0xff] %v1312_v2  ;;  %1315 = vst [vmem:[%s5194_s8 + $0x818] sm:$0xff] %v1314_v3  ;;  %v1318_v5 = vld [vmem:[%s5186_s7 + $0x1050] sm:$0xff] }
  0x95   : > { %1317 = vst [vmem:[%s5194_s8 + $0x820] sm:$0xff] %v1316_v4  ;;  %v1320_v6 = vld [vmem:[%s5186_s7 + $0x1060] sm:$0xff]  ;;  %v1322_v7 = vld [vmem:[%s5186_s7 + $0x1070] sm:$0xff]  ;;  %1319 = vst [vmem:[%s5194_s8 + $0x828] sm:$0xff] %v1318_v5 }
  0x96   : > { %1321 = vst [vmem:[%s5194_s8 + $0x830] sm:$0xff] %v1320_v6  ;;  %1323 = vst [vmem:[%s5194_s8 + $0x838] sm:$0xff] %v1322_v7  ;;  %v1324_v8 = vld [vmem:[%s5186_s7 + $0x1080] sm:$0xff]  ;;  %v1326_v9 = vld [vmem:[%s5186_s7 + $0x1090] sm:$0xff] }
  0x97   : > { %v1328_v10 = vld [vmem:[%s5186_s7 + $0x10a0] sm:$0xff]  ;;  %1325 = vst [vmem:[%s5194_s8 + $0x840] sm:$0xff] %v1324_v8  ;;  %1327 = vst [vmem:[%s5194_s8 + $0x848] sm:$0xff] %v1326_v9  ;;  %v1330_v11 = vld [vmem:[%s5186_s7 + $0x10b0] sm:$0xff] }
  0x98   : > { %1329 = vst [vmem:[%s5194_s8 + $0x850] sm:$0xff] %v1328_v10  ;;  %v1332_v12 = vld [vmem:[%s5186_s7 + $0x10c0] sm:$0xff]  ;;  %v1334_v13 = vld [vmem:[%s5186_s7 + $0x10d0] sm:$0xff]  ;;  %1331 = vst [vmem:[%s5194_s8 + $0x858] sm:$0xff] %v1330_v11 }
  0x99   : > { %1333 = vst [vmem:[%s5194_s8 + $0x860] sm:$0xff] %v1332_v12  ;;  %1335 = vst [vmem:[%s5194_s8 + $0x868] sm:$0xff] %v1334_v13  ;;  %v1336_v14 = vld [vmem:[%s5186_s7 + $0x10e0] sm:$0xff]  ;;  %v1338_v15 = vld [vmem:[%s5186_s7 + $0x10f0] sm:$0xff] }
  0x9a   : > { %v1340_v16 = vld [vmem:[%s5186_s7 + $0x1100] sm:$0xff]  ;;  %1337 = vst [vmem:[%s5194_s8 + $0x870] sm:$0xff] %v1336_v14  ;;  %1339 = vst [vmem:[%s5194_s8 + $0x878] sm:$0xff] %v1338_v15  ;;  %v1342_v17 = vld [vmem:[%s5186_s7 + $0x1110] sm:$0xff] }
  0x9b   : > { %1341 = vst [vmem:[%s5194_s8 + $0x880] sm:$0xff] %v1340_v16  ;;  %v1344_v18 = vld [vmem:[%s5186_s7 + $0x1120] sm:$0xff]  ;;  %v1346_v19 = vld [vmem:[%s5186_s7 + $0x1130] sm:$0xff]  ;;  %1343 = vst [vmem:[%s5194_s8 + $0x888] sm:$0xff] %v1342_v17 }
  0x9c   : > { %1345 = vst [vmem:[%s5194_s8 + $0x890] sm:$0xff] %v1344_v18  ;;  %1347 = vst [vmem:[%s5194_s8 + $0x898] sm:$0xff] %v1346_v19  ;;  %v1348_v20 = vld [vmem:[%s5186_s7 + $0x1140] sm:$0xff]  ;;  %v1350_v21 = vld [vmem:[%s5186_s7 + $0x1150] sm:$0xff] }
  0x9d   : > { %v1352_v22 = vld [vmem:[%s5186_s7 + $0x1160] sm:$0xff]  ;;  %1349 = vst [vmem:[%s5194_s8 + $0x8a0] sm:$0xff] %v1348_v20  ;;  %1351 = vst [vmem:[%s5194_s8 + $0x8a8] sm:$0xff] %v1350_v21  ;;  %v1354_v23 = vld [vmem:[%s5186_s7 + $0x1170] sm:$0xff] }
  0x9e   : > { %1353 = vst [vmem:[%s5194_s8 + $0x8b0] sm:$0xff] %v1352_v22  ;;  %v1356_v24 = vld [vmem:[%s5186_s7 + $0x1180] sm:$0xff]  ;;  %v1358_v25 = vld [vmem:[%s5186_s7 + $0x1190] sm:$0xff]  ;;  %1355 = vst [vmem:[%s5194_s8 + $0x8b8] sm:$0xff] %v1354_v23 }
  0x9f   : > { %1357 = vst [vmem:[%s5194_s8 + $0x8c0] sm:$0xff] %v1356_v24  ;;  %1359 = vst [vmem:[%s5194_s8 + $0x8c8] sm:$0xff] %v1358_v25  ;;  %v1360_v26 = vld [vmem:[%s5186_s7 + $0x11a0] sm:$0xff]  ;;  %v1362_v27 = vld [vmem:[%s5186_s7 + $0x11b0] sm:$0xff] }
  0xa0   : > { %v1364_v28 = vld [vmem:[%s5186_s7 + $0x11c0] sm:$0xff]  ;;  %1361 = vst [vmem:[%s5194_s8 + $0x8d0] sm:$0xff] %v1360_v26  ;;  %1363 = vst [vmem:[%s5194_s8 + $0x8d8] sm:$0xff] %v1362_v27  ;;  %v1366_v29 = vld [vmem:[%s5186_s7 + $0x11d0] sm:$0xff] }
  0xa1   : > { %1365 = vst [vmem:[%s5194_s8 + $0x8e0] sm:$0xff] %v1364_v28  ;;  %v1368_v30 = vld [vmem:[%s5186_s7 + $0x11e0] sm:$0xff]  ;;  %v1370_v31 = vld [vmem:[%s5186_s7 + $0x11f0] sm:$0xff]  ;;  %1367 = vst [vmem:[%s5194_s8 + $0x8e8] sm:$0xff] %v1366_v29 }
  0xa2   : > { %1369 = vst [vmem:[%s5194_s8 + $0x8f0] sm:$0xff] %v1368_v30  ;;  %1371 = vst [vmem:[%s5194_s8 + $0x8f8] sm:$0xff] %v1370_v31 }
  0xa3 PF: > { %p4199_p7 = scmp.ge.s32.totalorder %s5113_s20, 1  ;;  %p1400_p8 = scmp.lt.s32.totalorder %s5113_s20, 3 }
  0xa5   : > { %p1401_p9 = pnand %p4199_p7, %p1400_p8 }
  0xa7   : > { %1404 = sbr.rel (%p1401_p9) target bundleno = 781 (0x30d), region = 74 }
  0xac   : > { %s1407_s9 = sand.u32 1, %s5105_s18   ;;  %v4699_v32 = vld [vmem:[%s6369_s0 + $0x4] ss:$72 sps:$4 sm:$0xff]  }
  0xad   : > { %s4576_s10 = smul.u32 2304, %s1407_s9  ;;  %v4702_v33 = vld [vmem:[%s6369_s0 + $0xc] ss:$72 sps:$4 sm:$0xff]   ;;  %3450 = vmatprep.mubr.bf16.mxu0 %v4699_v32  ;;  %s4200_s6 = sshll.u32 %s1407_s9, 5 }
  0xae   : > { %3503 = vmatprep.mubr.bf16.mxu1 %v4702_v33  ;;  %s1444_s18 = scalar_lea.vmem [#allocation3], %s4200_s6  ;;  %s4542_s9 = sshll.u32 (%p5176_p5), %s5161_s21, 3 }
  0xaf   : > { %s5777_s15 = scalar_lea.vmem [#allocation2], %s4576_s10  ;;  %s4064_s10 = scalar_lea.vmem (%p5176_p5), %s6374_s5, %s4542_s9 }
  0xb0   : > { %v4601_v34 = vld [vmem:[%s5777_s15 + $0x74] ss:$8 sps:$4 sm:$0xff]   ;;  %v4605_v36 = vld [vmem:[%s5777_s15 + $0x70] ss:$8 sps:$4 sm:$0xff]   ;;  %v4607_v38 = vld [vmem:[%s5777_s15 + $0x64] ss:$8 sps:$4 sm:$0xff]  }
  0xb1   : > { %v4603_v35 = vld [vmem:[%s5777_s15 + $0x174] ss:$8 sps:$4 sm:$0xff]   ;;  %3418 = vmatprep.subr.bf16.mxu0 %v4601_v34  ;;  %v4606_v37 = vld [vmem:[%s5777_s15 + $0x170] ss:$8 sps:$4 sm:$0xff]   ;;  %v4609_v39 = vld [vmem:[%s5777_s15 + $0x164] ss:$8 sps:$4 sm:$0xff]  }
  0xb2   : > { %3471 = vmatprep.subr.bf16.mxu1 %v4603_v35  ;;  %3419 = vmatpush1.bf16.msra.mxu0 %v4605_v36  ;;  %v4611_v40 = vld [vmem:[%s5777_s15 + $0x60] ss:$8 sps:$4 sm:$0xff]   ;;  %v4613_v42 = vld [vmem:[%s5777_s15 + $0x54] ss:$8 sps:$4 sm:$0xff]   ;;  %v4617_v44 = vld [vmem:[%s5777_s15 + $0x50] ss:$8 sps:$4 sm:$0xff]  }
  0xb3   : > { %3472 = vmatpush1.bf16.msra.mxu1 %v4606_v37  ;;  %3420 = vmatprep.subr.bf16.mxu0 %v4607_v38  ;;  %v4612_v41 = vld [vmem:[%s5777_s15 + $0x160] ss:$8 sps:$4 sm:$0xff]   ;;  %v4615_v43 = vld [vmem:[%s5777_s15 + $0x154] ss:$8 sps:$4 sm:$0xff]   ;;  %v4618_v45 = vld [vmem:[%s5777_s15 + $0x150] ss:$8 sps:$4 sm:$0xff]  }
  0xb4   : > { %3473 = vmatprep.subr.bf16.mxu1 %v4609_v39  ;;  %v4619_v46 = vld [vmem:[%s5777_s15 + $0x44] ss:$8 sps:$4 sm:$0xff]   ;;  %v4623_v48 = vld [vmem:[%s5777_s15 + $0x40] ss:$8 sps:$4 sm:$0xff]   ;;  %v4625_v50 = vld [vmem:[%s5777_s15 + $0x34] ss:$8 sps:$4 sm:$0xff]  }
  0xb5   : > { %v4621_v47 = vld [vmem:[%s5777_s15 + $0x144] ss:$8 sps:$4 sm:$0xff]   ;;  %v4624_v49 = vld [vmem:[%s5777_s15 + $0x140] ss:$8 sps:$4 sm:$0xff]   ;;  %v4627_v51 = vld [vmem:[%s5777_s15 + $0x134] ss:$8 sps:$4 sm:$0xff]  }
  0xb6   : > { %3421 = vmatpush1.bf16.msra.mxu0 %v4611_v40  ;;  %v4629_v52 = vld [vmem:[%s5777_s15 + $0x30] ss:$8 sps:$4 sm:$0xff]   ;;  %v4631_v54 = vld [vmem:[%s5777_s15 + $0x24] ss:$8 sps:$4 sm:$0xff]   ;;  %v4635_v56 = vld [vmem:[%s5777_s15 + $0x20] ss:$8 sps:$4 sm:$0xff]  }
  0xb7   : > { %3474 = vmatpush1.bf16.msra.mxu1 %v4612_v41  ;;  %3422 = vmatprep.subr.bf16.mxu0 %v4613_v42  ;;  %v4630_v53 = vld [vmem:[%s5777_s15 + $0x130] ss:$8 sps:$4 sm:$0xff]   ;;  %v4633_v55 = vld [vmem:[%s5777_s15 + $0x124] ss:$8 sps:$4 sm:$0xff]   ;;  %v4636_v57 = vld [vmem:[%s5777_s15 + $0x120] ss:$8 sps:$4 sm:$0xff]  }
  0xb8   : > { %3475 = vmatprep.subr.bf16.mxu1 %v4615_v43  ;;  %v4637_v58 = vld [vmem:[%s5777_s15 + $0x14] ss:$8 sps:$4 sm:$0xff]   ;;  %v4641_v60 = vld [vmem:[%s5777_s15 + $0x10] ss:$8 sps:$4 sm:$0xff]   ;;  %v4643_v62 = vld [vmem:[%s5777_s15 + $0x4] ss:$8 sps:$4 sm:$0xff]  }
  0xb9   : > { %v4639_v59 = vld [vmem:[%s5777_s15 + $0x114] ss:$8 sps:$4 sm:$0xff]   ;;  %v4642_v61 = vld [vmem:[%s5777_s15 + $0x110] ss:$8 sps:$4 sm:$0xff]   ;;  %v4645_v63 = vld [vmem:[%s5777_s15 + $0x104] ss:$8 sps:$4 sm:$0xff]  }
  0xba   : > { %3423 = vmatpush1.bf16.msra.mxu0 %v4617_v44  ;;  %v4647_v0 = vld [vmem:[%s5777_s15] ss:$8 sps:$4 sm:$0xff]   ;;  %v4649_v2 = vld [vmem:[%s5777_s15 + $0xf4] ss:$8 sps:$4 sm:$0xff]   ;;  %v4653_v4 = vld [vmem:[%s5777_s15 + $0xf0] ss:$8 sps:$4 sm:$0xff]  }
  0xbb   : > { %3476 = vmatpush1.bf16.msra.mxu1 %v4618_v45  ;;  %3424 = vmatprep.subr.bf16.mxu0 %v4619_v46  ;;  %v4648_v1 = vld [vmem:[%s5777_s15 + $0x100] ss:$8 sps:$4 sm:$0xff]   ;;  %v4651_v3 = vld [vmem:[%s5777_s15 + $0x1f4] ss:$8 sps:$4 sm:$0xff]   ;;  %v4654_v5 = vld [vmem:[%s5777_s15 + $0x1f0] ss:$8 sps:$4 sm:$0xff]  }
  0xbc   : > { %3477 = vmatprep.subr.bf16.mxu1 %v4621_v47  ;;  %v4655_v6 = vld [vmem:[%s5777_s15 + $0xe4] ss:$8 sps:$4 sm:$0xff]   ;;  %v4659_v8 = vld [vmem:[%s5777_s15 + $0xe0] ss:$8 sps:$4 sm:$0xff]   ;;  %v4661_v10 = vld [vmem:[%s5777_s15 + $0xd4] ss:$8 sps:$4 sm:$0xff]  }
  0xbd   : > { %v4657_v7 = vld [vmem:[%s5777_s15 + $0x1e4] ss:$8 sps:$4 sm:$0xff]   ;;  %v4660_v9 = vld [vmem:[%s5777_s15 + $0x1e0] ss:$8 sps:$4 sm:$0xff]   ;;  %v4663_v11 = vld [vmem:[%s5777_s15 + $0x1d4] ss:$8 sps:$4 sm:$0xff]  }
  0xbe   : > { %3425 = vmatpush1.bf16.msra.mxu0 %v4623_v48  ;;  %v4665_v12 = vld [vmem:[%s5777_s15 + $0xd0] ss:$8 sps:$4 sm:$0xff]   ;;  %v4667_v14 = vld [vmem:[%s5777_s15 + $0xc4] ss:$8 sps:$4 sm:$0xff]   ;;  %v4671_v16 = vld [vmem:[%s5777_s15 + $0xc0] ss:$8 sps:$4 sm:$0xff]  }
  0xbf   : > { %3478 = vmatpush1.bf16.msra.mxu1 %v4624_v49  ;;  %3426 = vmatprep.subr.bf16.mxu0 %v4625_v50  ;;  %v4666_v13 = vld [vmem:[%s5777_s15 + $0x1d0] ss:$8 sps:$4 sm:$0xff]   ;;  %v4669_v15 = vld [vmem:[%s5777_s15 + $0x1c4] ss:$8 sps:$4 sm:$0xff]   ;;  %v4672_v17 = vld [vmem:[%s5777_s15 + $0x1c0] ss:$8 sps:$4 sm:$0xff]  }
  0xc0   : > { %3479 = vmatprep.subr.bf16.mxu1 %v4627_v51  ;;  %v4673_v18 = vld [vmem:[%s5777_s15 + $0xb4] ss:$8 sps:$4 sm:$0xff]   ;;  %v4677_v20 = vld [vmem:[%s5777_s15 + $0xb0] ss:$8 sps:$4 sm:$0xff]   ;;  %v4679_v22 = vld [vmem:[%s5777_s15 + $0xa4] ss:$8 sps:$4 sm:$0xff]  }
  0xc1   : > { %v4675_v19 = vld [vmem:[%s5777_s15 + $0x1b4] ss:$8 sps:$4 sm:$0xff]   ;;  %v4678_v21 = vld [vmem:[%s5777_s15 + $0x1b0] ss:$8 sps:$4 sm:$0xff]   ;;  %v4681_v23 = vld [vmem:[%s5777_s15 + $0x1a4] ss:$8 sps:$4 sm:$0xff]  }
  0xc2   : > { %3427 = vmatpush1.bf16.msra.mxu0 %v4629_v52  ;;  %v4683_v24 = vld [vmem:[%s5777_s15 + $0xa0] ss:$8 sps:$4 sm:$0xff]   ;;  %v4685_v26 = vld [vmem:[%s5777_s15 + $0x94] ss:$8 sps:$4 sm:$0xff]   ;;  %v4689_v28 = vld [vmem:[%s5777_s15 + $0x90] ss:$8 sps:$4 sm:$0xff]  }
  0xc3   : > { %3480 = vmatpush1.bf16.msra.mxu1 %v4630_v53  ;;  %3428 = vmatprep.subr.bf16.mxu0 %v4631_v54  ;;  %v4684_v25 = vld [vmem:[%s5777_s15 + $0x1a0] ss:$8 sps:$4 sm:$0xff]   ;;  %v4687_v27 = vld [vmem:[%s5777_s15 + $0x194] ss:$8 sps:$4 sm:$0xff]   ;;  %v4690_v29 = vld [vmem:[%s5777_s15 + $0x190] ss:$8 sps:$4 sm:$0xff]  }
  0xc4   : > { %3481 = vmatprep.subr.bf16.mxu1 %v4633_v55  ;;  %v4691_v30 = vld [vmem:[%s5777_s15 + $0x84] ss:$8 sps:$4 sm:$0xff]   ;;  %v4695_v32 = vld [vmem:[%s5777_s15 + $0x80] ss:$8 sps:$4 sm:$0xff]   ;;  %v4705_v34 = vld [vmem:[%s5777_s15 + $0x274] ss:$8 sps:$4 sm:$0xff]  }
  0xc5   : > { %v4693_v31 = vld [vmem:[%s5777_s15 + $0x184] ss:$8 sps:$4 sm:$0xff]   ;;  %v4696_v33 = vld [vmem:[%s5777_s15 + $0x180] ss:$8 sps:$4 sm:$0xff]   ;;  %v4708_v35 = vld [vmem:[%s5777_s15 + $0x374] ss:$8 sps:$4 sm:$0xff]  }
  0xc6   : > { %3429 = vmatpush1.bf16.msra.mxu0 %v4635_v56  ;;  %v4697_v36 = vld [vmem:[%s6369_s0] ss:$72 sps:$4 sm:$0xff]   ;;  %v4703_v38 = vld [vmem:[%s5777_s15 + $0x270] ss:$8 sps:$4 sm:$0xff]   ;;  %v4711_v40 = vld [vmem:[%s5777_s15 + $0x264] ss:$8 sps:$4 sm:$0xff]  }
  0xc7   : > { %3482 = vmatpush1.bf16.msra.mxu1 %v4636_v57  ;;  %3430 = vmatprep.subr.bf16.mxu0 %v4637_v58  ;;  %v4700_v37 = vld [vmem:[%s6369_s0 + $0x8] ss:$72 sps:$4 sm:$0xff]   ;;  %v4714_v41 = vld [vmem:[%s5777_s15 + $0x364] ss:$8 sps:$4 sm:$0xff]   ;;  %v4781_v42 = vld [vmem:[%s6369_s0 + $0x94] ss:$72 sps:$4 sm:$0xff]  }
  0xc8   : > { %3483 = vmatprep.subr.bf16.mxu1 %v4639_v59  ;;  %v4706_v39 = vld [vmem:[%s5777_s15 + $0x370] ss:$8 sps:$4 sm:$0xff]   ;;  %v4709_v43 = vld [vmem:[%s5777_s15 + $0x260] ss:$8 sps:$4 sm:$0xff]   ;;  %v4717_v45 = vld [vmem:[%s5777_s15 + $0x254] ss:$8 sps:$4 sm:$0xff]  }
  0xc9   : > { %v4712_v44 = vld [vmem:[%s5777_s15 + $0x360] ss:$8 sps:$4 sm:$0xff]   ;;  %v4720_v46 = vld [vmem:[%s5777_s15 + $0x354] ss:$8 sps:$4 sm:$0xff]   ;;  %v4783_v47 = vld [vmem:[%s6369_s0 + $0x90] ss:$72 sps:$4 sm:$0xff]  }
  0xca   : > { %3431 = vmatpush1.bf16.msra.mxu0 %v4641_v60  ;;  %v4715_v48 = vld [vmem:[%s5777_s15 + $0x250] ss:$8 sps:$4 sm:$0xff]   ;;  %v4723_v50 = vld [vmem:[%s5777_s15 + $0x244] ss:$8 sps:$4 sm:$0xff]   ;;  %v4721_v52 = vld [vmem:[%s5777_s15 + $0x240] ss:$8 sps:$4 sm:$0xff]  }
  0xcb   : > { %3484 = vmatpush1.bf16.msra.mxu1 %v4642_v61  ;;  %3432 = vmatprep.subr.bf16.mxu0 %v4643_v62  ;;  %v4718_v49 = vld [vmem:[%s5777_s15 + $0x350] ss:$8 sps:$4 sm:$0xff]   ;;  %v4726_v51 = vld [vmem:[%s5777_s15 + $0x344] ss:$8 sps:$4 sm:$0xff]   ;;  %v4724_v53 = vld [vmem:[%s5777_s15 + $0x340] ss:$8 sps:$4 sm:$0xff]  }
  0xcc   : > { %3485 = vmatprep.subr.bf16.mxu1 %v4645_v63  ;;  %v4729_v54 = vld [vmem:[%s5777_s15 + $0x234] ss:$8 sps:$4 sm:$0xff]   ;;  %v4727_v57 = vld [vmem:[%s5777_s15 + $0x230] ss:$8 sps:$4 sm:$0xff]   ;;  %v4735_v59 = vld [vmem:[%s5777_s15 + $0x224] ss:$8 sps:$4 sm:$0xff]  }
  0xcd   : > { %v4732_v55 = vld [vmem:[%s5777_s15 + $0x334] ss:$8 sps:$4 sm:$0xff]   ;;  %v4730_v58 = vld [vmem:[%s5777_s15 + $0x330] ss:$8 sps:$4 sm:$0xff]   ;;  %v4738_v60 = vld [vmem:[%s5777_s15 + $0x324] ss:$8 sps:$4 sm:$0xff]  }
  0xce   : > { %3433 = vmatpush1.bf16.msra.mxu0 %v4647_v0  ;;  %v4784_v56 = vld [vmem:[%s6369_s0 + $0x9c] ss:$72 sps:$4 sm:$0xff]   ;;  %v4792_v61 = vld [vmem:[%s6369_s0 + $0x98] ss:$72 sps:$4 sm:$0xff]  }
  0xcf   : > { %3486 = vmatpush1.bf16.msra.mxu1 %v4648_v1  ;;  %3434 = vmatprep.subr.bf16.mxu0 %v4649_v2  ;;  %v4733_v62 = vld [vmem:[%s5777_s15 + $0x220] ss:$8 sps:$4 sm:$0xff]   ;;  %v4741_v0 = vld [vmem:[%s5777_s15 + $0x214] ss:$8 sps:$4 sm:$0xff]   ;;  %v4739_v2 = vld [vmem:[%s5777_s15 + $0x210] ss:$8 sps:$4 sm:$0xff]  }
  0xd0   : > { %3487 = vmatprep.subr.bf16.mxu1 %v4651_v3  ;;  %v4736_v63 = vld [vmem:[%s5777_s15 + $0x320] ss:$8 sps:$4 sm:$0xff]   ;;  %v4744_v1 = vld [vmem:[%s5777_s15 + $0x314] ss:$8 sps:$4 sm:$0xff]   ;;  %v4742_v3 = vld [vmem:[%s5777_s15 + $0x310] ss:$8 sps:$4 sm:$0xff]  }
  0xd2   : > { %3435 = vmatpush2.bf16.msra.mxu0 %v4653_v4  ;;  %v4747_v4 = vld [vmem:[%s5777_s15 + $0x204] ss:$8 sps:$4 sm:$0xff]  }
  0xd3   : > { %3488 = vmatpush2.bf16.msra.mxu1 %v4654_v5  ;;  %3436 = vmatprep.subr.bf16.mxu0 %v4655_v6  ;;  %v4807_v5 = vld [vmem:[%s6369_s0 + $0x14] ss:$72 sps:$4 sm:$0xff]   ;;  %v4750_v6 = vld [vmem:[%s5777_s15 + $0x304] ss:$8 sps:$4 sm:$0xff]  }
  0xd4   : > { %3489 = vmatprep.subr.bf16.mxu1 %v4657_v7  ;;  %v4810_v7 = vld [vmem:[%s6369_s0 + $0x1c] ss:$72 sps:$4 sm:$0xff]  }
  0xd6   : > { %3437 = vmatpush2.bf16.msra.mxu0 %v4659_v8  ;;  %v4745_v8 = vld [vmem:[%s5777_s15 + $0x200] ss:$8 sps:$4 sm:$0xff]  }
  0xd7   : > { %3490 = vmatpush2.bf16.msra.mxu1 %v4660_v9  ;;  %3438 = vmatprep.subr.bf16.mxu0 %v4661_v10  ;;  %v4748_v9 = vld [vmem:[%s5777_s15 + $0x300] ss:$8 sps:$4 sm:$0xff]   ;;  %v4753_v10 = vld [vmem:[%s5777_s15 + $0x2f4] ss:$8 sps:$4 sm:$0xff]  }
  0xd8   : > { %3491 = vmatprep.subr.bf16.mxu1 %v4663_v11  ;;  %v4756_v11 = vld [vmem:[%s5777_s15 + $0x3f4] ss:$8 sps:$4 sm:$0xff]  }
  0xda   : > { %3439 = vmatpush2.bf16.msra.mxu0 %v4665_v12  ;;  %v4751_v12 = vld [vmem:[%s5777_s15 + $0x2f0] ss:$8 sps:$4 sm:$0xff]  }
  0xdb   : > { %3492 = vmatpush2.bf16.msra.mxu1 %v4666_v13  ;;  %3440 = vmatprep.subr.bf16.mxu0 %v4667_v14  ;;  %v4754_v13 = vld [vmem:[%s5777_s15 + $0x3f0] ss:$8 sps:$4 sm:$0xff]   ;;  %v4759_v14 = vld [vmem:[%s5777_s15 + $0x2e4] ss:$8 sps:$4 sm:$0xff]  }
  0xdc   : > { %3493 = vmatprep.subr.bf16.mxu1 %v4669_v15  ;;  %v4762_v15 = vld [vmem:[%s5777_s15 + $0x3e4] ss:$8 sps:$4 sm:$0xff]  }
  0xde   : > { %3441 = vmatpush2.bf16.msra.mxu0 %v4671_v16  ;;  %v4757_v16 = vld [vmem:[%s5777_s15 + $0x2e0] ss:$8 sps:$4 sm:$0xff]  }
  0xdf   : > { %3494 = vmatpush2.bf16.msra.mxu1 %v4672_v17  ;;  %3442 = vmatprep.subr.bf16.mxu0 %v4673_v18  ;;  %v4760_v17 = vld [vmem:[%s5777_s15 + $0x3e0] ss:$8 sps:$4 sm:$0xff]   ;;  %v4765_v18 = vld [vmem:[%s5777_s15 + $0x2d4] ss:$8 sps:$4 sm:$0xff]  }
  0xe0   : > { %3495 = vmatprep.subr.bf16.mxu1 %v4675_v19  ;;  %v4768_v19 = vld [vmem:[%s5777_s15 + $0x3d4] ss:$8 sps:$4 sm:$0xff]  }
  0xe2   : > { %3443 = vmatpush2.bf16.msra.mxu0 %v4677_v20  ;;  %v4763_v20 = vld [vmem:[%s5777_s15 + $0x2d0] ss:$8 sps:$4 sm:$0xff]  }
  0xe3   : > { %3496 = vmatpush2.bf16.msra.mxu1 %v4678_v21  ;;  %3444 = vmatprep.subr.bf16.mxu0 %v4679_v22  ;;  %v4766_v21 = vld [vmem:[%s5777_s15 + $0x3d0] ss:$8 sps:$4 sm:$0xff]   ;;  %v4771_v22 = vld [vmem:[%s5777_s15 + $0x2c4] ss:$8 sps:$4 sm:$0xff]  }
  0xe4   : > { %3497 = vmatprep.subr.bf16.mxu1 %v4681_v23  ;;  %v4774_v23 = vld [vmem:[%s5777_s15 + $0x3c4] ss:$8 sps:$4 sm:$0xff]  }
  0xe6   : > { %3445 = vmatpush2.bf16.msra.mxu0 %v4683_v24  ;;  %v4769_v24 = vld [vmem:[%s5777_s15 + $0x2c0] ss:$8 sps:$4 sm:$0xff]  }
  0xe7   : > { %3498 = vmatpush2.bf16.msra.mxu1 %v4684_v25  ;;  %3446 = vmatprep.subr.bf16.mxu0 %v4685_v26  ;;  %v4772_v25 = vld [vmem:[%s5777_s15 + $0x3c0] ss:$8 sps:$4 sm:$0xff]   ;;  %v4777_v26 = vld [vmem:[%s5777_s15 + $0x2b4] ss:$8 sps:$4 sm:$0xff]  }
  0xe8   : > { %3499 = vmatprep.subr.bf16.mxu1 %v4687_v27  ;;  %v4780_v27 = vld [vmem:[%s5777_s15 + $0x3b4] ss:$8 sps:$4 sm:$0xff]  }
  0xea   : > { %3447 = vmatpush2.bf16.msra.mxu0 %v4689_v28  ;;  %v4775_v28 = vld [vmem:[%s5777_s15 + $0x2b0] ss:$8 sps:$4 sm:$0xff]  }
  0xeb   : > { %3500 = vmatpush2.bf16.msra.mxu1 %v4690_v29  ;;  %3448 = vmatprep.subr.bf16.mxu0 %v4691_v30  ;;  %v4778_v29 = vld [vmem:[%s5777_s15 + $0x3b0] ss:$8 sps:$4 sm:$0xff]   ;;  %v4788_v30 = vld [vmem:[%s5777_s15 + $0x2a4] ss:$8 sps:$4 sm:$0xff]  }
  0xec   : > { %3501 = vmatprep.subr.bf16.mxu1 %v4693_v31  ;;  %v4791_v31 = vld [vmem:[%s5777_s15 + $0x3a4] ss:$8 sps:$4 sm:$0xff]  }
  0xee   : > { %3449 = vmatpush2.bf16.msra.mxu0 %v4695_v32  ;;  %v4786_v32 = vld [vmem:[%s5777_s15 + $0x2a0] ss:$8 sps:$4 sm:$0xff]  }
  0xef   : > { %3502 = vmatpush2.bf16.msra.mxu1 %v4696_v33  ;;  %3524 = vmatprep.subr.bf16.mxu0 %v4705_v34  ;;  %v4789_v33 = vld [vmem:[%s5777_s15 + $0x3a0] ss:$8 sps:$4 sm:$0xff]   ;;  %v4795_v34 = vld [vmem:[%s5777_s15 + $0x294] ss:$8 sps:$4 sm:$0xff]  }
  0xf0   : > { %3577 = vmatprep.subr.bf16.mxu1 %v4708_v35  ;;  %v4798_v35 = vld [vmem:[%s5777_s15 + $0x394] ss:$8 sps:$4 sm:$0xff]  }
  0xf1   : > { %3451 = vmatmul.mubr.bf16.vlgmr.msra.gmra.mxu0 %v4697_v36  ;;  %v4793_v36 = vld [vmem:[%s5777_s15 + $0x290] ss:$8 sps:$4 sm:$0xff]  }
  0xf2   : > { %3504 = vmatmul.mubr.bf16.vlgmr.msra.gmra.mxu1 %v4700_v37  ;;  %3525 = vmatpush1.bf16.msra.mxu0 %v4703_v38  ;;  %v4796_v37 = vld [vmem:[%s5777_s15 + $0x390] ss:$8 sps:$4 sm:$0xff]   ;;  %v4801_v38 = vld [vmem:[%s5777_s15 + $0x284] ss:$8 sps:$4 sm:$0xff]  }
  0xf3   : > { %3578 = vmatpush1.bf16.msra.mxu1 %v4706_v39  ;;  %3526 = vmatprep.subr.bf16.mxu0 %v4711_v40  ;;  %v4804_v39 = vld [vmem:[%s5777_s15 + $0x384] ss:$8 sps:$4 sm:$0xff]   ;;  %v4799_v40 = vld [vmem:[%s5777_s15 + $0x280] ss:$8 sps:$4 sm:$0xff]  }
  0xf4   : > { %3579 = vmatprep.subr.bf16.mxu1 %v4714_v41  ;;  %3460 = vmatprep.mubr.bf16.mxu0 %v4781_v42  ;;  %v4802_v41 = vld [vmem:[%s5777_s15 + $0x380] ss:$8 sps:$4 sm:$0xff]   ;;  %v4813_v42 = vld [vmem:[%s5777_s15 + $0x474] ss:$8 sps:$4 sm:$0xff]  }
  0xf5   : > { %3513 = vmatprep.mubr.bf16.mxu1 %v4784_v56  ;;  %v4825_v56 = vld [vmem:[%s6369_s0 + $0xa0] ss:$72 sps:$4 sm:$0xff]  }
  0xf6   : > { %3527 = vmatpush1.bf16.msra.mxu0 %v4709_v43  ;;  %v4816_v43 = vld [vmem:[%s5777_s15 + $0x574] ss:$8 sps:$4 sm:$0xff]  }
  0xf7   : > { %3580 = vmatpush1.bf16.msra.mxu1 %v4712_v44  ;;  %3528 = vmatprep.subr.bf16.mxu0 %v4717_v45  ;;  %v4805_v44 = vld [vmem:[%s6369_s0 + $0x10] ss:$72 sps:$4 sm:$0xff]  }
  0xf8   : > { %3581 = vmatprep.subr.bf16.mxu1 %v4720_v46  ;;  %v4808_v45 = vld [vmem:[%s6369_s0 + $0x18] ss:$72 sps:$4 sm:$0xff]  }
  0xf9   : > { %3461 = vmatmul.mubr.bf16.gmra.mxu0 %v4783_v47  ;;  %v4811_v46 = vld [vmem:[%s5777_s15 + $0x470] ss:$8 sps:$4 sm:$0xff]  }
  0xfa   : > { %3529 = vmatpush1.bf16.msra.mxu0 %v4715_v48  ;;  %3514 = vmatmul.mubr.bf16.gmra.mxu1 %v4792_v61  ;;  %v4814_v47 = vld [vmem:[%s5777_s15 + $0x570] ss:$8 sps:$4 sm:$0xff]   ;;  %v4819_v48 = vld [vmem:[%s5777_s15 + $0x464] ss:$8 sps:$4 sm:$0xff]  }
  0xfb   : > { %3582 = vmatpush1.bf16.msra.mxu1 %v4718_v49  ;;  %3530 = vmatprep.subr.bf16.mxu0 %v4723_v50  ;;  %v4822_v49 = vld [vmem:[%s5777_s15 + $0x564] ss:$8 sps:$4 sm:$0xff]  }
  0xfc   : > { %3583 = vmatprep.subr.bf16.mxu1 %v4726_v51  ;;  %3556 = vmatprep.mubr.bf16.mxu0 %v4807_v5  ;;  %v4823_v50 = vld [vmem:[%s6369_s0 + $0xa4] ss:$72 sps:$4 sm:$0xff]   ;;  %v4844_v5 = vld [vmem:[%s5777_s15 + $0x530] ss:$8 sps:$4 sm:$0xff]  }
  0xfd   : > { %3609 = vmatprep.mubr.bf16.mxu1 %v4810_v7  ;;  %v4832_v51 = vld [vmem:[%s6369_s0 + $0xac] ss:$72 sps:$4 sm:$0xff]  }
  0xfe   : > { %3531 = vmatpush1.bf16.msra.mxu0 %v4721_v52  ;;  %v4817_v52 = vld [vmem:[%s5777_s15 + $0x460] ss:$8 sps:$4 sm:$0xff]   ;;  %v4840_v61 = vld [vmem:[%s5777_s15 + $0x544] ss:$8 sps:$4 sm:$0xff]  }
  0xff   : > { %3584 = vmatpush1.bf16.msra.mxu1 %v4724_v53  ;;  %3532 = vmatprep.subr.bf16.mxu0 %v4729_v54  ;;  %v4820_v53 = vld [vmem:[%s5777_s15 + $0x560] ss:$8 sps:$4 sm:$0xff]   ;;  %v4828_v54 = vld [vmem:[%s5777_s15 + $0x454] ss:$8 sps:$4 sm:$0xff]   ;;  %v4852_v7 = vld [vmem:[%s5777_s15 + $0x524] ss:$8 sps:$4 sm:$0xff]  }
 0x100   : > { %3585 = vmatprep.subr.bf16.mxu1 %v4732_v55  ;;  %v4831_v55 = vld [vmem:[%s5777_s15 + $0x554] ss:$8 sps:$4 sm:$0xff]  }
 0x102   : > { %3533 = vmatpush1.bf16.msra.mxu0 %v4727_v57  ;;  %v4826_v57 = vld [vmem:[%s5777_s15 + $0x450] ss:$8 sps:$4 sm:$0xff]  }
 0x103   : > { %3586 = vmatpush1.bf16.msra.mxu1 %v4730_v58  ;;  %3534 = vmatprep.subr.bf16.mxu0 %v4735_v59  ;;  %v4829_v58 = vld [vmem:[%s5777_s15 + $0x550] ss:$8 sps:$4 sm:$0xff]  }
 0x104   : > { %3587 = vmatprep.subr.bf16.mxu1 %v4738_v60  ;;  %v4834_v59 = vld [vmem:[%s6369_s0 + $0xa8] ss:$72 sps:$4 sm:$0xff]   ;;  %v4837_v60 = vld [vmem:[%s5777_s15 + $0x444] ss:$8 sps:$4 sm:$0xff]  }
 0x106   : > { %3535 = vmatpush1.bf16.msra.mxu0 %v4733_v62  ;;  %v4915_v62 = vld [vmem:[%s6369_s0 + $0x24] ss:$72 sps:$4 sm:$0xff]  }
 0x107   : > { %3588 = vmatpush1.bf16.msra.mxu1 %v4736_v63  ;;  %3536 = vmatprep.subr.bf16.mxu0 %v4741_v0  ;;  %v4918_v63 = vld [vmem:[%s6369_s0 + $0x2c] ss:$72 sps:$4 sm:$0xff]   ;;  %v4835_v0 = vld [vmem:[%s5777_s15 + $0x440] ss:$8 sps:$4 sm:$0xff]  }
 0x108   : > { %3589 = vmatprep.subr.bf16.mxu1 %v4744_v1  ;;  %v4838_v1 = vld [vmem:[%s5777_s15 + $0x540] ss:$8 sps:$4 sm:$0xff]  }
 0x10a   : > { %3537 = vmatpush1.bf16.msra.mxu0 %v4739_v2  ;;  %v4843_v2 = vld [vmem:[%s5777_s15 + $0x434] ss:$8 sps:$4 sm:$0xff]  }
 0x10b   : > { %3590 = vmatpush1.bf16.msra.mxu1 %v4742_v3  ;;  %3538 = vmatprep.subr.bf16.mxu0 %v4747_v4  ;;  %v4846_v3 = vld [vmem:[%s5777_s15 + $0x534] ss:$8 sps:$4 sm:$0xff]   ;;  %v4841_v4 = vld [vmem:[%s5777_s15 + $0x430] ss:$8 sps:$4 sm:$0xff]  }
 0x10c   : > { %3591 = vmatprep.subr.bf16.mxu1 %v4750_v6  ;;  %v4849_v6 = vld [vmem:[%s5777_s15 + $0x424] ss:$8 sps:$4 sm:$0xff]  }
 0x10e   : > { %3539 = vmatpush1.bf16.msra.mxu0 %v4745_v8  ;;  %v4847_v8 = vld [vmem:[%s5777_s15 + $0x420] ss:$8 sps:$4 sm:$0xff]  }
 0x10f   : > { %3592 = vmatpush1.bf16.msra.mxu1 %v4748_v9  ;;  %3540 = vmatprep.subr.bf16.mxu0 %v4753_v10  ;;  %v4850_v9 = vld [vmem:[%s5777_s15 + $0x520] ss:$8 sps:$4 sm:$0xff]   ;;  %v4855_v10 = vld [vmem:[%s5777_s15 + $0x414] ss:$8 sps:$4 sm:$0xff]  }
 0x110   : > { %3593 = vmatprep.subr.bf16.mxu1 %v4756_v11  ;;  %v4858_v11 = vld [vmem:[%s5777_s15 + $0x514] ss:$8 sps:$4 sm:$0xff]  }
 0x112   : > { %3541 = vmatpush2.bf16.msra.mxu0 %v4751_v12  ;;  %v4853_v12 = vld [vmem:[%s5777_s15 + $0x410] ss:$8 sps:$4 sm:$0xff]  }
 0x113   : > { %3594 = vmatpush2.bf16.msra.mxu1 %v4754_v13  ;;  %3542 = vmatprep.subr.bf16.mxu0 %v4759_v14  ;;  %v4856_v13 = vld [vmem:[%s5777_s15 + $0x510] ss:$8 sps:$4 sm:$0xff]   ;;  %v4861_v14 = vld [vmem:[%s5777_s15 + $0x404] ss:$8 sps:$4 sm:$0xff]  }
 0x114   : > { %3595 = vmatprep.subr.bf16.mxu1 %v4762_v15  ;;  %v4864_v15 = vld [vmem:[%s5777_s15 + $0x504] ss:$8 sps:$4 sm:$0xff]  }
 0x116   : > { %3543 = vmatpush2.bf16.msra.mxu0 %v4757_v16  ;;  %v4859_v16 = vld [vmem:[%s5777_s15 + $0x400] ss:$8 sps:$4 sm:$0xff]  }
 0x117   : > { %3596 = vmatpush2.bf16.msra.mxu1 %v4760_v17  ;;  %3544 = vmatprep.subr.bf16.mxu0 %v4765_v18  ;;  %v4862_v17 = vld [vmem:[%s5777_s15 + $0x500] ss:$8 sps:$4 sm:$0xff]   ;;  %v4867_v18 = vld [vmem:[%s5777_s15 + $0x4f4] ss:$8 sps:$4 sm:$0xff]  }
 0x118   : > { %3597 = vmatprep.subr.bf16.mxu1 %v4768_v19  ;;  %v4870_v19 = vld [vmem:[%s5777_s15 + $0x5f4] ss:$8 sps:$4 sm:$0xff]  }
 0x11a   : > { %3545 = vmatpush2.bf16.msra.mxu0 %v4763_v20  ;;  %v4865_v20 = vld [vmem:[%s5777_s15 + $0x4f0] ss:$8 sps:$4 sm:$0xff]  }
 0x11b   : > { %3598 = vmatpush2.bf16.msra.mxu1 %v4766_v21  ;;  %3546 = vmatprep.subr.bf16.mxu0 %v4771_v22  ;;  %v4868_v21 = vld [vmem:[%s5777_s15 + $0x5f0] ss:$8 sps:$4 sm:$0xff]   ;;  %v4873_v22 = vld [vmem:[%s5777_s15 + $0x4e4] ss:$8 sps:$4 sm:$0xff]  }
 0x11c   : > { %3599 = vmatprep.subr.bf16.mxu1 %v4774_v23  ;;  %v4876_v23 = vld [vmem:[%s5777_s15 + $0x5e4] ss:$8 sps:$4 sm:$0xff]  }
 0x11e   : > { %3547 = vmatpush2.bf16.msra.mxu0 %v4769_v24  ;;  %v4871_v24 = vld [vmem:[%s5777_s15 + $0x4e0] ss:$8 sps:$4 sm:$0xff]  }
 0x11f   : > { %3600 = vmatpush2.bf16.msra.mxu1 %v4772_v25  ;;  %3548 = vmatprep.subr.bf16.mxu0 %v4777_v26  ;;  %v4874_v25 = vld [vmem:[%s5777_s15 + $0x5e0] ss:$8 sps:$4 sm:$0xff]   ;;  %v4879_v26 = vld [vmem:[%s5777_s15 + $0x4d4] ss:$8 sps:$4 sm:$0xff]  }
 0x120   : > { %3601 = vmatprep.subr.bf16.mxu1 %v4780_v27  ;;  %v4882_v27 = vld [vmem:[%s5777_s15 + $0x5d4] ss:$8 sps:$4 sm:$0xff]  }
 0x122   : > { %3549 = vmatpush2.bf16.msra.mxu0 %v4775_v28  ;;  %v4877_v28 = vld [vmem:[%s5777_s15 + $0x4d0] ss:$8 sps:$4 sm:$0xff]  }
 0x123   : > { %3602 = vmatpush2.bf16.msra.mxu1 %v4778_v29  ;;  %3550 = vmatprep.subr.bf16.mxu0 %v4788_v30  ;;  %v4880_v29 = vld [vmem:[%s5777_s15 + $0x5d0] ss:$8 sps:$4 sm:$0xff]   ;;  %v4885_v30 = vld [vmem:[%s5777_s15 + $0x4c4] ss:$8 sps:$4 sm:$0xff]  }
 0x124   : > { %3603 = vmatprep.subr.bf16.mxu1 %v4791_v31  ;;  %v4888_v31 = vld [vmem:[%s5777_s15 + $0x5c4] ss:$8 sps:$4 sm:$0xff]  }
 0x126   : > { %3551 = vmatpush2.bf16.msra.mxu0 %v4786_v32  ;;  %v4883_v32 = vld [vmem:[%s5777_s15 + $0x4c0] ss:$8 sps:$4 sm:$0xff]  }
 0x127   : > { %3604 = vmatpush2.bf16.msra.mxu1 %v4789_v33  ;;  %3552 = vmatprep.subr.bf16.mxu0 %v4795_v34  ;;  %v4886_v33 = vld [vmem:[%s5777_s15 + $0x5c0] ss:$8 sps:$4 sm:$0xff]   ;;  %v4891_v34 = vld [vmem:[%s5777_s15 + $0x4b4] ss:$8 sps:$4 sm:$0xff]  }
 0x128   : > { %3605 = vmatprep.subr.bf16.mxu1 %v4798_v35  ;;  %v4894_v35 = vld [vmem:[%s5777_s15 + $0x5b4] ss:$8 sps:$4 sm:$0xff]  }
 0x12a   : > { %3553 = vmatpush2.bf16.msra.mxu0 %v4793_v36  ;;  %v4889_v36 = vld [vmem:[%s5777_s15 + $0x4b0] ss:$8 sps:$4 sm:$0xff]  }
 0x12b   : > { %3606 = vmatpush2.bf16.msra.mxu1 %v4796_v37  ;;  %3554 = vmatprep.subr.bf16.mxu0 %v4801_v38  ;;  %v4892_v37 = vld [vmem:[%s5777_s15 + $0x5b0] ss:$8 sps:$4 sm:$0xff]   ;;  %v4897_v38 = vld [vmem:[%s5777_s15 + $0x4a4] ss:$8 sps:$4 sm:$0xff]  }
 0x12c   : > { %3607 = vmatprep.subr.bf16.mxu1 %v4804_v39  ;;  %v4900_v39 = vld [vmem:[%s5777_s15 + $0x5a4] ss:$8 sps:$4 sm:$0xff]  }
 0x12e   : > { %3555 = vmatpush2.bf16.msra.mxu0 %v4799_v40  ;;  %v4895_v40 = vld [vmem:[%s5777_s15 + $0x4a0] ss:$8 sps:$4 sm:$0xff]  }
 0x12f   : > { %3608 = vmatpush2.bf16.msra.mxu1 %v4802_v41  ;;  %3630 = vmatprep.subr.bf16.mxu0 %v4813_v42  ;;  %v4898_v41 = vld [vmem:[%s5777_s15 + $0x5a0] ss:$8 sps:$4 sm:$0xff]   ;;  %v4903_v42 = vld [vmem:[%s5777_s15 + $0x494] ss:$8 sps:$4 sm:$0xff]  }
 0x130   : > { %3683 = vmatprep.subr.bf16.mxu1 %v4816_v43  ;;  %v4906_v43 = vld [vmem:[%s5777_s15 + $0x594] ss:$8 sps:$4 sm:$0xff]  }
 0x131   : > { %3557 = vmatmul.mubr.bf16.vlgmr.msra.gmra.mxu0 %v4805_v44  ;;  %v4901_v44 = vld [vmem:[%s5777_s15 + $0x490] ss:$8 sps:$4 sm:$0xff]  }
 0x132   : > { %3610 = vmatmul.mubr.bf16.vlgmr.msra.gmra.mxu1 %v4808_v45  ;;  %3631 = vmatpush1.bf16.msra.mxu0 %v4811_v46  ;;  %v4904_v45 = vld [vmem:[%s5777_s15 + $0x590] ss:$8 sps:$4 sm:$0xff]   ;;  %v4909_v46 = vld [vmem:[%s5777_s15 + $0x484] ss:$8 sps:$4 sm:$0xff]  }
 0x133   : > { %3684 = vmatpush1.bf16.msra.mxu1 %v4814_v47  ;;  %3632 = vmatprep.subr.bf16.mxu0 %v4819_v48  ;;  %v4912_v47 = vld [vmem:[%s5777_s15 + $0x584] ss:$8 sps:$4 sm:$0xff]   ;;  %v4907_v48 = vld [vmem:[%s5777_s15 + $0x480] ss:$8 sps:$4 sm:$0xff]  }
 0x134   : > { %3685 = vmatprep.subr.bf16.mxu1 %v4822_v49  ;;  %3566 = vmatprep.mubr.bf16.mxu0 %v4823_v50  ;;  %v4910_v49 = vld [vmem:[%s5777_s15 + $0x580] ss:$8 sps:$4 sm:$0xff]   ;;  %v4921_v50 = vld [vmem:[%s5777_s15 + $0x674] ss:$8 sps:$4 sm:$0xff]  }
 0x135   : > { %3619 = vmatprep.mubr.bf16.mxu1 %v4832_v51  ;;  %v4924_v51 = vld [vmem:[%s5777_s15 + $0x774] ss:$8 sps:$4 sm:$0xff]  }
 0x136   : > { %3633 = vmatpush1.bf16.msra.mxu0 %v4817_v52  ;;  %v4913_v52 = vld [vmem:[%s6369_s0 + $0x20] ss:$72 sps:$4 sm:$0xff]  }
 0x137   : > { %3686 = vmatpush1.bf16.msra.mxu1 %v4820_v53  ;;  %3634 = vmatprep.subr.bf16.mxu0 %v4828_v54  ;;  %v4916_v53 = vld [vmem:[%s6369_s0 + $0x28] ss:$72 sps:$4 sm:$0xff]  }
 0x138   : > { %3687 = vmatprep.subr.bf16.mxu1 %v4831_v55  ;;  %v4919_v54 = vld [vmem:[%s5777_s15 + $0x670] ss:$8 sps:$4 sm:$0xff]  }
 0x139   : > { %3567 = vmatmul.mubr.bf16.gmra.mxu0 %v4825_v56  ;;  %v4922_v55 = vld [vmem:[%s5777_s15 + $0x770] ss:$8 sps:$4 sm:$0xff]   ;;  %v4927_v56 = vld [vmem:[%s5777_s15 + $0x664] ss:$8 sps:$4 sm:$0xff]  }
 0x13a   : > { %3620 = vmatmul.mubr.bf16.gmra.mxu1 %v4834_v59  ;;  %3635 = vmatpush1.bf16.msra.mxu0 %v4826_v57  ;;  %v4930_v57 = vld [vmem:[%s5777_s15 + $0x764] ss:$8 sps:$4 sm:$0xff]  }
 0x13b   : > { %3688 = vmatpush1.bf16.msra.mxu1 %v4829_v58  ;;  %3636 = vmatprep.subr.bf16.mxu0 %v4837_v60  ;;  %v4931_v58 = vld [vmem:[%s6369_s0 + $0xb4] ss:$72 sps:$4 sm:$0xff]   ;;  %v4925_v60 = vld [vmem:[%s5777_s15 + $0x660] ss:$8 sps:$4 sm:$0xff]  }
 0x13c   : > { %3689 = vmatprep.subr.bf16.mxu1 %v4840_v61  ;;  %3662 = vmatprep.mubr.bf16.mxu0 %v4915_v62  ;;  %v4940_v59 = vld [vmem:[%s6369_s0 + $0xbc] ss:$72 sps:$4 sm:$0xff]   ;;  %v4928_v61 = vld [vmem:[%s5777_s15 + $0x760] ss:$8 sps:$4 sm:$0xff]  }
 0x13d   : > { %3715 = vmatprep.mubr.bf16.mxu1 %v4918_v63  ;;  %v4936_v62 = vld [vmem:[%s5777_s15 + $0x654] ss:$8 sps:$4 sm:$0xff]  }
 0x13e   : > { %3637 = vmatpush1.bf16.msra.mxu0 %v4835_v0  ;;  %v4939_v63 = vld [vmem:[%s5777_s15 + $0x754] ss:$8 sps:$4 sm:$0xff]   ;;  %v4933_v0 = vld [vmem:[%s6369_s0 + $0xb0] ss:$72 sps:$4 sm:$0xff]  }
 0x13f   : > { %3690 = vmatpush1.bf16.msra.mxu1 %v4838_v1  ;;  %3638 = vmatprep.subr.bf16.mxu0 %v4843_v2  ;;  %v4934_v1 = vld [vmem:[%s5777_s15 + $0x650] ss:$8 sps:$4 sm:$0xff]  }
 0x140   : > { %3691 = vmatprep.subr.bf16.mxu1 %v4846_v3  ;;  %v4942_v2 = vld [vmem:[%s6369_s0 + $0xb8] ss:$72 sps:$4 sm:$0xff]  }
 0x141   : > { %v4937_v3 = vld [vmem:[%s5777_s15 + $0x750] ss:$8 sps:$4 sm:$0xff]  }
 0x142   : > { %3639 = vmatpush1.bf16.msra.mxu0 %v4841_v4  ;;  %v4945_v4 = vld [vmem:[%s5777_s15 + $0x644] ss:$8 sps:$4 sm:$0xff]  }
 0x143   : > { %3692 = vmatpush1.bf16.msra.mxu1 %v4844_v5  ;;  %3640 = vmatprep.subr.bf16.mxu0 %v4849_v6  ;;  %v4948_v5 = vld [vmem:[%s5777_s15 + $0x744] ss:$8 sps:$4 sm:$0xff]   ;;  %v5023_v6 = vld [vmem:[%s6369_s0 + $0x34] ss:$72 sps:$4 sm:$0xff]  }
 0x144   : > { %3693 = vmatprep.subr.bf16.mxu1 %v4852_v7  ;;  %v5026_v7 = vld [vmem:[%s6369_s0 + $0x3c] ss:$72 sps:$4 sm:$0xff]  }
 0x146   : > { %3641 = vmatpush1.bf16.msra.mxu0 %v4847_v8  ;;  %v4943_v8 = vld [vmem:[%s5777_s15 + $0x640] ss:$8 sps:$4 sm:$0xff]  }
 0x147   : > { %3694 = vmatpush1.bf16.msra.mxu1 %v4850_v9  ;;  %3642 = vmatprep.subr.bf16.mxu0 %v4855_v10  ;;  %v4946_v9 = vld [vmem:[%s5777_s15 + $0x740] ss:$8 sps:$4 sm:$0xff]   ;;  %v4951_v10 = vld [vmem:[%s5777_s15 + $0x634] ss:$8 sps:$4 sm:$0xff]  }
 0x148   : > { %3695 = vmatprep.subr.bf16.mxu1 %v4858_v11  ;;  %v4954_v11 = vld [vmem:[%s5777_s15 + $0x734] ss:$8 sps:$4 sm:$0xff]  }
 0x14a   : > { %3643 = vmatpush1.bf16.msra.mxu0 %v4853_v12  ;;  %v4949_v12 = vld [vmem:[%s5777_s15 + $0x630] ss:$8 sps:$4 sm:$0xff]  }
 0x14b   : > { %3696 = vmatpush1.bf16.msra.mxu1 %v4856_v13  ;;  %3644 = vmatprep.subr.bf16.mxu0 %v4861_v14  ;;  %v4952_v13 = vld [vmem:[%s5777_s15 + $0x730] ss:$8 sps:$4 sm:$0xff]   ;;  %v4957_v14 = vld [vmem:[%s5777_s15 + $0x624] ss:$8 sps:$4 sm:$0xff]  }
 0x14c   : > { %3697 = vmatprep.subr.bf16.mxu1 %v4864_v15  ;;  %v4960_v15 = vld [vmem:[%s5777_s15 + $0x724] ss:$8 sps:$4 sm:$0xff]  }
 0x14e   : > { %3645 = vmatpush1.bf16.msra.mxu0 %v4859_v16  ;;  %v4955_v16 = vld [vmem:[%s5777_s15 + $0x620] ss:$8 sps:$4 sm:$0xff]  }
 0x14f   : > { %3698 = vmatpush1.bf16.msra.mxu1 %v4862_v17  ;;  %3646 = vmatprep.subr.bf16.mxu0 %v4867_v18  ;;  %v4958_v17 = vld [vmem:[%s5777_s15 + $0x720] ss:$8 sps:$4 sm:$0xff]   ;;  %v4963_v18 = vld [vmem:[%s5777_s15 + $0x614] ss:$8 sps:$4 sm:$0xff]  }
 0x150   : > { %3699 = vmatprep.subr.bf16.mxu1 %v4870_v19  ;;  %v4966_v19 = vld [vmem:[%s5777_s15 + $0x714] ss:$8 sps:$4 sm:$0xff]  }
 0x152   : > { %3647 = vmatpush2.bf16.msra.mxu0 %v4865_v20  ;;  %v4961_v20 = vld [vmem:[%s5777_s15 + $0x610] ss:$8 sps:$4 sm:$0xff]  }
 0x153   : > { %3700 = vmatpush2.bf16.msra.mxu1 %v4868_v21  ;;  %3648 = vmatprep.subr.bf16.mxu0 %v4873_v22  ;;  %v4964_v21 = vld [vmem:[%s5777_s15 + $0x710] ss:$8 sps:$4 sm:$0xff]   ;;  %v4969_v22 = vld [vmem:[%s5777_s15 + $0x604] ss:$8 sps:$4 sm:$0xff]  }
 0x154   : > { %3701 = vmatprep.subr.bf16.mxu1 %v4876_v23  ;;  %v4972_v23 = vld [vmem:[%s5777_s15 + $0x704] ss:$8 sps:$4 sm:$0xff]  }
 0x156   : > { %3649 = vmatpush2.bf16.msra.mxu0 %v4871_v24  ;;  %v4967_v24 = vld [vmem:[%s5777_s15 + $0x600] ss:$8 sps:$4 sm:$0xff]  }
 0x157   : > { %3702 = vmatpush2.bf16.msra.mxu1 %v4874_v25  ;;  %3650 = vmatprep.subr.bf16.mxu0 %v4879_v26  ;;  %v4970_v25 = vld [vmem:[%s5777_s15 + $0x700] ss:$8 sps:$4 sm:$0xff]   ;;  %v4975_v26 = vld [vmem:[%s5777_s15 + $0x6f4] ss:$8 sps:$4 sm:$0xff]  }
 0x158   : > { %3703 = vmatprep.subr.bf16.mxu1 %v4882_v27  ;;  %v4978_v27 = vld [vmem:[%s5777_s15 + $0x7f4] ss:$8 sps:$4 sm:$0xff]  }
 0x15a   : > { %3651 = vmatpush2.bf16.msra.mxu0 %v4877_v28  ;;  %v4973_v28 = vld [vmem:[%s5777_s15 + $0x6f0] ss:$8 sps:$4 sm:$0xff]  }
 0x15b   : > { %3704 = vmatpush2.bf16.msra.mxu1 %v4880_v29  ;;  %3652 = vmatprep.subr.bf16.mxu0 %v4885_v30  ;;  %v4976_v29 = vld [vmem:[%s5777_s15 + $0x7f0] ss:$8 sps:$4 sm:$0xff]   ;;  %v4981_v30 = vld [vmem:[%s5777_s15 + $0x6e4] ss:$8 sps:$4 sm:$0xff]  }
 0x15c   : > { %3705 = vmatprep.subr.bf16.mxu1 %v4888_v31  ;;  %v4984_v31 = vld [vmem:[%s5777_s15 + $0x7e4] ss:$8 sps:$4 sm:$0xff]  }
 0x15e   : > { %3653 = vmatpush2.bf16.msra.mxu0 %v4883_v32  ;;  %v4979_v32 = vld [vmem:[%s5777_s15 + $0x6e0] ss:$8 sps:$4 sm:$0xff]  }
 0x15f   : > { %3706 = vmatpush2.bf16.msra.mxu1 %v4886_v33  ;;  %3654 = vmatprep.subr.bf16.mxu0 %v4891_v34  ;;  %v4982_v33 = vld [vmem:[%s5777_s15 + $0x7e0] ss:$8 sps:$4 sm:$0xff]   ;;  %v4987_v34 = vld [vmem:[%s5777_s15 + $0x6d4] ss:$8 sps:$4 sm:$0xff]  }
 0x160   : > { %3707 = vmatprep.subr.bf16.mxu1 %v4894_v35  ;;  %v4990_v35 = vld [vmem:[%s5777_s15 + $0x7d4] ss:$8 sps:$4 sm:$0xff]  }
 0x162   : > { %3655 = vmatpush2.bf16.msra.mxu0 %v4889_v36  ;;  %v4985_v36 = vld [vmem:[%s5777_s15 + $0x6d0] ss:$8 sps:$4 sm:$0xff]  }
 0x163   : > { %3708 = vmatpush2.bf16.msra.mxu1 %v4892_v37  ;;  %3656 = vmatprep.subr.bf16.mxu0 %v4897_v38  ;;  %v4988_v37 = vld [vmem:[%s5777_s15 + $0x7d0] ss:$8 sps:$4 sm:$0xff]   ;;  %v4993_v38 = vld [vmem:[%s5777_s15 + $0x6c4] ss:$8 sps:$4 sm:$0xff]  }
 0x164   : > { %3709 = vmatprep.subr.bf16.mxu1 %v4900_v39  ;;  %v4996_v39 = vld [vmem:[%s5777_s15 + $0x7c4] ss:$8 sps:$4 sm:$0xff]  }
 0x166   : > { %3657 = vmatpush2.bf16.msra.mxu0 %v4895_v40  ;;  %v4991_v40 = vld [vmem:[%s5777_s15 + $0x6c0] ss:$8 sps:$4 sm:$0xff]  }
 0x167   : > { %3710 = vmatpush2.bf16.msra.mxu1 %v4898_v41  ;;  %3658 = vmatprep.subr.bf16.mxu0 %v4903_v42  ;;  %v4994_v41 = vld [vmem:[%s5777_s15 + $0x7c0] ss:$8 sps:$4 sm:$0xff]   ;;  %v4999_v42 = vld [vmem:[%s5777_s15 + $0x6b4] ss:$8 sps:$4 sm:$0xff]  }
 0x168   : > { %3711 = vmatprep.subr.bf16.mxu1 %v4906_v43  ;;  %v5002_v43 = vld [vmem:[%s5777_s15 + $0x7b4] ss:$8 sps:$4 sm:$0xff]  }
 0x16a   : > { %3659 = vmatpush2.bf16.msra.mxu0 %v4901_v44  ;;  %v4997_v44 = vld [vmem:[%s5777_s15 + $0x6b0] ss:$8 sps:$4 sm:$0xff]  }
 0x16b   : > { %3712 = vmatpush2.bf16.msra.mxu1 %v4904_v45  ;;  %3660 = vmatprep.subr.bf16.mxu0 %v4909_v46  ;;  %v5000_v45 = vld [vmem:[%s5777_s15 + $0x7b0] ss:$8 sps:$4 sm:$0xff]   ;;  %v5005_v46 = vld [vmem:[%s5777_s15 + $0x6a4] ss:$8 sps:$4 sm:$0xff]  }
 0x16c   : > { %3713 = vmatprep.subr.bf16.mxu1 %v4912_v47  ;;  %v5008_v47 = vld [vmem:[%s5777_s15 + $0x7a4] ss:$8 sps:$4 sm:$0xff]  }
 0x16e   : > { %3661 = vmatpush2.bf16.msra.mxu0 %v4907_v48  ;;  %v5003_v48 = vld [vmem:[%s5777_s15 + $0x6a0] ss:$8 sps:$4 sm:$0xff]  }
 0x16f   : > { %3714 = vmatpush2.bf16.msra.mxu1 %v4910_v49  ;;  %3736 = vmatprep.subr.bf16.mxu0 %v4921_v50  ;;  %v5006_v49 = vld [vmem:[%s5777_s15 + $0x7a0] ss:$8 sps:$4 sm:$0xff]   ;;  %v5011_v50 = vld [vmem:[%s5777_s15 + $0x694] ss:$8 sps:$4 sm:$0xff]  }
 0x170   : > { %3789 = vmatprep.subr.bf16.mxu1 %v4924_v51  ;;  %v5014_v51 = vld [vmem:[%s5777_s15 + $0x794] ss:$8 sps:$4 sm:$0xff]  }
 0x171   : > { %3663 = vmatmul.mubr.bf16.vlgmr.msra.gmra.mxu0 %v4913_v52  ;;  %v5009_v52 = vld [vmem:[%s5777_s15 + $0x690] ss:$8 sps:$4 sm:$0xff]  }
 0x172   : > { %3716 = vmatmul.mubr.bf16.vlgmr.msra.gmra.mxu1 %v4916_v53  ;;  %3737 = vmatpush1.bf16.msra.mxu0 %v4919_v54  ;;  %v5012_v53 = vld [vmem:[%s5777_s15 + $0x790] ss:$8 sps:$4 sm:$0xff]   ;;  %v5017_v54 = vld [vmem:[%s5777_s15 + $0x684] ss:$8 sps:$4 sm:$0xff]  }
 0x173   : > { %3790 = vmatpush1.bf16.msra.mxu1 %v4922_v55  ;;  %3738 = vmatprep.subr.bf16.mxu0 %v4927_v56  ;;  %v5020_v55 = vld [vmem:[%s5777_s15 + $0x784] ss:$8 sps:$4 sm:$0xff]   ;;  %v5015_v56 = vld [vmem:[%s5777_s15 + $0x680] ss:$8 sps:$4 sm:$0xff]  }
 0x174   : > { %3791 = vmatprep.subr.bf16.mxu1 %v4930_v57  ;;  %3672 = vmatprep.mubr.bf16.mxu0 %v4931_v58  ;;  %v5018_v57 = vld [vmem:[%s5777_s15 + $0x780] ss:$8 sps:$4 sm:$0xff]   ;;  %v5029_v58 = vld [vmem:[%s5777_s15 + $0x874] ss:$8 sps:$4 sm:$0xff]  }
 0x175   : > { %3725 = vmatprep.mubr.bf16.mxu1 %v4940_v59  ;;  %v5021_v59 = vld [vmem:[%s6369_s0 + $0x30] ss:$72 sps:$4 sm:$0xff]  }
 0x176   : > { %3739 = vmatpush1.bf16.msra.mxu0 %v4925_v60  ;;  %v5024_v60 = vld [vmem:[%s6369_s0 + $0x38] ss:$72 sps:$4 sm:$0xff]  }
 0x177   : > { %3792 = vmatpush1.bf16.msra.mxu1 %v4928_v61  ;;  %3740 = vmatprep.subr.bf16.mxu0 %v4936_v62  ;;  %v5027_v61 = vld [vmem:[%s5777_s15 + $0x870] ss:$8 sps:$4 sm:$0xff]   ;;  %v5032_v62 = vld [vmem:[%s5777_s15 + $0x864] ss:$8 sps:$4 sm:$0xff]  }
 0x178   : > { %3793 = vmatprep.subr.bf16.mxu1 %v4939_v63  ;;  %v5033_v63 = vld [vmem:[%s6369_s0 + $0xc4] ss:$72 sps:$4 sm:$0xff]  }
 0x179   : > { %3673 = vmatmul.mubr.bf16.gmra.mxu0 %v4933_v0  ;;  %v5039_v0 = vld [vmem:[%s6369_s0 + $0xcc] ss:$72 sps:$4 sm:$0xff]  }
 0x17a   : > { %3726 = vmatmul.mubr.bf16.gmra.mxu1 %v4942_v2  ;;  %3741 = vmatpush1.bf16.msra.mxu0 %v4934_v1  ;;  %v5030_v1 = vld [vmem:[%s5777_s15 + $0x860] ss:$8 sps:$4 sm:$0xff]   ;;  %v5038_v2 = vld [vmem:[%s5777_s15 + $0x854] ss:$8 sps:$4 sm:$0xff]  }
 0x17b   : > { %3794 = vmatpush1.bf16.msra.mxu1 %v4937_v3  ;;  %3742 = vmatprep.subr.bf16.mxu0 %v4945_v4  ;;  %v5035_v3 = vld [vmem:[%s6369_s0 + $0xc0] ss:$72 sps:$4 sm:$0xff]  }
 0x17c   : > { %3795 = vmatprep.subr.bf16.mxu1 %v4948_v5  ;;  %3768 = vmatprep.mubr.bf16.mxu0 %v5023_v6  ;;  %v5041_v4 = vld [vmem:[%s6369_s0 + $0xc8] ss:$72 sps:$4 sm:$0xff]   ;;  %v5044_v6 = vld [vmem:[%s5777_s15 + $0x844] ss:$8 sps:$4 sm:$0xff]  }
 0x17d   : > { %3821 = vmatprep.mubr.bf16.mxu1 %v5026_v7  ;;  %v5036_v5 = vld [vmem:[%s5777_s15 + $0x850] ss:$8 sps:$4 sm:$0xff]   ;;  %v5083_v7 = vld [vmem:[%s6369_s0 + $0x44] ss:$72 sps:$4 sm:$0xff]  }
 0x17e   : > { %3743 = vmatpush1.bf16.msra.mxu0 %v4943_v8  ;;  %v5086_v8 = vld [vmem:[%s6369_s0 + $0xd4] ss:$72 sps:$4 sm:$0xff]  }
 0x17f   : > { %3796 = vmatpush1.bf16.msra.mxu1 %v4946_v9  ;;  %3744 = vmatprep.subr.bf16.mxu0 %v4951_v10  ;;  %v5042_v9 = vld [vmem:[%s5777_s15 + $0x840] ss:$8 sps:$4 sm:$0xff]   ;;  %v5047_v10 = vld [vmem:[%s5777_s15 + $0x834] ss:$8 sps:$4 sm:$0xff]  }
 0x180   : > { %3797 = vmatprep.subr.bf16.mxu1 %v4954_v11  ;;  %v5045_v11 = vld [vmem:[%s5777_s15 + $0x830] ss:$8 sps:$4 sm:$0xff]  }
 0x182   : > { %3745 = vmatpush1.bf16.msra.mxu0 %v4949_v12  ;;  %v5050_v12 = vld [vmem:[%s5777_s15 + $0x824] ss:$8 sps:$4 sm:$0xff]  }
 0x183   : > { %3798 = vmatpush1.bf16.msra.mxu1 %v4952_v13  ;;  %3746 = vmatprep.subr.bf16.mxu0 %v4957_v14  ;;  %v5048_v13 = vld [vmem:[%s5777_s15 + $0x820] ss:$8 sps:$4 sm:$0xff]   ;;  %v5053_v14 = vld [vmem:[%s5777_s15 + $0x814] ss:$8 sps:$4 sm:$0xff]  }
 0x184   : > { %3799 = vmatprep.subr.bf16.mxu1 %v4960_v15  ;;  %v5051_v15 = vld [vmem:[%s5777_s15 + $0x810] ss:$8 sps:$4 sm:$0xff]  }
 0x186   : > { %3747 = vmatpush1.bf16.msra.mxu0 %v4955_v16  ;;  %v5056_v16 = vld [vmem:[%s5777_s15 + $0x804] ss:$8 sps:$4 sm:$0xff]  }
 0x187   : > { %3800 = vmatpush1.bf16.msra.mxu1 %v4958_v17  ;;  %3748 = vmatprep.subr.bf16.mxu0 %v4963_v18  ;;  %v5054_v17 = vld [vmem:[%s5777_s15 + $0x800] ss:$8 sps:$4 sm:$0xff]   ;;  %v5059_v18 = vld [vmem:[%s5777_s15 + $0x8f4] ss:$8 sps:$4 sm:$0xff]  }
 0x188   : > { %3801 = vmatprep.subr.bf16.mxu1 %v4966_v19  ;;  %v5057_v19 = vld [vmem:[%s5777_s15 + $0x8f0] ss:$8 sps:$4 sm:$0xff]  }
 0x18a   : > { %3749 = vmatpush1.bf16.msra.mxu0 %v4961_v20  ;;  %v5062_v20 = vld [vmem:[%s5777_s15 + $0x8e4] ss:$8 sps:$4 sm:$0xff]  }
 0x18b   : > { %3802 = vmatpush1.bf16.msra.mxu1 %v4964_v21  ;;  %3750 = vmatprep.subr.bf16.mxu0 %v4969_v22  ;;  %v5060_v21 = vld [vmem:[%s5777_s15 + $0x8e0] ss:$8 sps:$4 sm:$0xff]   ;;  %v5065_v22 = vld [vmem:[%s5777_s15 + $0x8d4] ss:$8 sps:$4 sm:$0xff]  }
 0x18c   : > { %3803 = vmatprep.subr.bf16.mxu1 %v4972_v23  ;;  %v5063_v23 = vld [vmem:[%s5777_s15 + $0x8d0] ss:$8 sps:$4 sm:$0xff]  }
 0x18e   : > { %3751 = vmatpush1.bf16.msra.mxu0 %v4967_v24  ;;  %v5068_v24 = vld [vmem:[%s5777_s15 + $0x8c4] ss:$8 sps:$4 sm:$0xff]  }
 0x18f   : > { %3804 = vmatpush1.bf16.msra.mxu1 %v4970_v25  ;;  %3752 = vmatprep.subr.bf16.mxu0 %v4975_v26  ;;  %v5066_v25 = vld [vmem:[%s5777_s15 + $0x8c0] ss:$8 sps:$4 sm:$0xff]   ;;  %v5071_v26 = vld [vmem:[%s5777_s15 + $0x8b4] ss:$8 sps:$4 sm:$0xff]  }
 0x190   : > { %3805 = vmatprep.subr.bf16.mxu1 %v4978_v27  ;;  %v5069_v27 = vld [vmem:[%s5777_s15 + $0x8b0] ss:$8 sps:$4 sm:$0xff]  }
 0x192   : > { %3753 = vmatpush2.bf16.msra.mxu0 %v4973_v28  ;;  %v5074_v28 = vld [vmem:[%s5777_s15 + $0x8a4] ss:$8 sps:$4 sm:$0xff]  }
 0x193   : > { %3806 = vmatpush2.bf16.msra.mxu1 %v4976_v29  ;;  %3754 = vmatprep.subr.bf16.mxu0 %v4981_v30  ;;  %v5072_v29 = vld [vmem:[%s5777_s15 + $0x8a0] ss:$8 sps:$4 sm:$0xff]   ;;  %v5077_v30 = vld [vmem:[%s5777_s15 + $0x894] ss:$8 sps:$4 sm:$0xff]  }
 0x194   : > { %3807 = vmatprep.subr.bf16.mxu1 %v4984_v31  ;;  %v5075_v31 = vld [vmem:[%s5777_s15 + $0x890] ss:$8 sps:$4 sm:$0xff]  }
 0x196   : > { %3755 = vmatpush2.bf16.msra.mxu0 %v4979_v32  ;;  %v5080_v32 = vld [vmem:[%s5777_s15 + $0x884] ss:$8 sps:$4 sm:$0xff]  }
 0x197   : > { %3808 = vmatpush2.bf16.msra.mxu1 %v4982_v33  ;;  %3756 = vmatprep.subr.bf16.mxu0 %v4987_v34  ;;  %v5078_v33 = vld [vmem:[%s5777_s15 + $0x880] ss:$8 sps:$4 sm:$0xff]   ;;  %s4201_s15 = sshll.u32 %s5161_s21, 1 }
 0x198   : > { %3809 = vmatprep.subr.bf16.mxu1 %v4990_v35  ;;  %v5081_v34 = vld [vmem:[%s6369_s0 + $0x40] ss:$72 sps:$4 sm:$0xff]   ;;  %v5084_v35 = vld [vmem:[%s6369_s0 + $0xd0] ss:$72 sps:$4 sm:$0xff]   ;;  %p1447_p10 = scmp.lt.s32.totalorder %s4201_s15, 3 }
 0x19a   : > { %3757 = vmatpush2.bf16.msra.mxu0 %v4985_v36  ;;  %s6398_s15 = smov (!%p1447_p10, %s4201_s15), 3 }
 0x19b   : > { %3810 = vmatpush2.bf16.msra.mxu1 %v4988_v37  ;;  %3758 = vmatprep.subr.bf16.mxu0 %v4993_v38  ;;  %s1449_s20 = scalar_lea.vmem %s6371_s2, %s6398_s15  ;;  %s1454_s27 = scalar_lea.vmem %s6372_s3, %s6398_s15 }
 0x19c   : > { %3811 = vmatprep.subr.bf16.mxu1 %v4996_v39  ;;  %s1459_s30 = scalar_lea.vmem %s6373_s4, %s6398_s15 }
 0x19e   : > { %3759 = vmatpush2.bf16.msra.mxu0 %v4991_v40 }
 0x19f   : > { %3812 = vmatpush2.bf16.msra.mxu1 %v4994_v41  ;;  %3760 = vmatprep.subr.bf16.mxu0 %v4999_v42 }
 0x1a0   : > { %3813 = vmatprep.subr.bf16.mxu1 %v5002_v43 }
 0x1a2   : > { %3761 = vmatpush2.bf16.msra.mxu0 %v4997_v44 }
 0x1a3   : > { %3814 = vmatpush2.bf16.msra.mxu1 %v5000_v45  ;;  %3762 = vmatprep.subr.bf16.mxu0 %v5005_v46 }
 0x1a4   : > { %3815 = vmatprep.subr.bf16.mxu1 %v5008_v47 }
 0x1a6   : > { %3763 = vmatpush2.bf16.msra.mxu0 %v5003_v48 }
 0x1a7   : > { %3816 = vmatpush2.bf16.msra.mxu1 %v5006_v49  ;;  %3764 = vmatprep.subr.bf16.mxu0 %v5011_v50 }
 0x1a8   : > { %3817 = vmatprep.subr.bf16.mxu1 %v5014_v51 }
 0x1aa   : > { %3765 = vmatpush2.bf16.msra.mxu0 %v5009_v52 }
 0x1ab   : > { %3818 = vmatpush2.bf16.msra.mxu1 %v5012_v53  ;;  %3766 = vmatprep.subr.bf16.mxu0 %v5017_v54 }
 0x1ac   : > { %3819 = vmatprep.subr.bf16.mxu1 %v5020_v55 }
 0x1ae   : > { %3767 = vmatpush2.bf16.msra.mxu0 %v5015_v56 }
 0x1af   : > { %3820 = vmatpush2.bf16.msra.mxu1 %v5018_v57  ;;  %3842 = vmatprep.subr.bf16.mxu0 %v5029_v58 }
 0x1b0   : > { %4543 = vmatprep.subr.bf16.mxu1 %v5029_v58 }
 0x1b1   : > { %3769 = vmatmul.mubr.bf16.vlgmr.msra.gmra.mxu0 %v5021_v59  ;;  %v6169_v36 = vpop.f32.mrf.mxu0 }
 0x1b2   : > { %3822 = vmatmul.mubr.bf16.vlgmr.msra.gmra.mxu1 %v5024_v60  ;;  %3843 = vmatpush1.bf16.msra.mxu0 %v5027_v61  ;;  %v6173_v38 = vpop.f32.mrf.mxu1 }
 0x1b3   : > { %4559 = vmatpush1.bf16.msra.mxu1 %v5027_v61  ;;  %3844 = vmatprep.subr.bf16.mxu0 %v5032_v62  ;;  %v6171_v37 = vpop.f32.mrf.mxu0 }
 0x1b4   : > { %4544 = vmatprep.subr.bf16.mxu1 %v5032_v62  ;;  %3778 = vmatprep.mubr.bf16.mxu0 %v5033_v63  ;;  %v6177_v40 = vpop.f32.mrf.mxu1 }
 0x1b5   : > { %3831 = vmatprep.mubr.bf16.mxu1 %v5039_v0  ;;  %v6175_v39 = vpop.f32.mrf.mxu0 }
 0x1b6   : > { %3845 = vmatpush1.bf16.msra.mxu0 %v5030_v1  ;;  %v6181_v42 = vpop.f32.mrf.mxu1 }
 0x1b7   : > { %4560 = vmatpush1.bf16.msra.mxu1 %v5030_v1  ;;  %3846 = vmatprep.subr.bf16.mxu0 %v5038_v2  ;;  %v6179_v41 = vpop.f32.mrf.mxu0 }
 0x1b8   : > { %4545 = vmatprep.subr.bf16.mxu1 %v5038_v2  ;;  %v6185_v44 = vpop.f32.mrf.mxu1 }
 0x1b9   : > { %3779 = vmatmul.mubr.bf16.gmra.mxu0 %v5035_v3  ;;  %v6183_v43 = vpop.f32.mrf.mxu0 }
 0x1ba   : > { %3832 = vmatmul.mubr.bf16.gmra.mxu1 %v5041_v4  ;;  %3847 = vmatpush1.bf16.msra.mxu0 %v5036_v5  ;;  %v6187_v46 = vpop.f32.mrf.mxu1 }
 0x1bb   : > { %4561 = vmatpush1.bf16.msra.mxu1 %v5036_v5  ;;  %3848 = vmatprep.subr.bf16.mxu0 %v5044_v6  ;;  %v3464_v45 = vpop.f32.mrf.mxu0 }
 0x1bc   : > { %4546 = vmatprep.subr.bf16.mxu1 %v5044_v6  ;;  %3874 = vmatprep.mubr.bf16.mxu0 %v5083_v7  ;;  %v6189_v48 = vpop.f32.mrf.mxu1 }
 0x1bd   : > { %3884 = vmatprep.mubr.bf16.mxu1 %v5086_v8  ;;  %v3466_v47 = vpop.f32.mrf.mxu0 }
 0x1be   : > { %3849 = vmatpush1.bf16.msra.mxu0 %v5042_v9  ;;  %v6193_v50 = vpop.f32.mrf.mxu1 }
 0x1bf   : > { %4562 = vmatpush1.bf16.msra.mxu1 %v5042_v9  ;;  %3850 = vmatprep.subr.bf16.mxu0 %v5047_v10  ;;  %v6191_v49 = vpop.f32.mrf.mxu0 }
 0x1c0   : > { %4547 = vmatprep.subr.bf16.mxu1 %v5047_v10  ;;  %v6197_v52 = vpop.f32.mrf.mxu1 }
 0x1c2   : > { %3851 = vmatpush1.bf16.msra.mxu0 %v5045_v11 }
 0x1c3   : > { %4563 = vmatpush1.bf16.msra.mxu1 %v5045_v11  ;;  %3852 = vmatprep.subr.bf16.mxu0 %v5050_v12 }
 0x1c4   : > { %4548 = vmatprep.subr.bf16.mxu1 %v5050_v12 }
 0x1c6   : > { %3853 = vmatpush1.bf16.msra.mxu0 %v5048_v13 }
 0x1c7   : > { %4564 = vmatpush1.bf16.msra.mxu1 %v5048_v13  ;;  %3854 = vmatprep.subr.bf16.mxu0 %v5053_v14 }
 0x1c8   : > { %4549 = vmatprep.subr.bf16.mxu1 %v5053_v14 }
 0x1ca   : > { %3855 = vmatpush1.bf16.msra.mxu0 %v5051_v15 }
 0x1cb   : > { %4565 = vmatpush1.bf16.msra.mxu1 %v5051_v15  ;;  %3856 = vmatprep.subr.bf16.mxu0 %v5056_v16 }
 0x1cc   : > { %4550 = vmatprep.subr.bf16.mxu1 %v5056_v16 }
 0x1ce   : > { %3857 = vmatpush1.bf16.msra.mxu0 %v5054_v17 }
 0x1cf   : > { %4566 = vmatpush1.bf16.msra.mxu1 %v5054_v17  ;;  %3858 = vmatprep.subr.bf16.mxu0 %v5059_v18  ;;  %v1788_v17 = vlaneseq }
 0x1d0   : > { %4551 = vmatprep.subr.bf16.mxu1 %v5059_v18 }
 0x1d2   : > { %3859 = vmatpush2.bf16.msra.mxu0 %v5057_v19 }
 0x1d3   : > { %4567 = vmatpush2.bf16.msra.mxu1 %v5057_v19  ;;  %3860 = vmatprep.subr.bf16.mxu0 %v5062_v20 }
 0x1d4   : > { %4552 = vmatprep.subr.bf16.mxu1 %v5062_v20  ;;  %v1789_v20 = vshrl.u32 %v1788_v17, 7 }
 0x1d6   : > { %3861 = vmatpush2.bf16.msra.mxu0 %v5060_v21 }
 0x1d7   : > { %4568 = vmatpush2.bf16.msra.mxu1 %v5060_v21  ;;  %3862 = vmatprep.subr.bf16.mxu0 %v5065_v22 }
 0x1d8   : > { %4553 = vmatprep.subr.bf16.mxu1 %v5065_v22 }
 0x1da   : > { %3863 = vmatpush2.bf16.msra.mxu0 %v5063_v23 }
 0x1db   : > { %4569 = vmatpush2.bf16.msra.mxu1 %v5063_v23  ;;  %3864 = vmatprep.subr.bf16.mxu0 %v5068_v24 }
 0x1dc   : > { %4554 = vmatprep.subr.bf16.mxu1 %v5068_v24  ;;  %v6272_v24 = vsub.s32 0, %v1789_v20 }
 0x1de   : > { %3865 = vmatpush2.bf16.msra.mxu0 %v5066_v25  ;;  %6382 = vst [vmem:[#allocation6_spill] sm:$0xff] %v6272_v24 }
 0x1df   : > { %4570 = vmatpush2.bf16.msra.mxu1 %v5066_v25  ;;  %3866 = vmatprep.subr.bf16.mxu0 %v5071_v26  ;;  %v1786_v25 = vld [vmem:[%s1449_s20] sm:$0x3] }
 0x1e0   : > { %4555 = vmatprep.subr.bf16.mxu1 %v5071_v26  ;;  %v6274_v26 = vsub.s32 1, %v1789_v20 }
 0x1e2   : > { %3867 = vmatpush2.bf16.msra.mxu0 %v5069_v27  ;;  %6383 = vst [vmem:[#allocation7_spill] sm:$0xff] %v6274_v26 }
 0x1e3   : > { %4571 = vmatpush2.bf16.msra.mxu1 %v5069_v27  ;;  %3868 = vmatprep.subr.bf16.mxu0 %v5074_v28 }
 0x1e4   : > { %4556 = vmatprep.subr.bf16.mxu1 %v5074_v28 }
 0x1e6   : > { %3869 = vmatpush2.bf16.msra.mxu0 %v5072_v29 }
 0x1e7   : > { %4572 = vmatpush2.bf16.msra.mxu1 %v5072_v29  ;;  %3870 = vmatprep.subr.bf16.mxu0 %v5077_v30  ;;  %v1791_v29 = vrot.slane %v1786_v25, %v6272_v24 }
 0x1e8   : > { %4557 = vmatprep.subr.bf16.mxu1 %v5077_v30  ;;  %v1795_v30 = vrot.slane %v1786_v25, %v6274_v26 }
 0x1ea   : > { %3871 = vmatpush2.bf16.msra.mxu0 %v5075_v31  ;;  %v3459_v20 = vadd.f32 %v6179_v41, %v1795_v30 }
 0x1eb   : > { %4573 = vmatpush2.bf16.msra.mxu1 %v5075_v31  ;;  %3872 = vmatprep.subr.bf16.mxu0 %v5080_v32 }
 0x1ec   : > { %4558 = vmatprep.subr.bf16.mxu1 %v5080_v32 }
 0x1ee   : > { %3873 = vmatpush2.bf16.msra.mxu0 %v5078_v33 }
 0x1ef   : > { %4574 = vmatpush2.bf16.msra.mxu1 %v5078_v33  ;;  %v3453_v33 = vadd.f32 %v6169_v36, %v1791_v29  ;;  %v3469_v36 = vadd.f32 %v6191_v49, %v1795_v30 }
 0x1f1   : > { %3875 = vmatmul.mubr.bf16.vlgmr.msra.gmra.mxu0 %v5081_v34  ;;  %v6195_v51 = vpop.f32.mrf.mxu0  ;;  %v3457_v34 = vadd.f32 %v6175_v39, %v1791_v29  ;;  %v3506_v25 = vadd.f32 %v6173_v38, %v3453_v33 }
 0x1f2   : > { %3885 = vmatmul.mubr.bf16.vlgmr.msra.gmra.mxu1 %v5084_v35  ;;  %v6201_v54 = vpop.f32.mrf.mxu1  ;;  %v3455_v35 = vadd.f32 %v6171_v37, %v1795_v30  ;;  %v3512_v37 = vadd.f32 %v6185_v44, %v3459_v20 }
 0x1f3   : > { %v6199_v53 = vpop.f32.mrf.mxu0  ;;  %v3510_v26 = vadd.f32 %v6181_v42, %v3457_v34 }
 0x1f4   : > { %v6205_v56 = vpop.f32.mrf.mxu1  ;;  %v3508_v24 = vadd.f32 %v6177_v40, %v3455_v35 }
 0x1f5   : > { %v6203_v55 = vpop.f32.mrf.mxu0 }
 0x1f6   : > { %v6209_v58 = vpop.f32.mrf.mxu1  ;;  %v3561_v42 = vadd.f32 %v6199_v53, %v3508_v24 }
 0x1f7   : > { %v6207_v57 = vpop.f32.mrf.mxu0 }
 0x1f8   : > { %v6213_v60 = vpop.f32.mrf.mxu1  ;;  %v3565_v40 = vadd.f32 %v6207_v57, %v3512_v37 }
 0x1f9   : > { %v6211_v59 = vpop.f32.mrf.mxu0 }
 0x1fa   : > { %v6217_v62 = vpop.f32.mrf.mxu1  ;;  %v3618_v57 = vadd.f32 %v6213_v60, %v3565_v40 }
 0x1fb   : > { %v6215_v61 = vpop.f32.mrf.mxu0 }
 0x1fc   : > { %v6221_v0 = vpop.f32.mrf.mxu1 }
 0x1fd   : > { %v6219_v63 = vpop.f32.mrf.mxu0 }
 0x1fe   : > { %v6225_v2 = vpop.f32.mrf.mxu1 }
 0x1ff   : > { %v6223_v1 = vpop.f32.mrf.mxu0 }
 0x200   : > { %v6229_v4 = vpop.f32.mrf.mxu1 }
 0x231   : > { %v6227_v3 = vpop.f32.mrf.mxu0 }
 0x232   : > { %v6231_v5 = vpop.f32.mrf.mxu1 }
 0x233   : > { %v6233_v6 = vpop.f32.mrf.mxu0 }
 0x234   : > { %v6235_v7 = vpop.f32.mrf.mxu1 }
 0x235   : > { %v6237_v8 = vpop.f32.mrf.mxu0 }
 0x236   : > { %v6239_v9 = vpop.f32.mrf.mxu1 }
 0x237   : > { %v6241_v10 = vpop.f32.mrf.mxu0 }
 0x238   : > { %v6243_v11 = vpop.f32.mrf.mxu1 }
 0x239   : > { %v6245_v12 = vpop.f32.mrf.mxu0 }
 0x23a   : > { %v6247_v13 = vpop.f32.mrf.mxu1 }
 0x23b   : > { %v6250_v14 = vpop.f32.mrf.mxu0 }
 0x23c   : > { %v6252_v15 = vpop.f32.mrf.mxu1 }
 0x23d   : > { %v6254_v16 = vpop.f32.mrf.mxu0 }
 0x23e   : > { %v6256_v18 = vpop.f32.mrf.mxu1 }
 0x23f   : > { %v6260_v19 = vpop.f32.mrf.mxu0 }
 0x240   : > { %v6262_v21 = vpop.f32.mrf.mxu1 }
 0x241   : > { %6380 = vst [vmem:[#allocation4_spill] sm:$0xff] %v6262_v21  ;;  %v3465_v21 = vadd.f32 %v3464_v45, %v1795_v30  ;;  %v3563_v45 = vadd.f32 %v6203_v55, %v3510_v26 }
 0x271   : > { %v6264_v22 = vpop.f32.mrf.mxu0 }
 0x272   : > { %v6270_v23 = vpop.f32.mrf.mxu1 }
 0x273   : > { %6381 = vst [vmem:[#allocation5_spill] sm:$0xff] %v6270_v23  ;;  %v6276_v27 = vpop.f32.mrf.mxu0  ;;  %v3463_v23 = vadd.f32 %v6183_v43, %v1791_v29  ;;  %v3559_v43 = vadd.f32 %v6195_v51, %v3506_v25 }
 0x274   : > { %6384 = vst [vmem:[#allocation8_spill] sm:$0xff] %v6276_v27  ;;  %v6278_v28 = vpop.f32.mrf.mxu1 }
 0x275   : > { %6385 = vst [vmem:[#allocation9_spill] sm:$0xff] %v6278_v28  ;;  %v3774_v31 = vpop.f32.mrf.mxu0  ;;  %v3467_v28 = vadd.f32 %v3466_v47, %v1791_v29  ;;  %v3516_v41 = vadd.f32 %v6187_v46, %v3463_v23  ;;  %v3518_v47 = vadd.f32 %v6189_v48, %v3465_v21  ;;  %v3522_v29 = vadd.f32 %v6197_v52, %v3469_v36 }
 0x276   : > { %v6282_v32 = vpop.f32.mrf.mxu1  ;;  %v3612_v55 = vadd.f32 %v6201_v54, %v3559_v43  ;;  %v3616_v48 = vadd.f32 %v6209_v58, %v3563_v45 }
 0x277   : > { %6386 = vst [vmem:[#allocation10_spill] sm:$0xff] %v6282_v32  ;;  %v3776_v17 = vpop.f32.mrf.mxu0  ;;  %v3520_v38 = vadd.f32 %v6193_v50, %v3467_v28  ;;  %v3569_v49 = vadd.f32 %v6211_v59, %v3516_v41  ;;  %v3571_v44 = vadd.f32 %v6215_v61, %v3518_v47  ;;  %v3614_v50 = vadd.f32 %v6205_v56, %v3561_v42 }
 0x278   : > { %v6289_v27 = vpop.f32.mrf.mxu1  ;;  %v3575_v53 = vadd.f32 %v6223_v1, %v3522_v29  ;;  %v3665_v52 = vadd.f32 %v6227_v3, %v3612_v55  ;;  %v3669_v61 = vadd.f32 %v6237_v8, %v3616_v48  ;;  %v3671_v56 = vadd.f32 %v6241_v10, %v3618_v57 }
 0x279   : > { %v3780_v39 = vpop.f32.mrf.mxu0  ;;  %v3573_v46 = vadd.f32 %v6219_v63, %v3520_v38  ;;  %v3622_v59 = vadd.f32 %v6217_v62, %v3569_v49  ;;  %v3624_v63 = vadd.f32 %v6221_v0, %v3571_v44  ;;  %v3667_v54 = vadd.f32 %v6233_v6, %v3614_v50 }
 0x27a   : > { %v3833_v32 = vpop.f32.mrf.mxu1  ;;  %v3628_v60 = vadd.f32 %v6229_v4, %v3575_v53  ;;  %v3718_v8 = vadd.f32 %v6231_v5, %v3665_v52  ;;  %v3722_v0 = vadd.f32 %v6239_v9, %v3669_v61  ;;  %v3724_v10 = vadd.f32 %v6243_v11, %v3671_v56 }
 0x27b   : > { %v3782_v23 = vpop.f32.mrf.mxu0  ;;  %v3626_v21 = vadd.f32 %v6225_v2, %v3573_v46  ;;  %v3675_v1 = vadd.f32 %v6245_v12, %v3622_v59  ;;  %v3677_v62 = vadd.f32 %v6250_v14, %v3624_v63  ;;  %v3720_v2 = vadd.f32 %v6235_v7, %v3667_v54  ;;  %v6387_v5 = vld [vmem:[#allocation8_spill] sm:$0xff] }
 0x27c   : > { %v3835_v51 = vpop.f32.mrf.mxu1  ;;  %v3681_v6 = vadd.f32 %v6260_v19, %v3628_v60  ;;  %v3771_v4 = vadd.f32 %v6264_v22, %v3718_v8  ;;  %v3775_v30 = vadd.f32 %v3774_v31, %v3722_v0  ;;  %v3777_v7 = vadd.f32 %v3776_v17, %v3724_v10  ;;  %v6388_v19 = vld [vmem:[#allocation4_spill] sm:$0xff]  ;;  %v6391_v43 = vld [vmem:[#allocation9_spill] sm:$0xff] }
 0x27d   : > { %v3784_v24 = vpop.f32.mrf.mxu0  ;;  %v3679_v3 = vadd.f32 %v6254_v16, %v3626_v21  ;;  %v3728_v12 = vadd.f32 %v6247_v13, %v3675_v1  ;;  %v3730_v14 = vadd.f32 %v6252_v15, %v3677_v62  ;;  %v3773_v33 = vadd.f32 %v6387_v5, %v3720_v2  ;;  %v6389_v13 = vld [vmem:[#allocation5_spill] sm:$0xff] }
 0x27e   : > { %v3837_v58 = vpop.f32.mrf.mxu1  ;;  %v3734_v20 = vadd.f32 %v6388_v19, %v3681_v6  ;;  %v3824_v41 = vadd.f32 %v6389_v13, %v3771_v4  ;;  %v6390_v22 = vld [vmem:[#allocation10_spill] sm:$0xff]  ;;  %v3830_v38 = vadd.f32 %v6289_v27, %v3777_v7 }
 0x27f   : > { %v3786_v26 = vpop.f32.mrf.mxu0  ;;  %v3732_v16 = vadd.f32 %v6256_v18, %v3679_v3  ;;  %v3781_v35 = vadd.f32 %v3780_v39, %v3728_v12  ;;  %v3783_v25 = vadd.f32 %v3782_v23, %v3730_v14  ;;  %v3828_v31 = vadd.f32 %v6390_v22, %v3775_v30 }
 0x280   : > { %v3839_v28 = vpop.f32.mrf.mxu1  ;;  %v3826_v15 = vadd.f32 %v6391_v43, %v3773_v33  ;;  %v3787_v45 = vadd.f32 %v3786_v26, %v3734_v20 }
 0x281   : > { %v3785_v36 = vadd.f32 %v3784_v24, %v3732_v16  ;;  %v3834_v42 = vadd.f32 %v3833_v32, %v3781_v35  ;;  %v3836_v40 = vadd.f32 %v3835_v51, %v3783_v25 }
 0x282   : > { %v3840_v48 = vadd.f32 %v3839_v28, %v3787_v45 }
 0x283   : > { %v3838_v49 = vadd.f32 %v3837_v58, %v3785_v36 }
 0x2b1   : > { %v3876_v9 = vpop.f32.mrf.mxu0 }
 0x2b2   : > { %v3886_v34 = vpop.f32.mrf.mxu1  ;;  %v3877_v17 = vadd.f32 %v3876_v9, %v3824_v41 }
 0x2b3   : > { %v3878_v11 = vpop.f32.mrf.mxu0  ;;  %v3887_v44 = vadd.f32 %v3886_v34, %v3834_v42 }
 0x2b4   : > { %v3888_v37 = vpop.f32.mrf.mxu1  ;;  %v3879_v46 = vadd.f32 %v3878_v11, %v3826_v15 }
 0x2b5   : > { %v3880_v18 = vpop.f32.mrf.mxu0  ;;  %v3889_v53 = vadd.f32 %v3888_v37, %v3836_v40 }
 0x2b6   : > { %v3890_v47 = vpop.f32.mrf.mxu1  ;;  %v3881_v39 = vadd.f32 %v3880_v18, %v3828_v31 }
 0x2b7   : > { %v3882_v29 = vpop.f32.mrf.mxu0  ;;  %v3891_v57 = vadd.f32 %v3890_v47, %v3838_v49 }
 0x2b8   : > { %v3895_v23 = vadd.f32 %v3881_v39, %v3877_v17  ;;  %v3883_v55 = vadd.f32 %v3882_v29, %v3830_v38  ;;  %v3892_v50 = vpop.f32.mrf.mxu1 }
 0x2b9   : > { %v3893_v63 = vadd.f32 %v3892_v50, %v3840_v48  ;;  %v6392_v48 = vld [vmem:[#allocation6_spill] sm:$0xff] }
 0x2ba   : > { %v3896_v59 = vadd.f32 %v3895_v23, %v3887_v44  ;;  %v3904_v52 = vadd.f32 %v3883_v55, %v3879_v46  ;;  %v3963_v23 = vld [vmem:[%s1454_s27] sm:$0x3] }
 0x2bb   : > { %v3968_v50 = vrot.slane %v3963_v23, %v6392_v48 }
 0x2bc   : > { %v3897_v61 = vadd.f32 %v3896_v59, %v3891_v57  ;;  %v3905_v21 = vadd.f32 %v3904_v52, %v3889_v53 }
 0x2be   : > { %v3898_v27 = vrot.slane %v3897_v61, 4  ;;  %v3906_v32 = vadd.f32 %v3905_v21, %v3893_v63  ;;  %v6393_v21 = vld [vmem:[#allocation7_spill] sm:$0xff] }
 0x2c0   : > { %v3899_v54 = vadd.f32 %v3898_v27, %v3897_v61  ;;  %v3907_v24 = vrot.slane %v3906_v32, 4  ;;  %v3972_v27 = vrot.slane %v3963_v23, %v6393_v21 }
 0x2c2   : > { %v3900_v51 = vrot.slane %v3899_v54, 2  ;;  %v3908_v58 = vadd.f32 %v3907_v24, %v3906_v32 }
 0x2c4   : > { %v3901_v56 = vadd.f32 %v3900_v51, %v3899_v54  ;;  %v3909_v1 = vrot.slane %v3908_v58, 2 }
 0x2c6   : > { %v3902_v60 = vrot.slane %v3901_v56, 1  ;;  %v3910_v62 = vadd.f32 %v3909_v1, %v3908_v58 }
 0x2c8   : > { %v3903_v3 = vadd.f32 %v3902_v60, %v3901_v56  ;;  %v3911_v8 = vrot.slane %v3910_v62, 1 }
 0x2ca   : > { %v3913_v0 = vmul.f32 0.03125, %v3903_v3  ;;  %v3912_v2 = vadd.f32 %v3911_v8, %v3910_v62 }
 0x2cc   : > { %v3915_v6 = vsub.f32 %v3877_v17, %v3913_v0  ;;  %v3917_v26 = vsub.f32 %v3881_v39, %v3913_v0  ;;  %v3919_v28 = vsub.f32 %v3887_v44, %v3913_v0  ;;  %v3914_v10 = vmul.f32 0.03125, %v3912_v2 }
 0x2cd   : > { %v3921_v12 = vsub.f32 %v3891_v57, %v3913_v0 }
 0x2ce   : > { %v3923_v4 = vmul.f32 %v3915_v6, %v3915_v6  ;;  %v3925_v30 = vmul.f32 %v3917_v26, %v3917_v26  ;;  %v3916_v14 = vsub.f32 %v3879_v46, %v3914_v10  ;;  %v3918_v16 = vsub.f32 %v3883_v55, %v3914_v10  ;;  %v3983_v55 = vld [vmem:[%s1459_s30] sm:$0x3] }
 0x2cf   : > { %v3920_v5 = vsub.f32 %v3889_v53, %v3914_v10  ;;  %v3927_v33 = vmul.f32 %v3919_v28, %v3919_v28  ;;  %v3922_v34 = vsub.f32 %v3893_v63, %v3914_v10  ;;  %v3929_v19 = vmul.f32 %v3921_v12, %v3921_v12 }
 0x2d0   : > { %v3931_v9 = vadd.f32 %v3925_v30, %v3923_v4  ;;  %v3924_v7 = vmul.f32 %v3916_v14, %v3916_v14  ;;  %v3926_v35 = vmul.f32 %v3918_v16, %v3918_v16  ;;  %v3988_v57 = vrot.slane %v3983_v55, %v6392_v48 }
 0x2d1   : > { %v3928_v25 = vmul.f32 %v3920_v5, %v3920_v5  ;;  %v3930_v37 = vmul.f32 %v3922_v34, %v3922_v34  ;;  %v3992_v32 = vrot.slane %v3983_v55, %v6393_v21 }
 0x2d2   : > { %v3932_v20 = vadd.f32 %v3931_v9, %v3927_v33  ;;  %v3940_v36 = vadd.f32 %v3926_v35, %v3924_v7 }
 0x2d4   : > { %v3933_v11 = vadd.f32 %v3932_v20, %v3929_v19  ;;  %v3941_v13 = vadd.f32 %v3940_v36, %v3928_v25 }
 0x2d6   : > { %v3934_v41 = vrot.slane %v3933_v11, 4  ;;  %v3942_v22 = vadd.f32 %v3941_v13, %v3930_v37 }
 0x2d8   : > { %v3935_v31 = vadd.f32 %v3934_v41, %v3933_v11  ;;  %v3943_v43 = vrot.slane %v3942_v22, 4 }
 0x2da   : > { %v3936_v15 = vrot.slane %v3935_v31, 2  ;;  %v3944_v45 = vadd.f32 %v3943_v43, %v3942_v22 }
 0x2dc   : > { %v3937_v18 = vadd.f32 %v3936_v15, %v3935_v31  ;;  %v3945_v47 = vrot.slane %v3944_v45, 2 }
 0x2de   : > { %v3938_v38 = vrot.slane %v3937_v18, 1  ;;  %v3946_v42 = vadd.f32 %v3945_v47, %v3944_v45 }
 0x2e0   : > { %v3939_v17 = vadd.f32 %v3938_v38, %v3937_v18  ;;  %v3947_v39 = vrot.slane %v3946_v42, 1 }
 0x2e2   : > { %v3949_v40 = vmul.f32 0.03125, %v3939_v17  ;;  %v3948_v49 = vadd.f32 %v3947_v39, %v3946_v42 }
 0x2e4   : > { %v3951_v29 = vadd.f32 1e-05, %v3949_v40  ;;  %v3950_v44 = vmul.f32 0.03125, %v3948_v49 }
 0x2e6   : > { %5087 = vrsqrt.f32 %v3951_v29  ;;  %v3952_v46 = vadd.f32 1e-05, %v3950_v44 }
 0x2e8   : > { %5089 = vrsqrt.f32 %v3952_v46 }
 0x2f3   : > { %v5088_v53 = vpop.eup %5087 }
 0x2f4   : > { %v3955_v59 = vmul.f32 %v5088_v53, %v3915_v6  ;;  %v3957_v52 = vmul.f32 %v5088_v53, %v3917_v26  ;;  %v3959_v61 = vmul.f32 %v5088_v53, %v3919_v28  ;;  %v3961_v63 = vmul.f32 %v5088_v53, %v3921_v12 }
 0x2f5   : > { %v5090_v54 = vpop.eup %5089 }
 0x2f6   : > { %v3975_v24 = vmul.f32 %v3968_v50, %v3955_v59  ;;  %v3977_v51 = vmul.f32 %v3968_v50, %v3957_v52  ;;  %v3979_v58 = vmul.f32 %v3968_v50, %v3959_v61  ;;  %v3981_v56 = vmul.f32 %v3968_v50, %v3961_v63 }
 0x2f7   : > { %v3956_v1 = vmul.f32 %v5090_v54, %v3916_v14  ;;  %v3958_v60 = vmul.f32 %v5090_v54, %v3918_v16  ;;  %v3960_v62 = vmul.f32 %v5090_v54, %v3920_v5  ;;  %v3962_v3 = vmul.f32 %v5090_v54, %v3922_v34 }
 0x2f8   : > { %v3995_v8 = vadd.f32 %v3988_v57, %v3975_v24  ;;  %v3997_v0 = vadd.f32 %v3988_v57, %v3977_v51  ;;  %v3999_v2 = vadd.f32 %v3988_v57, %v3979_v58  ;;  %v4001_v6 = vadd.f32 %v3988_v57, %v3981_v56 }
 0x2f9   : > { %v3976_v26 = vmul.f32 %v3972_v27, %v3956_v1  ;;  %v3978_v28 = vmul.f32 %v3972_v27, %v3958_v60  ;;  %v3980_v10 = vmul.f32 %v3972_v27, %v3960_v62  ;;  %v3982_v12 = vmul.f32 %v3972_v27, %v3962_v3 }
 0x2fa   : > { %vm4003_vm0 = vcmp.ge.f32.partialorder %v3995_v8, 0.0  ;;  %v4011_v4 = vmul.f32 0.01, %v3995_v8  ;;  %v4013_v30 = vmul.f32 0.01, %v3997_v0  ;;  %vm4005_vm1 = vcmp.ge.f32.partialorder %v3997_v0, 0.0 }
 0x2fb   : > { %v3996_v33 = vadd.f32 %v3992_v32, %v3976_v26  ;;  %v4015_v9 = vmul.f32 0.01, %v3999_v2  ;;  %v3998_v7 = vadd.f32 %v3992_v32, %v3978_v28  ;;  %v4000_v35 = vadd.f32 %v3992_v32, %v3980_v10 }
 0x2fc   : > { %v4002_v14 = vadd.f32 %v3992_v32, %v3982_v12  ;;  %vm4007_vm2 = vcmp.ge.f32.partialorder %v3999_v2, 0.0  ;;  %vm4009_vm3 = vcmp.ge.f32.partialorder %v4001_v6, 0.0  ;;  %v4017_v16 = vmul.f32 0.01, %v4001_v6 }
 0x2fd   : > { %vm4004_vm4 = vcmp.ge.f32.partialorder %v3996_v33, 0.0  ;;  %vm4006_vm5 = vcmp.ge.f32.partialorder %v3998_v7, 0.0  ;;  %vm4008_vm6 = vcmp.ge.f32.partialorder %v4000_v35, 0.0  ;;  %v4012_v5 = vmul.f32 0.01, %v3996_v33 }
 0x2fe   : > { %vm4010_vm7 = vcmp.ge.f32.partialorder %v4002_v14, 0.0  ;;  %v4014_v34 = vmul.f32 0.01, %v3998_v7  ;;  %v4016_v19 = vmul.f32 0.01, %v4000_v35  ;;  %v4019_v20 = vsel %vm4003_vm0, %v3995_v8, %v4011_v4 }
 0x2ff   : > { %v4021_v25 = vsel %vm4005_vm1, %v3997_v0, %v4013_v30  ;;  %v4023_v36 = vsel %vm4007_vm2, %v3999_v2, %v4015_v9  ;;  %v4018_v11 = vmul.f32 0.01, %v4002_v14  ;;  %v4025_v37 = vsel %vm4009_vm3, %v4001_v6, %v4017_v16 }
 0x300   : > { %v4020_v13 = vsel %vm4004_vm4, %v3996_v33, %v4012_v5  ;;  %v4022_v41 = vsel %vm4006_vm5, %v3998_v7, %v4014_v34  ;;  %v4024_v22 = vsel %vm4008_vm6, %v4000_v35, %v4016_v19  ;;  %4061 = sbr.rel (!%p5176_p5) target bundleno = 781 (0x30d), region = 82 }
 0x301   : > { %v4026_v31 = vsel %vm4010_vm7, %v4002_v14, %v4018_v11  ;;  %v4538_v43 = vpack.c.bf16 %v4020_v13, %v4019_v20  ;;  %v4539_v15 = vpack.c.bf16 %v4022_v41, %v4021_v25  ;;  %v4540_v45 = vpack.c.bf16 %v4024_v22, %v4023_v36 }
 0x302   : > { %v4541_v18 = vpack.c.bf16 %v4026_v31, %v4025_v37 }
 0x303   : > { %4051 = vst [vmem:[%s1444_s18] sm:$0xff] %v4538_v43  ;;  %4052 = vst [vmem:[%s1444_s18 + $0x8] sm:$0xff] %v4539_v15 }
 0x304   : > { %4053 = vst [vmem:[%s1444_s18 + $0x10] sm:$0xff] %v4540_v45  ;;  %4054 = vst [vmem:[%s1444_s18 + $0x18] sm:$0xff] %v4541_v18 }
 0x30a   : > { %v4099_v47 = vld [vmem:[%s1444_s18] sm:$0xff]  ;;  %v4101_v38 = vld [vmem:[%s1444_s18 + $0x8] sm:$0xff] }
 0x30b   : > { %v4103_v42 = vld [vmem:[%s1444_s18 + $0x10] sm:$0xff]  ;;  %v4105_v17 = vld [vmem:[%s1444_s18 + $0x18] sm:$0xff]  ;;  %4100 = vst [vmem:[%s4064_s10] sm:$0xff] %v4099_v47  ;;  %4102 = vst [vmem:[%s4064_s10 + $0x10] sm:$0xff] %v4101_v38 }
 0x30c   : > { %4104 = vst [vmem:[%s4064_s10 + $0x20] sm:$0xff] %v4103_v42  ;;  %4106 = vst [vmem:[%s4064_s10 + $0x30] sm:$0xff] %v4105_v17 }
 0x30d PF: > { %p12_p11 = scmp.ge.s32.totalorder %s5164_s22, 4   ;;  %s6394_s18 = smov %s5109_s19 }
 0x30e   : > { %s6395_s19 = smov %s5174_s25  ;;  %s6396_s20 = smov %s5164_s22 }
 0x30f   :  { %14 = sbr.rel (!%p12_p11) target bundleno = 2 (0x2), region = 160 }

// kernel: discriminator_forward.9
= control target key start
LH: loop header
LB: loop body
LE: loop exit
PB: predicated region body
PF: predicated region fallthrough
CT: control target
= control target key end

     0   :  { %v56_v1 = vlaneseq  ;;  %v1124_v51 = vmov 1983009808   ;;  %vm968_vm0 = vcmask 1041408   ;;  %vm1112_vm1 = vcmask 1024   ;;  %s1885_s2 = inlined_call_operand.<no memory space> [shape: f32[1,1], index: 2, kind: input, shape index: {}]   ;;  %s1886_s1 = inlined_call_operand.vmem [shape: f32[1,8192], index: 1, kind: input, shape index: {}]   ;;  %s1887_s0 = inlined_call_operand.vmem [shape: bf16[2,8192], index: 0, kind: input, shape index: {}]   ;;  %s1888_s3 = inlined_call_operand.vmem [shape: f32[2,1], index: 3, kind: output, shape index: {}]  }
   0x1   :  { %v8_v0 = vstv %s1885_s2  ;;  %v1153_v3 = vld [vmem:[%s1886_s1 + $0x20] sm:$0xff]  ;;  %v1170_v8 = vld [vmem:[%s1886_s1 + $0x28] sm:$0xff]  ;;  %v1195_v17 = vld [vmem:[%s1886_s1 + $0x30] sm:$0xff]  ;;  %v315_v52 = vunpack.c.l.s4 %v1124_v51 }
   0x2   :  { %9 = vst [vmem:[#allocation2] sm:$0x1] %v8_v0  ;;  %v1148_v2 = vshrl.u32 %v56_v1, 7  ;;  %v1216_v26 = vld [vmem:[%s1886_s1 + $0x38] sm:$0xff]  ;;  %v1253_v43 = vld [vmem:[%s1887_s0 + $0x20] sm:$0xff]  ;;  %v1258_v44 = vld [vmem:[%s1887_s0 + $0x28] sm:$0xff] }
   0x3   :  { %v1271_v49 = vld [vmem:[%s1887_s0 + $0x30] sm:$0xff]  ;;  %v1276_v50 = vld [vmem:[%s1887_s0 + $0x38] sm:$0xff]  ;;  %v1281_v53 = vld [vmem:[%s1886_s1] sm:$0xff]  ;;  %v316_v1 = vunpack.c.0.s8 %v315_v52 }
   0x4   :  { %v1156_v4 = vsub.s32 0, %v1148_v2  ;;  %v1159_v5 = vsub.s32 1, %v1148_v2  ;;  %v1162_v6 = vsub.s32 2, %v1148_v2  ;;  %v1165_v7 = vsub.s32 3, %v1148_v2  ;;  %v1293_v61 = vld [vmem:[%s1886_s1 + $0x8] sm:$0xff]  ;;  %v1311_v62 = vld [vmem:[%s1886_s1 + $0x10] sm:$0xff] }
   0x5   :  { %v1173_v9 = vsub.s32 4, %v1148_v2  ;;  %v1176_v10 = vsub.s32 5, %v1148_v2  ;;  %v1179_v11 = vsub.s32 6, %v1148_v2  ;;  %v1182_v12 = vsub.s32 7, %v1148_v2 }
   0x6   :  { %v187_v13 = vrot.slane %v1153_v3, %v1156_v4  ;;  %v191_v14 = vrot.slane %v1153_v3, %v1159_v5  ;;  %v195_v15 = vrot.slane %v1153_v3, %v1162_v6  ;;  %v199_v16 = vrot.slane %v1153_v3, %v1165_v7 }
   0x7   :  { %v203_v18 = vrot.slane %v1153_v3, %v1173_v9  ;;  %v207_v19 = vrot.slane %v1153_v3, %v1176_v10  ;;  %v211_v20 = vrot.slane %v1153_v3, %v1179_v11  ;;  %v215_v21 = vrot.slane %v1153_v3, %v1182_v12 }
   0x8   :  { %v219_v22 = vrot.slane %v1170_v8, %v1156_v4  ;;  %v223_v23 = vrot.slane %v1170_v8, %v1159_v5  ;;  %v227_v24 = vrot.slane %v1170_v8, %v1162_v6  ;;  %v231_v25 = vrot.slane %v1170_v8, %v1165_v7 }
   0x9   :  { %v235_v27 = vrot.slane %v1170_v8, %v1173_v9  ;;  %v239_v28 = vrot.slane %v1170_v8, %v1176_v10  ;;  %v243_v29 = vrot.slane %v1170_v8, %v1179_v11  ;;  %v247_v30 = vrot.slane %v1170_v8, %v1182_v12 }
   0xa   :  { %v251_v31 = vrot.slane %v1195_v17, %v1156_v4  ;;  %v255_v32 = vrot.slane %v1195_v17, %v1159_v5  ;;  %v259_v33 = vrot.slane %v1195_v17, %v1162_v6  ;;  %v263_v34 = vrot.slane %v1195_v17, %v1165_v7 }
   0xb   :  { %v267_v35 = vrot.slane %v1195_v17, %v1173_v9  ;;  %v271_v36 = vrot.slane %v1195_v17, %v1176_v10  ;;  %v279_v38 = vrot.slane %v1195_v17, %v1182_v12  ;;  %v59_v63 = vrot.slane %v1281_v53, %v1156_v4 }
   0xc   :  { %v63_v0 = vrot.slane %v1281_v53, %v1159_v5  ;;  %v67_v51 = vrot.slane %v1281_v53, %v1162_v6  ;;  %v71_v60 = vrot.slane %v1281_v53, %v1165_v7  ;;  %v75_v59 = vrot.slane %v1281_v53, %v1173_v9 }
   0xd   :  { %v79_v58 = vrot.slane %v1281_v53, %v1176_v10  ;;  %v83_v52 = vrot.slane %v1281_v53, %v1179_v11  ;;  %v87_v57 = vrot.slane %v1281_v53, %v1182_v12  ;;  %v91_v56 = vrot.slane %v1293_v61, %v1156_v4 }
   0xe   :  { %v95_v55 = vrot.slane %v1293_v61, %v1159_v5  ;;  %v99_v54 = vrot.slane %v1293_v61, %v1162_v6  ;;  %v103_v47 = vrot.slane %v1293_v61, %v1165_v7  ;;  %v107_v48 = vrot.slane %v1293_v61, %v1173_v9 }
   0xf   :  { %v111_v45 = vrot.slane %v1293_v61, %v1176_v10  ;;  %v115_v53 = vrot.slane %v1293_v61, %v1179_v11  ;;  %v119_v46 = vrot.slane %v1293_v61, %v1182_v12  ;;  %v1334_v41 = vsub.s32 %v316_v1, %v1148_v2 }
  0x10   :  { %v448_v42 = vcombine.low %v187_v13, %v191_v14  ;;  %v123_v39 = vrot.slane %v1311_v62, %v1156_v4  ;;  %v127_v40 = vrot.slane %v1311_v62, %v1159_v5  ;;  %v131_v37 = vrot.slane %v1311_v62, %v1162_v6 }
  0x11   :  { %v449_v2 = vcombine.low %v195_v15, %v199_v16  ;;  %v135_v61 = vrot.slane %v1311_v62, %v1165_v7  ;;  %v465_v14 = vcombine.low %v203_v18, %v207_v19  ;;  %v466_v1 = vcombine.low %v211_v20, %v215_v21 }
  0x12   :  { %v456_v13 = vrot.slane %v448_v42, %v1334_v41  ;;  %v1369_v15 = vcombine.low %v59_v63, %v63_v0  ;;  %v482_v42 = vcombine.low %v219_v22, %v223_v23  ;;  %v483_v18 = vcombine.low %v227_v24, %v231_v25 }
  0x13   :  { %v463_v16 = vrot.slane %v449_v2, %v1334_v41  ;;  %v1384_v3 = vcombine.low %v67_v51, %v71_v60  ;;  %v473_v19 = vrot.slane %v465_v14, %v1334_v41  ;;  %v480_v20 = vrot.slane %v466_v1, %v1334_v41 }
  0x14   :  { %v499_v21 = vcombine.low %v235_v27, %v239_v28  ;;  %v490_v23 = vrot.slane %v482_v42, %v1334_v41  ;;  %v497_v63 = vrot.slane %v483_v18, %v1334_v41  ;;  %v500_v24 = vcombine.low %v243_v29, %v247_v30 }
  0x15   :  { %v464_v22 = vcombine.low %v456_v13, %v463_v16  ;;  %v481_v25 = vcombine.low %v473_v19, %v480_v20  ;;  %v516_v27 = vcombine.low %v251_v31, %v255_v32  ;;  %v517_v28 = vcombine.low %v259_v33, %v263_v34 }
  0x16   :  { %v507_v60 = vrot.slane %v499_v21, %v1334_v41  ;;  %v498_v0 = vcombine.low %v490_v23, %v497_v63  ;;  %v514_v8 = vrot.slane %v500_v24, %v1334_v41  ;;  %v533_v29 = vcombine.low %v267_v35, %v271_v36 }
  0x17   :  { %v1890_v30 = vrot.slane %v1195_v17, %v1179_v11  ;;  %v524_v32 = vrot.slane %v516_v27, %v1334_v41  ;;  %v531_v33 = vrot.slane %v517_v28, %v1334_v41  ;;  %v1891_v34 = vrot.slane %v1216_v26, %v1159_v5 }
  0x18   :  { %v1892_v51 = vrot.slane %v1216_v26, %v1156_v4  ;;  %v1893_v35 = vrot.slane %v1216_v26, %v1165_v7  ;;  %v1894_v36 = vrot.slane %v1216_v26, %v1162_v6  ;;  %v515_v17 = vcombine.low %v507_v60, %v514_v8 }
  0x19   :  { %v534_v31 = vcombine.low %v1890_v30, %v279_v38  ;;  %v541_v38 = vrot.slane %v533_v29, %v1334_v41  ;;  %v1895_v1 = vrot.slane %v1216_v26, %v1176_v10  ;;  %v1896_v16 = vrot.slane %v1216_v26, %v1173_v9 }
  0x1a   :  { %v550_v2 = vcombine.low %v1892_v51, %v1891_v34  ;;  %v551_v13 = vcombine.low %v1894_v36, %v1893_v35  ;;  %v532_v18 = vcombine.low %v524_v32, %v531_v33  ;;  %v1897_v21 = vrot.slane %v1216_v26, %v1182_v12  ;;  %v17_v36 = vld [vmem:[%s1887_s0 + $0x8] sm:$0xff] }
  0x1b   :  { %v548_v14 = vrot.slane %v534_v31, %v1334_v41  ;;  %v567_v42 = vcombine.low %v1896_v16, %v1895_v1  ;;  %v1898_v23 = vrot.slane %v1216_v26, %v1179_v11  ;;  %v329_v24 = vcombine.low %v75_v59, %v79_v58  ;;  %v1517_v1 = vld [vmem:[%s1887_s0 + $0x10] sm:$0xff] }
  0x1c   :  { %v558_v19 = vrot.slane %v550_v2, %v1334_v41  ;;  %v565_v20 = vrot.slane %v551_v13, %v1334_v41  ;;  %v330_v60 = vcombine.low %v83_v52, %v87_v57  ;;  %v346_v8 = vcombine.low %v91_v56, %v95_v55 }
  0x1d   :  { %v568_v63 = vcombine.low %v1898_v23, %v1897_v21  ;;  %v549_v27 = vcombine.low %v541_v38, %v548_v14  ;;  %v575_v28 = vrot.slane %v567_v42, %v1334_v41  ;;  %v347_v29 = vcombine.low %v99_v54, %v103_v47 }
  0x1e   :  { %v566_v30 = vcombine.low %v558_v19, %v565_v20  ;;  %v320_v32 = vrot.slane %v1369_v15, %v1334_v41  ;;  %v327_v33 = vrot.slane %v1384_v3, %v1334_v41  ;;  %v363_v34 = vcombine.low %v107_v48, %v111_v45 }
  0x1f   :  { %v582_v31 = vrot.slane %v568_v63, %v1334_v41  ;;  %v364_v51 = vcombine.low %v115_v53, %v119_v46  ;;  %v1899_v58 = vunpack.c.l.bf16 %v1253_v43  ;;  %v1900_v59 = vunpack.c.h.bf16 %v1253_v43  ;;  %v16_v43 = vld [vmem:[%s1887_s0] sm:$0xff] }
  0x20   :  { %v1901_v47 = vunpack.c.l.bf16 %v1258_v44  ;;  %v1902_v55 = vunpack.c.h.bf16 %v1258_v44  ;;  %v1903_v15 = vunpack.c.l.bf16 %v1271_v49  ;;  %v1904_v45 = vunpack.c.h.bf16 %v1271_v49 }
  0x21   :  { %v583_v26 = vcombine.low %v575_v28, %v582_v31  ;;  %v608_v57 = vmul.f32 %v464_v22, %v1899_v58  ;;  %v609_v52 = vmul.f32 %v481_v25, %v1900_v59  ;;  %v1905_v48 = vunpack.c.l.bf16 %v1276_v50 }
  0x22   :  { %v610_v54 = vmul.f32 %v498_v0, %v1901_v47  ;;  %v611_v56 = vmul.f32 %v515_v17, %v1902_v55  ;;  %v1474_v2 = vmul.f32 %v532_v18, %v1903_v15  ;;  %v1478_v46 = vmul.f32 %v549_v27, %v1904_v45 }
  0x23   :  { %v1482_v53 = vmul.f32 %v566_v30, %v1905_v48  ;;  %v337_v3 = vrot.slane %v329_v24, %v1334_v41  ;;  %v344_v44 = vrot.slane %v330_v60, %v1334_v41  ;;  %v1906_v22 = vunpack.c.h.bf16 %v1276_v50 }
  0x24   :  { %v354_v49 = vrot.slane %v346_v8, %v1334_v41  ;;  %v361_v0 = vrot.slane %v347_v29, %v1334_v41  ;;  %v380_v35 = vcombine.low %v123_v39, %v127_v40  ;;  %v381_v50 = vcombine.low %v131_v37, %v135_v61  ;;  %v1522_v37 = vld [vmem:[%s1886_s1 + $0x18] sm:$0xff] }
  0x25   :  { %v1491_v25 = vmul.f32 %v583_v26, %v1906_v22  ;;  %v371_v13 = vrot.slane %v363_v34, %v1334_v41  ;;  %v378_v17 = vrot.slane %v364_v51, %v1334_v41  ;;  %v24_v38 = vunpack.c.l.bf16 %v16_v43 }
  0x26   :  { %v25_v14 = vunpack.c.h.bf16 %v16_v43  ;;  %v139_v39 = vrot.slane %v1311_v62, %v1173_v9  ;;  %v328_v40 = vcombine.low %v320_v32, %v327_v33  ;;  %v143_v61 = vrot.slane %v1311_v62, %v1176_v10 }
  0x27   :  { %v147_v16 = vrot.slane %v1311_v62, %v1179_v11  ;;  %v151_v42 = vrot.slane %v1311_v62, %v1182_v12  ;;  %v345_v18 = vcombine.low %v337_v3, %v344_v44  ;;  %v26_v19 = vunpack.c.l.bf16 %v17_v36 }
  0x28   :  { %v362_v20 = vcombine.low %v354_v49, %v361_v0  ;;  %v388_v21 = vrot.slane %v380_v35, %v1334_v41  ;;  %v395_v23 = vrot.slane %v381_v50, %v1334_v41  ;;  %v27_v63 = vunpack.c.h.bf16 %v17_v36 }
  0x29   :  { %v379_v24 = vcombine.low %v371_v13, %v378_v17  ;;  %v28_v60 = vunpack.c.l.bf16 %v1517_v1  ;;  %v600_v8 = vmul.f32 %v328_v40, %v24_v38  ;;  %v1539_v29 = vcombine.low %v139_v39, %v143_v61 }
  0x2a   :  { %v1541_v30 = vcombine.low %v147_v16, %v151_v42  ;;  %v601_v31 = vmul.f32 %v345_v18, %v25_v14  ;;  %v396_v32 = vcombine.low %v388_v21, %v395_v23  ;;  %v602_v33 = vmul.f32 %v362_v20, %v26_v19 }
  0x2b   :  { %v632_v34 = vcombine.high %v600_v8, %v600_v8  ;;  %v768_v51 = vcombine.high %v608_v57, %v608_v57  ;;  %v603_v26 = vmul.f32 %v379_v24, %v27_v63  ;;  %v1544_v58 = vrot.slane %v608_v57, %v1334_v41 }
  0x2c   :  { %v785_v59 = vcombine.high %v609_v52, %v609_v52  ;;  %v1547_v47 = vrot.slane %v609_v52, %v1334_v41  ;;  %v639_v55 = vrot.slane %v600_v8, %v1334_v41  ;;  %v802_v45 = vcombine.high %v610_v54, %v610_v54 }
  0x2d   :  { %1907 = vst [vmem:[#allocation3_spill] sm:$0xff] %v1544_v58  ;;  %v1551_v15 = vrot.slane %v768_v51, %v1334_v41  ;;  %v1554_v48 = vrot.slane %v610_v54, %v1334_v41  ;;  %v649_v43 = vcombine.high %v601_v31, %v601_v31  ;;  %v656_v3 = vrot.slane %v601_v31, %v1334_v41 }
  0x2e   :  { %v1558_v44 = vrot.slane %v785_v59, %v1334_v41  ;;  %v819_v57 = vcombine.high %v611_v56, %v611_v56  ;;  %v646_v22 = vrot.slane %v632_v34, %v1334_v41  ;;  %v666_v52 = vcombine.high %v602_v33, %v602_v33 }
  0x2f   :  { %v1562_v49 = vrot.slane %v802_v45, %v1334_v41  ;;  %v1565_v0 = vrot.slane %v611_v56, %v1334_v41  ;;  %v673_v35 = vrot.slane %v602_v33, %v1334_v41  ;;  %v836_v50 = vcombine.high %v1474_v2, %v1474_v2 }
  0x30   :  { %v1569_v54 = vrot.slane %v819_v57, %v1334_v41  ;;  %v1575_v36 = vrot.slane %v1474_v2, %v1334_v41  ;;  %v647_v13 = vcombine.high %v639_v55, %v639_v55  ;;  %v683_v17 = vcombine.high %v603_v26, %v603_v26 }
  0x31   :  { %v853_v38 = vcombine.high %v1478_v46, %v1478_v46  ;;  %v1581_v56 = vrot.slane %v1478_v46, %v1334_v41  ;;  %v663_v14 = vrot.slane %v649_v43, %v1334_v41  ;;  %v1585_v39 = vrot.slane %v603_v26, %v1334_v41 }
  0x32   :  { %v1588_v40 = vrot.slane %v836_v50, %v1334_v41  ;;  %v870_v2 = vcombine.high %v1482_v53, %v1482_v53  ;;  %v648_v61 = vcombine.high %v646_v22, %v646_v22  ;;  %v1597_v42 = vrot.slane %v1482_v53, %v1334_v41 }
  0x33   :  { %v1593_v16 = vrot.slane %v853_v38, %v1334_v41  ;;  %v887_v46 = vcombine.high %v1491_v25, %v1491_v25  ;;  %v680_v18 = vrot.slane %v666_v52, %v1334_v41  ;;  %v1607_v20 = vrot.slane %v1491_v25, %v1334_v41 }
  0x34   :  { %v1603_v19 = vrot.slane %v870_v2, %v1334_v41  ;;  %v969_v21 = vsel %vm968_vm0, %v639_v55, 0.0  ;;  %v970_v24 = vsel %vm968_vm0, %v647_v13, 0.0  ;;  %v1620_v31 = vmul.f32 %v396_v32, %v28_v60 }
  0x35   :  { %v1615_v63 = vrot.slane %v887_v46, %v1334_v41  ;;  %v971_v25 = vadd.f32 %v970_v24, %v969_v21  ;;  %v972_v33 = vsel %vm968_vm0, %v646_v22, 0.0  ;;  %v664_v34 = vcombine.high %v656_v3, %v656_v3 }
  0x36   :  { %v681_v51 = vcombine.high %v673_v35, %v673_v35  ;;  %v1624_v26 = vrot.slane %v683_v17, %v1334_v41  ;;  %v974_v59 = vsel %vm968_vm0, %v648_v61, 0.0  ;;  %v665_v55 = vcombine.high %v663_v14, %v663_v14 }
  0x37   :  { %v682_v45 = vcombine.high %v680_v18, %v680_v18  ;;  %v973_v57 = vadd.f32 %v972_v33, %v971_v25  ;;  %v783_v60 = vcombine.high %v1544_v58, %v1544_v58  ;;  %v784_v32 = vcombine.high %v1551_v15, %v1551_v15 }
  0x38   :  { %v800_v22 = vcombine.high %v1547_v47, %v1547_v47  ;;  %v976_v52 = vsel %vm968_vm0, %v656_v3, 0.0  ;;  %v801_v50 = vcombine.high %v1558_v44, %v1558_v44  ;;  %v817_v13 = vcombine.high %v1554_v48, %v1554_v48 }
  0x39   :  { %v818_v17 = vcombine.high %v1562_v49, %v1562_v49  ;;  %v975_v38 = vadd.f32 %v974_v59, %v973_v57  ;;  %v834_v2 = vcombine.high %v1565_v0, %v1565_v0  ;;  %v835_v61 = vcombine.high %v1569_v54, %v1569_v54 }
  0x3a   :  { %v851_v46 = vcombine.high %v1575_v36, %v1575_v36  ;;  %v978_v3 = vsel %vm968_vm0, %v664_v34, 0.0  ;;  %v852_v21 = vcombine.high %v1588_v40, %v1588_v40  ;;  %v868_v24 = vcombine.high %v1581_v56, %v1581_v56 }
  0x3b   :  { %v869_v25 = vcombine.high %v1593_v16, %v1593_v16  ;;  %v977_v33 = vadd.f32 %v976_v52, %v975_v38  ;;  %v885_v59 = vcombine.high %v1597_v42, %v1597_v42  ;;  %v886_v57 = vcombine.high %v1603_v19, %v1603_v19 }
  0x3c   :  { %v902_v43 = vcombine.high %v1607_v20, %v1607_v20  ;;  %v980_v34 = vsel %vm968_vm0, %v663_v14, 0.0  ;;  %v903_v62 = vcombine.high %v1615_v63, %v1615_v63  ;;  %v982_v27 = vsel %vm968_vm0, %v665_v55, 0.0 }
  0x3d   :  { %v979_v23 = vadd.f32 %v978_v3, %v977_v33  ;;  %v984_v28 = vsel %vm968_vm0, %v673_v35, 0.0  ;;  %v986_v52 = vsel %vm968_vm0, %v681_v51, 0.0  ;;  %v988_v38 = vsel %vm968_vm0, %v680_v18, 0.0 }
  0x3e   :  { %v990_v53 = vsel %vm968_vm0, %v682_v45, 0.0  ;;  %v1670_v8 = vsel %vm968_vm0, %v783_v60, 0.0  ;;  %v1674_v14 = vsel %vm968_vm0, %v1551_v15, 0.0  ;;  %v1677_v3 = vsel %vm968_vm0, %v784_v32, 0.0 }
  0x3f   :  { %v981_v58 = vadd.f32 %v980_v34, %v979_v23  ;;  %v1681_v35 = vsel %vm968_vm0, %v1547_v47, 0.0  ;;  %v1684_v51 = vsel %vm968_vm0, %v800_v22, 0.0  ;;  %v1688_v18 = vsel %vm968_vm0, %v1558_v44, 0.0 }
  0x40   :  { %v1691_v23 = vsel %vm968_vm0, %v801_v50, 0.0  ;;  %v1695_v15 = vsel %vm968_vm0, %v1554_v48, 0.0  ;;  %v1698_v45 = vsel %vm968_vm0, %v817_v13, 0.0  ;;  %v1702_v47 = vsel %vm968_vm0, %v1562_v49, 0.0 }
  0x41   :  { %v983_v55 = vadd.f32 %v982_v27, %v981_v58  ;;  %v1705_v60 = vsel %vm968_vm0, %v818_v17, 0.0  ;;  %v1709_v44 = vsel %vm968_vm0, %v1565_v0, 0.0  ;;  %v1712_v32 = vsel %vm968_vm0, %v834_v2, 0.0 }
  0x42   :  { %v1716_v27 = vsel %vm968_vm0, %v1569_v54, 0.0  ;;  %v1719_v58 = vsel %vm968_vm0, %v835_v61, 0.0  ;;  %v1723_v49 = vsel %vm968_vm0, %v1575_v36, 0.0  ;;  %v1726_v22 = vsel %vm968_vm0, %v851_v46, 0.0 }
  0x43   :  { %v985_v48 = vadd.f32 %v984_v28, %v983_v55  ;;  %v1730_v0 = vsel %vm968_vm0, %v1588_v40, 0.0  ;;  %v1733_v50 = vsel %vm968_vm0, %v852_v21, 0.0  ;;  %v1737_v54 = vsel %vm968_vm0, %v1581_v56, 0.0 }
  0x44   :  { %v1740_v28 = vsel %vm968_vm0, %v868_v24, 0.0  ;;  %v1744_v36 = vsel %vm968_vm0, %v1593_v16, 0.0  ;;  %v1747_v17 = vsel %vm968_vm0, %v869_v25, 0.0  ;;  %v1751_v40 = vsel %vm968_vm0, %v1597_v42, 0.0 }
  0x45   :  { %v987_v13 = vadd.f32 %v986_v52, %v985_v48  ;;  %v1754_v2 = vsel %vm968_vm0, %v885_v59, 0.0  ;;  %v1758_v56 = vsel %vm968_vm0, %v1603_v19, 0.0  ;;  %v1761_v61 = vsel %vm968_vm0, %v886_v57, 0.0 }
  0x46   :  { %v1765_v16 = vsel %vm968_vm0, %v1607_v20, 0.0  ;;  %v1768_v46 = vsel %vm968_vm0, %v902_v43, 0.0  ;;  %v1772_v42 = vsel %vm968_vm0, %v1615_v63, 0.0  ;;  %v1775_v24 = vsel %vm968_vm0, %v903_v62, 0.0 }
  0x47   :  { %v989_v21 = vadd.f32 %v988_v38, %v987_v13  ;;  %v29_v19 = vunpack.c.h.bf16 %v1517_v1  ;;  %v992_v25 = vsel %vm968_vm0, %v1585_v39, 0.0  ;;  %v1908_v20 = vrot.slane %v1541_v30, %v1334_v41 }
  0x48   :  { %v1909_v43 = vrot.slane %v1539_v29, %v1334_v41  ;;  %v1910_v59 = vrot.slane %v1522_v37, %v1159_v5  ;;  %v1911_v63 = vrot.slane %v1522_v37, %v1156_v4  ;;  %v1912_v1 = vrot.slane %v1522_v37, %v1165_v7 }
  0x49   :  { %v1913_v57 = vrot.slane %v1522_v37, %v1162_v6  ;;  %v991_v52 = vadd.f32 %v990_v53, %v989_v21  ;;  %v699_v30 = vcombine.high %v1624_v26, %v1624_v26  ;;  %v700_v29 = vcombine.high %v1620_v31, %v1620_v31 }
  0x4a   :  { %v413_v33 = vcombine.low %v1909_v43, %v1908_v20  ;;  %v414_v62 = vcombine.low %v1911_v63, %v1910_v59  ;;  %v707_v5 = vrot.slane %v1620_v31, %v1334_v41  ;;  %v1914_v4 = vcombine.high %v1585_v39, %v1585_v39  ;;  %v19_v31 = vld [vmem:[%s1887_s0 + $0x18] sm:$0xff] }
  0x4b   :  { %v415_v34 = vcombine.low %v1913_v57, %v1912_v1  ;;  %v993_v7 = vadd.f32 %v992_v25, %v991_v52  ;;  %v171_v6 = vrot.slane %v1522_v37, %v1173_v9  ;;  %v175_v53 = vrot.slane %v1522_v37, %v1176_v10 }
  0x4c   :  { %v994_v38 = vsel %vm968_vm0, %v1914_v4, 0.0  ;;  %v179_v55 = vrot.slane %v1522_v37, %v1179_v11  ;;  %v996_v48 = vsel %vm968_vm0, %v1624_v26, 0.0  ;;  %v183_v39 = vrot.slane %v1522_v37, %v1182_v12 }
  0x4d   :  { %v422_v13 = vrot.slane %v414_v62, %v1334_v41  ;;  %v429_v9 = vrot.slane %v415_v34, %v1334_v41  ;;  %v995_v21 = vadd.f32 %v994_v38, %v993_v7  ;;  %v605_v25 = vmul.f32 %v413_v33, %v29_v19 }
  0x4e   :  { %v714_v10 = vrot.slane %v700_v29, %v1334_v41  ;;  %v715_v20 = vcombine.high %v707_v5, %v707_v5  ;;  %v998_v11 = vsel %vm968_vm0, %v699_v30, 0.0  ;;  %v30_v26 = vunpack.c.l.bf16 %v19_v31 }
  0x4f   :  { %v997_v43 = vadd.f32 %v996_v48, %v995_v21  ;;  %v1000_v59 = vsel %vm968_vm0, %v707_v5, 0.0  ;;  %v430_v63 = vcombine.low %v422_v13, %v429_v9  ;;  %v431_v1 = vcombine.low %v171_v6, %v175_v53 }
  0x50   :  { %v432_v57 = vcombine.low %v179_v55, %v183_v39  ;;  %v716_v12 = vcombine.high %v714_v10, %v714_v10  ;;  %v717_v37 = vcombine.high %v605_v25, %v605_v25  ;;  %v724_v62 = vrot.slane %v605_v25, %v1334_v41 }
  0x51   :  { %v999_v52 = vadd.f32 %v998_v11, %v997_v43  ;;  %v1002_v34 = vsel %vm968_vm0, %v715_v20, 0.0  ;;  %v1004_v33 = vsel %vm968_vm0, %v714_v10, 0.0  ;;  %v439_v29 = vrot.slane %v431_v1, %v1334_v41 }
  0x52   :  { %v446_v30 = vrot.slane %v432_v57, %v1334_v41  ;;  %v606_v38 = vmul.f32 %v430_v63, %v30_v26  ;;  %v731_v5 = vrot.slane %v717_v37, %v1334_v41  ;;  %v732_v7 = vcombine.high %v724_v62, %v724_v62 }
  0x53   :  { %v1001_v19 = vadd.f32 %v1000_v59, %v999_v52  ;;  %v1006_v6 = vsel %vm968_vm0, %v716_v12, 0.0  ;;  %v1008_v55 = vsel %vm968_vm0, %v724_v62, 0.0  ;;  %v31_v48 = vunpack.c.h.bf16 %v19_v31 }
  0x54   :  { %v447_v39 = vcombine.low %v439_v29, %v446_v30  ;;  %v733_v9 = vcombine.high %v731_v5, %v731_v5  ;;  %v734_v21 = vcombine.high %v606_v38, %v606_v38  ;;  %v741_v25 = vrot.slane %v606_v38, %v1334_v41 }
  0x55   :  { %v1003_v4 = vadd.f32 %v1002_v34, %v1001_v19  ;;  %v1010_v10 = vsel %vm968_vm0, %v732_v7, 0.0  ;;  %v1012_v11 = vsel %vm968_vm0, %v731_v5, 0.0 }
  0x56   :  { %v607_v26 = vmul.f32 %v447_v39, %v31_v48  ;;  %v748_v59 = vrot.slane %v734_v21, %v1334_v41  ;;  %v749_v63 = vcombine.high %v741_v25, %v741_v25  ;;  %v1014_v1 = vsel %vm968_vm0, %v733_v9, 0.0 }
  0x57   :  { %v1005_v53 = vadd.f32 %v1004_v33, %v1003_v4  ;;  %v1016_v31 = vsel %vm968_vm0, %v741_v25, 0.0  ;;  %v1915_v25 = vld [vmem:[#allocation3_spill] sm:$0xff] }
  0x58   :  { %v750_v12 = vcombine.high %v748_v59, %v748_v59  ;;  %v751_v37 = vcombine.high %v607_v26, %v607_v26  ;;  %v758_v62 = vrot.slane %v607_v26, %v1334_v41  ;;  %v1018_v34 = vsel %vm968_vm0, %v749_v63, 0.0 }
  0x59   :  { %v1007_v13 = vadd.f32 %v1006_v6, %v1005_v53  ;;  %v1020_v33 = vsel %vm968_vm0, %v748_v59, 0.0 }
  0x5a   :  { %v765_v30 = vrot.slane %v751_v37, %v1334_v41  ;;  %v766_v4 = vcombine.high %v758_v62, %v758_v62  ;;  %v1022_v38 = vsel %vm968_vm0, %v750_v12, 0.0  ;;  %v1024_v7 = vsel %vm968_vm0, %v758_v62, 0.0 }
  0x5b   :  { %v1009_v20 = vadd.f32 %v1008_v55, %v1007_v13  ;;  %v1032_v41 = vsel %vm968_vm0, %v1915_v25, 0.0 }
  0x5c   :  { %v767_v53 = vcombine.high %v765_v30, %v765_v30  ;;  %v1026_v55 = vsel %vm968_vm0, %v766_v4, 0.0  ;;  %v1028_v39 = vsel %vm968_vm0, %v765_v30, 0.0 }
  0x5d   :  { %v1011_v43 = vadd.f32 %v1010_v10, %v1009_v20 }
  0x5e   :  { %v1030_v9 = vsel %vm968_vm0, %v767_v53, 0.0 }
  0x5f   :  { %v1013_v57 = vadd.f32 %v1012_v11, %v1011_v43 }
  0x61   :  { %v1015_v52 = vadd.f32 %v1014_v1, %v1013_v57 }
  0x63   :  { %v1017_v19 = vadd.f32 %v1016_v31, %v1015_v52 }
  0x65   :  { %v1019_v29 = vadd.f32 %v1018_v34, %v1017_v19 }
  0x67   :  { %v1021_v5 = vadd.f32 %v1020_v33, %v1019_v29 }
  0x69   :  { %v1023_v6 = vadd.f32 %v1022_v38, %v1021_v5 }
  0x6b   :  { %v1025_v48 = vadd.f32 %v1024_v7, %v1023_v6 }
  0x6d   :  { %v1027_v13 = vadd.f32 %v1026_v55, %v1025_v48 }
  0x6f   :  { %v1029_v21 = vadd.f32 %v1028_v39, %v1027_v13 }
  0x71   :  { %v1031_v10 = vadd.f32 %v1030_v9, %v1029_v21 }
  0x73   :  { %v1033_v20 = vadd.f32 %v1032_v41, %v1031_v10 }
  0x75   :  { %v1035_v11 = vadd.f32 %v1670_v8, %v1033_v20 }
  0x77   :  { %v1037_v43 = vadd.f32 %v1674_v14, %v1035_v11 }
  0x79   :  { %v1039_v26 = vadd.f32 %v1677_v3, %v1037_v43 }
  0x7b   :  { %v1041_v59 = vadd.f32 %v1681_v35, %v1039_v26 }
  0x7d   :  { %v1043_v63 = vadd.f32 %v1684_v51, %v1041_v59 }
  0x7f   :  { %v1045_v1 = vadd.f32 %v1688_v18, %v1043_v63 }
  0x81   :  { %v1047_v57 = vadd.f32 %v1691_v23, %v1045_v1 }
  0x83   :  { %v1049_v31 = vadd.f32 %v1695_v15, %v1047_v57 }
  0x85   :  { %v1051_v52 = vadd.f32 %v1698_v45, %v1049_v31 }
  0x87   :  { %v1053_v12 = vadd.f32 %v1702_v47, %v1051_v52 }
  0x89   :  { %v1055_v8 = vadd.f32 %v1705_v60, %v1053_v12 }
  0x8b   :  { %v1057_v14 = vadd.f32 %v1709_v44, %v1055_v8 }
  0x8d   :  { %v1059_v3 = vadd.f32 %v1712_v32, %v1057_v14 }
  0x8f   :  { %v1061_v35 = vadd.f32 %v1716_v27, %v1059_v3 }
  0x91   :  { %v1063_v51 = vadd.f32 %v1719_v58, %v1061_v35 }
  0x93   :  { %v1065_v18 = vadd.f32 %v1723_v49, %v1063_v51 }
  0x95   :  { %v1067_v23 = vadd.f32 %v1726_v22, %v1065_v18 }
  0x97   :  { %v1069_v15 = vadd.f32 %v1730_v0, %v1067_v23 }
  0x99   :  { %v1071_v45 = vadd.f32 %v1733_v50, %v1069_v15 }
  0x9b   :  { %v1073_v47 = vadd.f32 %v1737_v54, %v1071_v45 }
  0x9d   :  { %v1075_v60 = vadd.f32 %v1740_v28, %v1073_v47 }
  0x9f   :  { %v1077_v44 = vadd.f32 %v1744_v36, %v1075_v60  ;;  %v1118_v36 = vld [vmem:[#allocation2] ss:$0 sm:$0xff] }
  0xa1   :  { %v1079_v32 = vadd.f32 %v1747_v17, %v1077_v44 }
  0xa3   :  { %v1081_v27 = vadd.f32 %v1751_v40, %v1079_v32 }
  0xa5   :  { %v1083_v58 = vadd.f32 %v1754_v2, %v1081_v27 }
  0xa7   :  { %v1085_v49 = vadd.f32 %v1758_v56, %v1083_v58 }
  0xa9   :  { %v1087_v22 = vadd.f32 %v1761_v61, %v1085_v49 }
  0xab   :  { %v1089_v0 = vadd.f32 %v1765_v16, %v1087_v22 }
  0xad   :  { %v1091_v50 = vadd.f32 %v1768_v46, %v1089_v0 }
  0xaf   :  { %v1093_v54 = vadd.f32 %v1772_v42, %v1091_v50 }
  0xb1   :  { %v1095_v28 = vadd.f32 %v1775_v24, %v1093_v54 }
  0xb3   :  { %1096 = vadd.xlane.f32.xlu0 %v1095_v28 }
 0x13c   :  { %v1097_v37 = vpop.xlane.xlu0 %1096 }
 0x13d   :  { %v1105_v17 = vadd.f32 %v1118_v36, %v1097_v37 }
 0x13f   :  { %v1106_v62 = vsub.f32 0.0, %v1105_v17 }
 0x141   :  { %v1107_v40 = vmul.f32 1.442695, %v1106_v62 }
 0x143   :  { %1120 = vpow2.f32 %v1107_v40 }
 0x150   :  { %v1121_v2 = vpop.eup %1120 }
 0x151   :  { %v1109_v34 = vadd.f32 1.0, %v1121_v2 }
 0x153   :  { %1122 = vrcp.f32 %v1109_v34 }
 0x160   :  { %v1123_v56 = vpop.eup %1122 }
 0x161   :  { %1113 = vst.msk [vmem:[%s1888_s3] sm:$0x3] %vm1112_vm1, %v1123_v56 }

</bundles_post_ra>
